<compile_context>
chip_gen: v7x
topology: tpu7x:2x2x1
jax: 0.10.0
libtpu: 0.0.40
codegen_flags: <defaults>
</compile_context>

<pallas_src>
import functools

import jax
import jax.numpy as jnp
from jax import lax
from jax.experimental import pallas as pl
from jax.experimental.pallas import tpu as pltpu


# ----------------------------------------------------------------------------
# Tiling / VMEM helpers.
# ----------------------------------------------------------------------------
def _pick_row_tile(h, w, n_batch, pixel_target=1024):
    """Row tile: divides h, keeps the output block lane-dense, >=2 grid steps."""
    cands = [t for t in range(1, h + 1)
             if h % t == 0 and (t == h or (t * w) % 128 == 0)]
    within = [t for t in cands if t * w <= pixel_target] or [min(cands)]
    tr = max(within)
    if n_batch * (h // tr) < 2:                       # keep both TCs busy (v7x)
        splittable = [t for t in within if n_batch * (h // t) >= 2]
        if splittable:
            tr = max(splittable)
    return tr


def _roundup(v, m):
    return (v + m - 1) // m * m


def _padded_bytes(shape, itemsize):
    """Rough (8/16, 128)-tile-padded VMEM footprint of one buffer."""
    if len(shape) == 1:
        return _roundup(shape[0] * itemsize, 512)
    lead = 1
    for d in shape[:-2]:
        lead *= d
    sub = _roundup(shape[-2], 8 if itemsize >= 4 else 16)
    lane = _roundup(shape[-1], 128)
    return lead * sub * lane * itemsize


# ----------------------------------------------------------------------------
# Pallas kernel: in-kernel im2col into a VMEM slab + one transposed-GEMM MXU
# dot, fused with bias + ReLU + folded batch-norm.  Multiple input refs
# realize an implicit channel concat (the concat is never materialized).
# ----------------------------------------------------------------------------
def _conv_fused_kernel(*refs, num_inputs, taps, tr, w_out, cin_list, cout,
                       use_bias, use_relu, use_bn):
    x_refs = refs[:num_inputs]              # (1, Hp, Wp, Cin_i) bf16 each
    w_ref = refs[num_inputs]                # (Cout, K*K*Cin_total) bf16
    e_ref = refs[num_inputs + 1]            # (Cout, 3) f32: bias/scale/shift
    o_ref = refs[num_inputs + 2]            # (1, Cout, tr*W) bf16
    patch_ref = refs[num_inputs + 3]        # (tr*W, K*K*Cin_total) bf16 scratch

    r = pl.program_id(1)
    row0 = pl.multiple_of(r * tr, tr)       # first output row of this step

    # In-kernel im2col: shifted windows of the padded images -> one slab with
    # contraction dim K*K*Cin_total (pixels stay contiguous -> easy reshape).
    col = 0
    for x_ref, cin in zip(x_refs, cin_list):
        for (dh, dw) in taps:
            piece = x_ref[0, pl.ds(row0 + dh, tr), pl.ds(dw, w_out), :]
            patch_ref[:, col:col + cin] = piece.reshape(tr * w_out, cin)
            col += cin

    # Transposed GEMM: (Cout, P) = W(Cout, KKC) . patches(P, KKC)^T.
    acc = lax.dot_general(
        w_ref[...], patch_ref[...],
        dimension_numbers=(((1,), (1,)), ((), ())),
        preferred_element_type=jnp.float32)           # (Cout, tr*W) f32

    if use_bias:
        acc = acc + e_ref[:, 0:1]
    if use_relu:
        acc = jnp.maximum(acc, 0.0)
    if use_bn:
        acc = acc * e_ref[:, 1:2] + e_ref[:, 2:3]

    o_ref[...] = acc.reshape(1, cout, tr * w_out).astype(o_ref.dtype)


def conv2d_relu_norm(xs_padded_nhwc, weight, bias, bn_scale, bn_shift, *,
                     kernel_size, h_out, w_out, use_bias, use_relu, use_bn):
    """Fused Conv2D(same, stride 1) + bias/ReLU/folded-BN.

    `xs_padded_nhwc`: list of spatially zero-padded NHWC bf16 tensors that are
    implicitly concatenated along channels.  Returns (N, Cout, H*W) bf16.
    """
    k = kernel_size
    p = k // 2
    n = int(xs_padded_nhwc[0].shape[0])
    hp, wp = h_out + 2 * p, w_out + 2 * p
    cout = int(weight.shape[0])
    cin_list = [int(x.shape[-1]) for x in xs_padded_nhwc]
    assert sum(cin_list) == int(weight.shape[1])
    kkc = k * k * sum(cin_list)

    # Flatten weights once: (Cout, K*K*Cin_total), source-major / tap / cin
    # ordering matching the in-kernel slab layout.
    parts, off = [], 0
    for cin in cin_list:
        w_s = weight[:, off:off + cin, :, :]                       # (Cout,cin,k,k)
        w_s = jnp.transpose(w_s, (0, 2, 3, 1)).reshape(cout, k * k * cin)
        parts.append(w_s)
        off += cin
    w_flat = jnp.concatenate(parts, axis=1).astype(jnp.bfloat16)   # (Cout, KKC)

    # bias / folded-BN epilogue packed as column vectors: (Cout, 3) f32.
    epi = jnp.stack([bias, bn_scale, bn_shift], axis=1)

    tr = _pick_row_tile(h_out, w_out, n)
    pix = tr * w_out
    taps = [(dh, dw) for dh in range(k) for dw in range(k)]

    in_specs = (
        [pl.BlockSpec((1, hp, wp, cin), lambda i, r: (i, 0, 0, 0))
         for cin in cin_list]
        # Constant-index blocks -> single-buffered (review #4).
        + [pl.BlockSpec((cout, kkc), lambda i, r: (0, 0),
                        pipeline_mode=pl.Buffered(1)),
           pl.BlockSpec((cout, 3), lambda i, r: (0, 0),
                        pipeline_mode=pl.Buffered(1))]
    )
    out_spec = pl.BlockSpec((1, cout, pix), lambda i, r: (i, 0, r))

    # Explicit VMEM budget (tile-padded estimate; review #7).
    est = 0
    for x, cin in zip(xs_padded_nhwc, cin_list):
        est += 2 * _padded_bytes((1, hp, wp, cin), 2)
    est += _padded_bytes((cout, kkc), 2) + _padded_bytes((cout, 3), 4)
    est += 2 * _padded_bytes((1, cout, pix), 2)
    est += _padded_bytes((pix, kkc), 2)
    vmem_limit = int(min(max(2 * est + (8 << 20), 16 << 20), 96 << 20))

    kernel = functools.partial(
        _conv_fused_kernel, num_inputs=len(xs_padded_nhwc), taps=taps, tr=tr,
        w_out=w_out, cin_list=cin_list, cout=cout, use_bias=use_bias,
        use_relu=use_relu, use_bn=use_bn)

    return pl.pallas_call(
        kernel,
        out_shape=jax.ShapeDtypeStruct((n, cout, h_out * w_out), jnp.bfloat16),
        grid_spec=pltpu.PrefetchScalarGridSpec(
            num_scalar_prefetch=0,
            grid=(n, h_out // tr),
            in_specs=in_specs,
            out_specs=out_spec,
            scratch_shapes=[pltpu.VMEM((pix, kkc), jnp.bfloat16)]),
        compiler_params=pltpu.CompilerParams(
            dimension_semantics=("parallel", "parallel"),
            vmem_limit_bytes=vmem_limit),
    )(*xs_padded_nhwc, w_flat, epi)


# ----------------------------------------------------------------------------
# XLA glue: layout change, padding, nearest-neighbor upsample.
# ----------------------------------------------------------------------------
def _flat_to_nhwc(x_flat, h, w):
    n, c, _ = x_flat.shape
    return jnp.transpose(x_flat.reshape(n, c, h, w), (0, 2, 3, 1))


def _pad_nhwc(x_nhwc, p):
    if p == 0:
        return x_nhwc
    return jnp.pad(x_nhwc, ((0, 0), (p, p), (p, p), (0, 0)))


def _upsample_pad_nhwc(lo_nhwc, target_hw, p):
    """Padded nearest-neighbor upsample of an NHWC tensor.

    For exact integer factors the low-res image is padded first and then
    replicated, producing the padded upsampled tensor in a single XLA pass.
    """
    n, h, w, c = lo_nhwc.shape
    ht, wt = target_hw
    if ht % h == 0 and wt % w == 0 and ht // h == wt // w:
        f = ht // h
        q = -(-p // f)                 # ceil(p / f)
        s = f * q - p
        lo_pad = jnp.pad(lo_nhwc, ((0, 0), (q, q), (q, q), (0, 0)))
        up = jnp.repeat(jnp.repeat(lo_pad, f, axis=1), f, axis=2)
        return up[:, s:s + ht + 2 * p, s:s + wt + 2 * p, :]
    # General nearest-neighbor fallback (PyTorch 'nearest' semantics).
    hi = (jnp.arange(ht) * h) // ht
    wi = (jnp.arange(wt) * w) // wt
    return _pad_nhwc(lo_nhwc[:, hi][:, :, wi], p)


# ----------------------------------------------------------------------------
# UnetDecoder (parameter construction mirrors the PyTorch __init__).
# ----------------------------------------------------------------------------
class UnetDecoderPallas:

    def __init__(self, input_channels, channels_list, kernel_size_list,
                 skip_channels_list, output_level_list, normalization_config,
                 key):
        self._input_channels = input_channels
        self._skip_channels_list = list(skip_channels_list)
        self._output_level_list = list(output_level_list)
        self._layers = []
        use_bn = bool(normalization_config.get("use_batchnorm", True))

        def make_conv(k_param, cin, cout, k, *, relu, bias, bn):
            kw, kb, kg, kbe, km, kv = jax.random.split(k_param, 6)
            weight = 0.1 * jax.random.normal(kw, (cout, cin, k, k), jnp.float32)
            b = (0.05 * jax.random.normal(kb, (cout,), jnp.float32)
                 if bias else jnp.zeros((cout,), jnp.float32))
            if bn:
                gamma = 1.0 + 0.1 * jax.random.normal(kg, (cout,), jnp.float32)
                beta = 0.05 * jax.random.normal(kbe, (cout,), jnp.float32)
                mean = 0.1 * jax.random.normal(km, (cout,), jnp.float32)
                var = 1.0 + 0.1 * jax.random.uniform(kv, (cout,), jnp.float32)
                scale = gamma / jnp.sqrt(var + 1e-5)
                shift = beta - mean * scale
            else:
                scale = jnp.ones((cout,), jnp.float32)
                shift = jnp.zeros((cout,), jnp.float32)
            return {"type": "conv", "weight": weight, "bias": b,
                    "scale": scale, "shift": shift, "k": k,
                    "use_bias": bias, "use_relu": relu, "use_bn": bn}

        in_ch = input_channels
        keys = jax.random.split(key, len(kernel_size_list) + 1)
        for li in range(len(kernel_size_list) - 1):
            out_ch = channels_list[li]
            if skip_channels_list[li] is not None:
                in_ch += skip_channels_list[li]
                self._layers.append({"type": "up"})
                self._layers.append(make_conv(keys[li], in_ch, out_ch,
                                              kernel_size_list[li],
                                              relu=True, bias=True, bn=use_bn))
            else:
                self._layers.append(make_conv(keys[li], in_ch, out_ch,
                                              kernel_size_list[li],
                                              relu=True, bias=True, bn=use_bn))
            in_ch = out_ch
        if skip_channels_list[-1] is not None:
            in_ch += skip_channels_list[-1]
        self._layers.append(make_conv(keys[-1], in_ch, channels_list[-1],
                                      kernel_size_list[-1],
                                      relu=False, bias=False, bn=False))
        self._output_channels = channels_list[-1]

    # -------------------------- Pallas forward --------------------------- #
    def _conv_pallas(self, layer, xs_padded_nhwc, h_out, w_out):
        return conv2d_relu_norm(
            xs_padded_nhwc, layer["weight"], layer["bias"], layer["scale"],
            layer["shift"], kernel_size=layer["k"], h_out=h_out, w_out=w_out,
            use_bias=layer["use_bias"], use_relu=layer["use_relu"],
            use_bn=layer["use_bn"])

    def _forward_pallas(self, x_list):
        n = int(x_list[0].shape[0])
        cur_c = int(x_list[0].shape[1])
        cur_h, cur_w = int(x_list[0].shape[2]), int(x_list[0].shape[3])
        # Channel-major flat bf16 is the inter-layer representation.
        cur = x_list[0].astype(jnp.bfloat16).reshape(n, cur_c, cur_h * cur_w)

        outputs_list = []
        skip_index = 1
        layer_index = 0
        for level_index in range(len(self._skip_channels_list)):
            if self._skip_channels_list[level_index] is not None:
                conv_layer = self._layers[layer_index + 1]
                layer_index += 2
                skip = x_list[skip_index]
                skip_index += 1
                ht, wt = int(skip.shape[2]), int(skip.shape[3])
                p = conv_layer["k"] // 2
                lo_nhwc = _flat_to_nhwc(cur, cur_h, cur_w)
                up_pad = _upsample_pad_nhwc(lo_nhwc, (ht, wt), p)
                skip_pad = _pad_nhwc(
                    jnp.transpose(skip, (0, 2, 3, 1)).astype(jnp.bfloat16), p)
                # Channel concat realized implicitly inside the fused conv.
                cur = self._conv_pallas(conv_layer, [up_pad, skip_pad], ht, wt)
                cur_h, cur_w = ht, wt
            else:
                conv_layer = self._layers[layer_index]
                layer_index += 1
                p = conv_layer["k"] // 2
                x_pad = _pad_nhwc(_flat_to_nhwc(cur, cur_h, cur_w), p)
                cur = self._conv_pallas(conv_layer, [x_pad], cur_h, cur_w)
            if self._output_level_list[level_index]:
                c = int(cur.shape[1])
                outputs_list.append(
                    cur.reshape(n, c, cur_h, cur_w).astype(jnp.float32))
        return outputs_list

    # -------------------- Pure-JAX f32 reference path -------------------- #
    def _conv_reference(self, layer, x_nhwc):
        w_hwio = jnp.transpose(layer["weight"], (2, 3, 1, 0))
        p = layer["k"] // 2
        y = lax.conv_general_dilated(
            x_nhwc, w_hwio, window_strides=(1, 1),
            padding=[(p, p), (p, p)],
            dimension_numbers=("NHWC", "HWIO", "NHWC"))
        if layer["use_bias"]:
            y = y + layer["bias"]
        if layer["use_relu"]:
            y = jnp.maximum(y, 0.0)
        if layer["use_bn"]:
            y = y * layer["scale"] + layer["shift"]
        return y

    def _forward_reference(self, x_list):
        xs = [jnp.transpose(t, (0, 2, 3, 1)) for t in x_list]
        outputs = xs[0]
        outputs_list = []
        skip_index = 1
        layer_index = 0
        for level_index in range(len(self._skip_channels_list)):
            if self._skip_channels_list[level_index] is not None:
                conv_layer = self._layers[layer_index + 1]
                layer_index += 2
                skip = xs[skip_index]
                skip_index += 1
                ht, wt = skip.shape[1], skip.shape[2]
                hi = (jnp.arange(ht) * outputs.shape[1]) // ht
                wi = (jnp.arange(wt) * outputs.shape[2]) // wt
                up = outputs[:, hi][:, :, wi]
                outputs = self._conv_reference(
                    conv_layer, jnp.concatenate([up, skip], axis=-1))
            else:
                conv_layer = self._layers[layer_index]
                layer_index += 1
                outputs = self._conv_reference(conv_layer, outputs)
            if self._output_level_list[level_index]:
                outputs_list.append(jnp.transpose(outputs, (0, 3, 1, 2)))
        return outputs_list

    def __call__(self, x_nchw_list, use_pallas=True):
        if use_pallas:
            return self._forward_pallas(x_nchw_list)
        return self._forward_reference(x_nchw_list)

    def get_input_channels(self):
        return self._input_channels

    def get_output_channels(self):
        return self._output_channels


if __name__ == "__main__":
    key = jax.random.PRNGKey(0)
    k_x0, k_x1, k_params = jax.random.split(key, 3)

    input_channels = 8
    channels_list = [8, 8, 4]
    kernel_size_list = [3, 3, 1]
    skip_channels_list = [None, 4, None]
    output_level_list = [True, True, True]
    normalization_config = {"use_batchnorm": True}

    decoder = UnetDecoderPallas(input_channels, channels_list,
                                kernel_size_list, skip_channels_list,
                                output_level_list, normalization_config,
                                k_params)

    # NCHW inputs: x[0] = bottleneck feature, x[1] = skip for level 1.
    x0 = jax.random.normal(k_x0, (2, 8, 8, 8), jnp.float32)
    x1 = jax.random.normal(k_x1, (2, 4, 16, 16), jnp.float32)

    fwd = jax.jit(lambda a, b: decoder([a, b], use_pallas=True))
    outs = jax.block_until_ready(fwd(x0, x1))

    refs = decoder([x0, x1], use_pallas=False)
    assert len(outs) == len(refs)
    for o, r in zip(outs, refs):
        assert o.shape == r.shape, (o.shape, r.shape)
        # bf16 activations/weights/intermediates with f32 MXU accumulation
        # vs. the f32 reference.
        assert jnp.allclose(o, r, rtol=6e-2, atol=6e-2), \
            float(jnp.max(jnp.abs(o - r)))

    print("KERNEL_OK")
</pallas_src>

<mosaic_0001>
module attributes {stable_mosaic.version = 11 : i64} {
  func.func @_conv_fused_kernel(%arg0: i32, %arg1: i32, %arg2: memref<1x10x10x8xbf16, #tpu.memory_space<vmem>>, %arg3: memref<8x72xbf16, #tpu.memory_space<vmem>>, %arg4: memref<8x3xf32, #tpu.memory_space<vmem>>, %arg5: memref<1x8x64xbf16, #tpu.memory_space<vmem>>, %arg6: memref<64x72xbf16, #tpu.memory_space<vmem>>) attributes {dimension_semantics = [#tpu.dimension_semantics<parallel>, #tpu.dimension_semantics<parallel>], iteration_bounds = array<i64: 2, 1>, scalar_prefetch = 0 : i64, scratch_operands = 1 : i64, tpu.core_type = #tpu.core_type<tc>, window_params = [{transform_indices = @transform_0, window_bounds = array<i64: 1, 10, 10, 8>}, {pipeline_mode = #tpu.pipeline_mode<synchronous>, transform_indices = @transform_1, window_bounds = array<i64: 8, 72>}, {pipeline_mode = #tpu.pipeline_mode<synchronous>, transform_indices = @transform_2, window_bounds = array<i64: 8, 3>}, {transform_indices = @transform_3, window_bounds = array<i64: 1, 8, 64>}]} {
    %c8_i32 = arith.constant 8 : i32
    %0 = arith.muli %arg1, %c8_i32 : i32
    %1 = tpu.assume_multiple %0, 8 : i32
    %c0_i32 = arith.constant 0 : i32
    %2 = arith.addi %1, %c0_i32 : i32
    %c0 = arith.constant 0 : index
    %3 = arith.index_cast %2 : i32 to index
    %c0_0 = arith.constant 0 : index
    %c0_1 = arith.constant 0 : index
    %4 = vector.load %arg2[%c0, %3, %c0_0, %c0_1] : memref<1x10x10x8xbf16, #tpu.memory_space<vmem>>, vector<1x8x8x8xbf16>
    %5 = vector.shape_cast %4 : vector<1x8x8x8xbf16> to vector<8x8x8xbf16>
    %6 = vector.shape_cast %5 : vector<8x8x8xbf16> to vector<64x8xbf16>
    %c0_2 = arith.constant 0 : index
    %c0_3 = arith.constant 0 : index
    %7 = vector.load %arg6[%c0_2, %c0_3] : memref<64x72xbf16, #tpu.memory_space<vmem>>, vector<64x8xbf16>
    tpu.vector_store %arg6[%c0_2, %c0_3], %6 {strides = array<i32>} : memref<64x72xbf16, #tpu.memory_space<vmem>>, vector<64x8xbf16>,
    %c0_i32_4 = arith.constant 0 : i32
    %8 = arith.addi %1, %c0_i32_4 : i32
    %c0_5 = arith.constant 0 : index
    %9 = arith.index_cast %8 : i32 to index
    %c1 = arith.constant 1 : index
    %c0_6 = arith.constant 0 : index
    %10 = vector.load %arg2[%c0_5, %9, %c1, %c0_6] : memref<1x10x10x8xbf16, #tpu.memory_space<vmem>>, vector<1x8x8x8xbf16>
    %11 = vector.shape_cast %10 : vector<1x8x8x8xbf16> to vector<8x8x8xbf16>
    %12 = vector.shape_cast %11 : vector<8x8x8xbf16> to vector<64x8xbf16>
    %c0_7 = arith.constant 0 : index
    %c8 = arith.constant 8 : index
    %13 = vector.load %arg6[%c0_7, %c8] : memref<64x72xbf16, #tpu.memory_space<vmem>>, vector<64x8xbf16>
    tpu.vector_store %arg6[%c0_7, %c8], %12 {strides = array<i32>} : memref<64x72xbf16, #tpu.memory_space<vmem>>, vector<64x8xbf16>,
    %c0_i32_8 = arith.constant 0 : i32
    %14 = arith.addi %1, %c0_i32_8 : i32
    %c0_9 = arith.constant 0 : index
    %15 = arith.index_cast %14 : i32 to index
    %c2 = arith.constant 2 : index
    %c0_10 = arith.constant 0 : index
    %16 = vector.load %arg2[%c0_9, %15, %c2, %c0_10] : memref<1x10x10x8xbf16, #tpu.memory_space<vmem>>, vector<1x8x8x8xbf16>
    %17 = vector.shape_cast %16 : vector<1x8x8x8xbf16> to vector<8x8x8xbf16>
    %18 = vector.shape_cast %17 : vector<8x8x8xbf16> to vector<64x8xbf16>
    %c0_11 = arith.constant 0 : index
    %c16 = arith.constant 16 : index
    %19 = vector.load %arg6[%c0_11, %c16] : memref<64x72xbf16, #tpu.memory_space<vmem>>, vector<64x8xbf16>
    tpu.vector_store %arg6[%c0_11, %c16], %18 {strides = array<i32>} : memref<64x72xbf16, #tpu.memory_space<vmem>>, vector<64x8xbf16>,
    %c1_i32 = arith.constant 1 : i32
    %20 = arith.addi %1, %c1_i32 : i32
    %c0_12 = arith.constant 0 : index
    %21 = arith.index_cast %20 : i32 to index
    %c0_13 = arith.constant 0 : index
    %c0_14 = arith.constant 0 : index
    %22 = vector.load %arg2[%c0_12, %21, %c0_13, %c0_14] : memref<1x10x10x8xbf16, #tpu.memory_space<vmem>>, vector<1x8x8x8xbf16>
    %23 = vector.shape_cast %22 : vector<1x8x8x8xbf16> to vector<8x8x8xbf16>
    %24 = vector.shape_cast %23 : vector<8x8x8xbf16> to vector<64x8xbf16>
    %c0_15 = arith.constant 0 : index
    %c24 = arith.constant 24 : index
    %25 = vector.load %arg6[%c0_15, %c24] : memref<64x72xbf16, #tpu.memory_space<vmem>>, vector<64x8xbf16>
    tpu.vector_store %arg6[%c0_15, %c24], %24 {strides = array<i32>} : memref<64x72xbf16, #tpu.memory_space<vmem>>, vector<64x8xbf16>,
    %c1_i32_16 = arith.constant 1 : i32
    %26 = arith.addi %1, %c1_i32_16 : i32
    %c0_17 = arith.constant 0 : index
    %27 = arith.index_cast %26 : i32 to index
    %c1_18 = arith.constant 1 : index
    %c0_19 = arith.constant 0 : index
    %28 = vector.load %arg2[%c0_17, %27, %c1_18, %c0_19] : memref<1x10x10x8xbf16, #tpu.memory_space<vmem>>, vector<1x8x8x8xbf16>
    %29 = vector.shape_cast %28 : vector<1x8x8x8xbf16> to vector<8x8x8xbf16>
    %30 = vector.shape_cast %29 : vector<8x8x8xbf16> to vector<64x8xbf16>
    %c0_20 = arith.constant 0 : index
    %c32 = arith.constant 32 : index
    %31 = vector.load %arg6[%c0_20, %c32] : memref<64x72xbf16, #tpu.memory_space<vmem>>, vector<64x8xbf16>
    tpu.vector_store %arg6[%c0_20, %c32], %30 {strides = array<i32>} : memref<64x72xbf16, #tpu.memory_space<vmem>>, vector<64x8xbf16>,
    %c1_i32_21 = arith.constant 1 : i32
    %32 = arith.addi %1, %c1_i32_21 : i32
    %c0_22 = arith.constant 0 : index
    %33 = arith.index_cast %32 : i32 to index
    %c2_23 = arith.constant 2 : index
    %c0_24 = arith.constant 0 : index
    %34 = vector.load %arg2[%c0_22, %33, %c2_23, %c0_24] : memref<1x10x10x8xbf16, #tpu.memory_space<vmem>>, vector<1x8x8x8xbf16>
    %35 = vector.shape_cast %34 : vector<1x8x8x8xbf16> to vector<8x8x8xbf16>
    %36 = vector.shape_cast %35 : vector<8x8x8xbf16> to vector<64x8xbf16>
    %c0_25 = arith.constant 0 : index
    %c40 = arith.constant 40 : index
    %37 = vector.load %arg6[%c0_25, %c40] : memref<64x72xbf16, #tpu.memory_space<vmem>>, vector<64x8xbf16>
    tpu.vector_store %arg6[%c0_25, %c40], %36 {strides = array<i32>} : memref<64x72xbf16, #tpu.memory_space<vmem>>, vector<64x8xbf16>,
    %c2_i32 = arith.constant 2 : i32
    %38 = arith.addi %1, %c2_i32 : i32
    %c0_26 = arith.constant 0 : index
    %39 = arith.index_cast %38 : i32 to index
    %c0_27 = arith.constant 0 : index
    %c0_28 = arith.constant 0 : index
    %40 = vector.load %arg2[%c0_26, %39, %c0_27, %c0_28] : memref<1x10x10x8xbf16, #tpu.memory_space<vmem>>, vector<1x8x8x8xbf16>
    %41 = vector.shape_cast %40 : vector<1x8x8x8xbf16> to vector<8x8x8xbf16>
    %42 = vector.shape_cast %41 : vector<8x8x8xbf16> to vector<64x8xbf16>
    %c0_29 = arith.constant 0 : index
    %c48 = arith.constant 48 : index
    %43 = vector.load %arg6[%c0_29, %c48] : memref<64x72xbf16, #tpu.memory_space<vmem>>, vector<64x8xbf16>
    tpu.vector_store %arg6[%c0_29, %c48], %42 {strides = array<i32>} : memref<64x72xbf16, #tpu.memory_space<vmem>>, vector<64x8xbf16>,
    %c2_i32_30 = arith.constant 2 : i32
    %44 = arith.addi %1, %c2_i32_30 : i32
    %c0_31 = arith.constant 0 : index
    %45 = arith.index_cast %44 : i32 to index
    %c1_32 = arith.constant 1 : index
    %c0_33 = arith.constant 0 : index
    %46 = vector.load %arg2[%c0_31, %45, %c1_32, %c0_33] : memref<1x10x10x8xbf16, #tpu.memory_space<vmem>>, vector<1x8x8x8xbf16>
    %47 = vector.shape_cast %46 : vector<1x8x8x8xbf16> to vector<8x8x8xbf16>
    %48 = vector.shape_cast %47 : vector<8x8x8xbf16> to vector<64x8xbf16>
    %c0_34 = arith.constant 0 : index
    %c56 = arith.constant 56 : index
    %49 = vector.load %arg6[%c0_34, %c56] : memref<64x72xbf16, #tpu.memory_space<vmem>>, vector<64x8xbf16>
    tpu.vector_store %arg6[%c0_34, %c56], %48 {strides = array<i32>} : memref<64x72xbf16, #tpu.memory_space<vmem>>, vector<64x8xbf16>,
    %c2_i32_35 = arith.constant 2 : i32
    %50 = arith.addi %1, %c2_i32_35 : i32
    %c0_36 = arith.constant 0 : index
    %51 = arith.index_cast %50 : i32 to index
    %c2_37 = arith.constant 2 : index
    %c0_38 = arith.constant 0 : index
    %52 = vector.load %arg2[%c0_36, %51, %c2_37, %c0_38] : memref<1x10x10x8xbf16, #tpu.memory_space<vmem>>, vector<1x8x8x8xbf16>
    %53 = vector.shape_cast %52 : vector<1x8x8x8xbf16> to vector<8x8x8xbf16>
    %54 = vector.shape_cast %53 : vector<8x8x8xbf16> to vector<64x8xbf16>
    %c0_39 = arith.constant 0 : index
    %c64 = arith.constant 64 : index
    %55 = vector.load %arg6[%c0_39, %c64] : memref<64x72xbf16, #tpu.memory_space<vmem>>, vector<64x8xbf16>
    tpu.vector_store %arg6[%c0_39, %c64], %54 {strides = array<i32>} : memref<64x72xbf16, #tpu.memory_space<vmem>>, vector<64x8xbf16>,
    %c0_40 = arith.constant 0 : index
    %c0_41 = arith.constant 0 : index
    %56 = vector.load %arg3[%c0_40, %c0_41] : memref<8x72xbf16, #tpu.memory_space<vmem>>, vector<8x72xbf16>
    %c0_42 = arith.constant 0 : index
    %c0_43 = arith.constant 0 : index
    %57 = vector.load %arg6[%c0_42, %c0_43] : memref<64x72xbf16, #tpu.memory_space<vmem>>, vector<64x72xbf16>
    %cst = arith.constant dense<0.000000e+00> : vector<8x64xf32>
    %58 = tpu.matmul %56, %57, %cst {dimension_numbers = #tpu.dot_dimension_numbers<[1], [1], [0], [0], [0, 0, 1, 0], [], []>} : vector<8x72xbf16>, vector<64x72xbf16>, vector<8x64xf32> -> vector<8x64xf32>
    %c0_44 = arith.constant 0 : index
    %c0_45 = arith.constant 0 : index
    %59 = vector.load %arg4[%c0_44, %c0_45] : memref<8x3xf32, #tpu.memory_space<vmem>>, vector<8x1xf32>
    %60 = vector.broadcast %59 : vector<8x1xf32> to vector<8x64xf32>
    %61 = arith.addf %58, %60 : vector<8x64xf32>
    %cst_46 = arith.constant 0.000000e+00 : f32
    %62 = vector.broadcast %cst_46 : f32 to vector<8x64xf32>
    %63 = arith.maximumf %61, %62 : vector<8x64xf32>
    %c0_47 = arith.constant 0 : index
    %c1_48 = arith.constant 1 : index
    %64 = vector.load %arg4[%c0_47, %c1_48] : memref<8x3xf32, #tpu.memory_space<vmem>>, vector<8x1xf32>
    %65 = vector.broadcast %64 : vector<8x1xf32> to vector<8x64xf32>
    %66 = arith.mulf %63, %65 : vector<8x64xf32>
    %c0_49 = arith.constant 0 : index
    %c2_50 = arith.constant 2 : index
    %67 = vector.load %arg4[%c0_49, %c2_50] : memref<8x3xf32, #tpu.memory_space<vmem>>, vector<8x1xf32>
    %68 = vector.broadcast %67 : vector<8x1xf32> to vector<8x64xf32>
    %69 = arith.addf %66, %68 : vector<8x64xf32>
    %70 = vector.shape_cast %69 : vector<8x64xf32> to vector<1x8x64xf32>
    %71 = arith.truncf %70 : vector<1x8x64xf32> to vector<1x8x64xbf16>
    %c0_51 = arith.constant 0 : index
    %c0_52 = arith.constant 0 : index
    %c0_53 = arith.constant 0 : index
    %72 = vector.load %arg5[%c0_51, %c0_52, %c0_53] : memref<1x8x64xbf16, #tpu.memory_space<vmem>>, vector<1x8x64xbf16>
    tpu.vector_store %arg5[%c0_51, %c0_52, %c0_53], %71 {strides = array<i32>} : memref<1x8x64xbf16, #tpu.memory_space<vmem>>, vector<1x8x64xbf16>,
    return
  }
  func.func @transform_0(%arg0: i32, %arg1: i32) -> (i32, i32, i32, i32) {
    %c0_i32 = arith.constant 0 : i32
    %c0_i32_0 = arith.constant 0 : i32
    %c0_i32_1 = arith.constant 0 : i32
    %c0_i32_2 = arith.constant 0 : i32
    return %arg0, %c0_i32, %c0_i32_0, %c0_i32_1 : i32, i32, i32, i32
  }
  func.func @transform_1(%arg0: i32, %arg1: i32) -> (i32, i32) {
    %c0_i32 = arith.constant 0 : i32
    %c0_i32_0 = arith.constant 0 : i32
    %c0_i32_1 = arith.constant 0 : i32
    return %c0_i32, %c0_i32_0 : i32, i32
  }
  func.func @transform_2(%arg0: i32, %arg1: i32) -> (i32, i32) {
    %c0_i32 = arith.constant 0 : i32
    %c0_i32_0 = arith.constant 0 : i32
    %c0_i32_1 = arith.constant 0 : i32
    return %c0_i32, %c0_i32_0 : i32, i32
  }
  func.func @transform_3(%arg0: i32, %arg1: i32) -> (i32, i32, i32) {
    %c0_i32 = arith.constant 0 : i32
    %c0_i32_0 = arith.constant 0 : i32
    return %arg0, %c0_i32, %arg1 : i32, i32, i32
  }
}

module attributes {stable_mosaic.version = 11 : i64} {
  func.func @_conv_fused_kernel(%arg0: i32, %arg1: i32, %arg2: memref<1x18x18x8xbf16, #tpu.memory_space<vmem>>, %arg3: memref<1x18x18x4xbf16, #tpu.memory_space<vmem>>, %arg4: memref<8x108xbf16, #tpu.memory_space<vmem>>, %arg5: memref<8x3xf32, #tpu.memory_space<vmem>>, %arg6: memref<1x8x256xbf16, #tpu.memory_space<vmem>>, %arg7: memref<256x108xbf16, #tpu.memory_space<vmem>>) attributes {dimension_semantics = [#tpu.dimension_semantics<parallel>, #tpu.dimension_semantics<parallel>], iteration_bounds = array<i64: 2, 1>, scalar_prefetch = 0 : i64, scratch_operands = 1 : i64, tpu.core_type = #tpu.core_type<tc>, window_params = [{transform_indices = @transform_0, window_bounds = array<i64: 1, 18, 18, 8>}, {transform_indices = @transform_1, window_bounds = array<i64: 1, 18, 18, 4>}, {pipeline_mode = #tpu.pipeline_mode<synchronous>, transform_indices = @transform_2, window_bounds = array<i64: 8, 108>}, {pipeline_mode = #tpu.pipeline_mode<synchronous>, transform_indices = @transform_3, window_bounds = array<i64: 8, 3>}, {transform_indices = @transform_4, window_bounds = array<i64: 1, 8, 256>}]} {
    %c16_i32 = arith.constant 16 : i32
    %0 = arith.muli %arg1, %c16_i32 : i32
    %1 = tpu.assume_multiple %0, 16 : i32
    %c0_i32 = arith.constant 0 : i32
    %2 = arith.addi %1, %c0_i32 : i32
    %c0 = arith.constant 0 : index
    %3 = arith.index_cast %2 : i32 to index
    %c0_0 = arith.constant 0 : index
    %c0_1 = arith.constant 0 : index
    %4 = vector.load %arg2[%c0, %3, %c0_0, %c0_1] : memref<1x18x18x8xbf16, #tpu.memory_space<vmem>>, vector<1x16x16x8xbf16>
    %5 = vector.shape_cast %4 : vector<1x16x16x8xbf16> to vector<16x16x8xbf16>
    %6 = vector.shape_cast %5 : vector<16x16x8xbf16> to vector<256x8xbf16>
    %c0_2 = arith.constant 0 : index
    %c0_3 = arith.constant 0 : index
    %7 = vector.load %arg7[%c0_2, %c0_3] : memref<256x108xbf16, #tpu.memory_space<vmem>>, vector<256x8xbf16>
    tpu.vector_store %arg7[%c0_2, %c0_3], %6 {strides = array<i32>} : memref<256x108xbf16, #tpu.memory_space<vmem>>, vector<256x8xbf16>,
    %c0_i32_4 = arith.constant 0 : i32
    %8 = arith.addi %1, %c0_i32_4 : i32
    %c0_5 = arith.constant 0 : index
    %9 = arith.index_cast %8 : i32 to index
    %c1 = arith.constant 1 : index
    %c0_6 = arith.constant 0 : index
    %10 = vector.load %arg2[%c0_5, %9, %c1, %c0_6] : memref<1x18x18x8xbf16, #tpu.memory_space<vmem>>, vector<1x16x16x8xbf16>
    %11 = vector.shape_cast %10 : vector<1x16x16x8xbf16> to vector<16x16x8xbf16>
    %12 = vector.shape_cast %11 : vector<16x16x8xbf16> to vector<256x8xbf16>
    %c0_7 = arith.constant 0 : index
    %c8 = arith.constant 8 : index
    %13 = vector.load %arg7[%c0_7, %c8] : memref<256x108xbf16, #tpu.memory_space<vmem>>, vector<256x8xbf16>
    tpu.vector_store %arg7[%c0_7, %c8], %12 {strides = array<i32>} : memref<256x108xbf16, #tpu.memory_space<vmem>>, vector<256x8xbf16>,
    %c0_i32_8 = arith.constant 0 : i32
    %14 = arith.addi %1, %c0_i32_8 : i32
    %c0_9 = arith.constant 0 : index
    %15 = arith.index_cast %14 : i32 to index
    %c2 = arith.constant 2 : index
    %c0_10 = arith.constant 0 : index
    %16 = vector.load %arg2[%c0_9, %15, %c2, %c0_10] : memref<1x18x18x8xbf16, #tpu.memory_space<vmem>>, vector<1x16x16x8xbf16>
    %17 = vector.shape_cast %16 : vector<1x16x16x8xbf16> to vector<16x16x8xbf16>
    %18 = vector.shape_cast %17 : vector<16x16x8xbf16> to vector<256x8xbf16>
    %c0_11 = arith.constant 0 : index
    %c16 = arith.constant 16 : index
    %19 = vector.load %arg7[%c0_11, %c16] : memref<256x108xbf16, #tpu.memory_space<vmem>>, vector<256x8xbf16>
    tpu.vector_store %arg7[%c0_11, %c16], %18 {strides = array<i32>} : memref<256x108xbf16, #tpu.memory_space<vmem>>, vector<256x8xbf16>,
    %c1_i32 = arith.constant 1 : i32
    %20 = arith.addi %1, %c1_i32 : i32
    %c0_12 = arith.constant 0 : index
    %21 = arith.index_cast %20 : i32 to index
    %c0_13 = arith.constant 0 : index
    %c0_14 = arith.constant 0 : index
    %22 = vector.load %arg2[%c0_12, %21, %c0_13, %c0_14] : memref<1x18x18x8xbf16, #tpu.memory_space<vmem>>, vector<1x16x16x8xbf16>
    %23 = vector.shape_cast %22 : vector<1x16x16x8xbf16> to vector<16x16x8xbf16>
    %24 = vector.shape_cast %23 : vector<16x16x8xbf16> to vector<256x8xbf16>
    %c0_15 = arith.constant 0 : index
    %c24 = arith.constant 24 : index
    %25 = vector.load %arg7[%c0_15, %c24] : memref<256x108xbf16, #tpu.memory_space<vmem>>, vector<256x8xbf16>
    tpu.vector_store %arg7[%c0_15, %c24], %24 {strides = array<i32>} : memref<256x108xbf16, #tpu.memory_space<vmem>>, vector<256x8xbf16>,
    %c1_i32_16 = arith.constant 1 : i32
    %26 = arith.addi %1, %c1_i32_16 : i32
    %c0_17 = arith.constant 0 : index
    %27 = arith.index_cast %26 : i32 to index
    %c1_18 = arith.constant 1 : index
    %c0_19 = arith.constant 0 : index
    %28 = vector.load %arg2[%c0_17, %27, %c1_18, %c0_19] : memref<1x18x18x8xbf16, #tpu.memory_space<vmem>>, vector<1x16x16x8xbf16>
    %29 = vector.shape_cast %28 : vector<1x16x16x8xbf16> to vector<16x16x8xbf16>
    %30 = vector.shape_cast %29 : vector<16x16x8xbf16> to vector<256x8xbf16>
    %c0_20 = arith.constant 0 : index
    %c32 = arith.constant 32 : index
    %31 = vector.load %arg7[%c0_20, %c32] : memref<256x108xbf16, #tpu.memory_space<vmem>>, vector<256x8xbf16>
    tpu.vector_store %arg7[%c0_20, %c32], %30 {strides = array<i32>} : memref<256x108xbf16, #tpu.memory_space<vmem>>, vector<256x8xbf16>,
    %c1_i32_21 = arith.constant 1 : i32
    %32 = arith.addi %1, %c1_i32_21 : i32
    %c0_22 = arith.constant 0 : index
    %33 = arith.index_cast %32 : i32 to index
    %c2_23 = arith.constant 2 : index
    %c0_24 = arith.constant 0 : index
    %34 = vector.load %arg2[%c0_22, %33, %c2_23, %c0_24] : memref<1x18x18x8xbf16, #tpu.memory_space<vmem>>, vector<1x16x16x8xbf16>
    %35 = vector.shape_cast %34 : vector<1x16x16x8xbf16> to vector<16x16x8xbf16>
    %36 = vector.shape_cast %35 : vector<16x16x8xbf16> to vector<256x8xbf16>
    %c0_25 = arith.constant 0 : index
    %c40 = arith.constant 40 : index
    %37 = vector.load %arg7[%c0_25, %c40] : memref<256x108xbf16, #tpu.memory_space<vmem>>, vector<256x8xbf16>
    tpu.vector_store %arg7[%c0_25, %c40], %36 {strides = array<i32>} : memref<256x108xbf16, #tpu.memory_space<vmem>>, vector<256x8xbf16>,
    %c2_i32 = arith.constant 2 : i32
    %38 = arith.addi %1, %c2_i32 : i32
    %c0_26 = arith.constant 0 : index
    %39 = arith.index_cast %38 : i32 to index
    %c0_27 = arith.constant 0 : index
    %c0_28 = arith.constant 0 : index
    %40 = vector.load %arg2[%c0_26, %39, %c0_27, %c0_28] : memref<1x18x18x8xbf16, #tpu.memory_space<vmem>>, vector<1x16x16x8xbf16>
    %41 = vector.shape_cast %40 : vector<1x16x16x8xbf16> to vector<16x16x8xbf16>
    %42 = vector.shape_cast %41 : vector<16x16x8xbf16> to vector<256x8xbf16>
    %c0_29 = arith.constant 0 : index
    %c48 = arith.constant 48 : index
    %43 = vector.load %arg7[%c0_29, %c48] : memref<256x108xbf16, #tpu.memory_space<vmem>>, vector<256x8xbf16>
    tpu.vector_store %arg7[%c0_29, %c48], %42 {strides = array<i32>} : memref<256x108xbf16, #tpu.memory_space<vmem>>, vector<256x8xbf16>,
    %c2_i32_30 = arith.constant 2 : i32
    %44 = arith.addi %1, %c2_i32_30 : i32
    %c0_31 = arith.constant 0 : index
    %45 = arith.index_cast %44 : i32 to index
    %c1_32 = arith.constant 1 : index
    %c0_33 = arith.constant 0 : index
    %46 = vector.load %arg2[%c0_31, %45, %c1_32, %c0_33] : memref<1x18x18x8xbf16, #tpu.memory_space<vmem>>, vector<1x16x16x8xbf16>
    %47 = vector.shape_cast %46 : vector<1x16x16x8xbf16> to vector<16x16x8xbf16>
    %48 = vector.shape_cast %47 : vector<16x16x8xbf16> to vector<256x8xbf16>
    %c0_34 = arith.constant 0 : index
    %c56 = arith.constant 56 : index
    %49 = vector.load %arg7[%c0_34, %c56] : memref<256x108xbf16, #tpu.memory_space<vmem>>, vector<256x8xbf16>
    tpu.vector_store %arg7[%c0_34, %c56], %48 {strides = array<i32>} : memref<256x108xbf16, #tpu.memory_space<vmem>>, vector<256x8xbf16>,
    %c2_i32_35 = arith.constant 2 : i32
    %50 = arith.addi %1, %c2_i32_35 : i32
    %c0_36 = arith.constant 0 : index
    %51 = arith.index_cast %50 : i32 to index
    %c2_37 = arith.constant 2 : index
    %c0_38 = arith.constant 0 : index
    %52 = vector.load %arg2[%c0_36, %51, %c2_37, %c0_38] : memref<1x18x18x8xbf16, #tpu.memory_space<vmem>>, vector<1x16x16x8xbf16>
    %53 = vector.shape_cast %52 : vector<1x16x16x8xbf16> to vector<16x16x8xbf16>
    %54 = vector.shape_cast %53 : vector<16x16x8xbf16> to vector<256x8xbf16>
    %c0_39 = arith.constant 0 : index
    %c64 = arith.constant 64 : index
    %55 = vector.load %arg7[%c0_39, %c64] : memref<256x108xbf16, #tpu.memory_space<vmem>>, vector<256x8xbf16>
    tpu.vector_store %arg7[%c0_39, %c64], %54 {strides = array<i32>} : memref<256x108xbf16, #tpu.memory_space<vmem>>, vector<256x8xbf16>,
    %c0_i32_40 = arith.constant 0 : i32
    %56 = arith.addi %1, %c0_i32_40 : i32
    %c0_41 = arith.constant 0 : index
    %57 = arith.index_cast %56 : i32 to index
    %c0_42 = arith.constant 0 : index
    %c0_43 = arith.constant 0 : index
    %58 = vector.load %arg3[%c0_41, %57, %c0_42, %c0_43] : memref<1x18x18x4xbf16, #tpu.memory_space<vmem>>, vector<1x16x16x4xbf16>
    %59 = vector.shape_cast %58 : vector<1x16x16x4xbf16> to vector<16x16x4xbf16>
    %60 = vector.shape_cast %59 : vector<16x16x4xbf16> to vector<256x4xbf16>
    %c0_44 = arith.constant 0 : index
    %c72 = arith.constant 72 : index
    %61 = vector.load %arg7[%c0_44, %c72] : memref<256x108xbf16, #tpu.memory_space<vmem>>, vector<256x4xbf16>
    tpu.vector_store %arg7[%c0_44, %c72], %60 {strides = array<i32>} : memref<256x108xbf16, #tpu.memory_space<vmem>>, vector<256x4xbf16>,
    %c0_i32_45 = arith.constant 0 : i32
    %62 = arith.addi %1, %c0_i32_45 : i32
    %c0_46 = arith.constant 0 : index
    %63 = arith.index_cast %62 : i32 to index
    %c1_47 = arith.constant 1 : index
    %c0_48 = arith.constant 0 : index
    %64 = vector.load %arg3[%c0_46, %63, %c1_47, %c0_48] : memref<1x18x18x4xbf16, #tpu.memory_space<vmem>>, vector<1x16x16x4xbf16>
    %65 = vector.shape_cast %64 : vector<1x16x16x4xbf16> to vector<16x16x4xbf16>
    %66 = vector.shape_cast %65 : vector<16x16x4xbf16> to vector<256x4xbf16>
    %c0_49 = arith.constant 0 : index
    %c76 = arith.constant 76 : index
    %67 = vector.load %arg7[%c0_49, %c76] : memref<256x108xbf16, #tpu.memory_space<vmem>>, vector<256x4xbf16>
    tpu.vector_store %arg7[%c0_49, %c76], %66 {strides = array<i32>} : memref<256x108xbf16, #tpu.memory_space<vmem>>, vector<256x4xbf16>,
    %c0_i32_50 = arith.constant 0 : i32
    %68 = arith.addi %1, %c0_i32_50 : i32
    %c0_51 = arith.constant 0 : index
    %69 = arith.index_cast %68 : i32 to index
    %c2_52 = arith.constant 2 : index
    %c0_53 = arith.constant 0 : index
    %70 = vector.load %arg3[%c0_51, %69, %c2_52, %c0_53] : memref<1x18x18x4xbf16, #tpu.memory_space<vmem>>, vector<1x16x16x4xbf16>
    %71 = vector.shape_cast %70 : vector<1x16x16x4xbf16> to vector<16x16x4xbf16>
    %72 = vector.shape_cast %71 : vector<16x16x4xbf16> to vector<256x4xbf16>
    %c0_54 = arith.constant 0 : index
    %c80 = arith.constant 80 : index
    %73 = vector.load %arg7[%c0_54, %c80] : memref<256x108xbf16, #tpu.memory_space<vmem>>, vector<256x4xbf16>
    tpu.vector_store %arg7[%c0_54, %c80], %72 {strides = array<i32>} : memref<256x108xbf16, #tpu.memory_space<vmem>>, vector<256x4xbf16>,
    %c1_i32_55 = arith.constant 1 : i32
    %74 = arith.addi %1, %c1_i32_55 : i32
    %c0_56 = arith.constant 0 : index
    %75 = arith.index_cast %74 : i32 to index
    %c0_57 = arith.constant 0 : index
    %c0_58 = arith.constant 0 : index
    %76 = vector.load %arg3[%c0_56, %75, %c0_57, %c0_58] : memref<1x18x18x4xbf16, #tpu.memory_space<vmem>>, vector<1x16x16x4xbf16>
    %77 = vector.shape_cast %76 : vector<1x16x16x4xbf16> to vector<16x16x4xbf16>
    %78 = vector.shape_cast %77 : vector<16x16x4xbf16> to vector<256x4xbf16>
    %c0_59 = arith.constant 0 : index
    %c84 = arith.constant 84 : index
    %79 = vector.load %arg7[%c0_59, %c84] : memref<256x108xbf16, #tpu.memory_space<vmem>>, vector<256x4xbf16>
    tpu.vector_store %arg7[%c0_59, %c84], %78 {strides = array<i32>} : memref<256x108xbf16, #tpu.memory_space<vmem>>, vector<256x4xbf16>,
    %c1_i32_60 = arith.constant 1 : i32
    %80 = arith.addi %1, %c1_i32_60 : i32
    %c0_61 = arith.constant 0 : index
    %81 = arith.index_cast %80 : i32 to index
    %c1_62 = arith.constant 1 : index
    %c0_63 = arith.constant 0 : index
    %82 = vector.load %arg3[%c0_61, %81, %c1_62, %c0_63] : memref<1x18x18x4xbf16, #tpu.memory_space<vmem>>, vector<1x16x16x4xbf16>
    %83 = vector.shape_cast %82 : vector<1x16x16x4xbf16> to vector<16x16x4xbf16>
    %84 = vector.shape_cast %83 : vector<16x16x4xbf16> to vector<256x4xbf16>
    %c0_64 = arith.constant 0 : index
    %c88 = arith.constant 88 : index
    %85 = vector.load %arg7[%c0_64, %c88] : memref<256x108xbf16, #tpu.memory_space<vmem>>, vector<256x4xbf16>
    tpu.vector_store %arg7[%c0_64, %c88], %84 {strides = array<i32>} : memref<256x108xbf16, #tpu.memory_space<vmem>>, vector<256x4xbf16>,
    %c1_i32_65 = arith.constant 1 : i32
    %86 = arith.addi %1, %c1_i32_65 : i32
    %c0_66 = arith.constant 0 : index
    %87 = arith.index_cast %86 : i32 to index
    %c2_67 = arith.constant 2 : index
    %c0_68 = arith.constant 0 : index
    %88 = vector.load %arg3[%c0_66, %87, %c2_67, %c0_68] : memref<1x18x18x4xbf16, #tpu.memory_space<vmem>>, vector<1x16x16x4xbf16>
    %89 = vector.shape_cast %88 : vector<1x16x16x4xbf16> to vector<16x16x4xbf16>
    %90 = vector.shape_cast %89 : vector<16x16x4xbf16> to vector<256x4xbf16>
    %c0_69 = arith.constant 0 : index
    %c92 = arith.constant 92 : index
    %91 = vector.load %arg7[%c0_69, %c92] : memref<256x108xbf16, #tpu.memory_space<vmem>>, vector<256x4xbf16>
    tpu.vector_store %arg7[%c0_69, %c92], %90 {strides = array<i32>} : memref<256x108xbf16, #tpu.memory_space<vmem>>, vector<256x4xbf16>,
    %c2_i32_70 = arith.constant 2 : i32
    %92 = arith.addi %1, %c2_i32_70 : i32
    %c0_71 = arith.constant 0 : index
    %93 = arith.index_cast %92 : i32 to index
    %c0_72 = arith.constant 0 : index
    %c0_73 = arith.constant 0 : index
    %94 = vector.load %arg3[%c0_71, %93, %c0_72, %c0_73] : memref<1x18x18x4xbf16, #tpu.memory_space<vmem>>, vector<1x16x16x4xbf16>
    %95 = vector.shape_cast %94 : vector<1x16x16x4xbf16> to vector<16x16x4xbf16>
    %96 = vector.shape_cast %95 : vector<16x16x4xbf16> to vector<256x4xbf16>
    %c0_74 = arith.constant 0 : index
    %c96 = arith.constant 96 : index
    %97 = vector.load %arg7[%c0_74, %c96] : memref<256x108xbf16, #tpu.memory_space<vmem>>, vector<256x4xbf16>
    tpu.vector_store %arg7[%c0_74, %c96], %96 {strides = array<i32>} : memref<256x108xbf16, #tpu.memory_space<vmem>>, vector<256x4xbf16>,
    %c2_i32_75 = arith.constant 2 : i32
    %98 = arith.addi %1, %c2_i32_75 : i32
    %c0_76 = arith.constant 0 : index
    %99 = arith.index_cast %98 : i32 to index
    %c1_77 = arith.constant 1 : index
    %c0_78 = arith.constant 0 : index
    %100 = vector.load %arg3[%c0_76, %99, %c1_77, %c0_78] : memref<1x18x18x4xbf16, #tpu.memory_space<vmem>>, vector<1x16x16x4xbf16>
    %101 = vector.shape_cast %100 : vector<1x16x16x4xbf16> to vector<16x16x4xbf16>
    %102 = vector.shape_cast %101 : vector<16x16x4xbf16> to vector<256x4xbf16>
    %c0_79 = arith.constant 0 : index
    %c100 = arith.constant 100 : index
    %103 = vector.load %arg7[%c0_79, %c100] : memref<256x108xbf16, #tpu.memory_space<vmem>>, vector<256x4xbf16>
    tpu.vector_store %arg7[%c0_79, %c100], %102 {strides = array<i32>} : memref<256x108xbf16, #tpu.memory_space<vmem>>, vector<256x4xbf16>,
    %c2_i32_80 = arith.constant 2 : i32
    %104 = arith.addi %1, %c2_i32_80 : i32
    %c0_81 = arith.constant 0 : index
    %105 = arith.index_cast %104 : i32 to index
    %c2_82 = arith.constant 2 : index
    %c0_83 = arith.constant 0 : index
    %106 = vector.load %arg3[%c0_81, %105, %c2_82, %c0_83] : memref<1x18x18x4xbf16, #tpu.memory_space<vmem>>, vector<1x16x16x4xbf16>
    %107 = vector.shape_cast %106 : vector<1x16x16x4xbf16> to vector<16x16x4xbf16>
    %108 = vector.shape_cast %107 : vector<16x16x4xbf16> to vector<256x4xbf16>
    %c0_84 = arith.constant 0 : index
    %c104 = arith.constant 104 : index
    %109 = vector.load %arg7[%c0_84, %c104] : memref<256x108xbf16, #tpu.memory_space<vmem>>, vector<256x4xbf16>
    tpu.vector_store %arg7[%c0_84, %c104], %108 {strides = array<i32>} : memref<256x108xbf16, #tpu.memory_space<vmem>>, vector<256x4xbf16>,
    %c0_85 = arith.constant 0 : index
    %c0_86 = arith.constant 0 : index
    %110 = vector.load %arg4[%c0_85, %c0_86] : memref<8x108xbf16, #tpu.memory_space<vmem>>, vector<8x108xbf16>
    %c0_87 = arith.constant 0 : index
    %c0_88 = arith.constant 0 : index
    %111 = vector.load %arg7[%c0_87, %c0_88] : memref<256x108xbf16, #tpu.memory_space<vmem>>, vector<256x108xbf16>
    %cst = arith.constant dense<0.000000e+00> : vector<8x256xf32>
    %112 = tpu.matmul %110, %111, %cst {dimension_numbers = #tpu.dot_dimension_numbers<[1], [1], [0], [0], [0, 0, 1, 0], [], []>} : vector<8x108xbf16>, vector<256x108xbf16>, vector<8x256xf32> -> vector<8x256xf32>
    %c0_89 = arith.constant 0 : index
    %c0_90 = arith.constant 0 : index
    %113 = vector.load %arg5[%c0_89, %c0_90] : memref<8x3xf32, #tpu.memory_space<vmem>>, vector<8x1xf32>
    %114 = vector.broadcast %113 : vector<8x1xf32> to vector<8x256xf32>
    %115 = arith.addf %112, %114 : vector<8x256xf32>
    %cst_91 = arith.constant 0.000000e+00 : f32
    %116 = vector.broadcast %cst_91 : f32 to vector<8x256xf32>
    %117 = arith.maximumf %115, %116 : vector<8x256xf32>
    %c0_92 = arith.constant 0 : index
    %c1_93 = arith.constant 1 : index
    %118 = vector.load %arg5[%c0_92, %c1_93] : memref<8x3xf32, #tpu.memory_space<vmem>>, vector<8x1xf32>
    %119 = vector.broadcast %118 : vector<8x1xf32> to vector<8x256xf32>
    %120 = arith.mulf %117, %119 : vector<8x256xf32>
    %c0_94 = arith.constant 0 : index
    %c2_95 = arith.constant 2 : index
    %121 = vector.load %arg5[%c0_94, %c2_95] : memref<8x3xf32, #tpu.memory_space<vmem>>, vector<8x1xf32>
    %122 = vector.broadcast %121 : vector<8x1xf32> to vector<8x256xf32>
    %123 = arith.addf %120, %122 : vector<8x256xf32>
    %124 = vector.shape_cast %123 : vector<8x256xf32> to vector<1x8x256xf32>
    %125 = arith.truncf %124 : vector<1x8x256xf32> to vector<1x8x256xbf16>
    %c0_96 = arith.constant 0 : index
    %c0_97 = arith.constant 0 : index
    %c0_98 = arith.constant 0 : index
    %126 = vector.load %arg6[%c0_96, %c0_97, %c0_98] : memref<1x8x256xbf16, #tpu.memory_space<vmem>>, vector<1x8x256xbf16>
    tpu.vector_store %arg6[%c0_96, %c0_97, %c0_98], %125 {strides = array<i32>} : memref<1x8x256xbf16, #tpu.memory_space<vmem>>, vector<1x8x256xbf16>,
    return
  }
  func.func @transform_0(%arg0: i32, %arg1: i32) -> (i32, i32, i32, i32) {
    %c0_i32 = arith.constant 0 : i32
    %c0_i32_0 = arith.constant 0 : i32
    %c0_i32_1 = arith.constant 0 : i32
    %c0_i32_2 = arith.constant 0 : i32
    return %arg0, %c0_i32, %c0_i32_0, %c0_i32_1 : i32, i32, i32, i32
  }
  func.func @transform_1(%arg0: i32, %arg1: i32) -> (i32, i32, i32, i32) {
    %c0_i32 = arith.constant 0 : i32
    %c0_i32_0 = arith.constant 0 : i32
    %c0_i32_1 = arith.constant 0 : i32
    %c0_i32_2 = arith.constant 0 : i32
    return %arg0, %c0_i32, %c0_i32_0, %c0_i32_1 : i32, i32, i32, i32
  }
  func.func @transform_2(%arg0: i32, %arg1: i32) -> (i32, i32) {
    %c0_i32 = arith.constant 0 : i32
    %c0_i32_0 = arith.constant 0 : i32
    %c0_i32_1 = arith.constant 0 : i32
    return %c0_i32, %c0_i32_0 : i32, i32
  }
  func.func @transform_3(%arg0: i32, %arg1: i32) -> (i32, i32) {
    %c0_i32 = arith.constant 0 : i32
    %c0_i32_0 = arith.constant 0 : i32
    %c0_i32_1 = arith.constant 0 : i32
    return %c0_i32, %c0_i32_0 : i32, i32
  }
  func.func @transform_4(%arg0: i32, %arg1: i32) -> (i32, i32, i32) {
    %c0_i32 = arith.constant 0 : i32
    %c0_i32_0 = arith.constant 0 : i32
    return %arg0, %c0_i32, %arg1 : i32, i32, i32
  }
}

module attributes {stable_mosaic.version = 11 : i64} {
  func.func @_conv_fused_kernel(%arg0: i32, %arg1: i32, %arg2: memref<1x16x16x8xbf16, #tpu.memory_space<vmem>>, %arg3: memref<4x8xbf16, #tpu.memory_space<vmem>>, %arg4: memref<4x3xf32, #tpu.memory_space<vmem>>, %arg5: memref<1x4x256xbf16, #tpu.memory_space<vmem>>, %arg6: memref<256x8xbf16, #tpu.memory_space<vmem>>) attributes {dimension_semantics = [#tpu.dimension_semantics<parallel>, #tpu.dimension_semantics<parallel>], iteration_bounds = array<i64: 2, 1>, scalar_prefetch = 0 : i64, scratch_operands = 1 : i64, tpu.core_type = #tpu.core_type<tc>, window_params = [{transform_indices = @transform_0, window_bounds = array<i64: 1, 16, 16, 8>}, {pipeline_mode = #tpu.pipeline_mode<synchronous>, transform_indices = @transform_1, window_bounds = array<i64: 4, 8>}, {pipeline_mode = #tpu.pipeline_mode<synchronous>, transform_indices = @transform_2, window_bounds = array<i64: 4, 3>}, {transform_indices = @transform_3, window_bounds = array<i64: 1, 4, 256>}]} {
    %c16_i32 = arith.constant 16 : i32
    %0 = arith.muli %arg1, %c16_i32 : i32
    %1 = tpu.assume_multiple %0, 16 : i32
    %c0_i32 = arith.constant 0 : i32
    %2 = arith.addi %1, %c0_i32 : i32
    %c0 = arith.constant 0 : index
    %3 = arith.index_cast %2 : i32 to index
    %c0_0 = arith.constant 0 : index
    %c0_1 = arith.constant 0 : index
    %4 = vector.load %arg2[%c0, %3, %c0_0, %c0_1] : memref<1x16x16x8xbf16, #tpu.memory_space<vmem>>, vector<1x16x16x8xbf16>
    %5 = vector.shape_cast %4 : vector<1x16x16x8xbf16> to vector<16x16x8xbf16>
    %6 = vector.shape_cast %5 : vector<16x16x8xbf16> to vector<256x8xbf16>
    %c0_2 = arith.constant 0 : index
    %c0_3 = arith.constant 0 : index
    %7 = vector.load %arg6[%c0_2, %c0_3] : memref<256x8xbf16, #tpu.memory_space<vmem>>, vector<256x8xbf16>
    tpu.vector_store %arg6[%c0_2, %c0_3], %6 {strides = array<i32>} : memref<256x8xbf16, #tpu.memory_space<vmem>>, vector<256x8xbf16>,
    %c0_4 = arith.constant 0 : index
    %c0_5 = arith.constant 0 : index
    %8 = vector.load %arg3[%c0_4, %c0_5] : memref<4x8xbf16, #tpu.memory_space<vmem>>, vector<4x8xbf16>
    %c0_6 = arith.constant 0 : index
    %c0_7 = arith.constant 0 : index
    %9 = vector.load %arg6[%c0_6, %c0_7] : memref<256x8xbf16, #tpu.memory_space<vmem>>, vector<256x8xbf16>
    %cst = arith.constant dense<0.000000e+00> : vector<4x256xf32>
    %10 = tpu.matmul %8, %9, %cst {dimension_numbers = #tpu.dot_dimension_numbers<[1], [1], [0], [0], [0, 0, 1, 0], [], []>} : vector<4x8xbf16>, vector<256x8xbf16>, vector<4x256xf32> -> vector<4x256xf32>
    %11 = vector.shape_cast %10 : vector<4x256xf32> to vector<1x4x256xf32>
    %12 = arith.truncf %11 : vector<1x4x256xf32> to vector<1x4x256xbf16>
    %c0_8 = arith.constant 0 : index
    %c0_9 = arith.constant 0 : index
    %c0_10 = arith.constant 0 : index
    %13 = vector.load %arg5[%c0_8, %c0_9, %c0_10] : memref<1x4x256xbf16, #tpu.memory_space<vmem>>, vector<1x4x256xbf16>
    tpu.vector_store %arg5[%c0_8, %c0_9, %c0_10], %12 {strides = array<i32>} : memref<1x4x256xbf16, #tpu.memory_space<vmem>>, vector<1x4x256xbf16>,
    return
  }
  func.func @transform_0(%arg0: i32, %arg1: i32) -> (i32, i32, i32, i32) {
    %c0_i32 = arith.constant 0 : i32
    %c0_i32_0 = arith.constant 0 : i32
    %c0_i32_1 = arith.constant 0 : i32
    %c0_i32_2 = arith.constant 0 : i32
    return %arg0, %c0_i32, %c0_i32_0, %c0_i32_1 : i32, i32, i32, i32
  }
  func.func @transform_1(%arg0: i32, %arg1: i32) -> (i32, i32) {
    %c0_i32 = arith.constant 0 : i32
    %c0_i32_0 = arith.constant 0 : i32
    %c0_i32_1 = arith.constant 0 : i32
    return %c0_i32, %c0_i32_0 : i32, i32
  }
  func.func @transform_2(%arg0: i32, %arg1: i32) -> (i32, i32) {
    %c0_i32 = arith.constant 0 : i32
    %c0_i32_0 = arith.constant 0 : i32
    %c0_i32_1 = arith.constant 0 : i32
    return %c0_i32, %c0_i32_0 : i32, i32
  }
  func.func @transform_3(%arg0: i32, %arg1: i32) -> (i32, i32, i32) {
    %c0_i32 = arith.constant 0 : i32
    %c0_i32_0 = arith.constant 0 : i32
    return %arg0, %c0_i32, %arg1 : i32, i32, i32
  }
}

</mosaic_0001>

<bundles_post_ra>
// kernel: _lambda_.3
= control target key start
LH: loop header
LB: loop body
LE: loop exit
PB: predicated region body
PF: predicated region fallthrough
CT: control target
= control target key end

     0   :  { %s1525_s12 = smov 0   ;;  %s1527_s13 = smov 0   ;;  %s1862_s0 = inlined_call_operand.vmem [shape: bf16[2,10,10,8], index: 0, kind: input, shape index: {}]   ;;  %s1863_s1 = inlined_call_operand.vmem [shape: bf16[8,72], index: 1, kind: input, shape index: {}]   ;;  %s1864_s2 = inlined_call_operand.vmem [shape: f32[8,3], index: 2, kind: input, shape index: {}]   ;;  %s1865_s3 = inlined_call_operand.vmem [shape: bf16[2,8,64], index: 3, kind: output, shape index: {}]  }
   0x1   :  { %s1529_s14 = smov 0  }
   0x2 LB: > { %s25_s15 = sadd.s32 1, %s1486_s13  ;;  %p1251_p0 = scmp.ge.s32.totalorder %s1490_s14, 1  ;;  %s1490_s14 = sphi %s1529_s14, %s13_s14   ;;  %s1486_s13 = sphi %s1527_s13, %s1871_s13   ;;  %s1482_s12 = sphi %s1525_s12, %s1870_s12  }
   0x3   : > { %p27_p1 = scmp.ge.s32.totalorder %s25_s15, 2  ;;  %p151_p2 = scmp.lt.s32.totalorder %s1490_s14, 3 }
   0x5   : > { %s1873_s15 = smov (%p27_p1, %s25_s15), 0  ;;  %p152_p3 = pnand %p1251_p0, %p151_p2 }
   0x6   : > { %p177_p4 = scmp.lt.s32.totalorder (!%p152_p3), %s1482_s12, 1  ;;  %vm423_vm0 = vcmask (!%p152_p3), 1042432   ;;  %vm424_vm1 = vcmask (!%p152_p3), 1046532   ;;  %s1492_s20 = smov (!%p152_p3), 24   ;;  %vm247_vm3 = vsmask.f32 (!%p152_p3), 3328 }
   0x7   : > { %155 = sbr.rel (%p152_p3) target bundleno = 459 (0x1cb), region = 32  ;;  %vm1551_vm2 = vmor (!%p152_p3), %vm423_vm0, %vm424_vm1  ;;  %vm248_vm4 = vsmask.f32 (!%p152_p3), 7440  ;;  %s1493_s21 = smov (!%p152_p3), 48   ;;  %vm226_vm6 = vcmask (!%p152_p3), 64512   ;;  %v1500_v0 = vmov (!%p152_p3), 0.0  }
   0x8   : > { %s1494_s22 = smov (!%p152_p3), 16   ;;  %s1495_s23 = smov (!%p152_p3), 40   ;;  %vm1596_vm5 = vmor (!%p152_p3), %vm247_vm3, %vm248_vm4  ;;  %1402 = vmatprep.subr.bf16.mxu0 (!%p152_p3), %v1500_v0  ;;  %vm1501_vm7 = vmmov (!%p152_p3), 0   ;;  %v1090_v59 = vld [vmem:[%s1864_s2] sm:$0xff] (!%p152_p3)  ;;  %vm386_vm8 = vcmask (!%p152_p3), 130112   ;;  %vm482_vm9 = vcmask (!%p152_p3), 195712  }
   0x9   : > { %s1496_s24 = smov (!%p152_p3), 64   ;;  %s1497_s25 = smov (!%p152_p3), 8   ;;  %1410 = vmatprep.mubr.msk.bf16.mxu0 (!%p152_p3), %vm1501_vm7, %v1500_v0  ;;  %vm531_vm10 = vcmask (!%p152_p3), 261312   ;;  %vm688_vm11 = vcmask (!%p152_p3), 326912   ;;  %vm781_vm12 = vcmask (!%p152_p3), 392512   ;;  %vm830_vm13 = vcmask (!%p152_p3), 458112  }
   0xa   : > { %s1498_s26 = smov (!%p152_p3), 56   ;;  %s1499_s27 = smov (!%p152_p3), 32   ;;  %vm987_vm14 = vcmask (!%p152_p3), 523712   ;;  %vm1080_vm15 = vcmask (!%p152_p3), 589312   ;;  %vm1096_vm0 = vcmask (!%p152_p3), 588800   ;;  %vm1164_vm1 = vcmask (!%p152_p3), 519168  }
   0xe   : > { %s1875_s12 = smov (!%p177_p4, %s1482_s12), 1 }
   0xf   : > { %s1414_s16 = smul.u32 80, %s1875_s12  ;;  %s1253_s5 = sshll.u32 %s1875_s12, 2 }
  0x10   : > { %s188_s8 = scalar_lea.vmem %s1865_s3, %s1253_s5 }
  0x11   : > { %s1549_s19 = scalar_lea.vmem %s1862_s0, %s1414_s16 }
  0x12   : > { %v1456_v1 = vld [vmem:[%s1549_s19 + $0x8] ss:$8 sps:$4 sm:$0xff]   ;;  %v391_v2 = vld [vmem:[%s1549_s19] sm:$0xe]  ;;  %v392_v3 = vld [vmem:[%s1549_s19 + $0x4] sm:$0x1] }
  0x13   : > { %v393_v4 = vld [vmem:[%s1549_s19 + $0x8] sm:$0xe]  ;;  %519 = vrot.lane.b32.xlu1 %v1456_v1, %s1492_s20  ;;  %v394_v5 = vld [vmem:[%s1549_s19 + $0xc] sm:$0x1]  ;;  %v1262_v6 = vrot.slane %v391_v2, 9  ;;  %v428_v7 = vrot.slane %v392_v3, 5 }
  0x14   : > { %v1263_v8 = vrot.slane %v393_v4, 9  ;;  %v432_v9 = vrot.slane %v394_v5, 5  ;;  %v1457_v11 = vld [vmem:[%s1549_s19 + $0x10] ss:$8 sps:$4 sm:$0xff]   ;;  %v1306_v12 = vld [vmem:[%s1549_s19 + $0x8] sm:$0xe] }
  0x15   : > { %v429_v10 = vsel %vm1551_vm2, %v1262_v6, %v428_v7  ;;  %v1307_v13 = vld [vmem:[%s1549_s19 + $0xc] sm:$0x1]  ;;  %v1308_v15 = vld [vmem:[%s1549_s19 + $0x10] sm:$0xe]  ;;  %v1309_v16 = vld [vmem:[%s1549_s19 + $0x14] sm:$0x1] }
  0x16   : > { %v433_v14 = vsel %vm1551_vm2, %v1263_v8, %v432_v9  ;;  %v1322_v17 = vrot.slane %v1306_v12, 9  ;;  %v727_v18 = vrot.slane %v1307_v13, 5  ;;  %v1323_v20 = vrot.slane %v1308_v15, 9  ;;  %v1366_v22 = vld [vmem:[%s1549_s19 + $0x10] sm:$0xe] }
  0x17   : > { %v1270_v19 = vcombine.low %v429_v10, %v433_v14  ;;  %818 = vrot.lane.b32.xlu1 %v1457_v11, %s1493_s21  ;;  %v731_v21 = vrot.slane %v1309_v16, 5  ;;  %v1367_v23 = vld [vmem:[%s1549_s19 + $0x14] sm:$0x1]  ;;  %v1368_v25 = vld [vmem:[%s1549_s19 + $0x18] sm:$0xe]  ;;  %v1382_v27 = vrot.slane %v1366_v22, 9 }
  0x18   : > { %v728_v24 = vsel %vm1551_vm2, %v1322_v17, %v727_v18  ;;  %v1369_v26 = vld [vmem:[%s1549_s19 + $0x1c] sm:$0x1]  ;;  %v1026_v28 = vrot.slane %v1367_v23, 5  ;;  %v1383_v30 = vrot.slane %v1368_v25, 9  ;;  %v231_v32 = vld [vmem:[%s1549_s19] sm:$0xf] }
  0x19   : > { %470 = vrot.lane.b32.xlu0 %v1270_v19, %s1494_s22  ;;  %v732_v29 = vsel %vm1551_vm2, %v1323_v20, %v731_v21  ;;  %v1030_v31 = vrot.slane %v1369_v26, 5  ;;  %v232_v33 = vld [vmem:[%s1549_s19 + $0x4] sm:$0x1]  ;;  %v233_v36 = vld [vmem:[%s1549_s19 + $0x8] sm:$0xf]  ;;  %v251_v38 = vshrl.u32 %v231_v32, 16 }
  0x1a   : > { %v1330_v34 = vcombine.low %v728_v24, %v732_v29  ;;  %v1027_v35 = vsel %vm1551_vm2, %v1382_v27, %v1026_v28  ;;  %v234_v37 = vld [vmem:[%s1549_s19 + $0xc] sm:$0x1]  ;;  %v254_v39 = vshll.u32 %v231_v32, 16  ;;  %v260_v41 = vshll.u32 %v232_v33, 16  ;;  %v395_v44 = vld [vmem:[%s1549_s19 + $0x10] sm:$0xe] }
  0x1b   : > { %v1031_v40 = vsel %vm1551_vm2, %v1383_v30, %v1030_v31  ;;  %v265_v42 = vshrl.u32 %v233_v36, 16  ;;  %v268_v43 = vshll.u32 %v233_v36, 16  ;;  %v253_v46 = vrot.slane %v251_v38, 4  ;;  %v396_v49 = vld [vmem:[%s1549_s19 + $0x14] sm:$0x1] }
  0x1c   : > { %v1390_v45 = vcombine.low %v1027_v35, %v1031_v40  ;;  %v256_v47 = vrot.slane %v254_v39, 5  ;;  %v274_v48 = vshll.u32 %v234_v37, 16  ;;  %v397_v52 = vld [vmem:[%s1549_s19 + $0x18] sm:$0xe]  ;;  %v1264_v53 = vrot.slane %v395_v44, 9 }
  0x1d   : > { %769 = vrot.lane.b32.xlu0 %v1330_v34, %s1495_s23  ;;  %v267_v50 = vrot.slane %v265_v42, 4  ;;  %v270_v51 = vrot.slane %v268_v43, 5  ;;  %v262_v55 = vrot.slane %v260_v41, 5  ;;  %v398_v56 = vld [vmem:[%s1549_s19 + $0x1c] sm:$0x1]  ;;  %v436_v57 = vrot.slane %v396_v49, 5 }
  0x1e   : > { %1068 = vrot.lane.b32.xlu1 %v1390_v45, %s1496_s24  ;;  %v257_v54 = vor.u32 %v256_v47, %v253_v46  ;;  %v1265_v58 = vrot.slane %v397_v52, 9  ;;  %v276_v61 = vrot.slane %v274_v48, 5  ;;  %v440_v62 = vrot.slane %v398_v56, 5  ;;  %v1346_v63 = vld [vmem:[%s1549_s19 + $0x10] sm:$0xf] }
  0x1f   : > { %v271_v60 = vor.u32 %v270_v51, %v267_v50  ;;  %v1347_v1 = vld [vmem:[%s1549_s19 + $0x14] sm:$0x1]  ;;  %v437_v3 = vsel %vm1551_vm2, %v1264_v53, %v436_v57  ;;  %v1348_v4 = vld [vmem:[%s1549_s19 + $0x18] sm:$0xf]  ;;  %v1349_v5 = vld [vmem:[%s1549_s19 + $0x1c] sm:$0x1] }
  0x20   : > { %v258_v2 = vrot.slane %v257_v54, 4  ;;  %v852_v6 = vshrl.u32 %v1346_v63, 16  ;;  %v441_v8 = vsel %vm1551_vm2, %v1265_v58, %v440_v62  ;;  %v855_v9 = vshll.u32 %v1346_v63, 16  ;;  %v1286_v11 = vld [vmem:[%s1549_s19 + $0x8] sm:$0xf] }
  0x21   : > { %v272_v7 = vrot.slane %v271_v60, 4  ;;  %v861_v10 = vshll.u32 %v1347_v1, 16  ;;  %v1271_v13 = vcombine.low %v437_v3, %v441_v8  ;;  %v866_v15 = vshrl.u32 %v1348_v4, 16  ;;  %v1287_v16 = vld [vmem:[%s1549_s19 + $0xc] sm:$0x1] }
  0x22   : > { %v263_v12 = vsel %vm1596_vm5, %v258_v2, %v262_v55  ;;  %v854_v14 = vrot.slane %v852_v6, 4  ;;  %v857_v18 = vrot.slane %v855_v9, 5  ;;  %v869_v20 = vshll.u32 %v1348_v4, 16  ;;  %v1288_v21 = vld [vmem:[%s1549_s19 + $0x10] sm:$0xf] }
  0x23   : > { %v277_v17 = vsel %vm1596_vm5, %v272_v7, %v276_v61  ;;  %v863_v19 = vrot.slane %v861_v10, 5  ;;  %472 = vrot.lane.b32.xlu1 %v1271_v13, %s1494_s22  ;;  %v868_v23 = vrot.slane %v866_v15, 4  ;;  %v875_v24 = vshll.u32 %v1349_v5, 16  ;;  %v1289_v25 = vld [vmem:[%s1549_s19 + $0x14] sm:$0x1] }
  0x24   : > { %v1258_v22 = vcombine.low %v263_v12, %v277_v17  ;;  %v553_v26 = vshrl.u32 %v1286_v11, 16  ;;  %v858_v27 = vor.u32 %v857_v18, %v854_v14  ;;  %v871_v28 = vrot.slane %v869_v20, 5  ;;  %v235_v31 = vld [vmem:[%s1549_s19 + $0x10] sm:$0xf]  ;;  %v236_v36 = vld [vmem:[%s1549_s19 + $0x14] sm:$0x1] }
  0x25   : > { %v556_v29 = vshll.u32 %v1286_v11, 16  ;;  %v562_v30 = vshll.u32 %v1287_v16, 16  ;;  %v877_v32 = vrot.slane %v875_v24, 5  ;;  %v567_v34 = vshrl.u32 %v1288_v21, 16  ;;  %v237_v41 = vld [vmem:[%s1549_s19 + $0x18] sm:$0xf] }
  0x26   : > { %374 = vrot.lane.b32.xlu0 %v1258_v22, %s1497_s25  ;;  %v555_v33 = vrot.slane %v553_v26, 4  ;;  %v570_v35 = vshll.u32 %v1288_v21, 16  ;;  %v859_v37 = vrot.slane %v858_v27, 4  ;;  %v872_v38 = vor.u32 %v871_v28, %v868_v23  ;;  %v238_v49 = vld [vmem:[%s1549_s19 + $0x1c] sm:$0x1] }
  0x27   : > { %v558_v39 = vrot.slane %v556_v29, 5  ;;  %v564_v40 = vrot.slane %v562_v30, 5  ;;  %v569_v42 = vrot.slane %v567_v34, 4  ;;  %v576_v44 = vshll.u32 %v1289_v25, 16  ;;  %v1290_v55 = vld [vmem:[%s1549_s19 + $0x18] sm:$0xf] }
  0x28   : > { %v572_v43 = vrot.slane %v570_v35, 5  ;;  %v279_v45 = vshrl.u32 %v235_v31, 16  ;;  %v864_v46 = vsel %vm1596_vm5, %v859_v37, %v863_v19  ;;  %v873_v47 = vrot.slane %v872_v38, 4  ;;  %v1291_v61 = vld [vmem:[%s1549_s19 + $0x1c] sm:$0x1] }
  0x29   : > { %v559_v48 = vor.u32 %v558_v39, %v555_v33  ;;  %v282_v50 = vshll.u32 %v235_v31, 16  ;;  %v578_v52 = vrot.slane %v576_v44, 5  ;;  %v288_v54 = vshll.u32 %v236_v36, 16  ;;  %v1292_v3 = vld [vmem:[%s1549_s19 + $0x20] sm:$0xf] }
  0x2a   : > { %v573_v51 = vor.u32 %v572_v43, %v569_v42  ;;  %v281_v53 = vrot.slane %v279_v45, 4  ;;  %v878_v56 = vsel %vm1596_vm5, %v873_v47, %v877_v32  ;;  %v293_v60 = vshrl.u32 %v237_v41, 16  ;;  %v1293_v8 = vld [vmem:[%s1549_s19 + $0x24] sm:$0x1]  ;;  %v1310_v9 = vld [vmem:[%s1549_s19 + $0x18] sm:$0xe] }
  0x2b   : > { %v560_v57 = vrot.slane %v559_v48, 4  ;;  %v284_v58 = vrot.slane %v282_v50, 5  ;;  %v1362_v62 = vcombine.low %v864_v46, %v878_v56  ;;  %v290_v1 = vrot.slane %v288_v54, 5  ;;  %v1311_v14 = vld [vmem:[%s1549_s19 + $0x1c] sm:$0x1] }
  0x2c   : > { %v574_v63 = vrot.slane %v573_v51, 4  ;;  %v296_v2 = vshll.u32 %v237_v41, 16  ;;  %v295_v6 = vrot.slane %v293_v60, 4  ;;  %v302_v7 = vshll.u32 %v238_v49, 16  ;;  %v1312_v19 = vld [vmem:[%s1549_s19 + $0x20] sm:$0xe] }
  0x2d   : > { %v565_v4 = vsel %vm1596_vm5, %v560_v57, %v564_v40  ;;  %v285_v5 = vor.u32 %v284_v58, %v281_v53  ;;  %975 = vrot.lane.b32.xlu0 %v1362_v62, %s1498_s26  ;;  %v581_v12 = vshrl.u32 %v1290_v55, 16  ;;  %v584_v13 = vshll.u32 %v1290_v55, 16  ;;  %v1313_v24 = vld [vmem:[%s1549_s19 + $0x24] sm:$0x1]  ;;  %v1350_v40 = vld [vmem:[%s1549_s19 + $0x20] sm:$0xf] }
  0x2e   : > { %v579_v10 = vsel %vm1596_vm5, %v574_v63, %v578_v52  ;;  %v298_v11 = vrot.slane %v296_v2, 5  ;;  %v304_v17 = vrot.slane %v302_v7, 5  ;;  %v590_v18 = vshll.u32 %v1291_v61, 16  ;;  %v1351_v41 = vld [vmem:[%s1549_s19 + $0x24] sm:$0x1] }
  0x2f   : > { %v1302_v15 = vcombine.low %v565_v4, %v579_v10  ;;  %v286_v16 = vrot.slane %v285_v5, 4  ;;  %v583_v21 = vrot.slane %v581_v12, 4  ;;  %v586_v22 = vrot.slane %v584_v13, 5  ;;  %v1458_v43 = vld [vmem:[%s1549_s19 + $0x18] ss:$8 sps:$4 sm:$0xff]  }
  0x30   : > { %v299_v20 = vor.u32 %v298_v11, %v295_v6  ;;  %v595_v23 = vshrl.u32 %v1292_v3, 16  ;;  %v592_v26 = vrot.slane %v590_v18, 5  ;;  %v598_v27 = vshll.u32 %v1292_v3, 16  ;;  %v1352_v46 = vld [vmem:[%s1549_s19 + $0x28] sm:$0xf] }
  0x31   : > { %676 = vrot.lane.b32.xlu1 %v1302_v15, %s1499_s27  ;;  %v291_v25 = vsel %vm1596_vm5, %v286_v16, %v290_v1  ;;  %v604_v28 = vshll.u32 %v1293_v8, 16  ;;  %v587_v30 = vor.u32 %v586_v22, %v583_v21  ;;  %v1324_v32 = vrot.slane %v1310_v9, 9  ;;  %v1353_v47 = vld [vmem:[%s1549_s19 + $0x2c] sm:$0x1]  ;;  %v1370_v53 = vld [vmem:[%s1549_s19 + $0x20] sm:$0xe] }
  0x32   : > { %v300_v29 = vrot.slane %v299_v20, 4  ;;  %v597_v31 = vrot.slane %v595_v23, 4  ;;  %v600_v33 = vrot.slane %v598_v27, 5  ;;  %v735_v35 = vrot.slane %v1311_v14, 5  ;;  %v1371_v54 = vld [vmem:[%s1549_s19 + $0x24] sm:$0x1] }
  0x33   : > { %v606_v34 = vrot.slane %v604_v28, 5  ;;  %v1325_v36 = vrot.slane %v1312_v19, 9  ;;  %v588_v38 = vrot.slane %v587_v30, 4  ;;  %v739_v39 = vrot.slane %v1313_v24, 5  ;;  %v1372_v60 = vld [vmem:[%s1549_s19 + $0x28] sm:$0xe] }
  0x34   : > { %v305_v37 = vsel %vm1596_vm5, %v300_v29, %v304_v17  ;;  %v601_v44 = vor.u32 %v600_v33, %v597_v31  ;;  %v736_v45 = vsel %vm1551_vm2, %v1324_v32, %v735_v35  ;;  %v880_v48 = vshrl.u32 %v1350_v40, 16  ;;  %v1373_v2 = vld [vmem:[%s1549_s19 + $0x2c] sm:$0x1]  ;;  %v239_v7 = vld [vmem:[%s1549_s19 + $0x20] sm:$0xf] }
  0x35   : > { %v1259_v42 = vcombine.low %v291_v25, %v305_v37  ;;  %v593_v49 = vsel %vm1596_vm5, %v588_v38, %v592_v26  ;;  %v740_v50 = vsel %vm1551_vm2, %v1325_v36, %v739_v39  ;;  %v883_v51 = vshll.u32 %v1350_v40, 16  ;;  %v1459_v9 = vld [vmem:[%s1549_s19 + $0x20] ss:$8 sps:$4 sm:$0xff]   ;;  %v240_v13 = vld [vmem:[%s1549_s19 + $0x24] sm:$0x1] }
  0x36   : > { %v889_v52 = vshll.u32 %v1351_v41, 16  ;;  %v602_v55 = vrot.slane %v601_v44, 4  ;;  %v1331_v56 = vcombine.low %v736_v45, %v740_v50  ;;  %v882_v57 = vrot.slane %v880_v48, 4  ;;  %v241_v14 = vld [vmem:[%s1549_s19 + $0x28] sm:$0xf] }
  0x37   : > { %376 = vrot.lane.b32.xlu0 %v1259_v42, %s1497_s25  ;;  %v894_v58 = vshrl.u32 %v1352_v46, 16  ;;  %v885_v61 = vrot.slane %v883_v51, 5  ;;  %v897_v63 = vshll.u32 %v1352_v46, 16  ;;  %v903_v1 = vshll.u32 %v1353_v47, 16  ;;  %v242_v18 = vld [vmem:[%s1549_s19 + $0x2c] sm:$0x1] }
  0x38   : > { %v891_v62 = vrot.slane %v889_v52, 5  ;;  %v607_v3 = vsel %vm1596_vm5, %v602_v55, %v606_v34  ;;  %v1384_v5 = vrot.slane %v1370_v53, 9  ;;  %v1034_v6 = vrot.slane %v1371_v54, 5  ;;  %v399_v24 = vld [vmem:[%s1549_s19 + $0x20] sm:$0xe] }
  0x39   : > { %v896_v4 = vrot.slane %v894_v58, 4  ;;  %v1303_v8 = vcombine.low %v593_v49, %v607_v3  ;;  %v886_v10 = vor.u32 %v885_v61, %v882_v57  ;;  %v899_v11 = vrot.slane %v897_v63, 5  ;;  %v400_v29 = vld [vmem:[%s1549_s19 + $0x24] sm:$0x1]  ;;  %v401_v34 = vld [vmem:[%s1549_s19 + $0x28] sm:$0xe] }
  0x3a   : > { %v905_v12 = vrot.slane %v903_v1, 5  ;;  %v1035_v15 = vsel %vm1551_vm2, %v1384_v5, %v1034_v6  ;;  %v1385_v16 = vrot.slane %v1372_v60, 9  ;;  %v1038_v17 = vrot.slane %v1373_v2, 5  ;;  %v402_v35 = vld [vmem:[%s1549_s19 + $0x2c] sm:$0x1] }
  0x3b   : > { %521 = vrot.lane.b32.xlu0 %v1458_v43, %s1492_s20  ;;  %v307_v19 = vshrl.u32 %v239_v7, 16  ;;  %678 = vrot.lane.b32.xlu1 %v1303_v8, %s1499_s27  ;;  %v887_v20 = vrot.slane %v886_v10, 4  ;;  %v900_v21 = vor.u32 %v899_v11, %v896_v4  ;;  %v310_v22 = vshll.u32 %v239_v7, 16  ;;  %v1294_v48 = vld [vmem:[%s1549_s19 + $0x28] sm:$0xf] }
  0x3c   : > { %v316_v23 = vshll.u32 %v240_v13, 16  ;;  %v1039_v25 = vsel %vm1551_vm2, %v1385_v16, %v1038_v17  ;;  %v321_v27 = vshrl.u32 %v241_v14, 16  ;;  %v324_v28 = vshll.u32 %v241_v14, 16  ;;  %v1295_v49 = vld [vmem:[%s1549_s19 + $0x2c] sm:$0x1] }
  0x3d   : > { %v309_v26 = vrot.slane %v307_v19, 4  ;;  %v892_v30 = vsel %vm1596_vm5, %v887_v20, %v891_v62  ;;  %v901_v31 = vrot.slane %v900_v21, 4  ;;  %v1391_v32 = vcombine.low %v1035_v15, %v1039_v25  ;;  %v1296_v53 = vld [vmem:[%s1549_s19 + $0x30] sm:$0xf]  ;;  %v1297_v54 = vld [vmem:[%s1549_s19 + $0x34] sm:$0x1] }
  0x3e   : > { %v312_v33 = vrot.slane %v310_v22, 5  ;;  %v318_v36 = vrot.slane %v316_v23, 5  ;;  %v323_v37 = vrot.slane %v321_v27, 4  ;;  %v326_v38 = vrot.slane %v324_v28, 5  ;;  %v1314_v60 = vld [vmem:[%s1549_s19 + $0x28] sm:$0xe] }
  0x3f   : > { %771 = vrot.lane.b32.xlu0 %v1331_v56, %s1495_s23  ;;  %v330_v39 = vshll.u32 %v242_v18, 16  ;;  %820 = vrot.lane.b32.xlu1 %v1459_v9, %s1493_s21  ;;  %v906_v40 = vsel %vm1596_vm5, %v901_v31, %v905_v12  ;;  %v1266_v42 = vrot.slane %v399_v24, 9  ;;  %v444_v43 = vrot.slane %v400_v29, 5  ;;  %v1315_v2 = vld [vmem:[%s1549_s19 + $0x2c] sm:$0x1] }
  0x40   : > { %v313_v41 = vor.u32 %v312_v33, %v309_v26  ;;  %v1363_v44 = vcombine.low %v892_v30, %v906_v40  ;;  %v327_v45 = vor.u32 %v326_v38, %v323_v37  ;;  %v1267_v47 = vrot.slane %v401_v34, 9  ;;  %v1316_v3 = vld [vmem:[%s1549_s19 + $0x30] sm:$0xe]  ;;  %v1317_v8 = vld [vmem:[%s1549_s19 + $0x34] sm:$0x1] }
  0x41   : > { %v332_v46 = vrot.slane %v330_v39, 5  ;;  %v445_v51 = vsel %vm1551_vm2, %v1266_v42, %v444_v43  ;;  %v448_v52 = vrot.slane %v402_v35, 5  ;;  %v609_v56 = vshrl.u32 %v1294_v48, 16  ;;  %v1460_v13 = vld [vmem:[%s1549_s19 + $0x28] ss:$8 sps:$4 sm:$0xff]  }
  0x42   : > { %v314_v50 = vrot.slane %v313_v41, 4  ;;  %v328_v55 = vrot.slane %v327_v45, 4  ;;  %v612_v57 = vshll.u32 %v1294_v48, 16  ;;  %v618_v58 = vshll.u32 %v1295_v49, 16  ;;  %v1354_v21 = vld [vmem:[%s1549_s19 + $0x30] sm:$0xf] }
  0x43   : > { %977 = vrot.lane.b32.xlu0 %v1363_v44, %s1498_s26  ;;  %1070 = vrot.lane.b32.xlu1 %v1391_v32, %s1496_s24  ;;  %v449_v62 = vsel %vm1551_vm2, %v1267_v47, %v448_v52  ;;  %v623_v63 = vshrl.u32 %v1296_v53, 16  ;;  %v626_v1 = vshll.u32 %v1296_v53, 16  ;;  %v611_v6 = vrot.slane %v609_v56, 4  ;;  %v1355_v22 = vld [vmem:[%s1549_s19 + $0x34] sm:$0x1] }
  0x44   : > { %v319_v61 = vsel %vm1596_vm5, %v314_v50, %v318_v36  ;;  %v333_v4 = vsel %vm1596_vm5, %v328_v55, %v332_v46  ;;  %v1272_v5 = vcombine.low %v445_v51, %v449_v62  ;;  %v614_v7 = vrot.slane %v612_v57, 5  ;;  %v1356_v26 = vld [vmem:[%s1549_s19 + $0x38] sm:$0xf]  ;;  %v1357_v27 = vld [vmem:[%s1549_s19 + $0x3c] sm:$0x1] }
  0x45   : > { %v1260_v9 = vcombine.low %v319_v61, %v333_v4  ;;  %v620_v10 = vrot.slane %v618_v58, 5  ;;  %v625_v11 = vrot.slane %v623_v63, 4  ;;  %v628_v12 = vrot.slane %v626_v1, 5  ;;  %v1374_v32 = vld [vmem:[%s1549_s19 + $0x30] sm:$0xe] }
  0x46   : > { %v615_v14 = vor.u32 %v614_v7, %v611_v6  ;;  %v632_v15 = vshll.u32 %v1297_v54, 16  ;;  %v1326_v16 = vrot.slane %v1314_v60, 9  ;;  %v743_v17 = vrot.slane %v1315_v2, 5  ;;  %v1375_v37 = vld [vmem:[%s1549_s19 + $0x34] sm:$0x1] }
  0x47   : > { %378 = vrot.lane.b32.xlu0 %v1260_v9, %s1497_s25  ;;  %474 = vrot.lane.b32.xlu1 %v1272_v5, %s1494_s22  ;;  %v629_v18 = vor.u32 %v628_v12, %v625_v11  ;;  %v1327_v19 = vrot.slane %v1316_v3, 9  ;;  %v747_v20 = vrot.slane %v1317_v8, 5  ;;  %v908_v30 = vshrl.u32 %v1354_v21, 16  ;;  %v1376_v38 = vld [vmem:[%s1549_s19 + $0x38] sm:$0xe] }
  0x48   : > { %v616_v23 = vrot.slane %v615_v14, 4  ;;  %v634_v24 = vrot.slane %v632_v15, 5  ;;  %v744_v25 = vsel %vm1551_vm2, %v1326_v16, %v743_v17  ;;  %v911_v31 = vshll.u32 %v1354_v21, 16  ;;  %v1377_v43 = vld [vmem:[%s1549_s19 + $0x3c] sm:$0x1] }
  0x49   : > { %v630_v28 = vrot.slane %v629_v18, 4  ;;  %v748_v29 = vsel %vm1551_vm2, %v1327_v19, %v747_v20  ;;  %v917_v35 = vshll.u32 %v1355_v22, 16  ;;  %v922_v36 = vshrl.u32 %v1356_v26, 16  ;;  %v1461_v45 = vld [vmem:[%s1549_s19 + $0x30] ss:$8 sps:$4 sm:$0xff]  }
  0x4a   : > { %v621_v33 = vsel %vm1596_vm5, %v616_v23, %v620_v10  ;;  %v1332_v34 = vcombine.low %v744_v25, %v748_v29  ;;  %v910_v40 = vrot.slane %v908_v30, 4  ;;  %v913_v41 = vrot.slane %v911_v31, 5  ;;  %v243_v49 = vld [vmem:[%s1549_s19 + $0x30] sm:$0xf]  ;;  %v244_v54 = vld [vmem:[%s1549_s19 + $0x34] sm:$0x1] }
  0x4b   : > { %523 = vrot.lane.b32.xlu0 %v1460_v13, %s1492_s20  ;;  %v635_v39 = vsel %vm1596_vm5, %v630_v28, %v634_v24  ;;  %v925_v42 = vshll.u32 %v1356_v26, 16  ;;  %v919_v46 = vrot.slane %v917_v35, 5  ;;  %v924_v47 = vrot.slane %v922_v36, 4  ;;  %v245_v58 = vld [vmem:[%s1549_s19 + $0x38] sm:$0xf] }
  0x4c   : > { %v1304_v44 = vcombine.low %v621_v33, %v635_v39  ;;  %v931_v48 = vshll.u32 %v1357_v27, 16  ;;  %v914_v50 = vor.u32 %v913_v41, %v910_v40  ;;  %v1386_v52 = vrot.slane %v1374_v32, 9  ;;  %v246_v1 = vld [vmem:[%s1549_s19 + $0x3c] sm:$0x1]  ;;  %v403_v3 = vld [vmem:[%s1549_s19 + $0x30] sm:$0xe] }
  0x4d   : > { %v927_v51 = vrot.slane %v925_v42, 5  ;;  %v1042_v53 = vrot.slane %v1375_v37, 5  ;;  %v1387_v56 = vrot.slane %v1376_v38, 9  ;;  %v1046_v57 = vrot.slane %v1377_v43, 5  ;;  %v404_v8 = vld [vmem:[%s1549_s19 + $0x34] sm:$0x1] }
  0x4e   : > { %680 = vrot.lane.b32.xlu1 %v1304_v44, %s1499_s27  ;;  %v933_v55 = vrot.slane %v931_v48, 5  ;;  %v335_v60 = vshrl.u32 %v243_v49, 16  ;;  %v915_v61 = vrot.slane %v914_v50, 4  ;;  %v338_v2 = vshll.u32 %v243_v49, 16  ;;  %v405_v13 = vld [vmem:[%s1549_s19 + $0x38] sm:$0xe] }
  0x4f   : > { %773 = vrot.lane.b32.xlu0 %v1332_v34, %s1495_s23  ;;  %v928_v62 = vor.u32 %v927_v51, %v924_v47  ;;  %v1043_v63 = vsel %vm1551_vm2, %v1386_v52, %v1042_v53  ;;  %v1047_v4 = vsel %vm1551_vm2, %v1387_v56, %v1046_v57  ;;  %v344_v6 = vshll.u32 %v244_v54, 16  ;;  %v406_v14 = vld [vmem:[%s1549_s19 + $0x3c] sm:$0x1]  ;;  %v1298_v27 = vld [vmem:[%s1549_s19 + $0x38] sm:$0xf] }
  0x50   : > { %v337_v5 = vrot.slane %v335_v60, 4  ;;  %v349_v7 = vshrl.u32 %v245_v58, 16  ;;  %v920_v9 = vsel %vm1596_vm5, %v915_v61, %v919_v46  ;;  %v1392_v11 = vcombine.low %v1043_v63, %v1047_v4  ;;  %v1299_v31 = vld [vmem:[%s1549_s19 + $0x3c] sm:$0x1]  ;;  %v1300_v32 = vld [vmem:[%s1549_s19 + $0x40] sm:$0xf] }
  0x51   : > { %v929_v10 = vrot.slane %v928_v62, 4  ;;  %v340_v12 = vrot.slane %v338_v2, 5  ;;  %v346_v15 = vrot.slane %v344_v6, 5  ;;  %v352_v17 = vshll.u32 %v245_v58, 16  ;;  %v1301_v34 = vld [vmem:[%s1549_s19 + $0x44] sm:$0x1] }
  0x52   : > { %822 = vrot.lane.b32.xlu1 %v1461_v45, %s1493_s21  ;;  %v351_v16 = vrot.slane %v349_v7, 4  ;;  %v358_v18 = vshll.u32 %v246_v1, 16  ;;  %v1268_v21 = vrot.slane %v403_v3, 9  ;;  %v452_v22 = vrot.slane %v404_v8, 5  ;;  %v1318_v42 = vld [vmem:[%s1549_s19 + $0x38] sm:$0xe] }
  0x53   : > { %v934_v19 = vsel %vm1596_vm5, %v929_v10, %v933_v55  ;;  %v341_v20 = vor.u32 %v340_v12, %v337_v5  ;;  %v354_v24 = vrot.slane %v352_v17, 5  ;;  %v1269_v26 = vrot.slane %v405_v13, 9  ;;  %v1319_v43 = vld [vmem:[%s1549_s19 + $0x3c] sm:$0x1]  ;;  %v1320_v48 = vld [vmem:[%s1549_s19 + $0x40] sm:$0xe] }
  0x54   : > { %v1364_v23 = vcombine.low %v920_v9, %v934_v19  ;;  %v360_v25 = vrot.slane %v358_v18, 5  ;;  %v453_v29 = vsel %vm1551_vm2, %v1268_v21, %v452_v22  ;;  %v456_v30 = vrot.slane %v406_v14, 5  ;;  %v1321_v53 = vld [vmem:[%s1549_s19 + $0x44] sm:$0x1]  ;;  %v1462_v60 = vld [vmem:[%s1549_s19 + $0x38] ss:$8 sps:$4 sm:$0xff]  }
  0x55   : > { %v342_v28 = vrot.slane %v341_v20, 4  ;;  %v355_v33 = vor.u32 %v354_v24, %v351_v16  ;;  %v637_v35 = vshrl.u32 %v1298_v27, 16  ;;  %v640_v36 = vshll.u32 %v1298_v27, 16  ;;  %v1358_v1 = vld [vmem:[%s1549_s19 + $0x40] sm:$0xf] }
  0x56   : > { %979 = vrot.lane.b32.xlu0 %v1364_v23, %s1498_s26  ;;  %1072 = vrot.lane.b32.xlu1 %v1392_v11, %s1496_s24  ;;  %v646_v37 = vshll.u32 %v1299_v31, 16  ;;  %v457_v39 = vsel %vm1551_vm2, %v1269_v26, %v456_v30  ;;  %v651_v40 = vshrl.u32 %v1300_v32, 16  ;;  %v654_v41 = vshll.u32 %v1300_v32, 16  ;;  %v1359_v5 = vld [vmem:[%s1549_s19 + $0x44] sm:$0x1] }
  0x57   : > { %v347_v38 = vsel %vm1596_vm5, %v342_v28, %v346_v15  ;;  %v356_v44 = vrot.slane %v355_v33, 4  ;;  %v1273_v45 = vcombine.low %v453_v29, %v457_v39  ;;  %v639_v46 = vrot.slane %v637_v35, 4  ;;  %v1360_v6 = vld [vmem:[%s1549_s19 + $0x48] sm:$0xf]  ;;  %v1361_v8 = vld [vmem:[%s1549_s19 + $0x4c] sm:$0x1] }
  0x58   : > { %v642_v47 = vrot.slane %v640_v36, 5  ;;  %v648_v49 = vrot.slane %v646_v37, 5  ;;  %v653_v50 = vrot.slane %v651_v40, 4  ;;  %v656_v51 = vrot.slane %v654_v41, 5  ;;  %v1378_v16 = vld [vmem:[%s1549_s19 + $0x40] sm:$0xe] }
  0x59   : > { %v660_v52 = vshll.u32 %v1301_v34, 16  ;;  %v361_v54 = vsel %vm1596_vm5, %v356_v44, %v360_v25  ;;  %v1328_v56 = vrot.slane %v1318_v42, 9  ;;  %v751_v57 = vrot.slane %v1319_v43, 5  ;;  %v1379_v17 = vld [vmem:[%s1549_s19 + $0x44] sm:$0x1] }
  0x5a   : > { %476 = vrot.lane.b32.xlu1 %v1273_v45, %s1494_s22  ;;  %v643_v55 = vor.u32 %v642_v47, %v639_v46  ;;  %v1261_v58 = vcombine.low %v347_v38, %v361_v54  ;;  %v657_v61 = vor.u32 %v656_v51, %v653_v50  ;;  %v1329_v63 = vrot.slane %v1320_v48, 9  ;;  %v1380_v22 = vld [vmem:[%s1549_s19 + $0x48] sm:$0xe]  ;;  %v1381_v23 = vld [vmem:[%s1549_s19 + $0x4c] sm:$0x1] }
  0x5b   : > { %v662_v62 = vrot.slane %v660_v52, 5  ;;  %v752_v3 = vsel %vm1551_vm2, %v1328_v56, %v751_v57  ;;  %v755_v4 = vrot.slane %v1321_v53, 5  ;;  %v936_v9 = vshrl.u32 %v1358_v1, 16  ;;  %v1463_v32 = vld [vmem:[%s1549_s19 + $0x40] ss:$8 sps:$4 sm:$0xff]  }
  0x5c   : > { %v644_v2 = vrot.slane %v643_v55, 4  ;;  %380 = vrot.lane.b32.xlu0 %v1261_v58, %s1497_s25  ;;  %v658_v7 = vrot.slane %v657_v61, 4  ;;  %v939_v10 = vshll.u32 %v1358_v1, 16  ;;  %v945_v11 = vshll.u32 %v1359_v5, 16  ;;  %v1464_v36 = vld [vmem:[%s1549_s19] ss:$8 sps:$4 sm:$0xff]  }
  0x5d   : > { %v756_v13 = vsel %vm1551_vm2, %v1329_v63, %v755_v4  ;;  %v950_v14 = vshrl.u32 %v1360_v6, 16  ;;  %v953_v15 = vshll.u32 %v1360_v6, 16  ;;  %v938_v20 = vrot.slane %v936_v9, 4  ;;  %227 = vst.msk [vmem:[#allocation2] sm:$0xff] %vm226_vm6, %v1464_v36  ;;  %v1465_v42 = vld [vmem:[%s1549_s19 + $0x10] ss:$8 sps:$4 sm:$0xff]  }
  0x5e   : > { %v649_v12 = vsel %vm1596_vm5, %v644_v2, %v648_v49  ;;  %v663_v18 = vsel %vm1596_vm5, %v658_v7, %v662_v62  ;;  %v1333_v19 = vcombine.low %v752_v3, %v756_v13  ;;  %v941_v21 = vrot.slane %v939_v10, 5  ;;  %228 = vst.msk [vmem:[#allocation2 + $0x8] sm:$0xff] %vm226_vm6, %v1465_v42  ;;  %v1466_v46 = vld [vmem:[%s1549_s19 + $0x20] ss:$8 sps:$4 sm:$0xff]   ;;  %v1467_v48 = vld [vmem:[%s1549_s19 + $0x30] ss:$8 sps:$4 sm:$0xff]  }
  0x5f   : > { %v1305_v24 = vcombine.low %v649_v12, %v663_v18  ;;  %v947_v25 = vrot.slane %v945_v11, 5  ;;  %v952_v26 = vrot.slane %v950_v14, 4  ;;  %v955_v27 = vrot.slane %v953_v15, 5  ;;  %229 = vst.msk [vmem:[#allocation2 + $0x10] sm:$0xff] %vm226_vm6, %v1466_v46  ;;  %230 = vst.msk [vmem:[#allocation2 + $0x18] sm:$0xff] %vm226_vm6, %v1467_v48 }
  0x60   : > { %525 = vrot.lane.b32.xlu0 %v1462_v60, %s1492_s20  ;;  %v942_v28 = vor.u32 %v941_v21, %v938_v20  ;;  %v959_v29 = vshll.u32 %v1361_v8, 16  ;;  %v1388_v30 = vrot.slane %v1378_v16, 9  ;;  %v1050_v31 = vrot.slane %v1379_v17, 5 }
  0x61   : > { %682 = vrot.lane.b32.xlu1 %v1305_v24, %s1499_s27  ;;  %v956_v33 = vor.u32 %v955_v27, %v952_v26  ;;  %v1389_v34 = vrot.slane %v1380_v22, 9  ;;  %v1054_v35 = vrot.slane %v1381_v23, 5  ;;  %v1502_v49 = vmov 0  }
  0x62   : > { %v943_v37 = vrot.slane %v942_v28, 4  ;;  %v961_v38 = vrot.slane %v959_v29, 5  ;;  %v1051_v39 = vsel %vm1551_vm2, %v1388_v30, %v1050_v31  ;;  %1452 = vset.pattern.permute.xlu0 %v1502_v49  ;;  %v1503_v50 = vmov 1   ;;  %v1085_v30 = vld [vmem:[%s1863_s1] sm:$0xf] }
  0x63   : > { %v957_v40 = vrot.slane %v956_v33, 4  ;;  %v1055_v41 = vsel %vm1551_vm2, %v1389_v34, %v1054_v35  ;;  %1453 = vset.pattern.permute.xlu1 %v1503_v50  ;;  %v1504_v51 = vmov 2  }
  0x64   : > { %775 = vrot.lane.b32.xlu0 %v1333_v19, %s1495_s23  ;;  %v948_v43 = vsel %vm1596_vm5, %v943_v37, %v947_v25  ;;  %v1393_v45 = vcombine.low %v1051_v39, %v1055_v41 }
  0x65   : > { %824 = vrot.lane.b32.xlu1 %v1463_v32, %s1493_s21  ;;  %v962_v44 = vsel %vm1596_vm5, %v957_v40, %v961_v38 }
  0x66   : > { %v1365_v47 = vcombine.low %v948_v43, %v962_v44 }
  0x68   : > { %981 = vrot.lane.b32.xlu0 %v1365_v47, %s1498_s26 }
  0x69   : > { %1074 = vrot.lane.b32.xlu1 %v1393_v45, %s1496_s24 }
  0x6c   : > { %1093 = vperm.xlu0 %1452, %v1090_v59  }
  0x6d   : > { %1154 = vperm.xlu1 %1453, %v1090_v59  }
  0x70   : > { %1455 = vset.pattern.permute.xlu0 %v1504_v51 }
  0x71   : > { %1454 = vset.pattern.permute.xlu1 %v1504_v51 }
  0x72   : > { %1159 = vperm.xlu1 %1454, %v1090_v59  }
  0x85   : > { %v520_v52 = vpop.permute.xlu1 %519 }
  0x89   : > { %v819_v54 = vpop.permute.xlu1 %818 }
  0x8b   : > { %v471_v53 = vpop.permute.xlu0 %470 }
  0x8f   : > { %v770_v55 = vpop.permute.xlu0 %769 }
  0x90   : > { %v1069_v56 = vpop.permute.xlu1 %1068 }
  0x95   : > { %v473_v58 = vpop.permute.xlu1 %472 }
  0x98   : > { %v375_v57 = vpop.permute.xlu0 %374 }
  0x99   : > { %387 = vst.msk [vmem:[#allocation2] sm:$0xff] %vm386_vm8, %v375_v57 }
  0x9a   : > { %483 = vst.msk [vmem:[#allocation2] sm:$0xff] %vm482_vm9, %v471_v53 }
  0x9b   : > { %532 = vst.msk [vmem:[#allocation2] sm:$0xff] %vm531_vm10, %v520_v52 }
  0x9f   : > { %v976_v60 = vpop.permute.xlu0 %975 }
  0xa3   : > { %v677_v61 = vpop.permute.xlu1 %676 }
  0xa4   : > { %689 = vst.msk [vmem:[#allocation2] sm:$0xff] %vm688_vm11, %v677_v61 }
  0xa5   : > { %782 = vst.msk [vmem:[#allocation2] sm:$0xff] %vm781_vm12, %v770_v55 }
  0xa6   : > { %831 = vst.msk [vmem:[#allocation2] sm:$0xff] %vm830_vm13, %v819_v54 }
  0xa7   : > { %988 = vst.msk [vmem:[#allocation2] sm:$0xff] %vm987_vm14, %v976_v60 }
  0xa8   : > { %1081 = vst.msk [vmem:[#allocation2] sm:$0xff] %vm1080_vm15, %v1069_v56 }
  0xa9   : > { %v377_v62 = vpop.permute.xlu0 %376 }
  0xaa   : > { %388 = vst.msk [vmem:[#allocation2 + $0x8] sm:$0xff] %vm386_vm8, %v377_v62 }
  0xab   : > { %484 = vst.msk [vmem:[#allocation2 + $0x8] sm:$0xff] %vm482_vm9, %v473_v58 }
  0xad   : > { %v522_v63 = vpop.permute.xlu0 %521  ;;  %v679_v1 = vpop.permute.xlu1 %678 }
  0xae   : > { %533 = vst.msk [vmem:[#allocation2 + $0x8] sm:$0xff] %vm531_vm10, %v522_v63 }
  0xaf   : > { %690 = vst.msk [vmem:[#allocation2 + $0x8] sm:$0xff] %vm688_vm11, %v679_v1  ;;  %v1086_v2 = vld [vmem:[#allocation2] sm:$0xff] }
  0xb0   : > { %v1101_v3 = vsel %vm1096_vm0, %v1086_v2, 0 }
  0xb1   : > { %v772_v4 = vpop.permute.xlu0 %771  ;;  %1403 = vmatpush3.bf16.xpose.msra.mxu0 %v1101_v3  ;;  %v821_v5 = vpop.permute.xlu1 %820 }
  0xb2   : > { %783 = vst.msk [vmem:[#allocation2 + $0x8] sm:$0xff] %vm781_vm12, %v772_v4  ;;  %1404 = vmatprep.subr.bf16.mxu0 %v1500_v0 }
  0xb3   : > { %832 = vst.msk [vmem:[#allocation2 + $0x8] sm:$0xff] %vm830_vm13, %v821_v5 }
  0xb5   : > { %v978_v6 = vpop.permute.xlu0 %977  ;;  %v1071_v7 = vpop.permute.xlu1 %1070 }
  0xb6   : > { %989 = vst.msk [vmem:[#allocation2 + $0x8] sm:$0xff] %vm987_vm14, %v978_v6 }
  0xb7   : > { %1082 = vst.msk [vmem:[#allocation2 + $0x8] sm:$0xff] %vm1080_vm15, %v1071_v7 }
  0xb9   : > { %v379_v8 = vpop.permute.xlu0 %378  ;;  %v475_v9 = vpop.permute.xlu1 %474 }
  0xba   : > { %389 = vst.msk [vmem:[#allocation2 + $0x10] sm:$0xff] %vm386_vm8, %v379_v8 }
  0xbb   : > { %485 = vst.msk [vmem:[#allocation2 + $0x10] sm:$0xff] %vm482_vm9, %v475_v9 }
  0xbd   : > { %v524_v10 = vpop.permute.xlu0 %523 }
  0xbe   : > { %v1087_v11 = vld [vmem:[#allocation2 + $0x8] sm:$0xff]  ;;  %534 = vst.msk [vmem:[#allocation2 + $0x10] sm:$0xff] %vm531_vm10, %v524_v10 }
  0xbf   : > { %v1104_v12 = vsel %vm1096_vm0, %v1087_v11, 0 }
  0xc0   : > { %1405 = vmatpush3.bf16.xpose.msra.mxu0 %v1104_v12  ;;  %v681_v13 = vpop.permute.xlu1 %680 }
  0xc1   : > { %1406 = vmatprep.subr.bf16.mxu0 %v1500_v0  ;;  %691 = vst.msk [vmem:[#allocation2 + $0x10] sm:$0xff] %vm688_vm11, %v681_v13  ;;  %v774_v14 = vpop.permute.xlu0 %773 }
  0xc2   : > { %784 = vst.msk [vmem:[#allocation2 + $0x10] sm:$0xff] %vm781_vm12, %v774_v14 }
  0xc4   : > { %v823_v15 = vpop.permute.xlu1 %822 }
  0xc5   : > { %833 = vst.msk [vmem:[#allocation2 + $0x10] sm:$0xff] %vm830_vm13, %v823_v15 }
  0xc8   : > { %v980_v16 = vpop.permute.xlu0 %979  ;;  %v1073_v17 = vpop.permute.xlu1 %1072 }
  0xc9   : > { %990 = vst.msk [vmem:[#allocation2 + $0x10] sm:$0xff] %vm987_vm14, %v980_v16 }
  0xca   : > { %1083 = vst.msk [vmem:[#allocation2 + $0x10] sm:$0xff] %vm1080_vm15, %v1073_v17 }
  0xcc   : > { %v477_v18 = vpop.permute.xlu1 %476 }
  0xce   : > { %v381_v19 = vpop.permute.xlu0 %380 }
  0xcf   : > { %390 = vst.msk [vmem:[#allocation2 + $0x18] sm:$0xff] %vm386_vm8, %v381_v19 }
  0xd0   : > { %486 = vst.msk [vmem:[#allocation2 + $0x18] sm:$0xff] %vm482_vm9, %v477_v18 }
  0xd1   : > { %v1088_v20 = vld [vmem:[#allocation2 + $0x10] sm:$0xff] }
  0xd2   : > { %v1107_v21 = vsel %vm1096_vm0, %v1088_v20, 0  ;;  %v526_v22 = vpop.permute.xlu0 %525 }
  0xd3   : > { %1407 = vmatpush3.bf16.xpose.msra.mxu0 %v1107_v21  ;;  %535 = vst.msk [vmem:[#allocation2 + $0x18] sm:$0xff] %vm531_vm10, %v526_v22  ;;  %v683_v23 = vpop.permute.xlu1 %682 }
  0xd4   : > { %1408 = vmatprep.subr.bf16.mxu0 %v1500_v0  ;;  %692 = vst.msk [vmem:[#allocation2 + $0x18] sm:$0xff] %vm688_vm11, %v683_v23 }
  0xd6   : > { %v776_v24 = vpop.permute.xlu0 %775 }
  0xd7   : > { %785 = vst.msk [vmem:[#allocation2 + $0x18] sm:$0xff] %vm781_vm12, %v776_v24  ;;  %v825_v25 = vpop.permute.xlu1 %824 }
  0xd8   : > { %834 = vst.msk [vmem:[#allocation2 + $0x18] sm:$0xff] %vm830_vm13, %v825_v25 }
  0xda   : > { %v982_v26 = vpop.permute.xlu0 %981 }
  0xdb   : > { %991 = vst.msk [vmem:[#allocation2 + $0x18] sm:$0xff] %vm987_vm14, %v982_v26  ;;  %v1075_v27 = vpop.permute.xlu1 %1074 }
  0xdc   : > { %1084 = vst.msk [vmem:[#allocation2 + $0x18] sm:$0xff] %vm1080_vm15, %v1075_v27 }
  0xe3   : > { %v1089_v28 = vld [vmem:[#allocation2 + $0x18] sm:$0xff] }
  0xe4   : > { %v1110_v29 = vsel %vm1096_vm0, %v1089_v28, 0 }
  0xe5   : > { %1409 = vmatpush3.bf16.xpose.msra.mxu0 %v1110_v29 }
  0xeb   : > { %v1094_v31 = vpop.permute.xlu0 %1093 }
  0xec   : > { %1411 = vmatmul.mubr.msk.bf16.vlgmr.msra.gmra.mrb[0].mxu0 %vm1096_vm0, %v1085_v30  ;;  %v1155_v32 = vpop.permute.xlu1 %1154 }
  0xf1   : > { %v1160_v39 = vpop.permute.xlu1 %1159 }
 0x1bf   : > { %v1146_v33 = vpop.f32.mrb[0].mxu0 }
 0x1c0   : > { %v1147_v34 = vadd.f32 %v1146_v33, %v1094_v31  ;;  %v1412_v35 = vpop.f32.mrb[1].mxu0 }
 0x1c1   : > { %v1149_v36 = vpop.f32.mrb[2].mxu0 }
 0x1c2   : > { %v1152_v37 = vmax.f32 %v1147_v34, 0.0  ;;  %v1413_v38 = vpop.f32.mrb[3].mxu0 }
 0x1c4   : > { %v1157_v40 = vmul.f32 %v1155_v32, %v1152_v37 }
 0x1c6   : > { %v1162_v41 = vadd.f32 %v1160_v39, %v1157_v40 }
 0x1c8   : > { %v1163_v42 = vpack.c.bf16 %v1162_v41, %v1162_v41 }
 0x1ca   : > { %1165 = vst.msk [vmem:[%s188_s8] sm:$0xf] %vm1164_vm1, %v1163_v42 }
 0x1cb PF: > { %s13_s14 = sadd.s32 1, %s1490_s14   ;;  %s1870_s12 = smov %s1486_s13 }
 0x1cc   : > { %p10_p5 = scmp.ge.s32.totalorder %s13_s14, 4   ;;  %s1871_s13 = smov %s1873_s15 }
 0x1ce   :  { %12 = sbr.rel (!%p10_p5) target bundleno = 2 (0x2), region = 65 }

// kernel: _lambda_.5
= control target key start
LH: loop header
LB: loop body
LE: loop exit
PB: predicated region body
PF: predicated region fallthrough
CT: control target
= control target key end

     0   :  { %s692_s12 = smov 0   ;;  %s694_s13 = smov 0   ;;  %s788_s0 = inlined_call_operand.vmem [shape: bf16[2,16,16,8], index: 0, kind: input, shape index: {}]   ;;  %s789_s1 = inlined_call_operand.vmem [shape: bf16[4,8], index: 1, kind: input, shape index: {}]   ;;  %s790_s2 = inlined_call_operand.vmem [shape: f32[4,3], index: 2, kind: input, shape index: {}]   ;;  %s791_s3 = inlined_call_operand.vmem [shape: bf16[2,4,256], index: 3, kind: output, shape index: {}]  }
   0x1   :  { %s696_s14 = smov 0  }
   0x2 LB: > { %s25_s2 = sadd.s32 1, %s666_s13  ;;  %p554_p0 = scmp.ge.s32.totalorder %s670_s14, 1  ;;  %s670_s14 = sphi %s696_s14, %s13_s14   ;;  %s666_s13 = sphi %s694_s13, %s793_s13   ;;  %s662_s12 = sphi %s692_s12, %s792_s12  }
   0x3   : > { %p27_p1 = scmp.ge.s32.totalorder %s25_s2, 2  ;;  %p151_p2 = scmp.lt.s32.totalorder %s670_s14, 3 }
   0x5   : > { %s795_s2 = smov (%p27_p1, %s25_s2), 0  ;;  %p152_p3 = pnand %p554_p0, %p151_p2 }
   0x6   : > { %p179_p4 = scmp.lt.s32.totalorder (!%p152_p3), %s662_s12, 1  ;;  %vm327_vm0 = vcmask (!%p152_p3), 64512   ;;  %v713_v0 = vld [vmem:[%s789_s1] sm:$0x3] (!%p152_p3) }
   0x7   : > { %155 = sbr.rel (%p152_p3) target bundleno = 307 (0x133), region = 32  ;;  %598 = vmatprep.mubr.msk.bf16.mxu0 (!%p152_p3), %vm327_vm0, %v713_v0 }
   0xe   : > { %s797_s12 = smov (!%p179_p4, %s662_s12), 1 }
   0xf   : > { %s580_s17 = sshll.u32 %s797_s12, 7  ;;  %s581_s21 = sshll.u32 %s797_s12, 2 }
  0x10   : > { %s723_s20 = scalar_lea.vmem %s788_s0, %s580_s17  ;;  %s192_s24 = scalar_lea.vmem %s791_s3, %s581_s21 }
  0x11   : > { %v632_v1 = vld [vmem:[%s723_s20 + $0x40] sm:$0xff]   ;;  %v634_v3 = vld [vmem:[%s723_s20 + $0x48] sm:$0xff]   ;;  %v636_v5 = vld [vmem:[%s723_s20 + $0x50] sm:$0xff]  }
  0x12   : > { %v633_v2 = vld [vmem:[%s723_s20] sm:$0xff]   ;;  %336 = vst.msk [vmem:[#allocation2 + $0x40] sm:$0xff] %vm327_vm0, %v632_v1  ;;  %v635_v4 = vld [vmem:[%s723_s20 + $0x8] sm:$0xff]   ;;  %337 = vst.msk [vmem:[#allocation2 + $0x48] sm:$0xff] %vm327_vm0, %v634_v3 }
  0x13   : > { %328 = vst.msk [vmem:[#allocation2] sm:$0xff] %vm327_vm0, %v633_v2  ;;  %329 = vst.msk [vmem:[#allocation2 + $0x8] sm:$0xff] %vm327_vm0, %v635_v4  ;;  %v637_v6 = vld [vmem:[%s723_s20 + $0x10] sm:$0xff]   ;;  %v638_v7 = vld [vmem:[%s723_s20 + $0x58] sm:$0xff]  }
  0x14   : > { %338 = vst.msk [vmem:[#allocation2 + $0x50] sm:$0xff] %vm327_vm0, %v636_v5  ;;  %330 = vst.msk [vmem:[#allocation2 + $0x10] sm:$0xff] %vm327_vm0, %v637_v6  ;;  %v639_v8 = vld [vmem:[%s723_s20 + $0x18] sm:$0xff]   ;;  %v640_v9 = vld [vmem:[%s723_s20 + $0x60] sm:$0xff]  }
  0x15   : > { %339 = vst.msk [vmem:[#allocation2 + $0x58] sm:$0xff] %vm327_vm0, %v638_v7  ;;  %331 = vst.msk [vmem:[#allocation2 + $0x18] sm:$0xff] %vm327_vm0, %v639_v8  ;;  %v641_v12 = vld [vmem:[%s723_s20 + $0x20] sm:$0xff]   ;;  %v642_v15 = vld [vmem:[%s723_s20 + $0x68] sm:$0xff]  }
  0x16   : > { %340 = vst.msk [vmem:[#allocation2 + $0x60] sm:$0xff] %vm327_vm0, %v640_v9  ;;  %332 = vst.msk [vmem:[#allocation2 + $0x20] sm:$0xff] %vm327_vm0, %v641_v12  ;;  %v643_v16 = vld [vmem:[%s723_s20 + $0x28] sm:$0xff]   ;;  %v644_v18 = vld [vmem:[%s723_s20 + $0x70] sm:$0xff]  }
  0x17   : > { %341 = vst.msk [vmem:[#allocation2 + $0x68] sm:$0xff] %vm327_vm0, %v642_v15  ;;  %333 = vst.msk [vmem:[#allocation2 + $0x28] sm:$0xff] %vm327_vm0, %v643_v16  ;;  %v645_v19 = vld [vmem:[%s723_s20 + $0x30] sm:$0xff]   ;;  %v646_v22 = vld [vmem:[%s723_s20 + $0x78] sm:$0xff]  }
  0x18   : > { %342 = vst.msk [vmem:[#allocation2 + $0x70] sm:$0xff] %vm327_vm0, %v644_v18  ;;  %334 = vst.msk [vmem:[#allocation2 + $0x30] sm:$0xff] %vm327_vm0, %v645_v19  ;;  %v647_v23 = vld [vmem:[%s723_s20 + $0x38] sm:$0xff]  }
  0x19   : > { %v353_v10 = vld [vmem:[#allocation2 + $0x40] sm:$0xff]  ;;  %v354_v14 = vld [vmem:[#allocation2 + $0x48] sm:$0xff]  ;;  %343 = vst.msk [vmem:[#allocation2 + $0x78] sm:$0xff] %vm327_vm0, %v646_v22  ;;  %335 = vst.msk [vmem:[#allocation2 + $0x38] sm:$0xff] %vm327_vm0, %v647_v23 }
  0x1a   : > { %600 = vmatprep.subr.msk.bf16.mxu0 %vm327_vm0, %v353_v10  ;;  %v345_v11 = vld [vmem:[#allocation2] sm:$0xff]  ;;  %v346_v17 = vld [vmem:[#allocation2 + $0x8] sm:$0xff] }
  0x1b   : > { %v365_v13 = vsel %vm327_vm0, %v345_v11, 0  ;;  %v368_v20 = vsel %vm327_vm0, %v346_v17, 0  ;;  %v355_v21 = vld [vmem:[#allocation2 + $0x50] sm:$0xff] }
  0x1c   : > { %583 = vmatpush3.bf16.xpose.msra.mxu0 %v365_v13  ;;  %v347_v24 = vld [vmem:[#allocation2 + $0x10] sm:$0xff]  ;;  %v356_v26 = vld [vmem:[#allocation2 + $0x58] sm:$0xff] }
  0x1d   : > { %601 = vmatprep.subr.msk.bf16.mxu0 %vm327_vm0, %v354_v14  ;;  %v371_v25 = vsel %vm327_vm0, %v347_v24, 0  ;;  %v348_v27 = vld [vmem:[#allocation2 + $0x18] sm:$0xff]  ;;  %v357_v29 = vld [vmem:[#allocation2 + $0x60] sm:$0xff] }
  0x1e   : > { %v374_v28 = vsel %vm327_vm0, %v348_v27, 0  ;;  %v349_v30 = vld [vmem:[#allocation2 + $0x20] sm:$0xff]  ;;  %v358_v32 = vld [vmem:[#allocation2 + $0x68] sm:$0xff] }
  0x1f   : > { %v377_v31 = vsel %vm327_vm0, %v349_v30, 0  ;;  %v350_v33 = vld [vmem:[#allocation2 + $0x28] sm:$0xff]  ;;  %v359_v35 = vld [vmem:[#allocation2 + $0x70] sm:$0xff] }
  0x20   : > { %v380_v34 = vsel %vm327_vm0, %v350_v33, 0  ;;  %v351_v36 = vld [vmem:[#allocation2 + $0x30] sm:$0xff]  ;;  %v360_v38 = vld [vmem:[#allocation2 + $0x78] sm:$0xff] }
  0x21   : > { %v383_v37 = vsel %vm327_vm0, %v351_v36, 0  ;;  %v352_v39 = vld [vmem:[#allocation2 + $0x38] sm:$0xff] }
  0x22   : > { %v386_v40 = vsel %vm327_vm0, %v352_v39, 0 }
  0x24   : > { %585 = vmatpush3.bf16.xpose.msra.mxu0 %v368_v20 }
  0x25   : > { %602 = vmatprep.subr.msk.bf16.mxu0 %vm327_vm0, %v355_v21 }
  0x2c   : > { %587 = vmatpush3.bf16.xpose.msra.mxu0 %v371_v25 }
  0x2d   : > { %603 = vmatprep.subr.msk.bf16.mxu0 %vm327_vm0, %v356_v26 }
  0x34   : > { %589 = vmatpush3.bf16.xpose.msra.mxu0 %v374_v28 }
  0x35   : > { %604 = vmatprep.subr.msk.bf16.mxu0 %vm327_vm0, %v357_v29 }
  0x3c   : > { %591 = vmatpush3.bf16.xpose.msra.mxu0 %v377_v31 }
  0x3d   : > { %605 = vmatprep.subr.msk.bf16.mxu0 %vm327_vm0, %v358_v32 }
  0x44   : > { %593 = vmatpush3.bf16.xpose.msra.mxu0 %v380_v34 }
  0x45   : > { %606 = vmatprep.subr.msk.bf16.mxu0 %vm327_vm0, %v359_v35 }
  0x4c   : > { %595 = vmatpush3.bf16.xpose.msra.mxu0 %v383_v37 }
  0x4d   : > { %607 = vmatprep.subr.msk.bf16.mxu0 %vm327_vm0, %v360_v38 }
  0x54   : > { %597 = vmatpush3.bf16.xpose.msra.mxu0 %v386_v40 }
  0x5b   : > { %599 = vmatmul.mubr.msk.bf16.vlgmr.msra.gmra.mrb[0].mxu0 %vm327_vm0, %v713_v0 }
 0x12e   : > { %v446_v41 = vpop.f32.mrb[0].mxu0 }
 0x12f   : > { %v448_v42 = vpop.f32.mrb[1].mxu0 }
 0x130   : > { %v576_v43 = vpack.c.bf16 %v448_v42, %v446_v41  ;;  %v450_v44 = vpop.f32.mrb[2].mxu0 }
 0x131   : > { %v451_v45 = vpop.f32.mrb[3].mxu0 }
 0x132   : > { %577 = vst.sshfl [vmem:[%s192_s24] sm:$0x33 pattern:$0x76325410] %v576_v43 }
 0x133 PF: > { %s13_s14 = sadd.s32 1, %s670_s14   ;;  %s792_s12 = smov %s666_s13 }
 0x134   : > { %p10_p5 = scmp.ge.s32.totalorder %s13_s14, 4   ;;  %s793_s13 = smov %s795_s2 }
 0x136   :  { %12 = sbr.rel (!%p10_p5) target bundleno = 2 (0x2), region = 63 }

// kernel: _lambda_.4
= control target key start
LH: loop header
LB: loop body
LE: loop exit
PB: predicated region body
PF: predicated region fallthrough
CT: control target
= control target key end

     0   :  { %s7895_s15 = smov 0   ;;  %s7897_s16 = smov 0   ;;  %s11042_s0 = inlined_call_operand.vmem [shape: bf16[2,18,18,8], index: 0, kind: input, shape index: {}]   ;;  %s11043_s1 = inlined_call_operand.vmem [shape: bf16[2,18,18,4], index: 1, kind: input, shape index: {}]   ;;  %s11044_s2 = inlined_call_operand.vmem [shape: bf16[8,108], index: 2, kind: input, shape index: {}]   ;;  %s11045_s3 = inlined_call_operand.vmem [shape: f32[8,3], index: 3, kind: input, shape index: {}]   ;;  %s11046_s4 = inlined_call_operand.vmem [shape: bf16[2,8,256], index: 4, kind: output, shape index: {}]  }
   0x1   :  { %s7899_s17 = smov 0  }
   0x2 LB: > { %s26_s18 = sadd.s32 1, %s7844_s16  ;;  %p6748_p0 = scmp.ge.s32.totalorder %s7848_s17, 1  ;;  %s7848_s17 = sphi %s7899_s17, %s14_s17   ;;  %s7844_s16 = sphi %s7897_s16, %s11052_s16   ;;  %s7840_s15 = sphi %s7895_s15, %s11051_s15  }
   0x3   : > { %p28_p1 = scmp.ge.s32.totalorder %s26_s18, 2  ;;  %p186_p2 = scmp.lt.s32.totalorder %s7848_s17, 3 }
   0x5   : > { %s11054_s18 = smov (%p28_p1, %s26_s18), 0  ;;  %p187_p3 = pnand %p6748_p0, %p186_p2 }
   0x6   : > { %p221_p4 = scmp.lt.s32.totalorder (!%p187_p3), %s7840_s15, 1  ;;  %vm439_vm0 = vsmask.f32 (!%p187_p3), 3328  ;;  %vm440_vm1 = vsmask.f32 (!%p187_p3), 7440  ;;  %s7850_s23 = smov (!%p187_p3), 8  }
   0x7   : > { %190 = sbr.rel (%p187_p3) target bundleno = 962 (0x3c2), region = 36  ;;  %vm7933_vm2 = vmor (!%p187_p3), %vm439_vm0, %vm440_vm1  ;;  %vm1035_vm3 = vcmask (!%p187_p3), 1042432   ;;  %vm1036_vm4 = vcmask (!%p187_p3), 1046532   ;;  %s7851_s24 = smov (!%p187_p3), 16   ;;  %vm374_vm6 = vcmask (!%p187_p3), 64512   ;;  %vm922_vm7 = vcmask (!%p187_p3), 130112  }
   0x8   : > { %vm8054_vm5 = vmor (!%p187_p3), %vm1035_vm3, %vm1036_vm4  ;;  %s7852_s25 = smov (!%p187_p3), 24   ;;  %s7853_s26 = smov (!%p187_p3), 32   ;;  %vm1246_vm8 = vcmask (!%p187_p3), 195712   ;;  %vm1427_vm9 = vcmask (!%p187_p3), 261312   ;;  %vm1972_vm10 = vcmask (!%p187_p3), 326912   ;;  %vm2293_vm11 = vcmask (!%p187_p3), 392512  }
   0x9   : > { %s7854_s27 = smov (!%p187_p3), 40   ;;  %s7855_s28 = smov (!%p187_p3), 48   ;;  %vm2474_vm12 = vcmask (!%p187_p3), 458112   ;;  %vm3019_vm13 = vcmask (!%p187_p3), 523712   ;;  %vm3340_vm14 = vcmask (!%p187_p3), 589312   ;;  %vm3519_vm15 = vcmask (!%p187_p3), 622144  }
   0xa   : > { %s7856_s6 = smov (!%p187_p3), 56   ;;  %s7857_s7 = smov (!%p187_p3), 64   ;;  %vm4064_vm0 = vcmask (!%p187_p3), 654944   ;;  %vm4385_vm1 = vcmask (!%p187_p3), 687744   ;;  %vm4564_vm3 = vcmask (!%p187_p3), 720544   ;;  %vm5109_vm4 = vcmask (!%p187_p3), 753344  }
   0xb   : > { %s7858_s8 = smov (!%p187_p3), 72   ;;  %s7859_s9 = smov (!%p187_p3), 76   ;;  %v10955_v26 = vld [vmem:[%s11044_s2] sm:$0xf] (!%p187_p3) }
   0xc   : > { %s7860_s10 = smov (!%p187_p3), 80   ;;  %s7861_s11 = smov (!%p187_p3), 84  }
   0xd   : > { %s7862_s12 = smov (!%p187_p3), 88   ;;  %s7863_s13 = smov (!%p187_p3), 92  }
   0xe   : > { %s11056_s15 = smov (!%p221_p4, %s7840_s15), 1  ;;  %s7864_s14 = smov 96  }
   0xf   : > { %s7681_s19 = smul.u32 216, %s11056_s15  ;;  %s7866_s20 = smov 104  }
  0x11   : > { %s7921_s22 = scalar_lea.vmem %s11042_s0, %s7681_s19  ;;  %s8609_s5 = scalar_lea.vmem %s11043_s1, %s7681_s19 }
  0x12   : > { %v397_v0 = vld [vmem:[%s7921_s22 + $0x18] sm:$0xf]  ;;  %v398_v1 = vld [vmem:[%s7921_s22 + $0x1c] sm:$0xf]  ;;  %v399_v2 = vld [vmem:[%s7921_s22 + $0x20] sm:$0x1] }
  0x13   : > { %v491_v3 = vshrl.u32 %v397_v0, 16  ;;  %v494_v4 = vshll.u32 %v397_v0, 16  ;;  %v500_v5 = vshll.u32 %v398_v1, 16  ;;  %v504_v6 = vshrl.u32 %v398_v1, 16  ;;  %v391_v7 = vld [vmem:[%s7921_s22] sm:$0xf] }
  0x14   : > { %v510_v8 = vshll.u32 %v399_v2, 16  ;;  %v392_v9 = vld [vmem:[%s7921_s22 + $0x4] sm:$0xf]  ;;  %v393_v10 = vld [vmem:[%s7921_s22 + $0x8] sm:$0x1]  ;;  %v443_v11 = vshrl.u32 %v391_v7, 16 }
  0x15   : > { %v493_v12 = vrot.slane %v491_v3, 4  ;;  %v496_v13 = vrot.slane %v494_v4, 5  ;;  %v502_v14 = vrot.slane %v500_v5, 5  ;;  %v506_v15 = vrot.slane %v504_v6, 4  ;;  %v400_v16 = vld [vmem:[%s7921_s22 + $0x24] sm:$0xf] }
  0x16   : > { %v512_v17 = vrot.slane %v510_v8, 5  ;;  %v445_v18 = vrot.slane %v443_v11, 4  ;;  %v446_v19 = vshll.u32 %v391_v7, 16  ;;  %v452_v20 = vshll.u32 %v392_v9, 16  ;;  %v401_v25 = vld [vmem:[%s7921_s22 + $0x28] sm:$0xf] }
  0x17   : > { %v497_v21 = vor.u32 %v496_v13, %v493_v12  ;;  %v507_v22 = vor.u32 %v506_v15, %v502_v14  ;;  %v456_v23 = vshrl.u32 %v392_v9, 16  ;;  %v462_v24 = vshll.u32 %v393_v10, 16  ;;  %v402_v35 = vld [vmem:[%s7921_s22 + $0x2c] sm:$0x1]  ;;  %v395_v45 = vld [vmem:[%s7921_s22 + $0x10] sm:$0xf] }
  0x18   : > { %v448_v27 = vrot.slane %v446_v19, 5  ;;  %v454_v28 = vrot.slane %v452_v20, 5  ;;  %v515_v29 = vshrl.u32 %v400_v16, 16  ;;  %v518_v30 = vshll.u32 %v400_v16, 16  ;;  %v394_v40 = vld [vmem:[%s7921_s22 + $0xc] sm:$0xf] }
  0x19   : > { %v498_v31 = vrot.slane %v497_v21, 4  ;;  %v508_v32 = vrot.slane %v507_v22, 4  ;;  %v458_v33 = vrot.slane %v456_v23, 4  ;;  %v464_v34 = vrot.slane %v462_v24, 5  ;;  %v396_v53 = vld [vmem:[%s7921_s22 + $0x14] sm:$0x1] }
  0x1a   : > { %v449_v36 = vor.u32 %v448_v27, %v445_v18  ;;  %v517_v37 = vrot.slane %v515_v29, 4  ;;  %v520_v38 = vrot.slane %v518_v30, 5  ;;  %v524_v39 = vshll.u32 %v401_v25, 16  ;;  %v406_v59 = vld [vmem:[%s7921_s22 + $0x3c] sm:$0xf]  ;;  %s7865_s19 = smov 100  }
  0x1b   : > { %v503_v41 = vsel %vm7933_vm2, %v498_v31, %v502_v14  ;;  %v513_v42 = vsel %vm7933_vm2, %v508_v32, %v512_v17  ;;  %v459_v43 = vor.u32 %v458_v33, %v454_v28  ;;  %v528_v44 = vshrl.u32 %v401_v25, 16  ;;  %v407_v0 = vld [vmem:[%s7921_s22 + $0x40] sm:$0xf]  ;;  %v408_v8 = vld [vmem:[%s7921_s22 + $0x44] sm:$0x1] }
  0x1c   : > { %v6771_v46 = vcombine.low %v503_v41, %v513_v42  ;;  %v450_v47 = vrot.slane %v449_v36, 4  ;;  %v521_v48 = vor.u32 %v520_v38, %v517_v37  ;;  %v526_v49 = vrot.slane %v524_v39, 5  ;;  %v403_v14 = vld [vmem:[%s7921_s22 + $0x30] sm:$0xf]  ;;  %v404_v19 = vld [vmem:[%s7921_s22 + $0x34] sm:$0xf] }
  0x1d   : > { %v460_v50 = vrot.slane %v459_v43, 4  ;;  %v530_v51 = vrot.slane %v528_v44, 4  ;;  %v534_v52 = vshll.u32 %v402_v35, 16  ;;  %v467_v54 = vshrl.u32 %v394_v40, 16  ;;  %v405_v31 = vld [vmem:[%s7921_s22 + $0x38] sm:$0x1] }
  0x1e   : > { %878 = vrot.lane.b32.xlu1 %v6771_v46, %s7850_s23  ;;  %v455_v55 = vsel %vm7933_vm2, %v450_v47, %v454_v28  ;;  %v522_v56 = vrot.slane %v521_v48, 4  ;;  %v470_v57 = vshll.u32 %v394_v40, 16  ;;  %v476_v58 = vshll.u32 %v395_v45, 16  ;;  %v413_v46 = vld [vmem:[%s7921_s22 + $0x58] sm:$0xf] }
  0x1f   : > { %v465_v60 = vsel %vm7933_vm2, %v460_v50, %v464_v34  ;;  %v531_v61 = vor.u32 %v530_v51, %v526_v49  ;;  %v536_v62 = vrot.slane %v534_v52, 5  ;;  %v469_v63 = vrot.slane %v467_v54, 4  ;;  %v412_v34 = vld [vmem:[%s7921_s22 + $0x54] sm:$0xf]  ;;  %v414_v52 = vld [vmem:[%s7921_s22 + $0x5c] sm:$0x1] }
  0x20   : > { %v6769_v1 = vcombine.low %v455_v55, %v465_v60  ;;  %v527_v2 = vsel %vm7933_vm2, %v522_v56, %v526_v49  ;;  %v472_v3 = vrot.slane %v470_v57, 5  ;;  %v478_v4 = vrot.slane %v476_v58, 5 }
  0x21   : > { %v532_v5 = vrot.slane %v531_v61, 4  ;;  %v480_v6 = vshrl.u32 %v395_v45, 16  ;;  %v486_v7 = vshll.u32 %v396_v53, 16  ;;  %v563_v9 = vshrl.u32 %v406_v59, 16  ;;  %v409_v53 = vld [vmem:[%s7921_s22 + $0x48] sm:$0xf] }
  0x22   : > { %874 = vrot.lane.b32.xlu0 %v6769_v1, %s7850_s23  ;;  %v473_v10 = vor.u32 %v472_v3, %v469_v63  ;;  %v566_v11 = vshll.u32 %v406_v59, 16  ;;  %v572_v12 = vshll.u32 %v407_v0, 16  ;;  %v576_v13 = vshrl.u32 %v407_v0, 16  ;;  %v410_v1 = vld [vmem:[%s7921_s22 + $0x4c] sm:$0xf] }
  0x23   : > { %v537_v15 = vsel %vm7933_vm2, %v532_v5, %v536_v62  ;;  %v482_v16 = vrot.slane %v480_v6, 4  ;;  %v488_v17 = vrot.slane %v486_v7, 5  ;;  %v565_v18 = vrot.slane %v563_v9, 4  ;;  %v411_v6 = vld [vmem:[%s7921_s22 + $0x50] sm:$0x1] }
  0x24   : > { %v6772_v20 = vcombine.low %v527_v2, %v537_v15  ;;  %v474_v21 = vrot.slane %v473_v10, 4  ;;  %v568_v22 = vrot.slane %v566_v11, 5  ;;  %v574_v23 = vrot.slane %v572_v12, 5  ;;  %v418_v12 = vld [vmem:[%s7921_s22 + $0x6c] sm:$0xf] }
  0x25   : > { %v483_v24 = vor.u32 %v482_v16, %v478_v4  ;;  %v578_v25 = vrot.slane %v576_v13, 4  ;;  %v582_v27 = vshll.u32 %v408_v8, 16  ;;  %v539_v28 = vshrl.u32 %v403_v14, 16 }
  0x26   : > { %880 = vrot.lane.b32.xlu1 %v6772_v20, %s7850_s23  ;;  %v479_v29 = vsel %vm7933_vm2, %v474_v21, %v478_v4  ;;  %v569_v30 = vor.u32 %v568_v22, %v565_v18  ;;  %v542_v32 = vshll.u32 %v403_v14, 16  ;;  %v548_v33 = vshll.u32 %v404_v19, 16  ;;  %v419_v21 = vld [vmem:[%s7921_s22 + $0x70] sm:$0xf] }
  0x27   : > { %v484_v35 = vrot.slane %v483_v24, 4  ;;  %v579_v36 = vor.u32 %v578_v25, %v574_v23  ;;  %v584_v37 = vrot.slane %v582_v27, 5  ;;  %v541_v38 = vrot.slane %v539_v28, 4  ;;  %v420_v25 = vld [vmem:[%s7921_s22 + $0x74] sm:$0x1] }
  0x28   : > { %v570_v39 = vrot.slane %v569_v30, 4  ;;  %v544_v40 = vrot.slane %v542_v32, 5  ;;  %v550_v41 = vrot.slane %v548_v33, 5  ;;  %v552_v42 = vshrl.u32 %v404_v19, 16 }
  0x29   : > { %v489_v43 = vsel %vm7933_vm2, %v484_v35, %v488_v17  ;;  %v580_v44 = vrot.slane %v579_v36, 4  ;;  %v558_v45 = vshll.u32 %v405_v31, 16  ;;  %v611_v47 = vshrl.u32 %v412_v34, 16  ;;  %v415_v36 = vld [vmem:[%s7921_s22 + $0x60] sm:$0xf] }
  0x2a   : > { %v6770_v48 = vcombine.low %v479_v29, %v489_v43  ;;  %v575_v49 = vsel %vm7933_vm2, %v570_v39, %v574_v23  ;;  %v545_v50 = vor.u32 %v544_v40, %v541_v38  ;;  %v554_v51 = vrot.slane %v552_v42, 4 }
  0x2b   : > { %v585_v54 = vsel %vm7933_vm2, %v580_v44, %v584_v37  ;;  %v560_v55 = vrot.slane %v558_v45, 5  ;;  %v613_v56 = vrot.slane %v611_v47, 4  ;;  %v614_v57 = vshll.u32 %v412_v34, 16 }
  0x2c   : > { %876 = vrot.lane.b32.xlu0 %v6770_v48, %s7850_s23  ;;  %v6774_v58 = vcombine.low %v575_v49, %v585_v54  ;;  %v546_v59 = vrot.slane %v545_v50, 4  ;;  %v555_v60 = vor.u32 %v554_v51, %v550_v41  ;;  %v620_v61 = vshll.u32 %v413_v46, 16  ;;  %v417_v49 = vld [vmem:[%s7921_s22 + $0x68] sm:$0x1] }
  0x2d   : > { %v616_v62 = vrot.slane %v614_v57, 5  ;;  %v624_v63 = vshrl.u32 %v413_v46, 16  ;;  %v630_v0 = vshll.u32 %v414_v52, 16  ;;  %v587_v2 = vshrl.u32 %v409_v53, 16 }
  0x2e   : > { %884 = vrot.lane.b32.xlu1 %v6774_v58, %s7850_s23  ;;  %v551_v3 = vsel %vm7933_vm2, %v546_v59, %v550_v41  ;;  %v556_v4 = vrot.slane %v555_v60, 4  ;;  %v622_v5 = vrot.slane %v620_v61, 5  ;;  %v590_v7 = vshll.u32 %v409_v53, 16  ;;  %v416_v41 = vld [vmem:[%s7921_s22 + $0x64] sm:$0xf] }
  0x2f   : > { %v617_v8 = vor.u32 %v616_v62, %v613_v56  ;;  %v626_v9 = vrot.slane %v624_v63, 4  ;;  %v632_v10 = vrot.slane %v630_v0, 5  ;;  %v589_v11 = vrot.slane %v587_v2, 4  ;;  %v425_v60 = vld [vmem:[%s7921_s22 + $0x88] sm:$0xf] }
  0x30   : > { %v561_v13 = vsel %vm7933_vm2, %v556_v4, %v560_v55  ;;  %v592_v14 = vrot.slane %v590_v7, 5  ;;  %v596_v15 = vshll.u32 %v410_v1, 16  ;;  %v600_v16 = vshrl.u32 %v410_v1, 16  ;;  %v424_v55 = vld [vmem:[%s7921_s22 + $0x84] sm:$0xf] }
  0x31   : > { %v6773_v17 = vcombine.low %v551_v3, %v561_v13  ;;  %v618_v18 = vrot.slane %v617_v8, 4  ;;  %v627_v19 = vor.u32 %v626_v9, %v622_v5  ;;  %v606_v20 = vshll.u32 %v411_v6, 16  ;;  %v426_v8 = vld [vmem:[%s7921_s22 + $0x8c] sm:$0x1] }
  0x32   : > { %v593_v22 = vor.u32 %v592_v14, %v589_v11  ;;  %v598_v23 = vrot.slane %v596_v15, 5  ;;  %v602_v24 = vrot.slane %v600_v16, 4  ;;  %v659_v27 = vshrl.u32 %v418_v12, 16  ;;  %v422_v15 = vld [vmem:[%s7921_s22 + $0x7c] sm:$0xf] }
  0x33   : > { %882 = vrot.lane.b32.xlu0 %v6773_v17, %s7850_s23  ;;  %v623_v28 = vsel %vm7933_vm2, %v618_v18, %v622_v5  ;;  %v628_v29 = vrot.slane %v627_v19, 4  ;;  %v608_v30 = vrot.slane %v606_v20, 5  ;;  %v662_v31 = vshll.u32 %v418_v12, 16 }
  0x34   : > { %v594_v32 = vrot.slane %v593_v22, 4  ;;  %v603_v33 = vor.u32 %v602_v24, %v598_v23  ;;  %v661_v34 = vrot.slane %v659_v27, 4  ;;  %v668_v35 = vshll.u32 %v419_v21, 16  ;;  %v423_v27 = vld [vmem:[%s7921_s22 + $0x80] sm:$0x1] }
  0x35   : > { %v633_v37 = vsel %vm7933_vm2, %v628_v29, %v632_v10  ;;  %v664_v38 = vrot.slane %v662_v31, 5  ;;  %v672_v39 = vshrl.u32 %v419_v21, 16  ;;  %v678_v40 = vshll.u32 %v420_v25, 16  ;;  %v421_v10 = vld [vmem:[%s7921_s22 + $0x78] sm:$0xf] }
  0x36   : > { %v6776_v42 = vcombine.low %v623_v28, %v633_v37  ;;  %v599_v43 = vsel %vm7933_vm2, %v594_v32, %v598_v23  ;;  %v604_v44 = vrot.slane %v603_v33, 4  ;;  %v670_v45 = vrot.slane %v668_v35, 5  ;;  %v431_v35 = vld [vmem:[%s7921_s22 + $0xa0] sm:$0xf] }
  0x37   : > { %v665_v46 = vor.u32 %v664_v38, %v661_v34  ;;  %v674_v47 = vrot.slane %v672_v39, 4  ;;  %v680_v48 = vrot.slane %v678_v40, 5  ;;  %v635_v50 = vshrl.u32 %v415_v36, 16 }
  0x38   : > { %888 = vrot.lane.b32.xlu1 %v6776_v42, %s7850_s23  ;;  %v609_v51 = vsel %vm7933_vm2, %v604_v44, %v608_v30  ;;  %v638_v52 = vshll.u32 %v415_v36, 16  ;;  %v644_v53 = vshll.u32 %v416_v41, 16  ;;  %v648_v54 = vshrl.u32 %v416_v41, 16  ;;  %v430_v30 = vld [vmem:[%s7921_s22 + $0x9c] sm:$0xf] }
  0x39   : > { %v6775_v56 = vcombine.low %v599_v43, %v609_v51  ;;  %v666_v57 = vrot.slane %v665_v46, 4  ;;  %v675_v58 = vor.u32 %v674_v47, %v670_v45  ;;  %v637_v59 = vrot.slane %v635_v50, 4  ;;  %v432_v43 = vld [vmem:[%s7921_s22 + $0xa4] sm:$0x1] }
  0x3a   : > { %v640_v61 = vrot.slane %v638_v52, 5  ;;  %v646_v62 = vrot.slane %v644_v53, 5  ;;  %v650_v63 = vrot.slane %v648_v54, 4  ;;  %v654_v0 = vshll.u32 %v417_v49, 16  ;;  %v427_v49 = vld [vmem:[%s7921_s22 + $0x90] sm:$0xf] }
  0x3b   : > { %886 = vrot.lane.b32.xlu0 %v6775_v56, %s7850_s23  ;;  %v671_v1 = vsel %vm7933_vm2, %v666_v57, %v670_v45  ;;  %v676_v2 = vrot.slane %v675_v58, 4  ;;  %v707_v3 = vshrl.u32 %v424_v55, 16  ;;  %v710_v4 = vshll.u32 %v424_v55, 16  ;;  %v428_v58 = vld [vmem:[%s7921_s22 + $0x94] sm:$0xf] }
  0x3c   : > { %v641_v5 = vor.u32 %v640_v61, %v637_v59  ;;  %v651_v6 = vor.u32 %v650_v63, %v646_v62  ;;  %v656_v7 = vrot.slane %v654_v0, 5  ;;  %v716_v9 = vshll.u32 %v425_v60, 16 }
  0x3d   : > { %v681_v11 = vsel %vm7933_vm2, %v676_v2, %v680_v48  ;;  %v709_v12 = vrot.slane %v707_v3, 4  ;;  %v712_v13 = vrot.slane %v710_v4, 5  ;;  %v720_v14 = vshrl.u32 %v425_v60, 16  ;;  %v429_v2 = vld [vmem:[%s7921_s22 + $0x98] sm:$0x1] }
  0x3e   : > { %v6778_v16 = vcombine.low %v671_v1, %v681_v11  ;;  %v642_v17 = vrot.slane %v641_v5, 4  ;;  %v652_v18 = vrot.slane %v651_v6, 4  ;;  %v718_v19 = vrot.slane %v716_v9, 5 }
  0x3f   : > { %v713_v20 = vor.u32 %v712_v13, %v709_v12  ;;  %v722_v21 = vrot.slane %v720_v14, 4  ;;  %v726_v22 = vshll.u32 %v426_v8, 16  ;;  %v683_v23 = vshrl.u32 %v421_v10, 16  ;;  %v436_v8 = vld [vmem:[%s7921_s22 + $0xb4] sm:$0xf] }
  0x40   : > { %892 = vrot.lane.b32.xlu1 %v6778_v16, %s7850_s23  ;;  %v647_v24 = vsel %vm7933_vm2, %v642_v17, %v646_v62  ;;  %v657_v25 = vsel %vm7933_vm2, %v652_v18, %v656_v7  ;;  %v686_v28 = vshll.u32 %v421_v10, 16  ;;  %v692_v29 = vshll.u32 %v422_v15, 16  ;;  %v437_v13 = vld [vmem:[%s7921_s22 + $0xb8] sm:$0xf] }
  0x41   : > { %v6777_v31 = vcombine.low %v647_v24, %v657_v25  ;;  %v714_v32 = vrot.slane %v713_v20, 4  ;;  %v723_v33 = vor.u32 %v722_v21, %v718_v19  ;;  %v728_v34 = vrot.slane %v726_v22, 5  ;;  %v438_v21 = vld [vmem:[%s7921_s22 + $0xbc] sm:$0x1] }
  0x42   : > { %v685_v36 = vrot.slane %v683_v23, 4  ;;  %v688_v37 = vrot.slane %v686_v28, 5  ;;  %v694_v38 = vrot.slane %v692_v29, 5  ;;  %v696_v39 = vshrl.u32 %v422_v15, 16  ;;  %v433_v28 = vld [vmem:[%s7921_s22 + $0xa8] sm:$0xf] }
  0x43   : > { %890 = vrot.lane.b32.xlu0 %v6777_v31, %s7850_s23  ;;  %v719_v40 = vsel %vm7933_vm2, %v714_v32, %v718_v19  ;;  %v724_v41 = vrot.slane %v723_v33, 4  ;;  %v702_v42 = vshll.u32 %v423_v27, 16  ;;  %v755_v44 = vshrl.u32 %v430_v30, 16  ;;  %v434_v33 = vld [vmem:[%s7921_s22 + $0xac] sm:$0xf] }
  0x44   : > { %v689_v45 = vor.u32 %v688_v37, %v685_v36  ;;  %v698_v46 = vrot.slane %v696_v39, 4  ;;  %v758_v47 = vshll.u32 %v430_v30, 16  ;;  %v764_v48 = vshll.u32 %v431_v35, 16  ;;  %v942_v39 = vld [vmem:[%s7921_s22 + $0xc] sm:$0xe] }
  0x45   : > { %v729_v50 = vsel %vm7933_vm2, %v724_v41, %v728_v34  ;;  %v704_v51 = vrot.slane %v702_v42, 5  ;;  %v757_v52 = vrot.slane %v755_v44, 4  ;;  %v768_v53 = vshrl.u32 %v431_v35, 16  ;;  %v943_v44 = vld [vmem:[%s7921_s22 + $0x10] sm:$0xf] }
  0x46   : > { %v6780_v54 = vcombine.low %v719_v40, %v729_v50  ;;  %v690_v55 = vrot.slane %v689_v45, 4  ;;  %v699_v56 = vor.u32 %v698_v46, %v694_v38  ;;  %v760_v57 = vrot.slane %v758_v47, 5 }
  0x47   : > { %v766_v59 = vrot.slane %v764_v48, 5  ;;  %v770_v60 = vrot.slane %v768_v53, 4  ;;  %v774_v61 = vshll.u32 %v432_v43, 16  ;;  %v731_v62 = vshrl.u32 %v427_v49, 16 }
  0x48   : > { %896 = vrot.lane.b32.xlu1 %v6780_v54, %s7850_s23  ;;  %v695_v63 = vsel %vm7933_vm2, %v690_v55, %v694_v38  ;;  %v700_v0 = vrot.slane %v699_v56, 4  ;;  %v761_v1 = vor.u32 %v760_v57, %v757_v52  ;;  %v734_v3 = vshll.u32 %v427_v49, 16  ;;  %v435_v38 = vld [vmem:[%s7921_s22 + $0xb0] sm:$0x1]  ;;  %v944_v49 = vld [vmem:[%s7921_s22 + $0x14] sm:$0x1] }
  0x49   : > { %v771_v4 = vor.u32 %v770_v60, %v766_v59  ;;  %v776_v5 = vrot.slane %v774_v61, 5  ;;  %v733_v6 = vrot.slane %v731_v62, 4  ;;  %v740_v7 = vshll.u32 %v428_v58, 16  ;;  %v939_v54 = vld [vmem:[%s7921_s22] sm:$0xe] }
  0x4a   : > { %v705_v9 = vsel %vm7933_vm2, %v700_v0, %v704_v51  ;;  %v762_v10 = vrot.slane %v761_v1, 4  ;;  %v736_v11 = vrot.slane %v734_v3, 5  ;;  %v744_v12 = vshrl.u32 %v428_v58, 16  ;;  %v941_v60 = vld [vmem:[%s7921_s22 + $0x8] sm:$0x1] }
  0x4b   : > { %v6779_v14 = vcombine.low %v695_v63, %v705_v9  ;;  %v772_v15 = vrot.slane %v771_v4, 4  ;;  %v742_v16 = vrot.slane %v740_v7, 5  ;;  %v750_v17 = vshll.u32 %v429_v2, 16  ;;  %v948_v2 = vld [vmem:[%s7921_s22 + $0x24] sm:$0xe] }
  0x4c   : > { %v767_v18 = vsel %vm7933_vm2, %v762_v10, %v766_v59  ;;  %v737_v19 = vor.u32 %v736_v11, %v733_v6  ;;  %v746_v20 = vrot.slane %v744_v12, 4  ;;  %v803_v22 = vshrl.u32 %v436_v8, 16  ;;  %v940_v59 = vld [vmem:[%s7921_s22 + $0x4] sm:$0xf]  ;;  %v949_v7 = vld [vmem:[%s7921_s22 + $0x28] sm:$0xf] }
  0x4d   : > { %894 = vrot.lane.b32.xlu0 %v6779_v14, %s7850_s23  ;;  %v777_v23 = vsel %vm7933_vm2, %v772_v15, %v776_v5  ;;  %v752_v24 = vrot.slane %v750_v17, 5  ;;  %v806_v25 = vshll.u32 %v436_v8, 16  ;;  %v812_v27 = vshll.u32 %v437_v13, 16  ;;  %v950_v8 = vld [vmem:[%s7921_s22 + $0x2c] sm:$0x1] }
  0x4e   : > { %v6782_v29 = vcombine.low %v767_v18, %v777_v23  ;;  %v738_v30 = vrot.slane %v737_v19, 4  ;;  %v747_v31 = vor.u32 %v746_v20, %v742_v16  ;;  %v805_v32 = vrot.slane %v803_v22, 4  ;;  %v946_v18 = vld [vmem:[%s7921_s22 + $0x1c] sm:$0xf]  ;;  %v947_v19 = vld [vmem:[%s7921_s22 + $0x20] sm:$0x1] }
  0x4f   : > { %v808_v34 = vrot.slane %v806_v25, 5  ;;  %v814_v35 = vrot.slane %v812_v27, 5  ;;  %v816_v36 = vshrl.u32 %v437_v13, 16  ;;  %v822_v37 = vshll.u32 %v438_v21, 16  ;;  %v945_v13 = vld [vmem:[%s7921_s22 + $0x18] sm:$0xe] }
  0x50   : > { %900 = vrot.lane.b32.xlu1 %v6782_v29, %s7850_s23  ;;  %v743_v40 = vsel %vm7933_vm2, %v738_v30, %v742_v16  ;;  %v748_v41 = vrot.slane %v747_v31, 4  ;;  %v779_v42 = vshrl.u32 %v433_v28, 16  ;;  %v782_v43 = vshll.u32 %v433_v28, 16  ;;  %v955_v25 = vld [vmem:[%s7921_s22 + $0x40] sm:$0xf] }
  0x51   : > { %v809_v45 = vor.u32 %v808_v34, %v805_v32  ;;  %v818_v46 = vrot.slane %v816_v36, 4  ;;  %v824_v47 = vrot.slane %v822_v37, 5  ;;  %v788_v48 = vshll.u32 %v434_v33, 16  ;;  %v956_v31 = vld [vmem:[%s7921_s22 + $0x44] sm:$0x1] }
  0x52   : > { %v753_v50 = vsel %vm7933_vm2, %v748_v41, %v752_v24  ;;  %v781_v51 = vrot.slane %v779_v42, 4  ;;  %v784_v52 = vrot.slane %v782_v43, 5  ;;  %v792_v53 = vshrl.u32 %v434_v33, 16  ;;  %v954_v24 = vld [vmem:[%s7921_s22 + $0x3c] sm:$0xe] }
  0x53   : > { %v6781_v55 = vcombine.low %v743_v40, %v753_v50  ;;  %v810_v56 = vrot.slane %v809_v45, 4  ;;  %v819_v57 = vor.u32 %v818_v46, %v814_v35  ;;  %v790_v58 = vrot.slane %v788_v48, 5  ;;  %v951_v32 = vld [vmem:[%s7921_s22 + $0x30] sm:$0xe]  ;;  %v952_v33 = vld [vmem:[%s7921_s22 + $0x34] sm:$0xf] }
  0x54   : > { %v785_v61 = vor.u32 %v784_v52, %v781_v51  ;;  %v794_v62 = vrot.slane %v792_v53, 4  ;;  %v798_v63 = vshll.u32 %v435_v38, 16  ;;  %v6786_v1 = vrot.slane %v942_v39, 9  ;;  %v953_v42 = vld [vmem:[%s7921_s22 + $0x38] sm:$0x1] }
  0x55   : > { %898 = vrot.lane.b32.xlu0 %v6781_v55, %s7850_s23  ;;  %v815_v3 = vsel %vm7933_vm2, %v810_v56, %v814_v35  ;;  %v820_v4 = vrot.slane %v819_v57, 4  ;;  %v1047_v5 = vrot.slane %v943_v44, 5  ;;  %v1050_v6 = vrot.slane %v944_v49, 5  ;;  %v961_v48 = vld [vmem:[%s7921_s22 + $0x58] sm:$0xf] }
  0x56   : > { %v786_v9 = vrot.slane %v785_v61, 4  ;;  %v795_v10 = vor.u32 %v794_v62, %v790_v58  ;;  %v800_v11 = vrot.slane %v798_v63, 5  ;;  %v6785_v12 = vrot.slane %v939_v54, 9  ;;  %v962_v49 = vld [vmem:[%s7921_s22 + $0x5c] sm:$0x1] }
  0x57   : > { %v825_v14 = vsel %vm7933_vm2, %v820_v4, %v824_v47  ;;  %v1048_v15 = vsel %vm8054_vm5, %v6786_v1, %v1047_v5  ;;  %v1049_v16 = vrot.slane %v1047_v5, 4  ;;  %v1040_v17 = vrot.slane %v940_v59, 5  ;;  %v960_v47 = vld [vmem:[%s7921_s22 + $0x54] sm:$0xe]  ;;  %v957_v54 = vld [vmem:[%s7921_s22 + $0x48] sm:$0xe] }
  0x58   : > { %v6784_v20 = vcombine.low %v815_v3, %v825_v14  ;;  %v791_v21 = vsel %vm7933_vm2, %v786_v9, %v790_v58  ;;  %v796_v22 = vrot.slane %v795_v10, 4  ;;  %v1043_v23 = vrot.slane %v941_v60, 5  ;;  %v958_v55 = vld [vmem:[%s7921_s22 + $0x4c] sm:$0xf]  ;;  %v959_v60 = vld [vmem:[%s7921_s22 + $0x50] sm:$0x1] }
  0x59   : > { %v1051_v27 = vsel %vm8054_vm5, %v1049_v16, %v1050_v6  ;;  %v1041_v28 = vsel %vm8054_vm5, %v6785_v12, %v1040_v17  ;;  %v1042_v29 = vrot.slane %v1040_v17, 4  ;;  %v6788_v30 = vrot.slane %v948_v2, 9  ;;  %v966_v2 = vld [vmem:[%s7921_s22 + $0x6c] sm:$0xe]  ;;  %v967_v3 = vld [vmem:[%s7921_s22 + $0x70] sm:$0xf] }
  0x5a   : > { %904 = vrot.lane.b32.xlu1 %v6784_v20, %s7850_s23  ;;  %v801_v34 = vsel %vm7933_vm2, %v796_v22, %v800_v11  ;;  %v6802_v35 = vcombine.low %v1048_v15, %v1051_v27  ;;  %v1061_v36 = vrot.slane %v949_v7, 5  ;;  %v1064_v37 = vrot.slane %v950_v8, 5  ;;  %v968_v8 = vld [vmem:[%s7921_s22 + $0x74] sm:$0x1]  ;;  %v963_v9 = vld [vmem:[%s7921_s22 + $0x60] sm:$0xe] }
  0x5b   : > { %v6783_v38 = vcombine.low %v791_v21, %v801_v34  ;;  %v1044_v39 = vsel %vm8054_vm5, %v1042_v29, %v1043_v23  ;;  %v6787_v40 = vrot.slane %v945_v13, 9  ;;  %v1054_v41 = vrot.slane %v946_v18, 5  ;;  %v964_v10 = vld [vmem:[%s7921_s22 + $0x64] sm:$0xf]  ;;  %v974_v27 = vld [vmem:[%s7921_s22 + $0x8c] sm:$0x1] }
  0x5c   : > { %v6801_v43 = vcombine.low %v1041_v28, %v1044_v39  ;;  %v1062_v44 = vsel %vm8054_vm5, %v6788_v30, %v1061_v36  ;;  %v1063_v45 = vrot.slane %v1061_v36, 4  ;;  %v1057_v46 = vrot.slane %v947_v19, 5  ;;  %v965_v19 = vld [vmem:[%s7921_s22 + $0x68] sm:$0x1] }
  0x5d   : > { %902 = vrot.lane.b32.xlu0 %v6783_v38, %s7850_s23  ;;  %v1055_v50 = vsel %vm8054_vm5, %v6787_v40, %v1054_v41  ;;  %v1056_v51 = vrot.slane %v1054_v41, 4  ;;  %v6790_v52 = vrot.slane %v954_v24, 9  ;;  %v1075_v53 = vrot.slane %v955_v25, 5  ;;  %v972_v24 = vld [vmem:[%s7921_s22 + $0x84] sm:$0xe] }
  0x5e   : > { %1200 = vrot.lane.b32.xlu1 %v6802_v35, %s7851_s24  ;;  %v1065_v56 = vsel %vm8054_vm5, %v1063_v45, %v1064_v37  ;;  %v1078_v57 = vrot.slane %v956_v31, 5  ;;  %v6789_v58 = vrot.slane %v951_v32, 9  ;;  %v1068_v59 = vrot.slane %v952_v33, 5  ;;  %v973_v25 = vld [vmem:[%s7921_s22 + $0x88] sm:$0xf] }
  0x5f   : > { %v6804_v61 = vcombine.low %v1062_v44, %v1065_v56  ;;  %v1058_v62 = vsel %vm8054_vm5, %v1056_v51, %v1057_v46  ;;  %v1076_v63 = vsel %vm8054_vm5, %v6790_v52, %v1075_v53  ;;  %v1077_v1 = vrot.slane %v1075_v53, 4  ;;  %v969_v32 = vld [vmem:[%s7921_s22 + $0x78] sm:$0xe]  ;;  %v970_v33 = vld [vmem:[%s7921_s22 + $0x7c] sm:$0xf] }
  0x60   : > { %v6803_v4 = vcombine.low %v1055_v50, %v1058_v62  ;;  %v1069_v5 = vsel %vm8054_vm5, %v6789_v58, %v1068_v59  ;;  %v1070_v6 = vrot.slane %v1068_v59, 4  ;;  %v1071_v7 = vrot.slane %v953_v42, 5  ;;  %v971_v38 = vld [vmem:[%s7921_s22 + $0x80] sm:$0x1]  ;;  %v975_v50 = vld [vmem:[%s7921_s22 + $0x90] sm:$0xe] }
  0x61   : > { %1198 = vrot.lane.b32.xlu0 %v6801_v43, %s7851_s24  ;;  %v1079_v11 = vsel %vm8054_vm5, %v1077_v1, %v1078_v57  ;;  %v6792_v12 = vrot.slane %v960_v47, 9  ;;  %v1089_v13 = vrot.slane %v961_v48, 5  ;;  %v1092_v14 = vrot.slane %v962_v49, 5  ;;  %v978_v43 = vld [vmem:[%s7921_s22 + $0x9c] sm:$0xe] }
  0x62   : > { %1204 = vrot.lane.b32.xlu1 %v6804_v61, %s7851_s24  ;;  %v6806_v15 = vcombine.low %v1076_v63, %v1079_v11  ;;  %v1072_v16 = vsel %vm8054_vm5, %v1070_v6, %v1071_v7  ;;  %v6791_v17 = vrot.slane %v957_v54, 9  ;;  %v1082_v18 = vrot.slane %v958_v55, 5  ;;  %v979_v44 = vld [vmem:[%s7921_s22 + $0xa0] sm:$0xf]  ;;  %v980_v49 = vld [vmem:[%s7921_s22 + $0xa4] sm:$0x1] }
  0x63   : > { %v6805_v20 = vcombine.low %v1069_v5, %v1072_v16  ;;  %v1090_v21 = vsel %vm8054_vm5, %v6792_v12, %v1089_v13  ;;  %v1091_v22 = vrot.slane %v1089_v13, 4  ;;  %v1085_v23 = vrot.slane %v959_v60, 5  ;;  %v976_v51 = vld [vmem:[%s7921_s22 + $0x94] sm:$0xf]  ;;  %v977_v60 = vld [vmem:[%s7921_s22 + $0x98] sm:$0x1] }
  0x64   : > { %v1083_v28 = vsel %vm8054_vm5, %v6791_v17, %v1082_v18  ;;  %v1084_v29 = vrot.slane %v1082_v18, 4  ;;  %v6794_v30 = vrot.slane %v966_v2, 9  ;;  %v1103_v31 = vrot.slane %v967_v3, 5  ;;  %v984_v2 = vld [vmem:[%s7921_s22 + $0xb4] sm:$0xe] }
  0x65   : > { %1202 = vrot.lane.b32.xlu0 %v6803_v4, %s7851_s24  ;;  %v1093_v34 = vsel %vm8054_vm5, %v1091_v22, %v1092_v14  ;;  %v1106_v35 = vrot.slane %v968_v8, 5  ;;  %v6793_v36 = vrot.slane %v963_v9, 9  ;;  %v1096_v37 = vrot.slane %v964_v10, 5  ;;  %v985_v3 = vld [vmem:[%s7921_s22 + $0xb8] sm:$0xf] }
  0x66   : > { %1208 = vrot.lane.b32.xlu1 %v6806_v15, %s7851_s24  ;;  %v6808_v39 = vcombine.low %v1090_v21, %v1093_v34  ;;  %v1086_v40 = vsel %vm8054_vm5, %v1084_v29, %v1085_v23  ;;  %v1104_v41 = vsel %vm8054_vm5, %v6794_v30, %v1103_v31  ;;  %v1105_v42 = vrot.slane %v1103_v31, 4  ;;  %v986_v4 = vld [vmem:[%s7921_s22 + $0xbc] sm:$0x1]  ;;  %v981_v9 = vld [vmem:[%s7921_s22 + $0xa8] sm:$0xe] }
  0x67   : > { %v6807_v45 = vcombine.low %v1083_v28, %v1086_v40  ;;  %v1097_v46 = vsel %vm8054_vm5, %v6793_v36, %v1096_v37  ;;  %v1098_v47 = vrot.slane %v1096_v37, 4  ;;  %v1099_v48 = vrot.slane %v965_v19, 5  ;;  %v982_v18 = vld [vmem:[%s7921_s22 + $0xac] sm:$0xf]  ;;  %v983_v23 = vld [vmem:[%s7921_s22 + $0xb0] sm:$0x1] }
  0x68   : > { %v1107_v52 = vsel %vm8054_vm5, %v1105_v42, %v1106_v35  ;;  %v6796_v53 = vrot.slane %v972_v24, 9  ;;  %v1117_v54 = vrot.slane %v973_v25, 5  ;;  %v1120_v55 = vrot.slane %v974_v27, 5  ;;  %v6868_v29 = vld [vmem:[%s7921_s22 + $0x18] sm:$0xf] }
  0x69   : > { %1206 = vrot.lane.b32.xlu0 %v6805_v20, %s7851_s24  ;;  %v6810_v56 = vcombine.low %v1104_v41, %v1107_v52  ;;  %v1100_v57 = vsel %vm8054_vm5, %v1098_v47, %v1099_v48  ;;  %v6795_v58 = vrot.slane %v969_v32, 9  ;;  %v1110_v59 = vrot.slane %v970_v33, 5  ;;  %v6869_v34 = vld [vmem:[%s7921_s22 + $0x1c] sm:$0xf]  ;;  %v6870_v35 = vld [vmem:[%s7921_s22 + $0x20] sm:$0x1] }
  0x6a   : > { %1212 = vrot.lane.b32.xlu1 %v6808_v39, %s7851_s24  ;;  %v6809_v61 = vcombine.low %v1097_v46, %v1100_v57  ;;  %v1118_v62 = vsel %vm8054_vm5, %v6796_v53, %v1117_v54  ;;  %v1119_v63 = vrot.slane %v1117_v54, 4  ;;  %v1113_v1 = vrot.slane %v971_v38, 5  ;;  %v6867_v54 = vld [vmem:[%s7921_s22 + $0x14] sm:$0x1] }
  0x6b   : > { %v1111_v5 = vsel %vm8054_vm5, %v6795_v58, %v1110_v59  ;;  %v1112_v6 = vrot.slane %v1110_v59, 4  ;;  %v6798_v7 = vrot.slane %v978_v43, 9  ;;  %v1131_v8 = vrot.slane %v979_v44, 5  ;;  %v6865_v44 = vld [vmem:[%s7921_s22 + $0xc] sm:$0xf] }
  0x6c   : > { %v1121_v10 = vsel %vm8054_vm5, %v1119_v63, %v1120_v55  ;;  %v1134_v11 = vrot.slane %v980_v49, 5  ;;  %v6797_v12 = vrot.slane %v975_v50, 9  ;;  %v1124_v13 = vrot.slane %v976_v51, 5  ;;  %v6866_v49 = vld [vmem:[%s7921_s22 + $0x10] sm:$0xf] }
  0x6d   : > { %1210 = vrot.lane.b32.xlu0 %v6807_v45, %s7851_s24  ;;  %v6812_v14 = vcombine.low %v1118_v62, %v1121_v10  ;;  %v1114_v15 = vsel %vm8054_vm5, %v1112_v6, %v1113_v1  ;;  %v1132_v16 = vsel %vm8054_vm5, %v6798_v7, %v1131_v8  ;;  %v1133_v17 = vrot.slane %v1131_v8, 4  ;;  %v6874_v55 = vld [vmem:[%s7921_s22 + $0x30] sm:$0xf]  ;;  %v6876_v10 = vld [vmem:[%s7921_s22 + $0x38] sm:$0x1] }
  0x6e   : > { %1216 = vrot.lane.b32.xlu1 %v6810_v56, %s7851_s24  ;;  %v6811_v19 = vcombine.low %v1111_v5, %v1114_v15  ;;  %v1125_v20 = vsel %vm8054_vm5, %v6797_v12, %v1124_v13  ;;  %v1126_v21 = vrot.slane %v1124_v13, 4  ;;  %v1127_v22 = vrot.slane %v977_v60, 5  ;;  %v7730_v15 = vld [vmem:[%s7921_s22 + $0x18] sm:$0xff]  }
  0x6f   : > { %v1135_v24 = vsel %vm8054_vm5, %v1133_v17, %v1134_v11  ;;  %v6800_v25 = vrot.slane %v984_v2, 9  ;;  %v1145_v27 = vrot.slane %v985_v3, 5  ;;  %v1148_v28 = vrot.slane %v986_v4, 5  ;;  %v6875_v4 = vld [vmem:[%s7921_s22 + $0x34] sm:$0xf] }
  0x70   : > { %v6814_v30 = vcombine.low %v1132_v16, %v1135_v24  ;;  %v1128_v31 = vsel %vm8054_vm5, %v1126_v21, %v1127_v22  ;;  %v6799_v32 = vrot.slane %v981_v9, 9  ;;  %v1138_v33 = vrot.slane %v982_v18, 5 }
  0x71   : > { %1214 = vrot.lane.b32.xlu0 %v6809_v61, %s7851_s24  ;;  %v6813_v36 = vcombine.low %v1125_v20, %v1128_v31  ;;  %v1146_v37 = vsel %vm8054_vm5, %v6800_v25, %v1145_v27  ;;  %v1147_v38 = vrot.slane %v1145_v27, 4  ;;  %v1141_v39 = vrot.slane %v983_v23, 5  ;;  %v6871_v20 = vld [vmem:[%s7921_s22 + $0x24] sm:$0xf]  ;;  %v6872_v25 = vld [vmem:[%s7921_s22 + $0x28] sm:$0xf] }
  0x72   : > { %1220 = vrot.lane.b32.xlu1 %v6812_v14, %s7851_s24  ;;  %v1139_v40 = vsel %vm8054_vm5, %v6799_v32, %v1138_v33  ;;  %v1140_v41 = vrot.slane %v1138_v33, 4  ;;  %v1517_v42 = vshrl.u32 %v6868_v29, 16  ;;  %v1520_v43 = vshll.u32 %v6868_v29, 16  ;;  %v7731_v31 = vld [vmem:[%s7921_s22 + $0xc] sm:$0xff]  }
  0x73   : > { %v1149_v45 = vsel %vm8054_vm5, %v1147_v38, %v1148_v28  ;;  %v1526_v46 = vshll.u32 %v6869_v34, 16  ;;  %v1530_v47 = vshrl.u32 %v6869_v34, 16  ;;  %v1536_v48 = vshll.u32 %v6870_v35, 16  ;;  %v7732_v32 = vld [vmem:[%s7921_s22 + $0x30] sm:$0xff]  }
  0x74   : > { %v6816_v50 = vcombine.low %v1146_v37, %v1149_v45  ;;  %v1142_v51 = vsel %vm8054_vm5, %v1140_v41, %v1141_v39  ;;  %v1519_v52 = vrot.slane %v1517_v42, 4  ;;  %v1522_v53 = vrot.slane %v1520_v43, 5  ;;  %v6873_v39 = vld [vmem:[%s7921_s22 + $0x2c] sm:$0x1]  ;;  %v6880_v42 = vld [vmem:[%s7921_s22 + $0x48] sm:$0xf] }
  0x75   : > { %1218 = vrot.lane.b32.xlu0 %v6811_v19, %s7851_s24  ;;  %v6815_v56 = vcombine.low %v1139_v40, %v1142_v51  ;;  %v1528_v57 = vrot.slane %v1526_v46, 5  ;;  %v1532_v58 = vrot.slane %v1530_v47, 4  ;;  %v1538_v59 = vrot.slane %v1536_v48, 5  ;;  %v7733_v43 = vld [vmem:[%s7921_s22 + $0x24] sm:$0xff]   ;;  %v6881_v48 = vld [vmem:[%s7921_s22 + $0x4c] sm:$0xf] }
  0x76   : > { %1224 = vrot.lane.b32.xlu1 %v6814_v30, %s7851_s24  ;;  %v1523_v60 = vor.u32 %v1522_v53, %v1519_v52  ;;  %v1493_v61 = vshrl.u32 %v6865_v44, 16  ;;  %v1496_v62 = vshll.u32 %v6865_v44, 16  ;;  %v1502_v63 = vshll.u32 %v6866_v49, 16 }
  0x77   : > { %v1533_v1 = vor.u32 %v1532_v58, %v1528_v57  ;;  %v1506_v2 = vshrl.u32 %v6866_v49, 16  ;;  %v1512_v3 = vshll.u32 %v6867_v54, 16  ;;  %v1565_v5 = vshrl.u32 %v6874_v55, 16  ;;  %v7734_v49 = vld [vmem:[%s7921_s22 + $0x48] sm:$0xff]   ;;  %v6882_v54 = vld [vmem:[%s7921_s22 + $0x50] sm:$0x1] }
  0x78   : > { %v1524_v6 = vrot.slane %v1523_v60, 4  ;;  %v1495_v7 = vrot.slane %v1493_v61, 4  ;;  %v1498_v8 = vrot.slane %v1496_v62, 5  ;;  %v1504_v9 = vrot.slane %v1502_v63, 5 }
  0x79   : > { %1222 = vrot.lane.b32.xlu0 %v6813_v36, %s7851_s24  ;;  %v1534_v11 = vrot.slane %v1533_v1, 4  ;;  %v1508_v12 = vrot.slane %v1506_v2, 4  ;;  %v1514_v13 = vrot.slane %v1512_v3, 5  ;;  %v1567_v14 = vrot.slane %v1565_v5, 4  ;;  %v6878_v1 = vld [vmem:[%s7921_s22 + $0x40] sm:$0xf] }
  0x7a   : > { %1228 = vrot.lane.b32.xlu1 %v6816_v50, %s7851_s24  ;;  %v1529_v16 = vsel %vm7933_vm2, %v1524_v6, %v1528_v57  ;;  %v1499_v17 = vor.u32 %v1498_v8, %v1495_v7  ;;  %v1568_v18 = vshll.u32 %v6874_v55, 16  ;;  %v1574_v19 = vshll.u32 %v6875_v4, 16 }
  0x7b   : > { %v1539_v21 = vsel %vm7933_vm2, %v1534_v11, %v1538_v59  ;;  %v1509_v22 = vor.u32 %v1508_v12, %v1504_v9  ;;  %v1578_v23 = vshrl.u32 %v6875_v4, 16  ;;  %v1584_v24 = vshll.u32 %v6876_v10, 16  ;;  %v6877_v59 = vld [vmem:[%s7921_s22 + $0x3c] sm:$0xf]  ;;  %v7736_v11 = vld [vmem:[%s7921_s22 + $0x60] sm:$0xff]  }
  0x7c   : > { %v8206_v27 = vcombine.low %v1529_v16, %v1539_v21  ;;  %v1500_v28 = vrot.slane %v1499_v17, 4  ;;  %v1570_v29 = vrot.slane %v1568_v18, 5  ;;  %v1576_v30 = vrot.slane %v1574_v19, 5  ;;  %v7735_v10 = vld [vmem:[%s7921_s22 + $0x3c] sm:$0xff]   ;;  %v6879_v18 = vld [vmem:[%s7921_s22 + $0x44] sm:$0x1] }
  0x7d   : > { %1226 = vrot.lane.b32.xlu0 %v6815_v56, %s7851_s24  ;;  %v1510_v33 = vrot.slane %v1509_v22, 4  ;;  %v1580_v34 = vrot.slane %v1578_v23, 4  ;;  %v1586_v35 = vrot.slane %v1584_v24, 5  ;;  %v1541_v36 = vshrl.u32 %v6871_v20, 16  ;;  %v6886_v21 = vld [vmem:[%s7921_s22 + $0x60] sm:$0xf] }
  0x7e   : > { %1381 = vrot.lane.b32.xlu1 %v7730_v15, %s7852_s25  ;;  %v1505_v37 = vsel %vm7933_vm2, %v1500_v28, %v1504_v9  ;;  %v1571_v38 = vor.u32 %v1570_v29, %v1567_v14  ;;  %v1544_v40 = vshll.u32 %v6871_v20, 16  ;;  %v1550_v41 = vshll.u32 %v6872_v25, 16  ;;  %v6887_v28 = vld [vmem:[%s7921_s22 + $0x64] sm:$0xf]  ;;  %v7737_v29 = vld [vmem:[%s7921_s22 + $0x54] sm:$0xff]  }
  0x7f   : > { %v1515_v44 = vsel %vm7933_vm2, %v1510_v33, %v1514_v13  ;;  %v1581_v45 = vor.u32 %v1580_v34, %v1576_v30  ;;  %v1543_v46 = vrot.slane %v1541_v36, 4  ;;  %v1554_v47 = vshrl.u32 %v6872_v25, 16  ;;  %v6888_v34 = vld [vmem:[%s7921_s22 + $0x68] sm:$0x1] }
  0x80   : > { %v8221_v50 = vcombine.low %v1505_v37, %v1515_v44  ;;  %v1572_v51 = vrot.slane %v1571_v38, 4  ;;  %v1546_v52 = vrot.slane %v1544_v40, 5  ;;  %v1552_v53 = vrot.slane %v1550_v41, 5  ;;  %v6883_v40 = vld [vmem:[%s7921_s22 + $0x54] sm:$0xf] }
  0x81   : > { %1379 = vrot.lane.b32.xlu0 %v7731_v31, %s7852_s25  ;;  %v1582_v55 = vrot.slane %v1581_v45, 4  ;;  %v1556_v56 = vrot.slane %v1554_v47, 4  ;;  %v1560_v57 = vshll.u32 %v6873_v39, 16  ;;  %v1613_v58 = vshrl.u32 %v6880_v42, 16 }
  0x82   : > { %1385 = vrot.lane.b32.xlu1 %v7732_v32, %s7852_s25  ;;  %v1577_v60 = vsel %vm7933_vm2, %v1572_v51, %v1576_v30  ;;  %v1547_v61 = vor.u32 %v1546_v52, %v1543_v46  ;;  %v1616_v62 = vshll.u32 %v6880_v42, 16  ;;  %v1622_v63 = vshll.u32 %v6881_v48, 16 }
  0x83   : > { %v1587_v2 = vsel %vm7933_vm2, %v1582_v55, %v1586_v35  ;;  %v1557_v3 = vor.u32 %v1556_v56, %v1552_v53  ;;  %v1562_v4 = vrot.slane %v1560_v57, 5  ;;  %v1615_v5 = vrot.slane %v1613_v58, 4  ;;  %v7738_v35 = vld [vmem:[%s7921_s22 + $0x78] sm:$0xff]  }
  0x84   : > { %v8232_v6 = vcombine.low %v1577_v60, %v1587_v2  ;;  %v1548_v7 = vrot.slane %v1547_v61, 4  ;;  %v1618_v8 = vrot.slane %v1616_v62, 5  ;;  %v1624_v9 = vrot.slane %v1622_v63, 5  ;;  %v6884_v58 = vld [vmem:[%s7921_s22 + $0x58] sm:$0xf]  ;;  %v7740_v60 = vld [vmem:[%s7921_s22 + $0x90] sm:$0xff]  }
  0x85   : > { %1383 = vrot.lane.b32.xlu0 %v7733_v43, %s7852_s25  ;;  %v1558_v12 = vrot.slane %v1557_v3, 4  ;;  %v1626_v13 = vshrl.u32 %v6881_v48, 16  ;;  %v1632_v14 = vshll.u32 %v6882_v54, 16  ;;  %v1589_v15 = vshrl.u32 %v6877_v59, 16  ;;  %v7739_v54 = vld [vmem:[%s7921_s22 + $0x6c] sm:$0xff]  }
  0x86   : > { %1389 = vrot.lane.b32.xlu1 %v7734_v49, %s7852_s25  ;;  %v1553_v16 = vsel %vm7933_vm2, %v1548_v7, %v1552_v53  ;;  %v1619_v17 = vor.u32 %v1618_v8, %v1615_v5  ;;  %v1592_v19 = vshll.u32 %v6877_v59, 16  ;;  %v1598_v20 = vshll.u32 %v6878_v1, 16  ;;  %v6885_v2 = vld [vmem:[%s7921_s22 + $0x5c] sm:$0x1]  ;;  %v6892_v3 = vld [vmem:[%s7921_s22 + $0x78] sm:$0xf] }
  0x87   : > { %v1563_v22 = vsel %vm7933_vm2, %v1558_v12, %v1562_v4  ;;  %v1628_v23 = vrot.slane %v1626_v13, 4  ;;  %v1634_v24 = vrot.slane %v1632_v14, 5  ;;  %v1591_v25 = vrot.slane %v1589_v15, 4  ;;  %v6894_v15 = vld [vmem:[%s7921_s22 + $0x80] sm:$0x1] }
  0x88   : > { %v8246_v30 = vcombine.low %v1553_v16, %v1563_v22  ;;  %v1620_v31 = vrot.slane %v1619_v17, 4  ;;  %v1594_v32 = vrot.slane %v1592_v19, 5  ;;  %v1600_v33 = vrot.slane %v1598_v20, 5  ;;  %v7742_v16 = vld [vmem:[%s7921_s22 + $0xa8] sm:$0xff]  }
  0x89   : > { %1387 = vrot.lane.b32.xlu0 %v7735_v10, %s7852_s25  ;;  %v1629_v36 = vor.u32 %v1628_v23, %v1624_v9  ;;  %v1602_v37 = vshrl.u32 %v6878_v1, 16  ;;  %v1608_v38 = vshll.u32 %v6879_v18, 16  ;;  %v1661_v39 = vshrl.u32 %v6886_v21, 16  ;;  %v7741_v10 = vld [vmem:[%s7921_s22 + $0x84] sm:$0xff]  }
  0x8a   : > { %1393 = vrot.lane.b32.xlu1 %v7736_v11, %s7852_s25  ;;  %v1625_v41 = vsel %vm7933_vm2, %v1620_v31, %v1624_v9  ;;  %v1595_v42 = vor.u32 %v1594_v32, %v1591_v25  ;;  %v1664_v43 = vshll.u32 %v6886_v21, 16  ;;  %v1670_v44 = vshll.u32 %v6887_v28, 16  ;;  %v6893_v9 = vld [vmem:[%s7921_s22 + $0x7c] sm:$0xf]  ;;  %v6889_v21 = vld [vmem:[%s7921_s22 + $0x6c] sm:$0xf] }
  0x8b   : > { %v1630_v45 = vrot.slane %v1629_v36, 4  ;;  %v1604_v46 = vrot.slane %v1602_v37, 4  ;;  %v1610_v47 = vrot.slane %v1608_v38, 5  ;;  %v1663_v48 = vrot.slane %v1661_v39, 4  ;;  %v7743_v38 = vld [vmem:[%s7921_s22 + $0x9c] sm:$0xff]  }
  0x8c   : > { %v1596_v49 = vrot.slane %v1595_v42, 4  ;;  %v1666_v51 = vrot.slane %v1664_v43, 5  ;;  %v1672_v52 = vrot.slane %v1670_v44, 5  ;;  %v1674_v53 = vshrl.u32 %v6887_v28, 16  ;;  %v7744_v39 = vld [vmem:[%s7921_s22 + $0xc0] sm:$0xff]  }
  0x8d   : > { %1391 = vrot.lane.b32.xlu0 %v7737_v29, %s7852_s25  ;;  %v1635_v55 = vsel %vm7933_vm2, %v1630_v45, %v1634_v24  ;;  %v1605_v56 = vor.u32 %v1604_v46, %v1600_v33  ;;  %v1680_v57 = vshll.u32 %v6888_v34, 16  ;;  %v1637_v59 = vshrl.u32 %v6883_v40, 16  ;;  %v6890_v44 = vld [vmem:[%s7921_s22 + $0x70] sm:$0xf] }
  0x8e   : > { %1397 = vrot.lane.b32.xlu1 %v7738_v35, %s7852_s25  ;;  %v8262_v61 = vcombine.low %v1625_v41, %v1635_v55  ;;  %v1601_v62 = vsel %vm7933_vm2, %v1596_v49, %v1600_v33  ;;  %v1667_v63 = vor.u32 %v1666_v51, %v1663_v48  ;;  %v1676_v1 = vrot.slane %v1674_v53, 4  ;;  %v6891_v48 = vld [vmem:[%s7921_s22 + $0x74] sm:$0x1]  ;;  %v7746_v51 = vld [vmem:[%s7921_s22 + $0x18] sm:$0xff]   ;;  %v7748_v53 = vld [vmem:[%s7921_s22 + $0x24] sm:$0xff]  }
  0x8f   : > { %v1606_v4 = vrot.slane %v1605_v56, 4  ;;  %v1682_v5 = vrot.slane %v1680_v57, 5  ;;  %v1639_v7 = vrot.slane %v1637_v59, 4  ;;  %v1640_v8 = vshll.u32 %v6883_v40, 16  ;;  %v7750_v55 = vld [vmem:[%s7921_s22 + $0x3c] sm:$0xff]   ;;  %v7751_v56 = vld [vmem:[%s7921_s22 + $0x30] sm:$0xff]  }
  0x90   : > { %v1668_v11 = vrot.slane %v1667_v63, 4  ;;  %v1677_v12 = vor.u32 %v1676_v1, %v1672_v52  ;;  %v1646_v13 = vshll.u32 %v6884_v58, 16  ;;  %v1650_v14 = vshrl.u32 %v6884_v58, 16  ;;  %v8283_v37 = vpop.permute.xlu1 %878  ;;  %v7752_v57 = vld [vmem:[%s7921_s22 + $0x54] sm:$0xff]   ;;  %v7753_v58 = vld [vmem:[%s7921_s22 + $0x48] sm:$0xff]   ;;  %v7758_v1 = vld [vmem:[%s7921_s22 + $0x9c] sm:$0xff]  }
  0x91   : > { %1395 = vrot.lane.b32.xlu0 %v7739_v54, %s7852_s25  ;;  %v1611_v17 = vsel %vm7933_vm2, %v1606_v4, %v1610_v47  ;;  %v1642_v18 = vrot.slane %v1640_v8, 5  ;;  %v1656_v19 = vshll.u32 %v6885_v2, 16  ;;  %v1709_v20 = vshrl.u32 %v6892_v3, 16  ;;  %v7749_v54 = vld [vmem:[%s7921_s22 + $0xc] sm:$0xff]   ;;  %v7757_v63 = vld [vmem:[%s7921_s22 + $0x78] sm:$0xff]   ;;  %377 = vst.msk [vmem:[#allocation2 + $0x10] sm:$0xff] %vm374_vm6, %v7746_v51 }
  0x92   : > { %1401 = vrot.lane.b32.xlu1 %v7740_v60, %s7852_s25  ;;  %v8277_v22 = vcombine.low %v1601_v62, %v1611_v17  ;;  %v1673_v23 = vsel %vm7933_vm2, %v1668_v11, %v1672_v52  ;;  %v1678_v24 = vrot.slane %v1677_v12, 4  ;;  %v1648_v25 = vrot.slane %v1646_v13, 5  ;;  %v7747_v52 = vld [vmem:[%s7921_s22] sm:$0xff]   ;;  %v7754_v59 = vld [vmem:[%s7921_s22 + $0x6c] sm:$0xff]   ;;  %v7760_v8 = vld [vmem:[%s7921_s22 + $0xb4] sm:$0xff]   ;;  %378 = vst.msk [vmem:[#allocation2 + $0x18] sm:$0xff] %vm374_vm6, %v7748_v53 }
  0x93   : > { %v1643_v28 = vor.u32 %v1642_v18, %v1639_v7  ;;  %v1652_v29 = vrot.slane %v1650_v14, 4  ;;  %v1658_v31 = vrot.slane %v1656_v19, 5  ;;  %v1711_v32 = vrot.slane %v1709_v20, 4  ;;  %v7755_v60 = vld [vmem:[%s7921_s22 + $0x60] sm:$0xff]   ;;  %v7759_v7 = vld [vmem:[%s7921_s22 + $0x90] sm:$0xff]   ;;  %375 = vst.msk [vmem:[#allocation2] sm:$0xff] %vm374_vm6, %v7747_v52 }
  0x94   : > { %v1683_v33 = vsel %vm7933_vm2, %v1678_v24, %v1682_v5  ;;  %v1712_v34 = vshll.u32 %v6892_v3, 16  ;;  %v1718_v35 = vshll.u32 %v6893_v9, 16  ;;  %v1722_v36 = vshrl.u32 %v6893_v9, 16  ;;  %v7756_v62 = vld [vmem:[%s7921_s22 + $0x84] sm:$0xff]   ;;  %v875_v14 = vpop.permute.xlu0 %874  ;;  %376 = vst.msk [vmem:[#allocation2 + $0x8] sm:$0xff] %vm374_vm6, %v7749_v54  ;;  %380 = vst.msk [vmem:[#allocation2 + $0x28] sm:$0xff] %vm374_vm6, %v7750_v55 }
  0x95   : > { %1399 = vrot.lane.b32.xlu0 %v7741_v10, %s7852_s25  ;;  %v8288_v40 = vcombine.low %v1673_v23, %v1683_v33  ;;  %v1644_v41 = vrot.slane %v1643_v28, 4  ;;  %v1653_v42 = vor.u32 %v1652_v29, %v1648_v25  ;;  %v1728_v43 = vshll.u32 %v6894_v15, 16  ;;  %v7761_v9 = vld [vmem:[%s7921_s22 + $0xa8] sm:$0xff]   ;;  %v6898_v15 = vld [vmem:[%s7921_s22 + $0x90] sm:$0xf]  ;;  %379 = vst.msk [vmem:[#allocation2 + $0x20] sm:$0xff] %vm374_vm6, %v7751_v56 }
  0x96   : > { %1405 = vrot.lane.b32.xlu1 %v7742_v16, %s7852_s25  ;;  %v1714_v45 = vrot.slane %v1712_v34, 5  ;;  %v8292_v46 = vrot.slane %v1718_v35, 5  ;;  %v1724_v47 = vrot.slane %v1722_v36, 4  ;;  %v1685_v49 = vshrl.u32 %v6889_v21, 16  ;;  %v7745_v16 = vld [vmem:[%s7921_s22 + $0xb4] sm:$0xff]   ;;  %382 = vst.msk [vmem:[#allocation2 + $0x38] sm:$0xff] %vm374_vm6, %v7752_v57 }
  0x97   : > { %v1649_v2 = vsel %vm7933_vm2, %v1644_v41, %v1648_v25  ;;  %v1654_v3 = vrot.slane %v1653_v42, 4  ;;  %v1730_v4 = vrot.slane %v1728_v43, 5  ;;  %v1688_v5 = vshll.u32 %v6889_v21, 16  ;;  %v6899_v21 = vld [vmem:[%s7921_s22 + $0x94] sm:$0xf]  ;;  %381 = vst.msk [vmem:[#allocation2 + $0x30] sm:$0xff] %vm374_vm6, %v7753_v58 }
  0x98   : > { %v1715_v10 = vor.u32 %v1714_v45, %v1711_v32  ;;  %v1725_v11 = vor.u32 %v1724_v47, %v8292_v46  ;;  %v1687_v12 = vrot.slane %v1685_v49, 4  ;;  %v1694_v13 = vshll.u32 %v6890_v44, 16  ;;  %v6900_v23 = vld [vmem:[%s7921_s22 + $0x98] sm:$0x1]  ;;  %v881_v32 = vpop.permute.xlu1 %880  ;;  %384 = vst.msk [vmem:[#allocation2 + $0x48] sm:$0xff] %vm374_vm6, %v7754_v59  ;;  %383 = vst.msk [vmem:[#allocation2 + $0x40] sm:$0xff] %vm374_vm6, %v7755_v60 }
  0x99   : > { %1403 = vrot.lane.b32.xlu0 %v7743_v38, %s7852_s25  ;;  %v1659_v17 = vsel %vm7933_vm2, %v1654_v3, %v1658_v31  ;;  %v1690_v18 = vrot.slane %v1688_v5, 5  ;;  %v1698_v19 = vshrl.u32 %v6890_v44, 16  ;;  %v1704_v20 = vshll.u32 %v6891_v48, 16  ;;  %386 = vst.msk [vmem:[#allocation2 + $0x58] sm:$0xff] %vm374_vm6, %v7756_v62  ;;  %385 = vst.msk [vmem:[#allocation2 + $0x50] sm:$0xff] %vm374_vm6, %v7757_v63 }
  0x9a   : > { %1409 = vrot.lane.b32.xlu1 %v7744_v39, %s7852_s25  ;;  %v8322_v24 = vcombine.low %v1649_v2, %v1659_v17  ;;  %v1716_v25 = vrot.slane %v1715_v10, 4  ;;  %v1726_v28 = vrot.slane %v1725_v11, 4  ;;  %v8324_v29 = vrot.slane %v1694_v13, 5  ;;  %v6895_v39 = vld [vmem:[%s7921_s22 + $0x84] sm:$0xf]  ;;  %388 = vst.msk [vmem:[#allocation2 + $0x68] sm:$0xff] %vm374_vm6, %v7758_v1 }
  0x9b   : > { %v1691_v33 = vor.u32 %v1690_v18, %v1687_v12  ;;  %v1700_v34 = vrot.slane %v1698_v19, 4  ;;  %v1706_v35 = vrot.slane %v1704_v20, 5  ;;  %v1757_v38 = vshrl.u32 %v6898_v15, 16  ;;  %387 = vst.msk [vmem:[#allocation2 + $0x60] sm:$0xff] %vm374_vm6, %v7759_v7  ;;  %390 = vst.msk [vmem:[#allocation2 + $0x78] sm:$0xff] %vm374_vm6, %v7760_v8 }
  0x9c   : > { %v1721_v31 = vsel %vm7933_vm2, %v1716_v25, %v8292_v46  ;;  %v1731_v36 = vsel %vm7933_vm2, %v1726_v28, %v1730_v4  ;;  %389 = vst.msk [vmem:[#allocation2 + $0x70] sm:$0xff] %vm374_vm6, %v7761_v9  ;;  %v1760_v44 = vshll.u32 %v6898_v15, 16  ;;  %v6896_v45 = vld [vmem:[%s7921_s22 + $0x88] sm:$0xf]  ;;  %v1766_v47 = vshll.u32 %v6899_v21, 16 }
  0x9d   : > { %1407 = vrot.lane.b32.xlu0 %v7745_v16, %s7852_s25  ;;  %v8349_v41 = vcombine.low %v1721_v31, %v1731_v36  ;;  %v1692_v42 = vrot.slane %v1691_v33, 4  ;;  %v1701_v43 = vor.u32 %v1700_v34, %v8324_v29  ;;  %925 = vst.msk [vmem:[#allocation2 + $0x10] sm:$0xff] %vm922_vm7, %v8283_v37  ;;  %923 = vst.msk [vmem:[#allocation2] sm:$0xff] %vm922_vm7, %v875_v14  ;;  %v1759_v46 = vrot.slane %v1757_v38, 4  ;;  %v6897_v51 = vld [vmem:[%s7921_s22 + $0x8c] sm:$0x1] }
  0x9e   : > { %926 = vst.msk [vmem:[#allocation2 + $0x18] sm:$0xff] %vm922_vm7, %v881_v32  ;;  %1926 = vrot.lane.b32.xlu1 %v8206_v27, %s7853_s26  ;;  %v1770_v48 = vshrl.u32 %v6899_v21, 16  ;;  %v1776_v49 = vshll.u32 %v6900_v23, 16  ;;  %v877_v52 = vpop.permute.xlu0 %876  ;;  %v1762_v54 = vrot.slane %v1760_v44, 5  ;;  %v1733_v55 = vshrl.u32 %v6895_v39, 16  ;;  %s7653_s25 = sshll.u32 %s11056_s15, 3 }
  0x9f   : > { %v1697_v37 = vsel %vm7933_vm2, %v1692_v42, %v8324_v29  ;;  %v1702_v53 = vrot.slane %v1701_v43, 4  ;;  %924 = vst.msk [vmem:[#allocation2 + $0x8] sm:$0xff] %vm922_vm7, %v877_v52  ;;  %v6904_v56 = vld [vmem:[%s7921_s22 + $0xa8] sm:$0xf]  ;;  %v1768_v57 = vrot.slane %v1766_v47, 5  ;;  %v1736_v59 = vshll.u32 %v6895_v39, 16 }
  0xa0   : > { %v1772_v58 = vrot.slane %v1770_v48, 4  ;;  %v1778_v27 = vrot.slane %v1776_v49, 5  ;;  %v885_v60 = vpop.permute.xlu1 %884  ;;  %v1763_v63 = vor.u32 %v1762_v54, %v1759_v46  ;;  %v1735_v1 = vrot.slane %v1733_v55, 4  ;;  %v6905_v8 = vld [vmem:[%s7921_s22 + $0xac] sm:$0xf] }
  0xa1   : > { %1924 = vrot.lane.b32.xlu0 %v8221_v50, %s7853_s26  ;;  %v1707_v62 = vsel %vm7933_vm2, %v1702_v53, %v1706_v35  ;;  %v1742_v2 = vshll.u32 %v6896_v45, 16  ;;  %928 = vst.msk [vmem:[#allocation2 + $0x28] sm:$0xff] %vm922_vm7, %v885_v60  ;;  %v1738_v5 = vrot.slane %v1736_v59, 5  ;;  %v1746_v7 = vshrl.u32 %v6896_v45, 16  ;;  %v6906_v15 = vld [vmem:[%s7921_s22 + $0xb0] sm:$0x1] }
  0xa2   : > { %1930 = vrot.lane.b32.xlu1 %v8232_v6, %s7853_s26  ;;  %v8372_v3 = vcombine.low %v1697_v37, %v1707_v62  ;;  %v1773_v4 = vor.u32 %v1772_v58, %v1768_v57  ;;  %v1764_v50 = vrot.slane %v1763_v63, 4  ;;  %v1752_v10 = vshll.u32 %v6897_v51, 16  ;;  %v6901_v20 = vld [vmem:[%s7921_s22 + $0x9c] sm:$0xf]  ;;  %v6903_v31 = vld [vmem:[%s7921_s22 + $0xa4] sm:$0x1] }
  0xa3   : > { %v1744_v9 = vrot.slane %v1742_v2, 5  ;;  %v1805_v11 = vshrl.u32 %v6904_v56, 16  ;;  %v1739_v13 = vor.u32 %v1738_v5, %v1735_v1  ;;  %v1748_v14 = vrot.slane %v1746_v7, 4  ;;  %v6910_v36 = vld [vmem:[%s7921_s22 + $0xc0] sm:$0xf] }
  0xa4   : > { %v1774_v12 = vrot.slane %v1773_v4, 4  ;;  %v1808_v16 = vshll.u32 %v6904_v56, 16  ;;  %v1769_v6 = vsel %vm7933_vm2, %v1764_v50, %v1768_v57  ;;  %v1754_v17 = vrot.slane %v1752_v10, 5  ;;  %v6911_v52 = vld [vmem:[%s7921_s22 + $0xc4] sm:$0xf] }
  0xa5   : > { %1928 = vrot.lane.b32.xlu0 %v8246_v30, %s7853_s26  ;;  %v1807_v18 = vrot.slane %v1805_v11, 4  ;;  %v1814_v19 = vshll.u32 %v6905_v8, 16  ;;  %v883_v21 = vpop.permute.xlu0 %882  ;;  %v1740_v25 = vrot.slane %v1739_v13, 4  ;;  %v1749_v28 = vor.u32 %v1748_v14, %v1744_v9  ;;  %v6902_v30 = vld [vmem:[%s7921_s22 + $0xa0] sm:$0xf] }
  0xa6   : > { %1934 = vrot.lane.b32.xlu1 %v8262_v61, %s7853_s26  ;;  %v1779_v23 = vsel %vm7933_vm2, %v1774_v12, %v1778_v27  ;;  %v1810_v29 = vrot.slane %v1808_v16, 5  ;;  %927 = vst.msk [vmem:[#allocation2 + $0x20] sm:$0xff] %vm922_vm7, %v883_v21  ;;  %v1818_v34 = vshrl.u32 %v6905_v8, 16  ;;  %v1824_v35 = vshll.u32 %v6906_v15, 16  ;;  %v6912_v58 = vld [vmem:[%s7921_s22 + $0xc8] sm:$0x1] }
  0xa7   : > { %v6924_v32 = vcombine.low %v1769_v6, %v1779_v23  ;;  %v1816_v33 = vrot.slane %v1814_v19, 5  ;;  %v1745_v38 = vsel %vm7933_vm2, %v1740_v25, %v1744_v9  ;;  %v1750_v61 = vrot.slane %v1749_v28, 4  ;;  %v6907_v1 = vld [vmem:[%s7921_s22 + $0xb4] sm:$0xf]  ;;  %v6908_v50 = vld [vmem:[%s7921_s22 + $0xb8] sm:$0xf] }
  0xa8   : > { %v1811_v39 = vor.u32 %v1810_v29, %v1807_v18  ;;  %v1781_v42 = vshrl.u32 %v6901_v20, 16  ;;  %v1820_v43 = vrot.slane %v1818_v34, 4  ;;  %v1826_v44 = vrot.slane %v1824_v35, 5  ;;  %v6909_v12 = vld [vmem:[%s7921_s22 + $0xbc] sm:$0x1] }
  0xa9   : > { %1932 = vrot.lane.b32.xlu0 %v8277_v22, %s7853_s26  ;;  %v1784_v45 = vshll.u32 %v6901_v20, 16  ;;  %v1790_v46 = vshll.u32 %v6902_v30, 16  ;;  %v1755_v47 = vsel %vm7933_vm2, %v1750_v61, %v1754_v17  ;;  %v1794_v51 = vshrl.u32 %v6902_v30, 16  ;;  %v6932_v16 = vld [vmem:[%s7921_s22 + $0x18] sm:$0xe] }
  0xaa   : > { %1938 = vrot.lane.b32.xlu1 %v8288_v40, %s7853_s26  ;;  %v1812_v48 = vrot.slane %v1811_v39, 4  ;;  %v1783_v49 = vrot.slane %v1781_v42, 4  ;;  %v889_v37 = vpop.permute.xlu1 %888  ;;  %v6923_v53 = vcombine.low %v1745_v38, %v1755_v47  ;;  %v1821_v54 = vor.u32 %v1820_v43, %v1816_v33  ;;  %v6933_v28 = vld [vmem:[%s7921_s22 + $0x1c] sm:$0xf]  ;;  %v6934_v29 = vld [vmem:[%s7921_s22 + $0x20] sm:$0x1] }
  0xab   : > { %v1786_v22 = vrot.slane %v1784_v45, 5  ;;  %v1792_v55 = vrot.slane %v1790_v46, 5  ;;  %930 = vst.msk [vmem:[#allocation2 + $0x38] sm:$0xff] %vm922_vm7, %v889_v37  ;;  %v1796_v57 = vrot.slane %v1794_v51, 4  ;;  %v1800_v40 = vshll.u32 %v6903_v31, 16 }
  0xac   : > { %v1817_v56 = vsel %vm7933_vm2, %v1812_v48, %v1816_v33  ;;  %v1853_v27 = vshrl.u32 %v6910_v36, 16  ;;  %v1822_v59 = vrot.slane %v1821_v54, 4  ;;  %v1856_v62 = vshll.u32 %v6910_v36, 16  ;;  %v6929_v31 = vld [vmem:[%s7921_s22 + $0xc] sm:$0xe] }
  0xad   : > { %1936 = vrot.lane.b32.xlu0 %v8322_v24, %s7853_s26  ;;  %v1787_v60 = vor.u32 %v1786_v22, %v1783_v49  ;;  %v1862_v63 = vshll.u32 %v6911_v52, 16  ;;  %v887_v2 = vpop.permute.xlu0 %886  ;;  %v1797_v4 = vor.u32 %v1796_v57, %v1792_v55  ;;  %v1802_v5 = vrot.slane %v1800_v40, 5  ;;  %v6930_v36 = vld [vmem:[%s7921_s22 + $0x10] sm:$0xf]  ;;  %v6931_v42 = vld [vmem:[%s7921_s22 + $0x14] sm:$0x1] }
  0xae   : > { %1942 = vrot.lane.b32.xlu1 %v8349_v41, %s7853_s26  ;;  %v1855_v7 = vrot.slane %v1853_v27, 4  ;;  %v1866_v8 = vshrl.u32 %v6911_v52, 16  ;;  %929 = vst.msk [vmem:[#allocation2 + $0x30] sm:$0xff] %vm922_vm7, %v887_v2  ;;  %v1827_v24 = vsel %vm7933_vm2, %v1822_v59, %v1826_v44  ;;  %v1858_v10 = vrot.slane %v1856_v62, 5  ;;  %v6938_v48 = vld [vmem:[%s7921_s22 + $0x30] sm:$0xe] }
  0xaf   : > { %v1788_v9 = vrot.slane %v1787_v60, 4  ;;  %v1864_v11 = vrot.slane %v1862_v63, 5  ;;  %v6926_v13 = vcombine.low %v1817_v56, %v1827_v24  ;;  %v1798_v14 = vrot.slane %v1797_v4, 4  ;;  %v6939_v49 = vld [vmem:[%s7921_s22 + $0x34] sm:$0xf] }
  0xb0   : > { %v1868_v41 = vrot.slane %v1866_v8, 4  ;;  %v1872_v15 = vshll.u32 %v6912_v58, 16  ;;  %v1859_v17 = vor.u32 %v1858_v10, %v1855_v7  ;;  %v1829_v18 = vshrl.u32 %v6907_v1, 16  ;;  %v6935_v22 = vld [vmem:[%s7921_s22 + $0x24] sm:$0xe] }
  0xb1   : > { %1940 = vrot.lane.b32.xlu0 %v8372_v3, %s7853_s26  ;;  %v1793_v6 = vsel %vm7933_vm2, %v1788_v9, %v1792_v55  ;;  %v1832_v19 = vshll.u32 %v6907_v1, 16  ;;  %v1803_v20 = vsel %vm7933_vm2, %v1798_v14, %v1802_v5  ;;  %v1838_v25 = vshll.u32 %v6908_v50, 16  ;;  %v6936_v58 = vld [vmem:[%s7921_s22 + $0x28] sm:$0xf]  ;;  %v6937_v27 = vld [vmem:[%s7921_s22 + $0x2c] sm:$0x1] }
  0xb2   : > { %1946 = vrot.lane.b32.xlu1 %v6924_v32, %s7853_s26  ;;  %v1869_v21 = vor.u32 %v1868_v41, %v1864_v11  ;;  %v1874_v23 = vrot.slane %v1872_v15, 5  ;;  %v893_v3 = vpop.permute.xlu1 %892  ;;  %v6925_v30 = vcombine.low %v1793_v6, %v1803_v20  ;;  %v1860_v33 = vrot.slane %v1859_v17, 4  ;;  %v6944_v7 = vld [vmem:[%s7921_s22 + $0x48] sm:$0xe]  ;;  %v6945_v8 = vld [vmem:[%s7921_s22 + $0x4c] sm:$0xf] }
  0xb3   : > { %v1831_v34 = vrot.slane %v1829_v18, 4  ;;  %v1834_v35 = vrot.slane %v1832_v19, 5  ;;  %932 = vst.msk [vmem:[#allocation2 + $0x48] sm:$0xff] %vm922_vm7, %v893_v3  ;;  %v1840_v38 = vrot.slane %v1838_v25, 5  ;;  %v1842_v61 = vshrl.u32 %v6908_v50, 16 }
  0xb4   : > { %v1870_v32 = vrot.slane %v1869_v21, 4  ;;  %v1848_v39 = vshll.u32 %v6909_v12, 16  ;;  %v1865_v43 = vsel %vm7933_vm2, %v1860_v33, %v1864_v11  ;;  %v6978_v45 = vrot.slane %v6932_v16, 9  ;;  %v6946_v12 = vld [vmem:[%s7921_s22 + $0x50] sm:$0x1] }
  0xb5   : > { %1944 = vrot.lane.b32.xlu0 %v6923_v53, %s7853_s26  ;;  %v1835_v44 = vor.u32 %v1834_v35, %v1831_v34  ;;  %v2094_v46 = vrot.slane %v6933_v28, 5  ;;  %v891_v47 = vpop.permute.xlu0 %890  ;;  %v1844_v52 = vrot.slane %v1842_v61, 4  ;;  %v2097_v54 = vrot.slane %v6934_v29, 5  ;;  %v6940_v53 = vld [vmem:[%s7921_s22 + $0x38] sm:$0x1] }
  0xb6   : > { %1950 = vrot.lane.b32.xlu1 %v6926_v13, %s7853_s26  ;;  %v1875_v51 = vsel %vm7933_vm2, %v1870_v32, %v1874_v23  ;;  %v1850_v37 = vrot.slane %v1848_v39, 5  ;;  %931 = vst.msk [vmem:[#allocation2 + $0x40] sm:$0xff] %vm922_vm7, %v891_v47  ;;  %v6977_v60 = vrot.slane %v6929_v31, 9  ;;  %v2087_v62 = vrot.slane %v6930_v36, 5  ;;  %v6941_v13 = vld [vmem:[%s7921_s22 + $0x3c] sm:$0xe] }
  0xb7   : > { %v6928_v55 = vcombine.low %v1865_v43, %v1875_v51  ;;  %v1836_v56 = vrot.slane %v1835_v44, 4  ;;  %v2095_v57 = vsel %vm8054_vm5, %v6978_v45, %v2094_v46  ;;  %v2096_v40 = vrot.slane %v2094_v46, 4  ;;  %v6942_v6 = vld [vmem:[%s7921_s22 + $0x40] sm:$0xf]  ;;  %v6943_v21 = vld [vmem:[%s7921_s22 + $0x44] sm:$0x1] }
  0xb8   : > { %v1845_v59 = vor.u32 %v1844_v52, %v1840_v38  ;;  %v2090_v63 = vrot.slane %v6931_v42, 5  ;;  %v6980_v4 = vrot.slane %v6938_v48, 9  ;;  %v2108_v5 = vrot.slane %v6939_v49, 5  ;;  %v6950_v23 = vld [vmem:[%s7921_s22 + $0x60] sm:$0xe] }
  0xb9   : > { %1948 = vrot.lane.b32.xlu0 %v6925_v30, %s7853_s26  ;;  %v1841_v1 = vsel %vm7933_vm2, %v1836_v56, %v1840_v38  ;;  %v2098_v2 = vsel %vm8054_vm5, %v2096_v40, %v2097_v54  ;;  %v2088_v9 = vsel %vm8054_vm5, %v6977_v60, %v2087_v62  ;;  %v2089_v10 = vrot.slane %v2087_v62, 4  ;;  %v6951_v30 = vld [vmem:[%s7921_s22 + $0x64] sm:$0xf]  ;;  %v6952_v33 = vld [vmem:[%s7921_s22 + $0x68] sm:$0x1] }
  0xba   : > { %1954 = vrot.lane.b32.xlu1 %v6928_v55, %s7853_s26  ;;  %v1846_v50 = vrot.slane %v1845_v59, 4  ;;  %v6994_v24 = vcombine.low %v2095_v57, %v2098_v2  ;;  %v897_v11 = vpop.permute.xlu1 %896  ;;  %v2109_v14 = vsel %vm8054_vm5, %v6980_v4, %v2108_v5  ;;  %v2110_v41 = vrot.slane %v2108_v5, 4  ;;  %v6947_v32 = vld [vmem:[%s7921_s22 + $0x54] sm:$0xe]  ;;  %v6948_v38 = vld [vmem:[%s7921_s22 + $0x58] sm:$0xf] }
  0xbb   : > { %v2111_v15 = vrot.slane %v6940_v53, 5  ;;  %v6979_v16 = vrot.slane %v6935_v22, 9  ;;  %934 = vst.msk [vmem:[#allocation2 + $0x58] sm:$0xff] %vm922_vm7, %v897_v11  ;;  %v2091_v18 = vsel %vm8054_vm5, %v2089_v10, %v2090_v63  ;;  %v2101_v19 = vrot.slane %v6936_v58, 5  ;;  %v6949_v45 = vld [vmem:[%s7921_s22 + $0x5c] sm:$0x1] }
  0xbc   : > { %v1851_v17 = vsel %vm7933_vm2, %v1846_v50, %v1850_v37  ;;  %v2104_v20 = vrot.slane %v6937_v27, 5  ;;  %v6993_v28 = vcombine.low %v2088_v9, %v2091_v18  ;;  %v6982_v3 = vrot.slane %v6944_v7, 9  ;;  %v6956_v51 = vld [vmem:[%s7921_s22 + $0x78] sm:$0xe]  ;;  %v6957_v52 = vld [vmem:[%s7921_s22 + $0x7c] sm:$0xf] }
  0xbd   : > { %v6927_v25 = vcombine.low %v1841_v1, %v1851_v17  ;;  %v2112_v29 = vsel %vm8054_vm5, %v2110_v41, %v2111_v15  ;;  %v2102_v35 = vsel %vm8054_vm5, %v6979_v16, %v2101_v19  ;;  %v2103_v31 = vrot.slane %v2101_v19, 4  ;;  %v6958_v55 = vld [vmem:[%s7921_s22 + $0x80] sm:$0x1]  ;;  %v6953_v56 = vld [vmem:[%s7921_s22 + $0x6c] sm:$0xe] }
  0xbe   : > { %2247 = vrot.lane.b32.xlu1 %v6994_v24, %s7854_s27  ;;  %v6996_v34 = vcombine.low %v2109_v14, %v2112_v29  ;;  %v2122_v36 = vrot.slane %v6945_v8, 5  ;;  %v2125_v39 = vrot.slane %v6946_v12, 5  ;;  %v6981_v42 = vrot.slane %v6941_v13, 9  ;;  %v6954_v60 = vld [vmem:[%s7921_s22 + $0x70] sm:$0xf] }
  0xbf   : > { %1952 = vrot.lane.b32.xlu0 %v6927_v25, %s7853_s26  ;;  %v895_v61 = vpop.permute.xlu0 %894  ;;  %v2115_v43 = vrot.slane %v6942_v6, 5  ;;  %v2118_v44 = vrot.slane %v6943_v21, 5  ;;  %v2105_v46 = vsel %vm8054_vm5, %v2103_v31, %v2104_v20  ;;  %v6984_v49 = vrot.slane %v6950_v23, 9  ;;  %v6955_v4 = vld [vmem:[%s7921_s22 + $0x74] sm:$0x1] }
  0xc0   : > { %933 = vst.msk [vmem:[#allocation2 + $0x50] sm:$0xff] %vm922_vm7, %v895_v61  ;;  %v2123_v47 = vsel %vm8054_vm5, %v6982_v3, %v2122_v36  ;;  %v2124_v48 = vrot.slane %v2122_v36, 4  ;;  %v6995_v37 = vcombine.low %v2102_v35, %v2105_v46  ;;  %v2136_v22 = vrot.slane %v6951_v30, 5  ;;  %v6962_v5 = vld [vmem:[%s7921_s22 + $0x90] sm:$0xe] }
  0xc1   : > { %v8483_v54 = vsel %vm8054_vm5, %v6981_v42, %v2115_v43  ;;  %v2117_v53 = vrot.slane %v2115_v43, 4  ;;  %v2139_v58 = vrot.slane %v6952_v33, 5  ;;  %v6983_v27 = vrot.slane %v6947_v32, 9  ;;  %v6963_v50 = vld [vmem:[%s7921_s22 + $0x94] sm:$0xf] }
  0xc2   : > { %2251 = vrot.lane.b32.xlu1 %v6996_v34, %s7854_s27  ;;  %v2126_v57 = vsel %vm8054_vm5, %v2124_v48, %v2125_v39  ;;  %v901_v40 = vpop.permute.xlu1 %900  ;;  %v2129_v59 = vrot.slane %v6948_v38, 5  ;;  %v2137_v1 = vsel %vm8054_vm5, %v6984_v49, %v2136_v22  ;;  %v2138_v2 = vrot.slane %v2136_v22, 4  ;;  %v6964_v24 = vld [vmem:[%s7921_s22 + $0x98] sm:$0x1]  ;;  %v6959_v9 = vld [vmem:[%s7921_s22 + $0x84] sm:$0xe] }
  0xc3   : > { %2245 = vrot.lane.b32.xlu0 %v6993_v28, %s7854_s27  ;;  %v6998_v62 = vcombine.low %v2123_v47, %v2126_v57  ;;  %v2119_v63 = vsel %vm8054_vm5, %v2117_v53, %v2118_v44  ;;  %936 = vst.msk [vmem:[#allocation2 + $0x68] sm:$0xff] %vm922_vm7, %v901_v40  ;;  %v2132_v8 = vrot.slane %v6949_v45, 5  ;;  %v6986_v11 = vrot.slane %v6956_v51, 9  ;;  %v6960_v14 = vld [vmem:[%s7921_s22 + $0x88] sm:$0xf] }
  0xc4   : > { %v2131_v7 = vrot.slane %v2129_v59, 4  ;;  %v2140_v10 = vsel %vm8054_vm5, %v2138_v2, %v2139_v58  ;;  %v2150_v12 = vrot.slane %v6957_v52, 5  ;;  %v2153_v13 = vrot.slane %v6958_v55, 5  ;;  %v6961_v17 = vld [vmem:[%s7921_s22 + $0x8c] sm:$0x1] }
  0xc5   : > { %v6997_v41 = vcombine.low %v8483_v54, %v2119_v63  ;;  %v7000_v15 = vcombine.low %v2137_v1, %v2140_v10  ;;  %v6985_v16 = vrot.slane %v6953_v56, 9  ;;  %v2143_v6 = vrot.slane %v6954_v60, 5  ;;  %v6968_v18 = vld [vmem:[%s7921_s22 + $0xa8] sm:$0xe]  ;;  %v6969_v28 = vld [vmem:[%s7921_s22 + $0xac] sm:$0xf] }
  0xc6   : > { %2255 = vrot.lane.b32.xlu1 %v6998_v62, %s7854_s27  ;;  %v2130_v20 = vsel %vm8054_vm5, %v6983_v27, %v2129_v59  ;;  %v2151_v21 = vsel %vm8054_vm5, %v6986_v11, %v2150_v12  ;;  %v2152_v23 = vrot.slane %v2150_v12, 4  ;;  %v2146_v25 = vrot.slane %v6955_v4, 5  ;;  %v6970_v29 = vld [vmem:[%s7921_s22 + $0xb0] sm:$0x1]  ;;  %v8522_v35 = vld [vmem:[%s7921_s22 + $0xa0] sm:$0xf] }
  0xc7   : > { %2249 = vrot.lane.b32.xlu0 %v6995_v37, %s7854_s27  ;;  %v899_v19 = vpop.permute.xlu0 %898  ;;  %v2133_v3 = vsel %vm8054_vm5, %v2131_v7, %v2132_v8  ;;  %v2144_v30 = vsel %vm8054_vm5, %v6985_v16, %v2143_v6  ;;  %v2145_v33 = vrot.slane %v2143_v6, 4  ;;  %v6988_v34 = vrot.slane %v6962_v5, 9  ;;  %v6965_v61 = vld [vmem:[%s7921_s22 + $0x9c] sm:$0xe]  ;;  %v6967_v45 = vld [vmem:[%s7921_s22 + $0xa4] sm:$0x1] }
  0xc8   : > { %935 = vst.msk [vmem:[#allocation2 + $0x60] sm:$0xff] %vm922_vm7, %v899_v19  ;;  %v2154_v31 = vsel %vm8054_vm5, %v2152_v23, %v2153_v13  ;;  %v2164_v36 = vrot.slane %v6963_v50, 5  ;;  %v2167_v32 = vrot.slane %v6964_v24, 5  ;;  %v6987_v38 = vrot.slane %v6959_v9, 9  ;;  %v6974_v46 = vld [vmem:[%s7921_s22 + $0xc0] sm:$0xe] }
  0xc9   : > { %v7002_v39 = vcombine.low %v2151_v21, %v2154_v31  ;;  %v2147_v42 = vsel %vm8054_vm5, %v2145_v33, %v2146_v25  ;;  %v2157_v43 = vrot.slane %v6960_v14, 5  ;;  %v2160_v44 = vrot.slane %v6961_v17, 5  ;;  %v6975_v52 = vld [vmem:[%s7921_s22 + $0xc4] sm:$0xf]  ;;  %v6976_v37 = vld [vmem:[%s7921_s22 + $0xc8] sm:$0x1] }
  0xca   : > { %2259 = vrot.lane.b32.xlu1 %v7000_v15, %s7854_s27  ;;  %v6999_v47 = vcombine.low %v2130_v20, %v2133_v3  ;;  %v2165_v48 = vsel %vm8054_vm5, %v6988_v34, %v2164_v36  ;;  %v2166_v49 = vrot.slane %v2164_v36, 4  ;;  %v6990_v51 = vrot.slane %v6968_v18, 9  ;;  %v6971_v58 = vld [vmem:[%s7921_s22 + $0xb4] sm:$0xe]  ;;  %v6972_v27 = vld [vmem:[%s7921_s22 + $0xb8] sm:$0xf] }
  0xcb   : > { %2253 = vrot.lane.b32.xlu0 %v6997_v41, %s7854_s27  ;;  %v2159_v53 = vrot.slane %v2157_v43, 4  ;;  %v2178_v22 = vrot.slane %v6969_v28, 5  ;;  %v2181_v55 = vrot.slane %v6970_v29, 5  ;;  %v7001_v56 = vcombine.low %v2144_v30, %v2147_v42  ;;  %v6973_v1 = vld [vmem:[%s7921_s22 + $0xbc] sm:$0x1] }
  0xcc   : > { %v905_v54 = vpop.permute.xlu1 %904  ;;  %v2168_v57 = vsel %vm8054_vm5, %v2166_v49, %v2167_v32  ;;  %v2171_v40 = vrot.slane %v8522_v35, 5  ;;  %v2158_v60 = vsel %vm8054_vm5, %v6987_v38, %v2157_v43  ;;  %v6989_v63 = vrot.slane %v6965_v61, 9  ;;  %v7081_v3 = vld [vmem:[%s7921_s22 + $0x78] sm:$0xf]  ;;  %v7082_v35 = vld [vmem:[%s7921_s22 + $0x7c] sm:$0xf] }
  0xcd   : > { %938 = vst.msk [vmem:[#allocation2 + $0x78] sm:$0xff] %vm922_vm7, %v905_v54  ;;  %v7004_v59 = vcombine.low %v2165_v48, %v2168_v57  ;;  %v2180_v62 = vrot.slane %v2178_v22, 4  ;;  %v2161_v4 = vsel %vm8054_vm5, %v2159_v53, %v2160_v44  ;;  %v2179_v5 = vsel %vm8054_vm5, %v6990_v51, %v2178_v22  ;;  %v7083_v31 = vld [vmem:[%s7921_s22 + $0x80] sm:$0x1]  ;;  %v7762_v38 = vld [vmem:[%s7921_s22 + $0x24] sm:$0xff]  }
  0xce   : > { %2263 = vrot.lane.b32.xlu1 %v7002_v39, %s7854_s27  ;;  %v2174_v7 = vrot.slane %v6967_v45, 5  ;;  %v6992_v8 = vrot.slane %v6974_v46, 9  ;;  %v2173_v9 = vrot.slane %v2171_v40, 4  ;;  %v2192_v10 = vrot.slane %v6975_v52, 5  ;;  %v7057_v43 = vld [vmem:[%s7921_s22 + $0x18] sm:$0xf] }
  0xcf   : > { %2257 = vrot.lane.b32.xlu0 %v6999_v47, %s7854_s27  ;;  %v903_v2 = vpop.permute.xlu0 %902  ;;  %v2182_v24 = vsel %vm8054_vm5, %v2180_v62, %v2181_v55  ;;  %v2195_v11 = vrot.slane %v6976_v37, 5  ;;  %v2185_v12 = vrot.slane %v6972_v27, 5  ;;  %v6991_v41 = vrot.slane %v6971_v58, 9  ;;  %v7058_v46 = vld [vmem:[%s7921_s22 + $0x1c] sm:$0xf] }
  0xd0   : > { %937 = vst.msk [vmem:[#allocation2 + $0x70] sm:$0xff] %vm922_vm7, %v903_v2  ;;  %v1201_v50 = vpop.permute.xlu1 %1200  ;;  %v7006_v13 = vcombine.low %v2179_v5, %v2182_v24  ;;  %v2194_v14 = vrot.slane %v2192_v10, 4  ;;  %v7003_v16 = vcombine.low %v2158_v60, %v2161_v4  ;;  %v2193_v6 = vsel %vm8054_vm5, %v6992_v8, %v2192_v10  ;;  %v7059_v47 = vld [vmem:[%s7921_s22 + $0x20] sm:$0x1]  ;;  %v7146_v57 = vld [vmem:[%s7921_s22 + $0x7c] sm:$0xf] }
  0xd1   : > { %1248 = vst.msk [vmem:[#allocation2 + $0x8] sm:$0xff] %vm1246_vm8, %v1201_v50  ;;  %v2187_v17 = vrot.slane %v2185_v12, 4  ;;  %v2188_v18 = vrot.slane %v6973_v1, 5  ;;  %v2172_v20 = vsel %vm8054_vm5, %v6989_v63, %v2171_v40  ;;  %v2175_v21 = vsel %vm8054_vm5, %v2173_v9, %v2174_v7  ;;  %v7763_v60 = vld [vmem:[%s7921_s22 + $0x18] sm:$0xff]   ;;  %v7147_v8 = vld [vmem:[%s7921_s22 + $0x80] sm:$0x1] }
  0xd2   : > { %2267 = vrot.lane.b32.xlu1 %v7004_v59, %s7854_s27  ;;  %v2196_v23 = vsel %vm8054_vm5, %v2194_v14, %v2195_v11  ;;  %v7005_v29 = vcombine.low %v2172_v20, %v2175_v21  ;;  %v2186_v33 = vsel %vm8054_vm5, %v6991_v41, %v2185_v12  ;;  %v2732_v36 = vshrl.u32 %v7081_v3, 16  ;;  %v7145_v59 = vld [vmem:[%s7921_s22 + $0x78] sm:$0xe]  ;;  %v7764_v62 = vld [vmem:[%s7921_s22 + $0x3c] sm:$0xff]   ;;  %v7765_v14 = vld [vmem:[%s7921_s22 + $0x30] sm:$0xff]  }
  0xd3   : > { %2261 = vrot.lane.b32.xlu0 %v7001_v56, %s7854_s27  ;;  %v1199_v15 = vpop.permute.xlu0 %1198  ;;  %v7008_v25 = vcombine.low %v2193_v6, %v2196_v23  ;;  %v2189_v34 = vsel %vm8054_vm5, %v2187_v17, %v2188_v18  ;;  %v2735_v32 = vshll.u32 %v7081_v3, 16  ;;  %v2741_v61 = vshll.u32 %v7082_v35, 16  ;;  %v7122_v24 = vld [vmem:[%s7921_s22 + $0x1c] sm:$0xf]  ;;  %v7766_v41 = vld [vmem:[%s7921_s22 + $0x54] sm:$0xff]  }
  0xd4   : > { %1247 = vst.msk [vmem:[#allocation2] sm:$0xff] %vm1246_vm8, %v1199_v15  ;;  %v1205_v19 = vpop.permute.xlu1 %1204  ;;  %v2745_v39 = vshrl.u32 %v7082_v35, 16  ;;  %v2751_v42 = vshll.u32 %v7083_v31, 16  ;;  %v2734_v44 = vrot.slane %v2732_v36, 4  ;;  %v7007_v49 = vcombine.low %v2186_v33, %v2189_v34  ;;  %v8623_v17 = vld [vmem:[%s7921_s22 + $0x20] sm:$0x1] }
  0xd5   : > { %1250 = vst.msk [vmem:[#allocation2 + $0x18] sm:$0xff] %vm1246_vm8, %v1205_v19  ;;  %v2737_v45 = vrot.slane %v2735_v32, 5  ;;  %v8585_v51 = vrot.slane %v2741_v61, 5  ;;  %v2540_v37 = vshrl.u32 %v7057_v43, 16  ;;  %v2543_v22 = vshll.u32 %v7057_v43, 16  ;;  %v7768_v43 = vld [vmem:[%s7921_s22 + $0x6c] sm:$0xff]  }
  0xd6   : > { %2271 = vrot.lane.b32.xlu1 %v7006_v13, %s7854_s27  ;;  %v2747_v52 = vrot.slane %v2745_v39, 4  ;;  %v2549_v55 = vshll.u32 %v7058_v46, 16  ;;  %v2553_v56 = vshrl.u32 %v7058_v46, 16  ;;  %v2559_v27 = vshll.u32 %v7059_v47, 16  ;;  %v7121_v13 = vld [vmem:[%s7921_s22 + $0x18] sm:$0xe] }
  0xd7   : > { %2265 = vrot.lane.b32.xlu0 %v7003_v16, %s7854_s27  ;;  %v1203_v28 = vpop.permute.xlu0 %1202  ;;  %v2738_v53 = vor.u32 %v2737_v45, %v2734_v44  ;;  %v2542_v58 = vrot.slane %v2540_v37, 4  ;;  %v8595_v63 = vrot.slane %v2751_v42, 5  ;;  %v2545_v1 = vrot.slane %v2543_v22, 5  ;;  %v3562_v34 = vld [vmem:[%s8609_s5 + $0x68] sm:$0x1] }
  0xd8   : > { %1249 = vst.msk [vmem:[#allocation2 + $0x10] sm:$0xff] %vm1246_vm8, %v1203_v28  ;;  %v1209_v30 = vpop.permute.xlu1 %1208  ;;  %v2748_v40 = vor.u32 %v2747_v52, %v8585_v51  ;;  %v8597_v2 = vrot.slane %v2549_v55, 5  ;;  %v2555_v4 = vrot.slane %v2553_v56, 4  ;;  %v3190_v50 = vrot.slane %v7146_v57, 5  ;;  %v3561_v28 = vld [vmem:[%s8609_s5 + $0x64] sm:$0xf] }
  0xd9   : > { %1252 = vst.msk [vmem:[#allocation2 + $0x28] sm:$0xff] %vm1246_vm8, %v1209_v30  ;;  %v8600_v7 = vrot.slane %v2738_v53, 4  ;;  %v2546_v11 = vor.u32 %v2545_v1, %v2542_v58  ;;  %v7177_v12 = vrot.slane %v7145_v59, 9  ;;  %v8619_v16 = vrot.slane %v2559_v27, 5  ;;  %v3536_v31 = vld [vmem:[%s8609_s5] sm:$0xf] }
  0xda   : > { %2275 = vrot.lane.b32.xlu1 %v7008_v25, %s7854_s27  ;;  %v8612_v10 = vrot.slane %v2748_v40, 4  ;;  %v2556_v15 = vor.u32 %v2555_v4, %v8597_v2  ;;  %v3193_v6 = vrot.slane %v7147_v8, 5  ;;  %v3134_v18 = vrot.slane %v7122_v24, 5  ;;  %v3560_v25 = vld [vmem:[%s8609_s5 + $0x60] sm:$0xf]  ;;  %v7767_v42 = vld [vmem:[%s7921_s22 + $0x48] sm:$0xff]  }
  0xdb   : > { %2269 = vrot.lane.b32.xlu0 %v7005_v29, %s7854_s27  ;;  %v1207_v48 = vpop.permute.xlu0 %1206  ;;  %v2744_v20 = vsel %vm7933_vm2, %v8600_v7, %v8585_v51  ;;  %v3192_v21 = vrot.slane %v3190_v50, 4  ;;  %v7169_v23 = vrot.slane %v7121_v13, 9  ;;  %v8637_v30 = vrot.slane %v2546_v11, 4  ;;  %v3537_v39 = vld [vmem:[%s8609_s5 + $0x4] sm:$0xf] }
  0xdc   : > { %1251 = vst.msk [vmem:[#allocation2 + $0x20] sm:$0xff] %vm1246_vm8, %v1207_v48  ;;  %v1213_v54 = vpop.permute.xlu1 %1212  ;;  %v2754_v3 = vsel %vm7933_vm2, %v8612_v10, %v8595_v63  ;;  %v8641_v33 = vsel %vm8054_vm5, %v7177_v12, %v3190_v50  ;;  %v3777_v35 = vshrl.u32 %v3560_v25, 16  ;;  %v8646_v36 = vrot.slane %v2556_v15, 4  ;;  %v3538_v37 = vld [vmem:[%s8609_s5 + $0x8] sm:$0x1]  ;;  %v7769_v11 = vld [vmem:[%s7921_s22 + $0x60] sm:$0xff]  }
  0xdd   : > { %1254 = vst.msk [vmem:[#allocation2 + $0x38] sm:$0xff] %vm1246_vm8, %v1213_v54  ;;  %v3137_v32 = vrot.slane %v8623_v17, 5  ;;  %v3786_v61 = vshll.u32 %v3561_v28, 16  ;;  %v3136_v44 = vrot.slane %v3134_v18, 4  ;;  %v3790_v46 = vshrl.u32 %v3561_v28, 16  ;;  %v7770_v4 = vld [vmem:[%s7921_s22 + $0x84] sm:$0xff]  }
  0xde   : > { %2428 = vrot.lane.b32.xlu1 %v7762_v38, %s7855_s28  ;;  %v3780_v38 = vshll.u32 %v3560_v25, 16  ;;  %v3779_v45 = vrot.slane %v3777_v35, 4  ;;  %v3796_v47 = vshll.u32 %v3562_v34, 16  ;;  %v3585_v54 = vshrl.u32 %v3536_v31, 16  ;;  %v4106_v1 = vld [vmem:[%s8609_s5 + $0x64] sm:$0xf] }
  0xdf   : > { %2273 = vrot.lane.b32.xlu0 %v7007_v49, %s7854_s27  ;;  %v1211_v5 = vpop.permute.xlu0 %1210  ;;  %v8654_v52 = vrot.slane %v3786_v61, 5  ;;  %v3588_v53 = vshll.u32 %v3536_v31, 16  ;;  %v8660_v55 = vsel %vm8054_vm5, %v3192_v21, %v3193_v6  ;;  %v3792_v56 = vrot.slane %v3790_v46, 4  ;;  %v8691_v15 = vld [vmem:[%s8609_s5 + $0x68] sm:$0x1]  ;;  %v7772_v17 = vld [vmem:[%s7921_s22 + $0x9c] sm:$0xff]  }
  0xe0   : > { %1253 = vst.msk [vmem:[#allocation2 + $0x30] sm:$0xff] %vm1246_vm8, %v1211_v5  ;;  %v1217_v9 = vpop.permute.xlu1 %1216  ;;  %v3782_v49 = vrot.slane %v3780_v38, 5  ;;  %v3594_v57 = vshll.u32 %v3537_v39, 16  ;;  %v3598_v40 = vshrl.u32 %v3537_v39, 16  ;;  %v8665_v58 = vsel %vm8054_vm5, %v7169_v23, %v3134_v18  ;;  %v8694_v6 = vld [vmem:[%s8609_s5] sm:$0xe] }
  0xe1   : > { %1256 = vst.msk [vmem:[#allocation2 + $0x48] sm:$0xff] %vm1246_vm8, %v1217_v9  ;;  %v3587_v59 = vrot.slane %v3585_v54, 4  ;;  %v3793_v5 = vor.u32 %v3792_v56, %v8654_v52  ;;  %v3604_v24 = vshll.u32 %v3538_v37, 16  ;;  %v2552_v12 = vsel %vm7933_vm2, %v8637_v30, %v8597_v2  ;;  %v7771_v23 = vld [vmem:[%s7921_s22 + $0x78] sm:$0xff]   ;;  %v8704_v28 = vld [vmem:[%s8609_s5 + $0x4] sm:$0xf] }
  0xe2   : > { %2432 = vrot.lane.b32.xlu1 %v7764_v62, %s7855_s28  ;;  %v3783_v27 = vor.u32 %v3782_v49, %v3779_v45  ;;  %v4105_v62 = vld [vmem:[%s8609_s5 + $0x60] sm:$0xe]  ;;  %v8672_v8 = vrot.slane %v3594_v57, 5  ;;  %v3600_v50 = vrot.slane %v3598_v40, 4  ;;  %v2562_v13 = vsel %vm7933_vm2, %v8646_v36, %v8619_v16  ;;  %v8724_v31 = vld [vmem:[%s8609_s5 + $0x8] sm:$0x1] }
  0xe3   : > { %2426 = vrot.lane.b32.xlu0 %v7763_v60, %s7855_s28  ;;  %v1215_v19 = vpop.permute.xlu0 %1214  ;;  %v3590_v60 = vrot.slane %v3588_v53, 5  ;;  %v7241_v21 = vrot.slane %v4105_v62, 9  ;;  %v4235_v16 = vrot.slane %v4106_v1, 5  ;;  %v7193_v30 = vcombine.low %v8641_v33, %v8660_v55  ;;  %v7338_v36 = vld [vmem:[%s8609_s5 + $0x70] sm:$0xf]  ;;  %v7774_v38 = vld [vmem:[%s7921_s22 + $0xb4] sm:$0xff]  }
  0xe4   : > { %1255 = vst.msk [vmem:[#allocation2 + $0x40] sm:$0xff] %vm1246_vm8, %v1215_v19  ;;  %v1221_v29 = vpop.permute.xlu1 %1220  ;;  %v8698_v18 = vrot.slane %v3783_v27, 4  ;;  %v3601_v25 = vor.u32 %v3600_v50, %v8672_v8  ;;  %v3794_v34 = vrot.slane %v3793_v5, 4  ;;  %v8721_v35 = vrot.slane %v3604_v24, 5  ;;  %v7773_v45 = vld [vmem:[%s7921_s22 + $0x90] sm:$0xff]  }
  0xe5   : > { %1258 = vst.msk [vmem:[#allocation2 + $0x58] sm:$0xff] %vm1246_vm8, %v1221_v29  ;;  %v3591_v19 = vor.u32 %v3590_v60, %v3587_v59  ;;  %v8717_v29 = vcombine.low %v2744_v20, %v2754_v3  ;;  %v8727_v10 = vcombine.low %v2552_v12, %v2562_v13  ;;  %v4238_v7 = vrot.slane %v8691_v15, 5  ;;  %v7337_v3 = vld [vmem:[%s8609_s5 + $0x6c] sm:$0xf]  ;;  %v7315_v56 = vld [vmem:[%s8609_s5 + $0x14] sm:$0x1] }
  0xe6   : > { %2436 = vrot.lane.b32.xlu1 %v7766_v41, %s7855_s28  ;;  %v8688_v41 = vrot.slane %v3796_v47, 5  ;;  %v7233_v20 = vrot.slane %v8694_v6, 9  ;;  %v3789_v61 = vsel %vm7933_vm2, %v8698_v18, %v8654_v52  ;;  %v8747_v46 = vrot.slane %v3601_v25, 4  ;;  %v7339_v47 = vld [vmem:[%s8609_s5 + $0x74] sm:$0x1]  ;;  %v7775_v25 = vld [vmem:[%s7921_s22 + $0xa8] sm:$0xff]  }
  0xe7   : > { %2430 = vrot.lane.b32.xlu0 %v7765_v14, %s7855_s28  ;;  %v1219_v48 = vpop.permute.xlu0 %1218  ;;  %v8686_v14 = vsel %vm8054_vm5, %v3136_v44, %v3137_v32  ;;  %v8741_v39 = vrot.slane %v3591_v19, 4  ;;  %v7313_v44 = vld [vmem:[%s8609_s5 + $0xc] sm:$0xf]  ;;  %v4825_v49 = vshll.u32 %v7337_v3, 16  ;;  %v4831_v37 = vshll.u32 %v7338_v36, 16 }
  0xe8   : > { %1257 = vst.msk [vmem:[#allocation2 + $0x50] sm:$0xff] %vm1246_vm8, %v1219_v48  ;;  %v1225_v22 = vpop.permute.xlu1 %1224  ;;  %v7185_v51 = vcombine.low %v8665_v58, %v8686_v14  ;;  %v4822_v48 = vshrl.u32 %v7337_v3, 16  ;;  %v3799_v52 = vsel %vm7933_vm2, %v3794_v34, %v8688_v41  ;;  %v8756_v54 = vsel %vm8054_vm5, %v7241_v21, %v4235_v16  ;;  %v8765_v1 = vld [vmem:[%s8609_s5 + $0x70] sm:$0xf]  ;;  %v8785_v3 = vld [vmem:[%s8609_s5 + $0x74] sm:$0x1] }
  0xe9   : > { %1260 = vst.msk [vmem:[#allocation2 + $0x68] sm:$0xff] %vm1246_vm8, %v1225_v22  ;;  %v4835_v53 = vshrl.u32 %v7338_v36, 16  ;;  %v7314_v22 = vld [vmem:[%s8609_s5 + $0x10] sm:$0xf]  ;;  %v4630_v57 = vshrl.u32 %v7313_v44, 16  ;;  %v4182_v27 = vrot.slane %v8724_v31, 5  ;;  %v3597_v34 = vsel %vm7933_vm2, %v8741_v39, %v8672_v8 }
  0xea   : > { %2440 = vrot.lane.b32.xlu1 %v7768_v43, %s7855_s28  ;;  %v4179_v43 = vrot.slane %v8704_v28, 5  ;;  %v4824_v59 = vrot.slane %v4822_v48, 4  ;;  %v4827_v60 = vrot.slane %v4825_v49, 5  ;;  %v8762_v62 = vrot.slane %v4831_v37, 5  ;;  %v8801_v39 = vld [vmem:[%s8609_s5 + $0x10] sm:$0xf] }
  0xeb   : > { %2434 = vrot.lane.b32.xlu0 %v7767_v42, %s7855_s28  ;;  %v1223_v9 = vpop.permute.xlu0 %1222  ;;  %v4237_v42 = vrot.slane %v4235_v16, 4  ;;  %v4837_v50 = vrot.slane %v4835_v53, 4  ;;  %v4841_v24 = vshll.u32 %v7339_v47, 16  ;;  %v4639_v12 = vshll.u32 %v7314_v22, 16  ;;  %v8822_v47 = vld [vmem:[%s8609_s5 + $0x14] sm:$0x1] }
  0xec   : > { %1259 = vst.msk [vmem:[#allocation2 + $0x60] sm:$0xff] %vm1246_vm8, %v1223_v9  ;;  %v1229_v2 = vpop.permute.xlu1 %1228  ;;  %v4181_v5 = vrot.slane %v4179_v43, 4  ;;  %v4633_v9 = vshll.u32 %v7313_v44, 16  ;;  %v4643_v13 = vshrl.u32 %v7314_v22, 16  ;;  %v4649_v41 = vshll.u32 %v7315_v56, 16 }
  0xed   : > { %1262 = vst.msk [vmem:[#allocation2 + $0x78] sm:$0xff] %vm1246_vm8, %v1229_v2  ;;  %v7401_v2 = vld [vmem:[%s8609_s5 + $0x6c] sm:$0xe]  ;;  %v4838_v18 = vor.u32 %v4837_v50, %v8762_v62  ;;  %v4632_v19 = vrot.slane %v4630_v57, 4  ;;  %v5280_v16 = vrot.slane %v8765_v1, 5  ;;  %v8776_v28 = vcombine.low %v3789_v61, %v3799_v52 }
  0xee   : > { %2444 = vrot.lane.b32.xlu1 %v7770_v4, %s7855_s28  ;;  %v4635_v21 = vrot.slane %v4633_v9, 5  ;;  %v8782_v31 = vrot.slane %v4639_v12, 5  ;;  %v8796_v8 = vsel %vm8054_vm5, %v4237_v42, %v4238_v7  ;;  %v7433_v61 = vrot.slane %v7401_v2, 9  ;;  %v7084_v44 = vld [vmem:[%s7921_s22 + $0x84] sm:$0xf] }
  0xef   : > { %2438 = vrot.lane.b32.xlu0 %v7769_v11, %s7855_s28  ;;  %v1227_v63 = vpop.permute.xlu0 %1226  ;;  %v4828_v11 = vor.u32 %v4827_v60, %v4824_v59  ;;  %v8814_v15 = vsel %vm8054_vm5, %v4181_v5, %v4182_v27  ;;  %v4843_v7 = vrot.slane %v4841_v24, 5  ;;  %v8816_v42 = vrot.slane %v4649_v41, 5  ;;  %v7060_v57 = vld [vmem:[%s7921_s22 + $0x24] sm:$0xf]  ;;  %v7061_v5 = vld [vmem:[%s7921_s22 + $0x28] sm:$0xf] }
  0xf0   : > { %1261 = vst.msk [vmem:[#allocation2 + $0x70] sm:$0xff] %vm1246_vm8, %v1227_v63  ;;  %v1382_v32 = vpop.permute.xlu1 %1381  ;;  %v4645_v63 = vrot.slane %v4643_v13, 4  ;;  %v4839_v48 = vrot.slane %v4838_v18, 4  ;;  %v4636_v6 = vor.u32 %v4635_v21, %v4632_v19  ;;  %v5282_v49 = vrot.slane %v5280_v16, 4  ;;  %v7062_v2 = vld [vmem:[%s7921_s22 + $0x2c] sm:$0x1] }
  0xf1   : > { %1429 = vst.msk [vmem:[#allocation2 + $0x8] sm:$0xff] %vm1427_vm9, %v1382_v32  ;;  %v3607_v32 = vsel %vm7933_vm2, %v8747_v46, %v8721_v35  ;;  %v8810_v35 = vsel %vm8054_vm5, %v7233_v20, %v4179_v43  ;;  %v8819_v46 = vld [vmem:[%s8609_s5 + $0xc] sm:$0xe]  ;;  %v5283_v20 = vrot.slane %v8785_v3, 5  ;;  %v7085_v43 = vld [vmem:[%s7921_s22 + $0x88] sm:$0xf]  ;;  %v7257_v52 = vcombine.low %v8756_v54, %v8796_v8 }
  0xf2   : > { %2448 = vrot.lane.b32.xlu1 %v7772_v17, %s7855_s28  ;;  %v7776_v17 = vld [vmem:[%s7921_s22 + $0xcc] sm:$0xff]   ;;  %v4646_v53 = vor.u32 %v4645_v63, %v8782_v31  ;;  %v5224_v22 = vrot.slane %v8801_v39, 5  ;;  %v2756_v56 = vshrl.u32 %v7084_v44, 16  ;;  %v8834_v27 = vcombine.low %v3597_v34, %v3607_v32  ;;  %v7149_v3 = vld [vmem:[%s7921_s22 + $0x88] sm:$0xf] }
  0xf3   : > { %2442 = vrot.lane.b32.xlu0 %v7771_v23, %s7855_s28  ;;  %v1380_v40 = vpop.permute.xlu0 %1379  ;;  %v7249_v59 = vcombine.low %v8810_v35, %v8814_v15  ;;  %v8844_v1 = vsel %vm8054_vm5, %v7433_v61, %v5280_v16  ;;  %v7425_v50 = vrot.slane %v8819_v46, 9  ;;  %v2759_v9 = vshll.u32 %v7084_v44, 16  ;;  %v7148_v39 = vld [vmem:[%s7921_s22 + $0x84] sm:$0xe] }
  0xf4   : > { %1428 = vst.msk [vmem:[#allocation2] sm:$0xff] %vm1427_vm9, %v1380_v40  ;;  %v1386_v4 = vpop.permute.xlu1 %1385  ;;  %v2758_v24 = vrot.slane %v2756_v56, 4  ;;  %v8854_v12 = vrot.slane %v4636_v6, 4  ;;  %v5227_v13 = vrot.slane %v8822_v47, 5  ;;  %v2769_v41 = vshrl.u32 %v7085_v43, 16  ;;  %v7778_v44 = vld [vmem:[%s8609_s5 + $0x60] sm:$0xff]  }
  0xf5   : > { %1431 = vst.msk [vmem:[#allocation2 + $0x18] sm:$0xff] %vm1427_vm9, %v1386_v4  ;;  %v7086_v4 = vld [vmem:[%s7921_s22 + $0x8c] sm:$0x1]  ;;  %v8859_v18 = vrot.slane %v4646_v53, 4  ;;  %v2761_v19 = vrot.slane %v2759_v9, 5  ;;  %v2567_v34 = vshll.u32 %v7060_v57, 16 }
  0xf6   : > { %2452 = vrot.lane.b32.xlu1 %v7774_v38, %s7855_s28  ;;  %v8798_v38 = vrot.slane %v4828_v11, 4  ;;  %v2765_v11 = vshll.u32 %v7085_v43, 16  ;;  %v2573_v63 = vshll.u32 %v7061_v5, 16  ;;  %v2775_v32 = vshll.u32 %v7086_v4, 16 }
  0xf7   : > { %2446 = vrot.lane.b32.xlu0 %v7773_v45, %s7855_s28  ;;  %v1384_v23 = vpop.permute.xlu0 %1383  ;;  %v7777_v45 = vld [vmem:[%s7921_s22 + $0xc0] sm:$0xff]   ;;  %v2583_v61 = vshll.u32 %v7062_v2, 16  ;;  %v2569_v47 = vrot.slane %v2567_v34, 5  ;;  %v8882_v43 = vsel %vm8054_vm5, %v5282_v49, %v5283_v20  ;;  %v8896_v49 = vsel %vm8054_vm5, %v7425_v50, %v5224_v22  ;;  %v8919_v50 = vld [vmem:[%s7921_s22 + $0x2c] sm:$0x1] }
  0xf8   : > { %1430 = vst.msk [vmem:[#allocation2 + $0x10] sm:$0xff] %vm1427_vm9, %v1384_v23  ;;  %v1390_v36 = vpop.permute.xlu1 %1389  ;;  %v4834_v60 = vsel %vm7933_vm2, %v8798_v38, %v8762_v62  ;;  %v4844_v62 = vsel %vm7933_vm2, %v4839_v48, %v4843_v7  ;;  %v8861_v21 = vrot.slane %v2765_v11, 5  ;;  %v5226_v23 = vrot.slane %v5224_v22, 4  ;;  %v8876_v48 = vld [vmem:[%s7921_s22 + $0x8c] sm:$0x1] }
  0xf9   : > { %1433 = vst.msk [vmem:[#allocation2 + $0x28] sm:$0xff] %vm1427_vm9, %v1390_v36  ;;  %v2762_v36 = vor.u32 %v2761_v19, %v2758_v24  ;;  %v2577_v38 = vshrl.u32 %v7061_v5, 16  ;;  %v8884_v33 = vrot.slane %v2573_v63, 5  ;;  %v7178_v56 = vrot.slane %v7148_v39, 9  ;;  %v8916_v5 = vld [vmem:[%s7921_s22 + $0x28] sm:$0xf] }
  0xfa   : > { %2456 = vrot.lane.b32.xlu1 %v7776_v17, %s7855_s28  ;;  %v8911_v4 = vrot.slane %v2775_v32, 5  ;;  %v8913_v22 = vrot.slane %v2583_v61, 5  ;;  %v3200_v9 = vrot.slane %v8876_v48, 5  ;;  %v7531_v32 = vld [vmem:[%s8609_s5 + $0x80] sm:$0x1]  ;;  %vm5430_vm6 = vcmask 786144  }
  0xfb   : > { %2450 = vrot.lane.b32.xlu0 %v7775_v25, %s7855_s28  ;;  %v1388_v37 = vpop.permute.xlu0 %1387  ;;  %v2771_v25 = vrot.slane %v2769_v41, 4  ;;  %v2579_v55 = vrot.slane %v2577_v38, 4  ;;  %v8898_v20 = vrot.slane %v2762_v36, 4  ;;  %v3144_v36 = vrot.slane %v8919_v50, 5 }
  0xfc   : > { %1432 = vst.msk [vmem:[#allocation2 + $0x20] sm:$0xff] %vm1427_vm9, %v1388_v37  ;;  %v1394_v40 = vpop.permute.xlu1 %1393  ;;  %v8887_v37 = vld [vmem:[%s7921_s22 + $0x24] sm:$0xe]  ;;  %vm5609_vm7 = vcmask 818944   ;;  %vm6154_vm8 = vcmask 851744  }
  0xfd   : > { %1435 = vst.msk [vmem:[#allocation2 + $0x38] sm:$0xff] %vm1427_vm9, %v1394_v40  ;;  %v2772_v7 = vor.u32 %v2771_v25, %v8861_v21  ;;  %v7779_v40 = vld [vmem:[%s8609_s5] sm:$0xff]   ;;  %v7170_v11 = vrot.slane %v8887_v37, 9  ;;  %v2580_v41 = vor.u32 %v2579_v55, %v8884_v33  ;;  %v2768_v58 = vsel %vm7933_vm2, %v8898_v20, %v8861_v21 }
  0xfe   : > { %2987 = vrot.lane.b32.xlu1 %v8717_v29, %s7856_s6  ;;  %v2564_v29 = vshrl.u32 %v7060_v57, 16  ;;  %v7529_v57 = vld [vmem:[%s8609_s5 + $0x78] sm:$0xf]  ;;  %v5886_v20 = vshll.u32 %v7531_v32, 16 }
  0xff   : > { %2454 = vrot.lane.b32.xlu0 %v7777_v45, %s7855_s28  ;;  %v1392_v17 = vpop.permute.xlu0 %1391  ;;  %v8872_v45 = vcombine.low %v4834_v60, %v4844_v62  ;;  %v4652_v60 = vsel %vm7933_vm2, %v8859_v18, %v8816_v42  ;;  %v8922_v24 = vrot.slane %v2772_v7, 4  ;;  %v7530_v62 = vld [vmem:[%s8609_s5 + $0x7c] sm:$0xf]  ;;  %v7505_v18 = vld [vmem:[%s8609_s5 + $0x18] sm:$0xf]  ;;  %v5870_v34 = vshll.u32 %v7529_v57, 16  ;;  %s239_s28 = scalar_lea.vmem %s11046_s4, %s7653_s25 }
 0x100   : > { %1434 = vst.msk [vmem:[#allocation2 + $0x30] sm:$0xff] %vm1427_vm9, %v1392_v17  ;;  %v1398_v16 = vpop.permute.xlu1 %1397  ;;  %v2566_v46 = vrot.slane %v2564_v29, 4  ;;  %v5867_v17 = vshrl.u32 %v7529_v57, 16  ;;  %v5876_v63 = vshll.u32 %v7530_v62, 16  ;;  %v5880_v38 = vshrl.u32 %v7530_v62, 16 }
 0x101   : > { %1437 = vst.msk [vmem:[#allocation2 + $0x48] sm:$0xff] %vm1427_vm9, %v1398_v16  ;;  %v2778_v21 = vsel %vm7933_vm2, %v8922_v24, %v8911_v4  ;;  %v2581_v39 = vrot.slane %v2580_v41, 4  ;;  %v5678_v55 = vshll.u32 %v7505_v18, 16  ;;  %v8970_v57 = vld [vmem:[%s8609_s5 + $0x7c] sm:$0xf] }
 0x102   : > { %3308 = vrot.lane.b32.xlu1 %v7193_v30, %s7857_s7  ;;  %v3197_v30 = vrot.slane %v7149_v3, 5  ;;  %v2570_v42 = vor.u32 %v2569_v47, %v2566_v46  ;;  %v5869_v25 = vrot.slane %v5867_v17, 4  ;;  %v8960_v7 = vrot.slane %v5876_v63, 5  ;;  %v8992_v62 = vld [vmem:[%s8609_s5 + $0x80] sm:$0x1] }
 0x103   : > { %2971 = vrot.lane.b32.xlu0 %v8727_v10, %s7856_s6  ;;  %v1396_v6 = vpop.permute.xlu0 %1395  ;;  %v4642_v10 = vsel %vm7933_vm2, %v8854_v12, %v8782_v31  ;;  %v8909_v31 = vsel %vm8054_vm5, %v5226_v23, %v5227_v13  ;;  %v7449_v13 = vcombine.low %v8844_v1, %v8882_v43  ;;  %v3141_v23 = vrot.slane %v8916_v5, 5  ;;  %v3563_v17 = vld [vmem:[%s8609_s5 + $0x6c] sm:$0xf] }
 0x104   : > { %1436 = vst.msk [vmem:[#allocation2 + $0x40] sm:$0xff] %vm1427_vm9, %v1396_v6  ;;  %v1402_v53 = vpop.permute.xlu1 %1401  ;;  %v3199_v2 = vrot.slane %v3197_v30, 4  ;;  %v8936_v29 = vcombine.low %v4642_v10, %v4652_v60  ;;  %v7441_v16 = vcombine.low %v8896_v49, %v8909_v31  ;;  %v8946_v14 = vsel %vm8054_vm5, %v7178_v56, %v3197_v30  ;;  %v7507_v6 = vld [vmem:[%s8609_s5 + $0x20] sm:$0x1] }
 0x105   : > { %1439 = vst.msk [vmem:[#allocation2 + $0x58] sm:$0xff] %vm1427_vm9, %v1402_v53  ;;  %v2571_v3 = vrot.slane %v2570_v42, 4  ;;  %v5882_v48 = vrot.slane %v5880_v38, 4  ;;  %v3143_v53 = vrot.slane %v3141_v23, 4  ;;  %v5680_v5 = vrot.slane %v5678_v55, 5 }
 0x106   : > { %3487 = vrot.lane.b32.xlu1 %v7778_v44, %s7858_s8  ;;  %v5872_v44 = vrot.slane %v5870_v34, 5  ;;  %v8965_v47 = vsel %vm8054_vm5, %v3199_v2, %v3200_v9  ;;  %v2586_v54 = vsel %vm7933_vm2, %v2581_v39, %v8913_v22  ;;  %v8989_v9 = vld [vmem:[%s8609_s5 + $0x78] sm:$0xe]  ;;  %v6325_v22 = vrot.slane %v8970_v57, 5  ;;  %v7781_v34 = vld [vmem:[%s8609_s5 + $0xc] sm:$0xff]  }
 0x107   : > { %3292 = vrot.lane.b32.xlu0 %v7185_v51, %s7857_s7  ;;  %v1400_v12 = vpop.permute.xlu0 %1399  ;;  %v7506_v51 = vld [vmem:[%s8609_s5 + $0x1c] sm:$0xf]  ;;  %v5883_v60 = vor.u32 %v5882_v48, %v8960_v7  ;;  %v2576_v42 = vsel %vm7933_vm2, %v2571_v3, %v8884_v33  ;;  %v7194_v33 = vcombine.low %v8946_v14, %v8965_v47  ;;  %v9003_v2 = vld [vmem:[%s8609_s5 + $0x18] sm:$0xe]  ;;  %v6328_v32 = vrot.slane %v8992_v62, 5 }
 0x108   : > { %1438 = vst.msk [vmem:[#allocation2 + $0x50] sm:$0xff] %vm1427_vm9, %v1400_v12  ;;  %v1406_v19 = vpop.permute.xlu1 %1405  ;;  %v5684_v30 = vshll.u32 %v7506_v51, 16  ;;  %v5873_v10 = vor.u32 %v5872_v44, %v5869_v25  ;;  %v5688_v56 = vshrl.u32 %v7506_v51, 16  ;;  %v8995_v12 = vcombine.low %v2768_v58, %v2778_v21  ;;  %v9022_v25 = vld [vmem:[%s8609_s5 + $0x1c] sm:$0xf] }
 0x109   : > { %1441 = vst.msk [vmem:[#allocation2 + $0x68] sm:$0xff] %vm1427_vm9, %v1406_v19  ;;  %v9015_v19 = vsel %vm8054_vm5, %v3143_v53, %v3144_v36  ;;  %v9017_v58 = vrot.slane %v5883_v60, 4  ;;  %v9019_v51 = vrot.slane %v5886_v20, 5  ;;  %v9026_v37 = vcombine.low %v2576_v42, %v2586_v54  ;;  %v3564_v21 = vld [vmem:[%s8609_s5 + $0x70] sm:$0xf] }
 0x10a   : > { %4032 = vrot.lane.b32.xlu1 %v8776_v28, %s7859_s9  ;;  %v5675_v28 = vshrl.u32 %v7505_v18, 16  ;;  %v8978_v50 = vrot.slane %v5684_v30, 5  ;;  %v5690_v8 = vrot.slane %v5688_v56, 4  ;;  %v8999_v41 = vrot.slane %v5873_v10, 4  ;;  %v9039_v38 = vld [vmem:[%s8609_s5 + $0x20] sm:$0x1] }
 0x10b   : > { %3471 = vrot.lane.b32.xlu0 %v7779_v40, %s7858_s8  ;;  %v1404_v61 = vpop.permute.xlu0 %1403  ;;  %v7780_v40 = vld [vmem:[%s8609_s5 + $0x6c] sm:$0xff]   ;;  %v9011_v18 = vsel %vm8054_vm5, %v7170_v11, %v3141_v23  ;;  %v7625_v23 = vrot.slane %v8989_v9, 9  ;;  %v3801_v39 = vshrl.u32 %v3563_v17, 16  ;;  %v6327_v15 = vrot.slane %v6325_v22, 4 }
 0x10c   : > { %1440 = vst.msk [vmem:[#allocation2 + $0x60] sm:$0xff] %vm1427_vm9, %v1404_v61  ;;  %v1410_v46 = vpop.permute.xlu1 %1409  ;;  %v5677_v4 = vrot.slane %v5675_v28, 4  ;;  %v5691_v11 = vor.u32 %v5690_v8, %v8978_v50  ;;  %v7617_v61 = vrot.slane %v9003_v2, 9  ;;  %v7186_v28 = vcombine.low %v9011_v18, %v9015_v19  ;;  %v3539_v48 = vld [vmem:[%s8609_s5 + $0xc] sm:$0xf] }
 0x10d   : > { %1443 = vst.msk [vmem:[#allocation2 + $0x78] sm:$0xff] %vm1427_vm9, %v1410_v46  ;;  %v5879_v35 = vsel %vm7933_vm2, %v8999_v41, %v8960_v7  ;;  %v3565_v46 = vld [vmem:[%s8609_s5 + $0x74] sm:$0x1]  ;;  %v3803_v55 = vrot.slane %v3801_v39, 4  ;;  %v3804_v30 = vshll.u32 %v3563_v17, 16  ;;  %v3810_v53 = vshll.u32 %v3564_v21, 16 }
 0x10e   : > { %4353 = vrot.lane.b32.xlu1 %v7257_v52, %s7860_s10  ;;  %v5694_v52 = vshll.u32 %v7507_v6, 16  ;;  %v5681_v63 = vor.u32 %v5680_v5, %v5677_v4  ;;  %v5889_v6 = vsel %vm7933_vm2, %v9017_v58, %v9019_v51  ;;  %v3540_v10 = vld [vmem:[%s8609_s5 + $0x10] sm:$0xf]  ;;  %v9062_v20 = vrot.slane %v5691_v11, 4  ;;  %v4108_v54 = vld [vmem:[%s8609_s5 + $0x6c] sm:$0xe] }
 0x10f   : > { %4016 = vrot.lane.b32.xlu0 %v8834_v27, %s7859_s9  ;;  %v1408_v24 = vpop.permute.xlu0 %1407  ;;  %v6272_v56 = vrot.slane %v9039_v38, 5  ;;  %v3814_v57 = vshrl.u32 %v3564_v21, 16  ;;  %v3806_v4 = vrot.slane %v3804_v30, 5  ;;  %v9067_v5 = vrot.slane %v3810_v53, 5  ;;  %v4109_v51 = vld [vmem:[%s8609_s5 + $0x70] sm:$0xf] }
 0x110   : > { %1442 = vst.msk [vmem:[#allocation2 + $0x70] sm:$0xff] %vm1427_vm9, %v1408_v24  ;;  %v1927_v27 = vpop.permute.xlu1 %1926  ;;  %v9035_v36 = vrot.slane %v5694_v52, 5  ;;  %v9060_v7 = vrot.slane %v5681_v63, 4  ;;  %v3820_v24 = vshll.u32 %v3565_v46, 16  ;;  %v3609_v42 = vshrl.u32 %v3539_v48, 16  ;;  %v7782_v30 = vld [vmem:[%s8609_s5 + $0x78] sm:$0xff]  }
 0x111   : > { %1974 = vst.msk [vmem:[#allocation2 + $0x8] sm:$0xff] %vm1972_vm10, %v1927_v27  ;;  %v3816_v52 = vrot.slane %v3814_v57, 4  ;;  %v3612_v9 = vshll.u32 %v3539_v48, 16  ;;  %v3618_v62 = vshll.u32 %v3540_v10, 16  ;;  %v9074_v27 = vsel %vm8054_vm5, %v7625_v23, %v6325_v22  ;;  %v9089_v11 = vld [vmem:[%s8609_s5 + $0x74] sm:$0x1] }
 0x112   : > { %4532 = vrot.lane.b32.xlu1 %v7780_v40, %s7861_s11  ;;  %v3541_v40 = vld [vmem:[%s8609_s5 + $0x14] sm:$0x1]  ;;  %v3807_v41 = vor.u32 %v3806_v4, %v3803_v55  ;;  %v3611_v17 = vrot.slane %v3609_v42, 4  ;;  %v3622_v58 = vshrl.u32 %v3540_v10, 16  ;;  %v9092_v23 = vld [vmem:[%s8609_s5 + $0xc] sm:$0xe]  ;;  %v9096_v1 = vcombine.low %v5879_v35, %v5889_v6 }
 0x113   : > { %4337 = vrot.lane.b32.xlu0 %v7249_v59, %s7860_s10  ;;  %v1925_v3 = vpop.permute.xlu0 %1924  ;;  %v6269_v59 = vrot.slane %v9022_v25, 5  ;;  %v9083_v25 = vsel %vm8054_vm5, %v6327_v15, %v6328_v32  ;;  %v3614_v63 = vrot.slane %v3612_v9, 5  ;;  %v9086_v22 = vrot.slane %v3618_v62, 5  ;;  %v9101_v32 = vld [vmem:[%s8609_s5 + $0x10] sm:$0xf] }
 0x114   : > { %1973 = vst.msk [vmem:[#allocation2] sm:$0xff] %vm1972_vm10, %v1925_v3  ;;  %v1931_v44 = vpop.permute.xlu1 %1930  ;;  %v9098_v43 = vrot.slane %v3820_v24, 5  ;;  %v3628_v3 = vshll.u32 %v3541_v40, 16  ;;  %v9104_v39 = vrot.slane %v3807_v41, 4  ;;  %v7242_v15 = vrot.slane %v4108_v54, 9 }
 0x115   : > { %1976 = vst.msk [vmem:[#allocation2 + $0x18] sm:$0xff] %vm1972_vm10, %v1931_v44  ;;  %v6271_v8 = vrot.slane %v6269_v59, 4  ;;  %v7340_v46 = vld [vmem:[%s8609_s5 + $0x78] sm:$0xf]  ;;  %v5687_v35 = vsel %vm7933_vm2, %v9060_v7, %v8978_v50  ;;  %v7641_v48 = vcombine.low %v9074_v27, %v9083_v25  ;;  %v9120_v6 = vsel %vm8054_vm5, %v7617_v61, %v6269_v59  ;;  %v7341_v59 = vld [vmem:[%s8609_s5 + $0x7c] sm:$0xf] }
 0x116   : > { %5077 = vrot.lane.b32.xlu1 %v8872_v45, %s7862_s12  ;;  %v3615_v55 = vor.u32 %v3614_v63, %v3611_v17  ;;  %v5697_v53 = vsel %vm7933_vm2, %v9062_v20, %v9035_v36  ;;  %v4186_v61 = vrot.slane %v9101_v32, 5  ;;  %v9140_v57 = vrot.slane %v3628_v3, 5  ;;  %v7342_v54 = vld [vmem:[%s8609_s5 + $0x80] sm:$0x1]  ;;  %v7317_v41 = vld [vmem:[%s8609_s5 + $0x1c] sm:$0xf] }
 0x117   : > { %4516 = vrot.lane.b32.xlu0 %v7781_v34, %s7861_s11  ;;  %v1929_v60 = vpop.permute.xlu0 %1928  ;;  %v3817_v34 = vor.u32 %v3816_v52, %v9067_v5  ;;  %v9131_v10 = vsel %vm8054_vm5, %v6271_v8, %v6272_v56  ;;  %v4245_v40 = vrot.slane %v9089_v11, 5  ;;  %v7234_v56 = vrot.slane %v9092_v23, 9  ;;  %v7783_v11 = vld [vmem:[%s8609_s5 + $0x18] sm:$0xff]   ;;  %v9306_v25 = vld [vmem:[%s7921_s22 + $0x30] sm:$0xe] }
 0x118   : > { %1975 = vst.msk [vmem:[#allocation2 + $0x10] sm:$0xff] %vm1972_vm10, %v1929_v60  ;;  %v1935_v45 = vpop.permute.xlu1 %1934  ;;  %v4086_v60 = vld [vmem:[%s8609_s5 + $0x14] sm:$0x1]  ;;  %v4846_v4 = vshrl.u32 %v7340_v46, 16  ;;  %v3813_v42 = vsel %vm7933_vm2, %v9104_v39, %v9067_v5  ;;  %v9161_v8 = vrot.slane %v3615_v55, 4  ;;  %v4849_v9 = vshll.u32 %v7340_v46, 16 }
 0x119   : > { %1978 = vst.msk [vmem:[#allocation2 + $0x28] sm:$0xff] %vm1972_vm10, %v1935_v45  ;;  %v9106_v44 = vrot.slane %v3817_v34, 4  ;;  %v7316_v45 = vld [vmem:[%s8609_s5 + $0x18] sm:$0xf]  ;;  %v4855_v62 = vshll.u32 %v7341_v59, 16  ;;  %v4859_v34 = vshrl.u32 %v7341_v59, 16 }
 0x11a   : > { %5398 = vrot.lane.b32.xlu1 %v7449_v13, %s7863_s13  ;;  %v3624_v13 = vrot.slane %v3622_v58, 4  ;;  %v4848_v52 = vrot.slane %v4846_v4, 4  ;;  %v4188_v58 = vrot.slane %v4186_v61, 4  ;;  %v4851_v23 = vrot.slane %v4849_v9, 5  ;;  %v9248_v5 = vld [vmem:[%s8609_s5 + $0x20] sm:$0x1] }
 0x11b   : > { %5061 = vrot.lane.b32.xlu0 %v8936_v29, %s7862_s12  ;;  %v1933_v21 = vpop.permute.xlu0 %1932  ;;  %v4242_v29 = vrot.slane %v4109_v51, 5  ;;  %v3823_v49 = vsel %vm7933_vm2, %v9106_v44, %v9098_v43  ;;  %v4189_v51 = vrot.slane %v4086_v60, 5  ;;  %v4654_v3 = vshrl.u32 %v7316_v45, 16  ;;  %v7088_v39 = vld [vmem:[%s7921_s22 + $0x94] sm:$0xf] }
 0x11c   : > { %1977 = vst.msk [vmem:[#allocation2 + $0x20] sm:$0xff] %vm1972_vm10, %v1933_v21  ;;  %v1939_v38 = vpop.permute.xlu1 %1938  ;;  %v3625_v2 = vor.u32 %v3624_v13, %v9086_v22  ;;  %v9168_v21 = vrot.slane %v4855_v62, 5  ;;  %v4865_v13 = vshll.u32 %v7342_v54, 16  ;;  %v4663_v46 = vshll.u32 %v7317_v41, 16  ;;  %v7087_v62 = vld [vmem:[%s7921_s22 + $0x90] sm:$0xf] }
 0x11d   : > { %1980 = vst.msk [vmem:[#allocation2 + $0x38] sm:$0xff] %vm1972_vm10, %v1939_v38  ;;  %v9156_v31 = vsel %vm8054_vm5, %v7242_v15, %v4242_v29  ;;  %v4861_v15 = vrot.slane %v4859_v34, 4  ;;  %v3621_v55 = vsel %vm7933_vm2, %v9161_v8, %v9086_v22  ;;  %v4667_v59 = vshrl.u32 %v7317_v41, 16 }
 0x11e   : > { %2989 = vrot.lane.b32.xlu1 %v8995_v12, %s7856_s6  ;;  %v3626_v17 = vrot.slane %v3625_v2, 4  ;;  %v4852_v2 = vor.u32 %v4851_v23, %v4848_v52  ;;  %v4656_v60 = vrot.slane %v4654_v3, 4  ;;  %v9201_v14 = vsel %vm8054_vm5, %v4188_v58, %v4189_v51  ;;  %v9237_v51 = vld [vmem:[%s8609_s5 + $0x1c] sm:$0xf]  ;;  %v7785_v23 = vld [vmem:[%s8609_s5 + $0xc] sm:$0xff]  }
 0x11f   : > { %5382 = vrot.lane.b32.xlu0 %v7441_v16, %s7863_s13  ;;  %v1937_v12 = vpop.permute.xlu0 %1936  ;;  %v4244_v16 = vrot.slane %v4242_v29, 4  ;;  %v7318_v29 = vld [vmem:[%s8609_s5 + $0x20] sm:$0x1]  ;;  %v4862_v22 = vor.u32 %v4861_v15, %v9168_v21  ;;  %v4867_v47 = vrot.slane %v4865_v13, 5  ;;  %v4669_v52 = vrot.slane %v4667_v59, 4 }
 0x120   : > { %1979 = vst.msk [vmem:[#allocation2 + $0x30] sm:$0xff] %vm1972_vm10, %v1937_v12  ;;  %v1943_v24 = vpop.permute.xlu1 %1942  ;;  %v7404_v12 = vld [vmem:[%s8609_s5 + $0x78] sm:$0xe]  ;;  %v7553_v41 = vcombine.low %v5687_v35, %v5697_v53  ;;  %v7633_v58 = vcombine.low %v9120_v6, %v9131_v10  ;;  %v9234_v36 = vcombine.low %v3813_v42, %v3823_v49  ;;  %v2780_v49 = vshrl.u32 %v7087_v62, 16 }
 0x121   : > { %1982 = vst.msk [vmem:[#allocation2 + $0x48] sm:$0xff] %vm1972_vm10, %v1943_v24  ;;  %v9173_v38 = vsel %vm8054_vm5, %v4244_v16, %v4245_v40  ;;  %v3631_v40 = vsel %vm7933_vm2, %v3626_v17, %v9140_v57  ;;  %v4673_v57 = vshll.u32 %v7318_v29, 16  ;;  %v9206_v16 = vld [vmem:[%s8609_s5 + $0x18] sm:$0xe]  ;;  %v4863_v8 = vrot.slane %v4862_v22, 4  ;;  %v7784_v17 = vld [vmem:[%s8609_s5 + $0x6c] sm:$0xff]  }
 0x122   : > { %5577 = vrot.lane.b32.xlu1 %v7782_v30, %s7864_s14  ;;  %v9183_v30 = vsel %vm8054_vm5, %v7234_v56, %v4186_v61  ;;  %v7405_v61 = vld [vmem:[%s8609_s5 + $0x7c] sm:$0xf]  ;;  %v9196_v56 = vld [vmem:[%s8609_s5 + $0x80] sm:$0x1]  ;;  %v7434_v9 = vrot.slane %v7404_v12, 9  ;;  %v9241_v50 = vcombine.low %v3621_v55, %v3631_v40  ;;  %v7258_v7 = vcombine.low %v9156_v31, %v9173_v38 }
 0x123   : > { %2973 = vrot.lane.b32.xlu0 %v9026_v37, %s7856_s6  ;;  %v1941_v63 = vpop.permute.xlu0 %1940  ;;  %v4657_v37 = vshll.u32 %v7316_v45, 16  ;;  %v4853_v45 = vrot.slane %v4852_v2, 4  ;;  %v5287_v20 = vrot.slane %v7405_v61, 5  ;;  %v7250_v43 = vcombine.low %v9183_v30, %v9201_v14  ;;  %v7089_v55 = vld [vmem:[%s7921_s22 + $0x98] sm:$0x1] }
 0x124   : > { %1981 = vst.msk [vmem:[#allocation2 + $0x40] sm:$0xff] %vm1972_vm10, %v1941_v63  ;;  %v1947_v32 = vpop.permute.xlu1 %1946  ;;  %v9255_v35 = vrot.slane %v4673_v57, 5  ;;  %v5290_v53 = vrot.slane %v9196_v56, 5  ;;  %v7426_v42 = vrot.slane %v9206_v16, 9  ;;  %v4868_v18 = vsel %vm7933_vm2, %v4863_v8, %v4867_v47  ;;  %v7065_v22 = vld [vmem:[%s7921_s22 + $0x38] sm:$0x1] }
 0x125   : > { %1984 = vst.msk [vmem:[#allocation2 + $0x58] sm:$0xff] %vm1972_vm10, %v1947_v32  ;;  %v4659_v4 = vrot.slane %v4657_v37, 5  ;;  %v4858_v63 = vsel %vm7933_vm2, %v4853_v45, %v9168_v21  ;;  %v5289_v13 = vrot.slane %v5287_v20, 4  ;;  %v2782_v3 = vrot.slane %v2780_v49, 4  ;;  %v7064_v21 = vld [vmem:[%s7921_s22 + $0x34] sm:$0xf] }
 0x126   : > { %3310 = vrot.lane.b32.xlu1 %v7194_v33, %s7857_s7  ;;  %v9203_v33 = vrot.slane %v4663_v46, 5  ;;  %v2783_v32 = vshll.u32 %v7087_v62, 16  ;;  %v2789_v15 = vshll.u32 %v7088_v39, 16  ;;  %v5231_v37 = vrot.slane %v9237_v51, 5  ;;  %v7152_v57 = vld [vmem:[%s7921_s22 + $0x94] sm:$0xf] }
 0x127   : > { %5561 = vrot.lane.b32.xlu0 %v7783_v11, %s7864_s14  ;;  %v1945_v24 = vpop.permute.xlu0 %1944  ;;  %v4660_v44 = vor.u32 %v4659_v4, %v4656_v60  ;;  %v7063_v11 = vld [vmem:[%s7921_s22 + $0x30] sm:$0xf]  ;;  %v5234_v46 = vrot.slane %v9248_v5, 5  ;;  %v2793_v2 = vshrl.u32 %v7088_v39, 16  ;;  %v9281_v59 = vcombine.low %v4858_v63, %v4868_v18  ;;  %v9315_v18 = vld [vmem:[%s7921_s22 + $0x34] sm:$0xf] }
 0x128   : > { %1983 = vst.msk [vmem:[#allocation2 + $0x50] sm:$0xff] %vm1972_vm10, %v1945_v24  ;;  %v1951_v54 = vpop.permute.xlu1 %1950  ;;  %v4670_v19 = vor.u32 %v4669_v52, %v9203_v33  ;;  %v2785_v12 = vrot.slane %v2783_v32, 5  ;;  %v9283_v40 = vrot.slane %v2789_v15, 5  ;;  %v2588_v60 = vshrl.u32 %v7063_v11, 16  ;;  %v7151_v62 = vld [vmem:[%s7921_s22 + $0x90] sm:$0xe] }
 0x129   : > { %1986 = vst.msk [vmem:[#allocation2 + $0x68] sm:$0xff] %vm1972_vm10, %v1951_v54  ;;  %v9275_v29 = vrot.slane %v4660_v44, 4  ;;  %v2795_v56 = vrot.slane %v2793_v2, 4  ;;  %v2591_v24 = vshll.u32 %v7063_v11, 16  ;;  %v2597_v47 = vshll.u32 %v7064_v21, 16 }
 0x12a   : > { %6122 = vrot.lane.b32.xlu1 %v9096_v1, %s7865_s19  ;;  %v9286_v61 = vrot.slane %v4670_v19, 4  ;;  %v2786_v45 = vor.u32 %v2785_v12, %v2782_v3  ;;  %v2799_v8 = vshll.u32 %v7089_v55, 16  ;;  %v2590_v52 = vrot.slane %v2588_v60, 4  ;;  %v7153_v44 = vld [vmem:[%s7921_s22 + $0x98] sm:$0x1] }
 0x12b   : > { %3294 = vrot.lane.b32.xlu0 %v7186_v28, %s7857_s7  ;;  %v1949_v1 = vpop.permute.xlu0 %1948  ;;  %v9268_v28 = vsel %vm8054_vm5, %v7434_v9, %v5287_v20  ;;  %v2601_v9 = vshrl.u32 %v7064_v21, 16  ;;  %v2593_v20 = vrot.slane %v2591_v24, 5  ;;  %v9301_v51 = vrot.slane %v2597_v47, 5  ;;  %v7532_v19 = vld [vmem:[%s8609_s5 + $0x84] sm:$0xf] }
 0x12c   : > { %1985 = vst.msk [vmem:[#allocation2 + $0x60] sm:$0xff] %vm1972_vm10, %v1949_v1  ;;  %v1955_v34 = vpop.permute.xlu1 %1954  ;;  %v5233_v5 = vrot.slane %v5231_v37, 4  ;;  %v2607_v1 = vshll.u32 %v7065_v22, 16  ;;  %v3204_v27 = vrot.slane %v7152_v57, 5  ;;  %v9312_v49 = vrot.slane %v2786_v45, 4  ;;  %v7786_v45 = vld [vmem:[%s8609_s5 + $0x78] sm:$0xff]  }
 0x12d   : > { %1988 = vst.msk [vmem:[#allocation2 + $0x78] sm:$0xff] %vm1972_vm10, %v1955_v34  ;;  %v2603_v39 = vrot.slane %v2601_v9, 4  ;;  %v2594_v34 = vor.u32 %v2593_v20, %v2590_v52  ;;  %v7179_v63 = vrot.slane %v7151_v62, 9  ;;  %v9329_v32 = vrot.slane %v2799_v8, 5  ;;  %v9332_v15 = vld [vmem:[%s7921_s22 + $0x38] sm:$0x1] }
 0x12e   : > { %3489 = vrot.lane.b32.xlu1 %v7784_v17, %s7858_s8  ;;  %v2796_v17 = vor.u32 %v2795_v56, %v9283_v40  ;;  %v4676_v16 = vsel %vm7933_vm2, %v9286_v61, %v9255_v35  ;;  %v3206_v21 = vrot.slane %v3204_v27, 4  ;;  %v7533_v55 = vld [vmem:[%s8609_s5 + $0x88] sm:$0xf]  ;;  %v9349_v2 = vsel %vm8054_vm5, %v5233_v5, %v5234_v46  ;;  %v7534_v62 = vld [vmem:[%s8609_s5 + $0x8c] sm:$0x1] }
 0x12f   : > { %6106 = vrot.lane.b32.xlu0 %v7553_v41, %s7865_s19  ;;  %v9298_v41 = vsel %vm8054_vm5, %v5289_v13, %v5290_v53  ;;  %v4666_v53 = vsel %vm7933_vm2, %v9275_v29, %v9203_v33  ;;  %v9325_v13 = vsel %vm8054_vm5, %v7426_v42, %v5231_v37  ;;  %v2604_v42 = vor.u32 %v2603_v39, %v9301_v51 }
 0x130   : > { %v2248_v4 = vpop.permute.xlu1 %2247  ;;  %v9327_v3 = vrot.slane %v2796_v17, 4  ;;  %v3207_v37 = vrot.slane %v7153_v44, 5  ;;  %v3148_v12 = vrot.slane %v9315_v18, 5  ;;  %v5891_v22 = vshrl.u32 %v7532_v19, 16  ;;  %v7597_v18 = vld [vmem:[%s8609_s5 + $0x88] sm:$0xf] }
 0x131   : > { %v1953_v54 = vpop.permute.xlu0 %1952  ;;  %2295 = vst.msk [vmem:[#allocation2 + $0x8] sm:$0xff] %vm2293_vm11, %v2248_v4  ;;  %v2792_v4 = vsel %vm7933_vm2, %v9312_v49, %v9283_v40  ;;  %v9358_v56 = vrot.slane %v2594_v34, 4  ;;  %v9362_v6 = vsel %vm8054_vm5, %v7179_v63, %v3204_v27  ;;  %v7171_v10 = vrot.slane %v9306_v25, 9 }
 0x132   : > { %1987 = vst.msk [vmem:[#allocation2 + $0x70] sm:$0xff] %vm1972_vm10, %v1953_v54  ;;  %6443 = vrot.lane.b32.xlu1 %v7641_v48, %s7866_s20  ;;  %v2802_v24 = vsel %vm7933_vm2, %v9327_v3, %v9329_v32  ;;  %v5893_v47 = vrot.slane %v5891_v22, 4  ;;  %v5894_v40 = vshll.u32 %v7532_v19, 16  ;;  %v5900_v57 = vshll.u32 %v7533_v55, 16  ;;  %v7509_v54 = vld [vmem:[%s8609_s5 + $0x28] sm:$0xf] }
 0x133   : > { %3473 = vrot.lane.b32.xlu0 %v7785_v23, %s7858_s8  ;;  %v7450_v23 = vcombine.low %v9268_v28, %v9298_v41  ;;  %v2605_v8 = vrot.slane %v2604_v42, 4  ;;  %v9380_v52 = vsel %vm8054_vm5, %v3206_v21, %v3207_v37  ;;  %v3151_v9 = vrot.slane %v9332_v15, 5  ;;  %v7596_v32 = vld [vmem:[%s8609_s5 + $0x84] sm:$0xe]  ;;  %v7787_v15 = vld [vmem:[%s8609_s5 + $0x18] sm:$0xff]  }
 0x134   : > { %v2252_v48 = vpop.permute.xlu1 %2251  ;;  %v5904_v17 = vshrl.u32 %v7533_v55, 16  ;;  %v3150_v20 = vrot.slane %v3148_v12, 4  ;;  %v5896_v44 = vrot.slane %v5894_v40, 5  ;;  %v9386_v5 = vrot.slane %v5900_v57, 5  ;;  %v3542_v40 = vld [vmem:[%s8609_s5 + $0x18] sm:$0xf] }
 0x135   : > { %v2246_v11 = vpop.permute.xlu0 %2245  ;;  %2297 = vst.msk [vmem:[#allocation2 + $0x18] sm:$0xff] %vm2293_vm11, %v2252_v48  ;;  %v5708_v25 = vshll.u32 %v7509_v54, 16  ;;  %v5910_v49 = vshll.u32 %v7534_v62, 16  ;;  %v5712_v63 = vshrl.u32 %v7509_v54, 16  ;;  %v9402_v19 = vsel %vm8054_vm5, %v7171_v10, %v3148_v12  ;;  %v3544_v41 = vld [vmem:[%s8609_s5 + $0x20] sm:$0x1] }
 0x136   : > { %2294 = vst.msk [vmem:[#allocation2] sm:$0xff] %vm2293_vm11, %v2246_v11  ;;  %4034 = vrot.lane.b32.xlu1 %v9234_v36, %s7859_s9  ;;  %v9351_v36 = vrot.slane %v2607_v1, 5  ;;  %v5906_v39 = vrot.slane %v5904_v17, 4  ;;  %v7510_v1 = vld [vmem:[%s8609_s5 + $0x2c] sm:$0x1]  ;;  %v9413_v42 = vsel %vm8054_vm5, %v3150_v20, %v3151_v9  ;;  %v7362_v30 = vcombine.low %v4666_v53, %v4676_v16 }
 0x137   : > { %6427 = vrot.lane.b32.xlu0 %v7633_v58, %s7866_s20  ;;  %v7508_v58 = vld [vmem:[%s8609_s5 + $0x24] sm:$0xf]  ;;  %v9415_v21 = vrot.slane %v5708_v25, 5  ;;  %v5714_v37 = vrot.slane %v5712_v63, 4  ;;  %v5718_v55 = vshll.u32 %v7510_v1, 16  ;;  %v6332_v22 = vrot.slane %v7597_v18, 5 }
 0x138   : > { %v2256_v60 = vpop.permute.xlu1 %2255  ;;  %v5699_v31 = vshrl.u32 %v7508_v58, 16  ;;  %v5702_v27 = vshll.u32 %v7508_v58, 16  ;;  %v5907_v11 = vor.u32 %v5906_v39, %v9386_v5  ;;  %v7442_v35 = vcombine.low %v9325_v13, %v9349_v2  ;;  %v9444_v53 = vld [vmem:[%s8609_s5 + $0x28] sm:$0xf]  ;;  %v9447_v16 = vld [vmem:[%s8609_s5 + $0x2c] sm:$0x1] }
 0x139   : > { %v2250_v46 = vpop.permute.xlu0 %2249  ;;  %2299 = vst.msk [vmem:[#allocation2 + $0x28] sm:$0xff] %vm2293_vm11, %v2256_v60  ;;  %v9433_v60 = vld [vmem:[%s8609_s5 + $0x24] sm:$0xe]  ;;  %v7115_v61 = vcombine.low %v2792_v4, %v2802_v24  ;;  %v7195_v33 = vcombine.low %v9362_v6, %v9380_v52  ;;  %v9441_v29 = vrot.slane %v5910_v49, 5  ;;  %v7187_v4 = vcombine.low %v9402_v19, %v9413_v42  ;;  %v3543_v9 = vld [vmem:[%s8609_s5 + $0x1c] sm:$0xf] }
 0x13a   : > { %2296 = vst.msk [vmem:[#allocation2 + $0x10] sm:$0xff] %vm2293_vm11, %v2250_v46  ;;  %4355 = vrot.lane.b32.xlu1 %v7258_v7, %s7860_s10  ;;  %v2600_v7 = vsel %vm7933_vm2, %v9358_v56, %v9301_v51  ;;  %v5701_v34 = vrot.slane %v5699_v31, 4  ;;  %v2610_v51 = vsel %vm7933_vm2, %v2605_v8, %v9351_v36  ;;  %v5704_v3 = vrot.slane %v5702_v27, 5  ;;  %v9418_v36 = vld [vmem:[%s8609_s5 + $0x8c] sm:$0x1] }
 0x13b   : > { %4018 = vrot.lane.b32.xlu0 %v9241_v50, %s7859_s9  ;;  %v5897_v50 = vor.u32 %v5896_v44, %v5893_v47  ;;  %v3566_v56 = vld [vmem:[%s8609_s5 + $0x78] sm:$0xf]  ;;  %v9452_v58 = vcombine.low %v2600_v7, %v2610_v51  ;;  %v9456_v46 = vrot.slane %v5907_v11, 4  ;;  %v7626_v24 = vrot.slane %v7596_v32, 9  ;;  %v3567_v47 = vld [vmem:[%s8609_s5 + $0x7c] sm:$0xf] }
 0x13c   : > { %v2260_v38 = vpop.permute.xlu1 %2259  ;;  %v5715_v57 = vor.u32 %v5714_v37, %v9415_v21  ;;  %v9462_v54 = vrot.slane %v5718_v55, 5  ;;  %v3568_v8 = vld [vmem:[%s8609_s5 + $0x80] sm:$0x1]  ;;  %v6334_v44 = vrot.slane %v6332_v22, 4  ;;  %v7618_v31 = vrot.slane %v9433_v60, 9 }
 0x13d   : > { %v2254_v48 = vpop.permute.xlu0 %2253  ;;  %2301 = vst.msk [vmem:[#allocation2 + $0x38] sm:$0xff] %vm2293_vm11, %v2260_v38  ;;  %v9430_v14 = vrot.slane %v5897_v50, 4  ;;  %v6276_v7 = vrot.slane %v9444_v53, 5  ;;  %v3828_v1 = vshll.u32 %v3566_v56, 16  ;;  %v3834_v27 = vshll.u32 %v3567_v47, 16 }
 0x13e   : > { %2298 = vst.msk [vmem:[#allocation2 + $0x20] sm:$0xff] %vm2293_vm11, %v2254_v48  ;;  %4534 = vrot.lane.b32.xlu1 %v7786_v45, %s7861_s11  ;;  %v6335_v45 = vrot.slane %v9418_v36, 5  ;;  %v9487_v25 = vsel %vm8054_vm5, %v7626_v24, %v6332_v22  ;;  %v6279_v48 = vrot.slane %v9447_v16, 5  ;;  %v3838_v50 = vshrl.u32 %v3567_v47, 16  ;;  %v4112_v32 = vld [vmem:[%s8609_s5 + $0x7c] sm:$0xf] }
 0x13f   : > { %4339 = vrot.lane.b32.xlu0 %v7250_v43, %s7860_s10  ;;  %v5705_v43 = vor.u32 %v5704_v3, %v5701_v34  ;;  %v5903_v17 = vsel %vm7933_vm2, %v9430_v14, %v9386_v5  ;;  %v5913_v5 = vsel %vm7933_vm2, %v9456_v46, %v9441_v29  ;;  %v5716_v49 = vrot.slane %v5715_v57, 4  ;;  %v4111_v14 = vld [vmem:[%s8609_s5 + $0x78] sm:$0xe]  ;;  %v4113_v29 = vld [vmem:[%s8609_s5 + $0x80] sm:$0x1] }
 0x140   : > { %v2264_v12 = vpop.permute.xlu1 %2263  ;;  %v3830_v34 = vrot.slane %v3828_v1, 5  ;;  %v9491_v28 = vrot.slane %v3834_v27, 5  ;;  %v3840_v18 = vrot.slane %v3838_v50, 4  ;;  %v3844_v51 = vshll.u32 %v3568_v8, 16  ;;  %v9516_v46 = vld [vmem:[%s8609_s5 + $0x1c] sm:$0xf] }
 0x141   : > { %v2258_v10 = vpop.permute.xlu0 %2257  ;;  %2303 = vst.msk [vmem:[#allocation2 + $0x48] sm:$0xff] %vm2293_vm11, %v2264_v12  ;;  %v9471_v20 = vrot.slane %v5705_v43, 4  ;;  %v3636_v11 = vshll.u32 %v3542_v40, 16  ;;  %v3642_v3 = vshll.u32 %v3543_v9, 16  ;;  %v7788_v43 = vld [vmem:[%s8609_s5 + $0x84] sm:$0xff]   ;;  %v6278_v22 = vrot.slane %v6276_v7, 4 }
 0x142   : > { %2300 = vst.msk [vmem:[#allocation2 + $0x30] sm:$0xff] %vm2293_vm11, %v2258_v10  ;;  %5079 = vrot.lane.b32.xlu1 %v9281_v59, %s7862_s12  ;;  %v3825_v59 = vshrl.u32 %v3566_v56, 16  ;;  %v3841_v60 = vor.u32 %v3840_v18, %v9491_v28  ;;  %v4249_v16 = vrot.slane %v4112_v32, 5  ;;  %v9522_v57 = vrot.slane %v3844_v51, 5  ;;  %v7343_v2 = vld [vmem:[%s8609_s5 + $0x84] sm:$0xf] }
 0x143   : > { %4518 = vrot.lane.b32.xlu0 %v7787_v15, %s7861_s11  ;;  %v5711_v37 = vsel %vm7933_vm2, %v9471_v20, %v9415_v21  ;;  %v3638_v56 = vrot.slane %v3636_v11, 5  ;;  %v9505_v10 = vrot.slane %v3642_v3, 5  ;;  %v5721_v21 = vsel %vm7933_vm2, %v5716_v49, %v9462_v54  ;;  %v7320_v3 = vld [vmem:[%s8609_s5 + $0x28] sm:$0xf]  ;;  %v7321_v52 = vld [vmem:[%s8609_s5 + $0x2c] sm:$0x1] }
 0x144   : > { %v2268_v62 = vpop.permute.xlu1 %2267  ;;  %v3827_v39 = vrot.slane %v3825_v59, 4  ;;  %v7243_v13 = vrot.slane %v4111_v14, 9  ;;  %v7562_v54 = vcombine.low %v5903_v17, %v5913_v5  ;;  %v9530_v8 = vsel %vm8054_vm5, %v6334_v44, %v6335_v45  ;;  %v7344_v45 = vld [vmem:[%s8609_s5 + $0x88] sm:$0xf] }
 0x145   : > { %v2262_v38 = vpop.permute.xlu0 %2261  ;;  %2305 = vst.msk [vmem:[#allocation2 + $0x58] sm:$0xff] %vm2293_vm11, %v2268_v62  ;;  %v9534_v59 = vsel %vm8054_vm5, %v7618_v31, %v6276_v7  ;;  %v4087_v62 = vld [vmem:[%s8609_s5 + $0x18] sm:$0xe]  ;;  %v9539_v20 = vcombine.low %v5711_v37, %v5721_v21  ;;  %v4251_v36 = vrot.slane %v4249_v16, 4  ;;  %v7789_v44 = vld [vmem:[%s8609_s5 + $0x24] sm:$0xff]   ;;  %v9548_v31 = vsel %vm8054_vm5, %v6278_v22, %v6279_v48 }
 0x146   : > { %2302 = vst.msk [vmem:[#allocation2 + $0x40] sm:$0xff] %vm2293_vm11, %v2262_v38  ;;  %5400 = vrot.lane.b32.xlu1 %v7450_v23, %s7863_s13  ;;  %v3633_v23 = vshrl.u32 %v3542_v40, 16  ;;  %v3831_v55 = vor.u32 %v3830_v34, %v3827_v39  ;;  %v9520_v40 = vrot.slane %v3841_v60, 4  ;;  %v4252_v38 = vrot.slane %v4113_v29, 5  ;;  %v4089_v39 = vld [vmem:[%s8609_s5 + $0x20] sm:$0x1] }
 0x147   : > { %5063 = vrot.lane.b32.xlu0 %v7362_v30, %s7862_s12  ;;  %v3646_v30 = vshrl.u32 %v3543_v9, 16  ;;  %v4193_v1 = vrot.slane %v9516_v46, 5  ;;  %v4870_v27 = vshrl.u32 %v7343_v2, 16  ;;  %v9564_v48 = vsel %vm8054_vm5, %v7243_v13, %v4249_v16  ;;  %v7345_v34 = vld [vmem:[%s8609_s5 + $0x8c] sm:$0x1]  ;;  %v7790_v60 = vld [vmem:[%s8609_s5 + $0x78] sm:$0xff]  }
 0x148   : > { %v2272_v63 = vpop.permute.xlu1 %2271  ;;  %v3635_v12 = vrot.slane %v3633_v23, 4  ;;  %v9518_v47 = vrot.slane %v3831_v55, 4  ;;  %v7235_v49 = vrot.slane %v4087_v62, 9  ;;  %v4873_v51 = vshll.u32 %v7343_v2, 16  ;;  %v7408_v62 = vld [vmem:[%s8609_s5 + $0x88] sm:$0xf] }
 0x149   : > { %v2266_v15 = vpop.permute.xlu0 %2265  ;;  %2307 = vst.msk [vmem:[#allocation2 + $0x68] sm:$0xff] %vm2293_vm11, %v2272_v63  ;;  %v3648_v53 = vrot.slane %v3646_v30, 4  ;;  %v4872_v18 = vrot.slane %v4870_v27, 4  ;;  %v4879_v11 = vshll.u32 %v7344_v45, 16  ;;  %v4196_v37 = vrot.slane %v4089_v39, 5 }
 0x14a   : > { %2304 = vst.msk [vmem:[#allocation2 + $0x50] sm:$0xff] %vm2293_vm11, %v2266_v15  ;;  %2991 = vrot.lane.b32.xlu1 %v7115_v61, %s7856_s6  ;;  %v3652_v61 = vshll.u32 %v3544_v41, 16  ;;  %v3639_v9 = vor.u32 %v3638_v56, %v3635_v12  ;;  %v3837_v50 = vsel %vm7933_vm2, %v9518_v47, %v9491_v28  ;;  %v7319_v41 = vld [vmem:[%s8609_s5 + $0x24] sm:$0xf]  ;;  %v9579_v15 = vsel %vm8054_vm5, %v4251_v36, %v4252_v38  ;;  %v9614_v38 = vld [vmem:[%s8609_s5 + $0x28] sm:$0xf] }
 0x14b   : > { %5384 = vrot.lane.b32.xlu0 %v7442_v35, %s7863_s13  ;;  %v3649_v17 = vor.u32 %v3648_v53, %v9505_v10  ;;  %v4883_v55 = vshrl.u32 %v7344_v45, 16  ;;  %v4195_v12 = vrot.slane %v4193_v1, 4  ;;  %v4875_v30 = vrot.slane %v4873_v51, 5  ;;  %v9628_v27 = vld [vmem:[%s8609_s5 + $0x8c] sm:$0x1] }
 0x14c   : > { %v2276_v24 = vpop.permute.xlu1 %2275  ;;  %v9550_v7 = vrot.slane %v3652_v61, 5  ;;  %v9569_v63 = vrot.slane %v3639_v9, 4  ;;  %v9582_v14 = vrot.slane %v4879_v11, 5  ;;  %v4889_v6 = vshll.u32 %v7345_v34, 16  ;;  %v9631_v34 = vld [vmem:[%s8609_s5 + $0x24] sm:$0xe] }
 0x14d   : > { %v2270_v35 = vpop.permute.xlu0 %2269  ;;  %2309 = vst.msk [vmem:[#allocation2 + $0x78] sm:$0xff] %vm2293_vm11, %v2276_v24  ;;  %v3650_v32 = vrot.slane %v3649_v17, 4  ;;  %v4885_v56 = vrot.slane %v4883_v55, 4  ;;  %v4687_v29 = vshll.u32 %v7320_v3, 16  ;;  %v4876_v61 = vor.u32 %v4875_v30, %v4872_v18  ;;  %v7407_v24 = vld [vmem:[%s8609_s5 + $0x84] sm:$0xe] }
 0x14e   : > { %2306 = vst.msk [vmem:[#allocation2 + $0x60] sm:$0xff] %vm2293_vm11, %v2270_v35  ;;  %5579 = vrot.lane.b32.xlu1 %v7788_v43, %s7864_s14  ;;  %v4678_v43 = vshrl.u32 %v7319_v41, 16  ;;  %v3645_v53 = vsel %vm7933_vm2, %v9569_v63, %v9505_v10  ;;  %v4691_v46 = vshrl.u32 %v7320_v3, 16  ;;  %v9596_v13 = vsel %vm8054_vm5, %v7235_v49, %v4193_v1  ;;  %v7090_v63 = vld [vmem:[%s7921_s22 + $0x9c] sm:$0xf] }
 0x14f   : > { %2975 = vrot.lane.b32.xlu0 %v9452_v58, %s7856_s6  ;;  %v3847_v58 = vsel %vm7933_vm2, %v9520_v40, %v9522_v57  ;;  %v4886_v2 = vor.u32 %v4885_v56, %v9582_v14  ;;  %v9599_v9 = vrot.slane %v4687_v29, 5  ;;  %v3655_v10 = vsel %vm7933_vm2, %v3650_v32, %v9550_v7  ;;  %v7791_v40 = vld [vmem:[%s8609_s5 + $0x18] sm:$0xff]   ;;  %v7385_v3 = vld [vmem:[%s8609_s5 + $0x2c] sm:$0x1]  ;;  %v7067_v29 = vld [vmem:[%s7921_s22 + $0x40] sm:$0xf] }
 0x150   : > { %v2429_v5 = vpop.permute.xlu1 %2428  ;;  %v4680_v16 = vrot.slane %v4678_v43, 4  ;;  %v4693_v17 = vrot.slane %v4691_v46, 4  ;;  %v4697_v36 = vshll.u32 %v7321_v52, 16  ;;  %v9620_v19 = vrot.slane %v4889_v6, 5  ;;  %v7068_v46 = vld [vmem:[%s7921_s22 + $0x44] sm:$0x1] }
 0x151   : > { %v2274_v23 = vpop.permute.xlu0 %2273  ;;  %2476 = vst.msk [vmem:[#allocation2 + $0x8] sm:$0xff] %vm2474_vm12, %v2429_v5  ;;  %v9618_v39 = vrot.slane %v4886_v2, 4  ;;  %v7642_v7 = vcombine.low %v9487_v25, %v9530_v8  ;;  %v7634_v1 = vcombine.low %v9534_v59, %v9548_v31  ;;  %v7435_v5 = vrot.slane %v7407_v24, 9 }
 0x152   : > { %2308 = vst.msk [vmem:[#allocation2 + $0x70] sm:$0xff] %vm2293_vm11, %v2274_v23  ;;  %3312 = vrot.lane.b32.xlu1 %v7195_v33, %s7857_s7  ;;  %v4681_v33 = vshll.u32 %v7319_v41, 16  ;;  %v5294_v49 = vrot.slane %v7408_v62, 5  ;;  %v7227_v25 = vcombine.low %v3837_v50, %v3847_v58  ;;  %v7259_v8 = vcombine.low %v9564_v48, %v9579_v15  ;;  %v7091_v58 = vld [vmem:[%s7921_s22 + $0xa0] sm:$0xf] }
 0x153   : > { %5563 = vrot.lane.b32.xlu0 %v7789_v44, %s7864_s14  ;;  %v9616_v44 = vrot.slane %v4876_v61, 4  ;;  %v4694_v41 = vor.u32 %v4693_v17, %v9599_v9  ;;  %v5238_v23 = vrot.slane %v9614_v38, 5  ;;  %v9653_v57 = vcombine.low %v3645_v53, %v3655_v10  ;;  %v9732_v38 = vld [vmem:[%s7921_s22 + $0x40] sm:$0xf] }
 0x154   : > { %v2433_v22 = vpop.permute.xlu1 %2432  ;;  %v4683_v35 = vrot.slane %v4681_v33, 5  ;;  %v9659_v50 = vrot.slane %v4697_v36, 5  ;;  %v5297_v11 = vrot.slane %v9628_v27, 5  ;;  %v7427_v32 = vrot.slane %v9631_v34, 9 }
 0x155   : > { %v2427_v21 = vpop.permute.xlu0 %2426  ;;  %2478 = vst.msk [vmem:[#allocation2 + $0x18] sm:$0xff] %vm2474_vm12, %v2433_v22  ;;  %v4882_v51 = vsel %vm7933_vm2, %v9616_v44, %v9582_v14  ;;  %v5296_v30 = vrot.slane %v5294_v49, 4  ;;  %v2804_v43 = vshrl.u32 %v7090_v63, 16  ;;  %v2807_v22 = vshll.u32 %v7090_v63, 16 }
 0x156   : > { %2475 = vst.msk [vmem:[#allocation2] sm:$0xff] %vm2474_vm12, %v2427_v21  ;;  %6124 = vrot.lane.b32.xlu1 %v7562_v54, %s7865_s19  ;;  %v9611_v54 = vsel %vm8054_vm5, %v4195_v12, %v4196_v37  ;;  %v4684_v42 = vor.u32 %v4683_v35, %v4680_v16  ;;  %v7092_v37 = vld [vmem:[%s7921_s22 + $0xa4] sm:$0x1]  ;;  %v9677_v12 = vsel %vm8054_vm5, %v7435_v5, %v5294_v49  ;;  %v4695_v56 = vrot.slane %v4694_v41, 4 }
 0x157   : > { %3296 = vrot.lane.b32.xlu0 %v7187_v4, %s7857_s7  ;;  %v7251_v28 = vcombine.low %v9596_v13, %v9611_v54  ;;  %v5240_v6 = vrot.slane %v5238_v23, 4  ;;  %v2813_v52 = vshll.u32 %v7091_v58, 16  ;;  %v2817_v33 = vshrl.u32 %v7091_v58, 16 }
 0x158   : > { %v2437_v45 = vpop.permute.xlu1 %2436  ;;  %v9657_v47 = vrot.slane %v4684_v42, 4  ;;  %v2806_v53 = vrot.slane %v2804_v43, 4  ;;  %v2809_v61 = vrot.slane %v2807_v22, 5  ;;  %v2823_v16 = vshll.u32 %v7092_v37, 16 }
 0x159   : > { %v2431_v4 = vpop.permute.xlu0 %2430  ;;  %2480 = vst.msk [vmem:[#allocation2 + $0x28] sm:$0xff] %vm2474_vm12, %v2437_v45  ;;  %v2815_v2 = vrot.slane %v2813_v52, 5  ;;  %v2819_v35 = vrot.slane %v2817_v33, 4  ;;  %v5241_v36 = vrot.slane %v7385_v3, 5  ;;  %v2621_v42 = vshll.u32 %v7067_v29, 16 }
 0x15a   : > { %2477 = vst.msk [vmem:[#allocation2 + $0x10] sm:$0xff] %vm2474_vm12, %v2431_v4  ;;  %3491 = vrot.lane.b32.xlu1 %v7790_v60, %s7858_s8  ;;  %v7066_v60 = vld [vmem:[%s7921_s22 + $0x3c] sm:$0xf]  ;;  %v4690_v21 = vsel %vm7933_vm2, %v9657_v47, %v9599_v9  ;;  %v2810_v45 = vor.u32 %v2809_v61, %v2806_v53  ;;  %v2625_v4 = vshrl.u32 %v7067_v29, 16  ;;  %v2825_v27 = vrot.slane %v2823_v16, 5  ;;  %v7793_v16 = vld [vmem:[%s8609_s5 + $0x24] sm:$0xff]  }
 0x15b   : > { %6108 = vrot.lane.b32.xlu0 %v9539_v20, %s7865_s19  ;;  %v4892_v20 = vsel %vm7933_vm2, %v9618_v39, %v9620_v19  ;;  %v2612_v62 = vshrl.u32 %v7066_v60, 16  ;;  %v2615_v10 = vshll.u32 %v7066_v60, 16  ;;  %v2820_v9 = vor.u32 %v2819_v35, %v2815_v2  ;;  %v7511_v61 = vld [vmem:[%s8609_s5 + $0x30] sm:$0xf] }
 0x15c   : > { %v2441_v18 = vpop.permute.xlu1 %2440  ;;  %v9703_v34 = vsel %vm8054_vm5, %v5296_v30, %v5297_v11  ;;  %v2811_v41 = vrot.slane %v2810_v45, 4  ;;  %v9705_v63 = vrot.slane %v2621_v42, 5  ;;  %v4700_v58 = vsel %vm7933_vm2, %v4695_v56, %v9659_v50  ;;  %v9729_v30 = vld [vmem:[%s7921_s22 + $0x3c] sm:$0xe]  ;;  %v7535_v56 = vld [vmem:[%s8609_s5 + $0x90] sm:$0xf] }
 0x15d   : > { %v2435_v55 = vpop.permute.xlu0 %2434  ;;  %2482 = vst.msk [vmem:[#allocation2 + $0x38] sm:$0xff] %vm2474_vm12, %v2441_v18  ;;  %v2614_v5 = vrot.slane %v2612_v62, 4  ;;  %v2617_v49 = vrot.slane %v2615_v10, 5  ;;  %v2821_v59 = vrot.slane %v2820_v9, 4  ;;  %v9716_v11 = vsel %vm8054_vm5, %v7427_v32, %v5238_v23  ;;  %v7792_v23 = vld [vmem:[%s8609_s5 + $0x84] sm:$0xff]  }
 0x15e   : > { %2479 = vst.msk [vmem:[#allocation2 + $0x20] sm:$0xff] %vm2474_vm12, %v2435_v55  ;;  %6445 = vrot.lane.b32.xlu1 %v7642_v7, %s7866_s20  ;;  %v9693_v7 = vld [vmem:[%s7921_s22 + $0x9c] sm:$0xe]  ;;  %v9720_v3 = vsel %vm8054_vm5, %v5240_v6, %v5241_v36  ;;  %v2816_v50 = vsel %vm7933_vm2, %v2811_v41, %v2815_v2  ;;  %v9726_v55 = vld [vmem:[%s7921_s22 + $0xa4] sm:$0x1]  ;;  %v7371_v48 = vcombine.low %v4882_v51, %v4892_v20  ;;  %v7172_v44 = vrot.slane %v9729_v30, 9 }
 0x15f   : > { %3475 = vrot.lane.b32.xlu0 %v7791_v40, %s7858_s8  ;;  %v7155_v40 = vld [vmem:[%s7921_s22 + $0xa0] sm:$0xf]  ;;  %v2618_v31 = vor.u32 %v2617_v49, %v2614_v5  ;;  %v2826_v32 = vsel %vm7933_vm2, %v2821_v59, %v2825_v27  ;;  %v7180_v22 = vrot.slane %v9693_v7, 9  ;;  %v9758_v15 = vcombine.low %v4690_v21, %v4700_v58  ;;  %v9763_v6 = vld [vmem:[%s7921_s22 + $0x44] sm:$0x1] }
 0x160   : > { %v2445_v24 = vpop.permute.xlu1 %2444  ;;  %v3211_v60 = vrot.slane %v7155_v40, 5  ;;  %v7443_v39 = vcombine.low %v9716_v11, %v9720_v3  ;;  %v3214_v14 = vrot.slane %v9726_v55, 5  ;;  %v7537_v51 = vld [vmem:[%s8609_s5 + $0x98] sm:$0x1]  ;;  %v9774_v33 = vcombine.low %v2816_v50, %v2826_v32  ;;  %v7512_v45 = vld [vmem:[%s8609_s5 + $0x34] sm:$0xf] }
 0x161   : > { %v2439_v17 = vpop.permute.xlu0 %2438  ;;  %2484 = vst.msk [vmem:[#allocation2 + $0x48] sm:$0xff] %vm2474_vm12, %v2445_v24  ;;  %v9742_v43 = vrot.slane %v2618_v31, 4  ;;  %v3155_v29 = vrot.slane %v9732_v38, 5  ;;  %v5915_v21 = vshrl.u32 %v7535_v56, 16  ;;  %v5918_v53 = vshll.u32 %v7535_v56, 16 }
 0x162   : > { %2481 = vst.msk [vmem:[#allocation2 + $0x30] sm:$0xff] %vm2474_vm12, %v2439_v17  ;;  %4036 = vrot.lane.b32.xlu1 %v7227_v25, %s7859_s9  ;;  %v2627_v25 = vrot.slane %v2625_v4, 4  ;;  %v9789_v2 = vsel %vm8054_vm5, %v7180_v22, %v3211_v60  ;;  %v3213_v35 = vrot.slane %v3211_v60, 4  ;;  %v3158_v4 = vrot.slane %v9763_v6, 5  ;;  %v7513_v9 = vld [vmem:[%s8609_s5 + $0x38] sm:$0x1] }
 0x163   : > { %6429 = vrot.lane.b32.xlu0 %v7634_v1, %s7866_s20  ;;  %v2631_v1 = vshll.u32 %v7068_v46, 16  ;;  %v2624_v46 = vsel %vm7933_vm2, %v9742_v43, %v9705_v63  ;;  %v5917_v62 = vrot.slane %v5915_v21, 4  ;;  %v5920_v10 = vrot.slane %v5918_v53, 5  ;;  %v7600_v31 = vld [vmem:[%s8609_s5 + $0x94] sm:$0xf] }
 0x164   : > { %v2449_v47 = vpop.permute.xlu1 %2448  ;;  %v2628_v37 = vor.u32 %v2627_v25, %v9705_v63  ;;  %v5934_v7 = vshll.u32 %v7537_v51, 16  ;;  %v5723_v27 = vshrl.u32 %v7511_v61, 16  ;;  %v5726_v5 = vshll.u32 %v7511_v61, 16  ;;  %v7599_v25 = vld [vmem:[%s8609_s5 + $0x90] sm:$0xe] }
 0x165   : > { %v2443_v18 = vpop.permute.xlu0 %2442  ;;  %2486 = vst.msk [vmem:[#allocation2 + $0x58] sm:$0xff] %vm2474_vm12, %v2449_v47  ;;  %v9768_v19 = vrot.slane %v2631_v1, 5  ;;  %v3157_v41 = vrot.slane %v3155_v29, 4  ;;  %v5921_v13 = vor.u32 %v5920_v10, %v5917_v62  ;;  %v5732_v59 = vshll.u32 %v7512_v45, 16  ;;  %v7575_v55 = vld [vmem:[%s8609_s5 + $0x30] sm:$0xe] }
 0x166   : > { %2483 = vst.msk [vmem:[#allocation2 + $0x40] sm:$0xff] %vm2474_vm12, %v2443_v18  ;;  %4357 = vrot.lane.b32.xlu1 %v7259_v8, %s7860_s10  ;;  %v7451_v8 = vcombine.low %v9677_v12, %v9703_v34  ;;  %v9785_v24 = vrot.slane %v2628_v37, 4  ;;  %v5725_v47 = vrot.slane %v5723_v27, 4  ;;  %v5728_v58 = vrot.slane %v5726_v5, 5  ;;  %v7576_v60 = vld [vmem:[%s8609_s5 + $0x34] sm:$0xf] }
 0x167   : > { %4020 = vrot.lane.b32.xlu0 %v9653_v57, %s7859_s9  ;;  %v7536_v57 = vld [vmem:[%s8609_s5 + $0x94] sm:$0xf]  ;;  %v5922_v1 = vrot.slane %v5921_v13, 4  ;;  %v5936_v50 = vrot.slane %v5934_v7, 5  ;;  %v5736_v37 = vshrl.u32 %v7512_v45, 16  ;;  %v9811_v38 = vsel %vm8054_vm5, %v3213_v35, %v3214_v14 }
 0x168   : > { %v2453_v52 = vpop.permute.xlu1 %2452  ;;  %v5924_v17 = vshll.u32 %v7536_v57, 16  ;;  %v5928_v36 = vshrl.u32 %v7536_v57, 16  ;;  %v2634_v40 = vsel %vm7933_vm2, %v9785_v24, %v9768_v19  ;;  %v9813_v32 = vrot.slane %v5732_v59, 5  ;;  %v7601_v19 = vld [vmem:[%s8609_s5 + $0x98] sm:$0x1] }
 0x169   : > { %v2447_v20 = vpop.permute.xlu0 %2446  ;;  %2488 = vst.msk [vmem:[#allocation2 + $0x68] sm:$0xff] %vm2474_vm12, %v2453_v52  ;;  %v5742_v22 = vshll.u32 %v7513_v9, 16  ;;  %v9823_v6 = vsel %vm8054_vm5, %v3157_v41, %v3158_v4  ;;  %v5738_v52 = vrot.slane %v5736_v37, 4  ;;  %v7627_v51 = vrot.slane %v7599_v25, 9  ;;  %v3569_v53 = vld [vmem:[%s8609_s5 + $0x84] sm:$0xf] }
 0x16a   : > { %2485 = vst.msk [vmem:[#allocation2 + $0x50] sm:$0xff] %vm2474_vm12, %v2447_v20  ;;  %4536 = vrot.lane.b32.xlu1 %v7792_v23, %s7861_s11  ;;  %v5926_v54 = vrot.slane %v5924_v17, 5  ;;  %v5729_v23 = vor.u32 %v5728_v58, %v5725_v47  ;;  %v6339_v20 = vrot.slane %v7600_v31, 5  ;;  %v7619_v34 = vrot.slane %v7575_v55, 9  ;;  %v3570_v62 = vld [vmem:[%s8609_s5 + $0x88] sm:$0xf] }
 0x16b   : > { %4341 = vrot.lane.b32.xlu0 %v7251_v28, %s7860_s10  ;;  %v5930_v28 = vrot.slane %v5928_v36, 4  ;;  %v5739_v12 = vor.u32 %v5738_v52, %v9813_v32  ;;  %v9849_v24 = vrot.slane %v5742_v22, 5  ;;  %v7794_v17 = vld [vmem:[%s8609_s5 + $0x90] sm:$0xff]   ;;  %v7196_v36 = vcombine.low %v9789_v2, %v9811_v38  ;;  %v3571_v2 = vld [vmem:[%s8609_s5 + $0x8c] sm:$0x1] }
 0x16c   : > { %v2457_v42 = vpop.permute.xlu1 %2456  ;;  %v5927_v14 = vsel %vm7933_vm2, %v5922_v1, %v5926_v54  ;;  %v6341_v35 = vrot.slane %v6339_v20, 4  ;;  %v3849_v4 = vshrl.u32 %v3569_v53, 16  ;;  %v3852_v7 = vshll.u32 %v3569_v53, 16  ;;  %v3545_v9 = vld [vmem:[%s8609_s5 + $0x24] sm:$0xf] }
 0x16d   : > { %v2451_v49 = vpop.permute.xlu0 %2450  ;;  %2490 = vst.msk [vmem:[#allocation2 + $0x78] sm:$0xff] %vm2474_vm12, %v2457_v42  ;;  %v5931_v18 = vor.u32 %v5930_v28, %v5926_v54  ;;  %v9860_v63 = vrot.slane %v5739_v12, 4  ;;  %v3546_v41 = vld [vmem:[%s8609_s5 + $0x28] sm:$0xf]  ;;  %v3547_v28 = vld [vmem:[%s8609_s5 + $0x2c] sm:$0x1] }
 0x16e   : > { %2487 = vst.msk [vmem:[#allocation2 + $0x60] sm:$0xff] %vm2474_vm12, %v2451_v49  ;;  %5081 = vrot.lane.b32.xlu1 %v7371_v48, %s7862_s12  ;;  %v9819_v48 = vsel %vm8054_vm5, %v7172_v44, %v3155_v29  ;;  %v9833_v44 = vrot.slane %v5729_v23, 4  ;;  %v9836_v29 = vld [vmem:[%s8609_s5 + $0x38] sm:$0x1]  ;;  %v3858_v49 = vshll.u32 %v3570_v62, 16  ;;  %v3851_v3 = vrot.slane %v3849_v4, 4 }
 0x16f   : > { %4520 = vrot.lane.b32.xlu0 %v7793_v16, %s7861_s11  ;;  %v5932_v57 = vrot.slane %v5931_v18, 4  ;;  %v7108_v16 = vcombine.low %v2624_v46, %v2634_v40  ;;  %v7188_v45 = vcombine.low %v9819_v48, %v9823_v6  ;;  %v9871_v46 = vsel %vm8054_vm5, %v7627_v51, %v6339_v20  ;;  %v9898_v31 = vld [vmem:[%s8609_s5 + $0x84] sm:$0xe]  ;;  %v4115_v55 = vld [vmem:[%s8609_s5 + $0x88] sm:$0xf] }
 0x170   : > { %v2988_v30 = vpop.permute.xlu1 %2987  ;;  %v5735_v43 = vsel %vm7933_vm2, %v9833_v44, %v9813_v32  ;;  %v6286_v5 = vrot.slane %v9836_v29, 5  ;;  %v5745_v54 = vsel %vm7933_vm2, %v9860_v63, %v9849_v24  ;;  %v9895_v40 = vrot.slane %v3858_v49, 5  ;;  %v4091_v53 = vld [vmem:[%s8609_s5 + $0x28] sm:$0xf]  ;;  %v7348_v4 = vld [vmem:[%s8609_s5 + $0x98] sm:$0x1] }
 0x171   : > { %v2455_v56 = vpop.permute.xlu0 %2454  ;;  %3028 = vst.msk [vmem:[#allocation2 + $0x40] sm:$0xff] %vm3019_vm13, %v2988_v30  ;;  %v5937_v21 = vsel %vm7933_vm2, %v5932_v57, %v5936_v50  ;;  %v3862_v47 = vshrl.u32 %v3570_v62, 16  ;;  %v3868_v58 = vshll.u32 %v3571_v2, 16  ;;  %v3657_v59 = vshrl.u32 %v3545_v9, 16  ;;  %v7795_v30 = vld [vmem:[%s8609_s5 + $0x30] sm:$0xff]   ;;  %v7796_v44 = vld [vmem:[%s8609_s5 + $0x84] sm:$0xff]  }
 0x172   : > { %2489 = vst.msk [vmem:[#allocation2 + $0x70] sm:$0xff] %vm2474_vm12, %v2455_v56  ;;  %5402 = vrot.lane.b32.xlu1 %v7451_v8, %s7863_s13  ;;  %v6283_v8 = vrot.slane %v7576_v60, 5  ;;  %v9858_v42 = vcombine.low %v5927_v14, %v5937_v21  ;;  %v3660_v18 = vshll.u32 %v3545_v9, 16  ;;  %v3666_v50 = vshll.u32 %v3546_v41, 16  ;;  %v4116_v56 = vld [vmem:[%s8609_s5 + $0x8c] sm:$0x1] }
 0x173   : > { %5065 = vrot.lane.b32.xlu0 %v9758_v15, %s7862_s12  ;;  %v6342_v15 = vrot.slane %v7601_v19, 5  ;;  %v3670_v37 = vshrl.u32 %v3546_v41, 16  ;;  %v3864_v23 = vrot.slane %v3862_v47, 4  ;;  %v3659_v22 = vrot.slane %v3657_v59, 4  ;;  %v7346_v62 = vld [vmem:[%s8609_s5 + $0x90] sm:$0xf] }
 0x174   : > { %v3309_v61 = vpop.permute.xlu1 %3308  ;;  %v6285_v27 = vrot.slane %v6283_v8, 4  ;;  %v3676_v60 = vshll.u32 %v3547_v28, 16  ;;  %v3662_v19 = vrot.slane %v3660_v18, 5  ;;  %v9908_v14 = vrot.slane %v3666_v50, 5  ;;  %v7347_v2 = vld [vmem:[%s8609_s5 + $0x94] sm:$0xf] }
 0x175   : > { %v2972_v10 = vpop.permute.xlu0 %2971  ;;  %3349 = vst.msk [vmem:[#allocation2 + $0x40] sm:$0xff] %vm3340_vm14, %v3309_v61  ;;  %v9891_v11 = vsel %vm8054_vm5, %v6341_v35, %v6342_v15  ;;  %v3672_v51 = vrot.slane %v3670_v37, 4  ;;  %v3865_v21 = vor.u32 %v3864_v23, %v9895_v40  ;;  %v3870_v12 = vrot.slane %v3868_v58, 5  ;;  %v4092_v15 = vld [vmem:[%s8609_s5 + $0x2c] sm:$0x1] }
 0x176   : > { %3020 = vst.msk [vmem:[#allocation2] sm:$0xff] %vm3019_vm13, %v2972_v10  ;;  %2993 = vrot.lane.b32.xlu1 %v9774_v33, %s7856_s6  ;;  %v9881_v33 = vsel %vm8054_vm5, %v7619_v34, %v6283_v8  ;;  %v7643_v38 = vcombine.low %v9871_v46, %v9891_v11  ;;  %v9913_v29 = vsel %vm8054_vm5, %v6285_v27, %v6286_v5  ;;  %v4256_v34 = vrot.slane %v4115_v55, 5  ;;  %v4090_v8 = vld [vmem:[%s8609_s5 + $0x24] sm:$0xe]  ;;  %v7322_v41 = vld [vmem:[%s8609_s5 + $0x30] sm:$0xf] }
 0x177   : > { %5386 = vrot.lane.b32.xlu0 %v7443_v39, %s7863_s13  ;;  %v3854_v39 = vrot.slane %v3852_v7, 5  ;;  %v3663_v61 = vor.u32 %v3662_v19, %v3659_v22  ;;  %v7244_v24 = vrot.slane %v9898_v31, 9  ;;  %v4259_v35 = vrot.slane %v4116_v56, 5  ;;  %v7324_v6 = vld [vmem:[%s8609_s5 + $0x38] sm:$0x1]  ;;  %v7797_v56 = vld [vmem:[%s8609_s5 + $0x24] sm:$0xff]  }
 0x178   : > { %v3488_v13 = vpop.permute.xlu1 %3487  ;;  %v9928_v63 = vrot.slane %v3676_v60, 5  ;;  %v7555_v9 = vcombine.low %v5735_v43, %v5745_v54  ;;  %v4200_v49 = vrot.slane %v4091_v53, 5  ;;  %v4894_v32 = vshrl.u32 %v7346_v62, 16  ;;  %v7410_v60 = vld [vmem:[%s8609_s5 + $0x90] sm:$0xe] }
 0x179   : > { %v3293_v25 = vpop.permute.xlu0 %3292  ;;  %3528 = vst.msk [vmem:[#allocation2 + $0x40] sm:$0xff] %vm3519_vm15, %v3488_v13  ;;  %v3855_v1 = vor.u32 %v3854_v39, %v3851_v3  ;;  %v9937_v27 = vrot.slane %v3663_v61, 4  ;;  %v9943_v13 = vld [vmem:[%s8609_s5 + $0x34] sm:$0xf]  ;;  %v7635_v39 = vcombine.low %v9881_v33, %v9913_v29  ;;  %v9958_v54 = vsel %vm8054_vm5, %v7244_v24, %v4256_v34 }
 0x17a   : > { %3341 = vst.msk [vmem:[#allocation2] sm:$0xff] %vm3340_vm14, %v3293_v25  ;;  %5581 = vrot.lane.b32.xlu1 %v7794_v17, %s7864_s14  ;;  %v3866_v17 = vrot.slane %v3865_v21, 4  ;;  %v7236_v25 = vrot.slane %v4090_v8, 9  ;;  %v4203_v47 = vrot.slane %v4092_v15, 5  ;;  %v4202_v59 = vrot.slane %v4200_v49, 4 }
 0x17b   : > { %2977 = vrot.lane.b32.xlu0 %v7108_v16, %s7856_s6  ;;  %v3856_v52 = vrot.slane %v3855_v1, 4  ;;  %v3673_v16 = vor.u32 %v3672_v51, %v9908_v14  ;;  %v4896_v31 = vrot.slane %v4894_v32, 4  ;;  %v4897_v18 = vshll.u32 %v7346_v62, 16  ;;  %v7411_v51 = vld [vmem:[%s8609_s5 + $0x94] sm:$0xf] }
 0x17c   : > { %v4033_v57 = vpop.permute.xlu1 %4032  ;;  %v3871_v28 = vsel %vm7933_vm2, %v3866_v17, %v3870_v12  ;;  %v4903_v50 = vshll.u32 %v7347_v2, 16  ;;  %v4907_v37 = vshrl.u32 %v7347_v2, 16  ;;  %v4913_v48 = vshll.u32 %v7348_v4, 16  ;;  %v7412_v8 = vld [vmem:[%s8609_s5 + $0x98] sm:$0x1] }
 0x17d   : > { %v3472_v20 = vpop.permute.xlu0 %3471  ;;  %4073 = vst.msk [vmem:[#allocation2 + $0x40] sm:$0xff] %vm4064_vm0, %v4033_v57  ;;  %v3861_v10 = vsel %vm7933_vm2, %v3856_v52, %v9895_v40  ;;  %v9939_v5 = vrot.slane %v3673_v16, 4  ;;  %v9980_v55 = vsel %vm8054_vm5, %v7236_v25, %v4200_v49  ;;  %v4705_v23 = vshll.u32 %v7322_v41, 16  ;;  %v7386_v15 = vld [vmem:[%s8609_s5 + $0x30] sm:$0xe] }
 0x17e   : > { %3520 = vst.msk [vmem:[#allocation2] sm:$0xff] %vm3519_vm15, %v3472_v20  ;;  %3314 = vrot.lane.b32.xlu1 %v7196_v36, %s7857_s7  ;;  %v4258_v36 = vrot.slane %v4256_v34, 4  ;;  %v9954_v43 = vcombine.low %v3861_v10, %v3871_v28  ;;  %v4711_v22 = vshll.u32 %v9943_v13, 16  ;;  %v9989_v57 = vsel %vm8054_vm5, %v4202_v59, %v4203_v47  ;;  %v7387_v62 = vld [vmem:[%s8609_s5 + $0x34] sm:$0xf] }
 0x17f   : > { %5565 = vrot.lane.b32.xlu0 %v7795_v30, %s7864_s14  ;;  %v3679_v58 = vsel %vm7933_vm2, %v9939_v5, %v9928_v63  ;;  %v4702_v30 = vshrl.u32 %v7322_v41, 16  ;;  %v4899_v52 = vrot.slane %v4897_v18, 5  ;;  %v4905_v19 = vrot.slane %v4903_v50, 5  ;;  %v7388_v4 = vld [vmem:[%s8609_s5 + $0x38] sm:$0x1] }
 0x180   : > { %v4354_v7 = vpop.permute.xlu1 %4353  ;;  %v9962_v40 = vsel %vm8054_vm5, %v4258_v36, %v4259_v35  ;;  %v4915_v20 = vrot.slane %v4913_v48, 5  ;;  %v4707_v12 = vrot.slane %v4705_v23, 5  ;;  %v9993_v34 = vrot.slane %v4711_v22, 5  ;;  %v7094_v41 = vld [vmem:[%s7921_s22 + $0xac] sm:$0xf] }
 0x181   : > { %v4017_v3 = vpop.permute.xlu0 %4016  ;;  %4394 = vst.msk [vmem:[#allocation2 + $0x40] sm:$0xff] %vm4385_vm1, %v4354_v7  ;;  %v4704_v21 = vrot.slane %v4702_v30, 4  ;;  %v4900_v61 = vor.u32 %v4899_v52, %v4896_v31  ;;  %v4715_v24 = vshrl.u32 %v9943_v13, 16  ;;  %v4721_v35 = vshll.u32 %v7324_v6, 16  ;;  %v7093_v7 = vld [vmem:[%s7921_s22 + $0xa8] sm:$0xf] }
 0x182   : > { %4065 = vst.msk [vmem:[#allocation2] sm:$0xff] %vm4064_vm0, %v4017_v3  ;;  %6126 = vrot.lane.b32.xlu1 %v9858_v42, %s7865_s19  ;;  %v3669_v42 = vsel %vm7933_vm2, %v9937_v27, %v9908_v14  ;;  %v4909_v14 = vrot.slane %v4907_v37, 4  ;;  %v7260_v17 = vcombine.low %v9958_v54, %v9962_v40  ;;  %v7436_v36 = vrot.slane %v7410_v60, 9  ;;  %v7095_v32 = vld [vmem:[%s7921_s22 + $0xb0] sm:$0x1] }
 0x183   : > { %3298 = vrot.lane.b32.xlu0 %v7188_v45, %s7857_s7  ;;  %v4708_v63 = vor.u32 %v4707_v12, %v4704_v21  ;;  %v5301_v2 = vrot.slane %v7411_v51, 5  ;;  %v4901_v27 = vrot.slane %v4900_v61, 4  ;;  %v4717_v49 = vrot.slane %v4715_v24, 4  ;;  %v7070_v52 = vld [vmem:[%s7921_s22 + $0x4c] sm:$0xf] }
 0x184   : > { %v4533_v1 = vpop.permute.xlu1 %4532  ;;  %v4910_v16 = vor.u32 %v4909_v14, %v4905_v19  ;;  %v7252_v13 = vcombine.low %v9980_v55, %v9989_v57  ;;  %v5304_v25 = vrot.slane %v7412_v8, 5  ;;  %v4723_v54 = vrot.slane %v4721_v35, 5  ;;  %v7071_v51 = vld [vmem:[%s7921_s22 + $0x50] sm:$0x1] }
 0x185   : > { %v4338_v45 = vpop.permute.xlu0 %4337  ;;  %4573 = vst.msk [vmem:[#allocation2 + $0x40] sm:$0xff] %vm4564_vm3, %v4533_v1  ;;  %v4709_v3 = vrot.slane %v4708_v63, 4  ;;  %v5303_v28 = vrot.slane %v5301_v2, 4  ;;  %v4906_v46 = vsel %vm7933_vm2, %v4901_v27, %v4905_v19  ;;  %v5245_v59 = vrot.slane %v7387_v62, 5 }
 0x186   : > { %4386 = vst.msk [vmem:[#allocation2] sm:$0xff] %vm4385_vm1, %v4338_v45  ;;  %3493 = vrot.lane.b32.xlu1 %v7796_v44, %s7858_s8  ;;  %v4911_v5 = vrot.slane %v4910_v16, 4  ;;  %v5248_v18 = vrot.slane %v7388_v4, 5  ;;  %v2828_v50 = vshrl.u32 %v7093_v7, 16  ;;  %v2837_v6 = vshll.u32 %v7094_v41, 16 }
 0x187   : > { %6110 = vrot.lane.b32.xlu0 %v7555_v9, %s7865_s19  ;;  %v7220_v9 = vcombine.low %v3669_v42, %v3679_v58  ;;  %v10024_v42 = vsel %vm8054_vm5, %v7436_v36, %v5301_v2  ;;  %v7428_v58 = vrot.slane %v7386_v15, 9  ;;  %v10031_v1 = vsel %vm8054_vm5, %v5303_v28, %v5304_v25  ;;  %v7069_v45 = vld [vmem:[%s7921_s22 + $0x48] sm:$0xf]  ;;  %v7158_v15 = vld [vmem:[%s7921_s22 + $0xac] sm:$0xf] }
 0x188   : > { %v5078_v53 = vpop.permute.xlu1 %5077  ;;  %v4916_v11 = vsel %vm7933_vm2, %v4911_v5, %v4915_v20  ;;  %v4714_v37 = vsel %vm7933_vm2, %v4709_v3, %v9993_v34  ;;  %v5247_v48 = vrot.slane %v5245_v59, 4  ;;  %v2830_v22 = vrot.slane %v2828_v50, 4  ;;  %v7798_v20 = vld [vmem:[%s8609_s5 + $0x90] sm:$0xff]  }
 0x189   : > { %v4517_v10 = vpop.permute.xlu0 %4516  ;;  %5118 = vst.msk [vmem:[#allocation2 + $0x40] sm:$0xff] %vm5109_vm4, %v5078_v53  ;;  %v10020_v47 = vcombine.low %v4906_v46, %v4916_v11  ;;  %v2841_v60 = vshrl.u32 %v7094_v41, 16  ;;  %v7452_v29 = vcombine.low %v10024_v42, %v10031_v1  ;;  %v2839_v14 = vrot.slane %v2837_v6, 5  ;;  %v7157_v53 = vld [vmem:[%s7921_s22 + $0xa8] sm:$0xe] }
 0x18a   : > { %4565 = vst.msk [vmem:[#allocation2] sm:$0xff] %vm4564_vm3, %v4517_v10  ;;  %6447 = vrot.lane.b32.xlu1 %v7643_v38, %s7866_s20  ;;  %v4718_v38 = vor.u32 %v4717_v49, %v9993_v34  ;;  %v10059_v12 = vsel %vm8054_vm5, %v5247_v48, %v5248_v18  ;;  %v2636_v8 = vshrl.u32 %v7069_v45, 16  ;;  %v2639_v16 = vshll.u32 %v7069_v45, 16  ;;  %v7159_v2 = vld [vmem:[%s7921_s22 + $0xb0] sm:$0x1] }
 0x18b   : > { %3477 = vrot.lane.b32.xlu0 %v7797_v56, %s7858_s8  ;;  %v2847_v56 = vshll.u32 %v7095_v32, 16  ;;  %v2843_v34 = vrot.slane %v2841_v60, 4  ;;  %v2645_v24 = vshll.u32 %v7070_v52, 16  ;;  %v2649_v35 = vshrl.u32 %v7070_v52, 16  ;;  %v7133_v49 = vld [vmem:[%s7921_s22 + $0x48] sm:$0xe] }
 0x18c   : > { %v5399_v44 = vpop.permute.xlu1 %5398  ;;  %v4719_v31 = vrot.slane %v4718_v38, 4  ;;  %v2638_v63 = vrot.slane %v2636_v8, 4  ;;  %v2655_v36 = vshll.u32 %v7071_v51, 16  ;;  %v2641_v27 = vrot.slane %v2639_v16, 5  ;;  %v7134_v32 = vld [vmem:[%s7921_s22 + $0x4c] sm:$0xf] }
 0x18d   : > { %v5062_v40 = vpop.permute.xlu0 %5061  ;;  %5439 = vst.msk [vmem:[#allocation2 + $0x40] sm:$0xff] %vm5430_vm6, %v5399_v44  ;;  %v2844_v10 = vor.u32 %v2843_v34, %v2839_v14  ;;  %v2651_v5 = vrot.slane %v2649_v35, 4  ;;  %v7181_v28 = vrot.slane %v7157_v53, 9  ;;  %v3218_v25 = vrot.slane %v7158_v15, 5  ;;  %v7799_v44 = vld [vmem:[%s8609_s5 + $0x30] sm:$0xff]  }
 0x18e   : > { %5110 = vst.msk [vmem:[#allocation2] sm:$0xff] %vm5109_vm4, %v5062_v40  ;;  %4038 = vrot.lane.b32.xlu1 %v9954_v43, %s7859_s9  ;;  %v2831_v43 = vshll.u32 %v7093_v7, 16  ;;  %v4724_v23 = vsel %vm7933_vm2, %v4719_v31, %v4723_v54  ;;  %v2657_v3 = vrot.slane %v2655_v36, 5  ;;  %v2642_v11 = vor.u32 %v2641_v27, %v2638_v63  ;;  %v7135_v40 = vld [vmem:[%s7921_s22 + $0x50] sm:$0x1] }
 0x18f   : > { %6431 = vrot.lane.b32.xlu0 %v7635_v39, %s7866_s20  ;;  %v10049_v39 = vsel %vm8054_vm5, %v7428_v58, %v5245_v59  ;;  %v10055_v21 = vcombine.low %v4714_v37, %v4724_v23  ;;  %v2845_v41 = vrot.slane %v2844_v10, 4  ;;  %v3221_v54 = vrot.slane %v7159_v2, 5  ;;  %v7538_v58 = vld [vmem:[%s8609_s5 + $0x9c] sm:$0xf]  ;;  %v7539_v6 = vld [vmem:[%s8609_s5 + $0xa0] sm:$0xf] }
 0x190   : > { %v2990_v30 = vpop.permute.xlu1 %2989  ;;  %v2833_v19 = vrot.slane %v2831_v43, 5  ;;  %v10083_v18 = vsel %vm8054_vm5, %v7181_v28, %v3218_v25  ;;  %v3220_v55 = vrot.slane %v3218_v25, 4  ;;  %v7173_v57 = vrot.slane %v7133_v49, 9  ;;  %v7602_v16 = vld [vmem:[%s8609_s5 + $0x9c] sm:$0xe] }
 0x191   : > { %v5383_v33 = vpop.permute.xlu0 %5382  ;;  %3029 = vst.msk [vmem:[#allocation2 + $0x48] sm:$0xff] %vm3019_vm13, %v2990_v30  ;;  %v7444_v50 = vcombine.low %v10049_v39, %v10059_v12  ;;  %v2643_v37 = vrot.slane %v2642_v11, 4  ;;  %v3162_v43 = vrot.slane %v7134_v32, 5  ;;  %vm6475_vm9 = vcmask 884544   ;;  %v7604_v42 = vld [vmem:[%s8609_s5 + $0xa4] sm:$0x1] }
 0x192   : > { %5431 = vst.msk [vmem:[#allocation2] sm:$0xff] %vm5430_vm6, %v5383_v33  ;;  %4359 = vrot.lane.b32.xlu1 %v7260_v17, %s7860_s10  ;;  %v2834_v61 = vor.u32 %v2833_v19, %v2830_v22  ;;  %v2849_v17 = vrot.slane %v2847_v56, 5  ;;  %v10094_v30 = vsel %vm8054_vm5, %v3220_v55, %v3221_v54  ;;  %v3165_v23 = vrot.slane %v7135_v40, 5  ;;  %v7540_v22 = vld [vmem:[%s8609_s5 + $0xa4] sm:$0x1] }
 0x193   : > { %4022 = vrot.lane.b32.xlu0 %v7220_v9, %s7859_s9  ;;  %v2647_v9 = vrot.slane %v2645_v24, 5  ;;  %v5939_v60 = vshrl.u32 %v7538_v58, 16  ;;  %v7514_v56 = vld [vmem:[%s8609_s5 + $0x3c] sm:$0xf]  ;;  %v7197_v33 = vcombine.low %v10083_v18, %v10094_v30  ;;  %v10107_v19 = vsel %vm8054_vm5, %v7173_v57, %v3162_v43  ;;  %v7579_v11 = vld [vmem:[%s8609_s5 + $0x40] sm:$0xf] }
 0x194   : > { %v5578_v62 = vpop.permute.xlu1 %5577  ;;  %v2835_v7 = vrot.slane %v2834_v61, 4  ;;  %v2850_v31 = vsel %vm7933_vm2, %v2845_v41, %v2849_v17  ;;  %v3164_v34 = vrot.slane %v3162_v43, 4  ;;  %v5942_v53 = vshll.u32 %v7538_v58, 16  ;;  %v7516_v61 = vld [vmem:[%s8609_s5 + $0x44] sm:$0x1] }
 0x195   : > { %v2974_v4 = vpop.permute.xlu0 %2973  ;;  %5618 = vst.msk [vmem:[#allocation2 + $0x40] sm:$0xff] %vm5609_vm7, %v5578_v62  ;;  %v2652_v38 = vor.u32 %v2651_v5, %v2647_v9  ;;  %v2648_v52 = vsel %vm7933_vm2, %v2643_v37, %v2647_v9  ;;  %v5941_v8 = vrot.slane %v5939_v60, 4  ;;  %v5948_v35 = vshll.u32 %v7539_v6, 16  ;;  %v7603_v17 = vld [vmem:[%s8609_s5 + $0xa0] sm:$0xf] }
 0x196   : > { %3021 = vst.msk [vmem:[#allocation2 + $0x8] sm:$0xff] %vm3019_vm13, %v2974_v4  ;;  %4538 = vrot.lane.b32.xlu1 %v7798_v20, %s7861_s11  ;;  %v2840_v46 = vsel %vm7933_vm2, %v2835_v7, %v2839_v14  ;;  %v7515_v14 = vld [vmem:[%s8609_s5 + $0x40] sm:$0xf]  ;;  %v5952_v15 = vshrl.u32 %v7539_v6, 16  ;;  %v5958_v62 = vshll.u32 %v7540_v22, 16  ;;  %v5747_v10 = vshrl.u32 %v7514_v56, 16 }
 0x197   : > { %4343 = vrot.lane.b32.xlu0 %v7252_v13, %s7860_s10  ;;  %v2653_v48 = vrot.slane %v2652_v38, 4  ;;  %v7117_v45 = vcombine.low %v2840_v46, %v2850_v31  ;;  %v10123_v63 = vsel %vm8054_vm5, %v3164_v34, %v3165_v23  ;;  %v5944_v36 = vrot.slane %v5942_v53, 5  ;;  %v7578_v28 = vld [vmem:[%s8609_s5 + $0x3c] sm:$0xe]  ;;  %v7580_v31 = vld [vmem:[%s8609_s5 + $0x44] sm:$0x1] }
 0x198   : > { %v3311_v59 = vpop.permute.xlu1 %3310  ;;  %v5750_v2 = vshll.u32 %v7514_v56, 16  ;;  %v5756_v4 = vshll.u32 %v7515_v14, 16  ;;  %v7189_v7 = vcombine.low %v10107_v19, %v10123_v63  ;;  %v5950_v27 = vrot.slane %v5948_v35, 5  ;;  %v7800_v38 = vld [vmem:[%s8609_s5 + $0x9c] sm:$0xff]   ;;  %v3574_v34 = vld [vmem:[%s8609_s5 + $0x98] sm:$0x1] }
 0x199   : > { %v5562_v13 = vpop.permute.xlu0 %5561  ;;  %3350 = vst.msk [vmem:[#allocation2 + $0x48] sm:$0xff] %vm3340_vm14, %v3311_v59  ;;  %v5954_v9 = vrot.slane %v5952_v15, 4  ;;  %v5960_v5 = vrot.slane %v5958_v62, 5  ;;  %v5749_v49 = vrot.slane %v5747_v10, 4  ;;  %v5760_v32 = vshrl.u32 %v7515_v14, 16 }
 0x19a   : > { %5610 = vst.msk [vmem:[#allocation2] sm:$0xff] %vm5609_vm7, %v5562_v13  ;;  %5083 = vrot.lane.b32.xlu1 %v10020_v47, %s7862_s12  ;;  %v2658_v47 = vsel %vm7933_vm2, %v2653_v48, %v2657_v3  ;;  %v5752_v41 = vrot.slane %v5750_v2, 5  ;;  %v10130_v3 = vrot.slane %v5756_v4, 5  ;;  %v7628_v46 = vrot.slane %v7602_v16, 9  ;;  %v3572_v48 = vld [vmem:[%s8609_s5 + $0x90] sm:$0xf] }
 0x19b   : > { %4522 = vrot.lane.b32.xlu0 %v7799_v44, %s7861_s11  ;;  %v10110_v20 = vcombine.low %v2648_v52, %v2658_v47  ;;  %v5766_v44 = vshll.u32 %v7516_v61, 16  ;;  %vm6515_vm10 = vcmask 883712   ;;  %v6346_v58 = vrot.slane %v7603_v17, 5  ;;  %v3573_v52 = vld [vmem:[%s8609_s5 + $0x94] sm:$0xf]  ;;  %v7801_v61 = vld [vmem:[%s8609_s5 + $0x3c] sm:$0xff]  }
 0x19c   : > { %v6123_v51 = vpop.permute.xlu1 %6122  ;;  %v5753_v40 = vor.u32 %v5752_v41, %v5749_v49  ;;  %v6349_v59 = vrot.slane %v7604_v42, 5  ;;  %v5762_v57 = vrot.slane %v5760_v32, 4  ;;  %v7620_v37 = vrot.slane %v7578_v28, 9  ;;  %v3548_v53 = vld [vmem:[%s8609_s5 + $0x30] sm:$0xf]  ;;  %7671 = vmatprep.mubr.msk.bf16.mxu0 %vm6515_vm10, %v10955_v26 }
 0x19d   : > { %v3295_v24 = vpop.permute.xlu0 %3294  ;;  %6163 = vst.msk [vmem:[#allocation2 + $0x40] sm:$0xff] %vm6154_vm8, %v6123_v51  ;;  %v5768_v13 = vrot.slane %v5766_v44, 5  ;;  %v10148_v23 = vsel %vm8054_vm5, %v7628_v46, %v6346_v58  ;;  %v6348_v22 = vrot.slane %v6346_v58, 4  ;;  %v6290_v60 = vrot.slane %v7579_v11, 5  ;;  %v3550_v42 = vld [vmem:[%s8609_s5 + $0x38] sm:$0x1] }
 0x19e   : > { %3342 = vst.msk [vmem:[#allocation2 + $0x8] sm:$0xff] %vm3340_vm14, %v3295_v24  ;;  %5404 = vrot.lane.b32.xlu1 %v7452_v29, %s7863_s13  ;;  %v5945_v29 = vor.u32 %v5944_v36, %v5941_v8  ;;  %v6293_v56 = vrot.slane %v7580_v31, 5  ;;  %v3873_v8 = vshrl.u32 %v3572_v48, 16  ;;  %v3876_v17 = vshll.u32 %v3572_v48, 16  ;;  %v4117_v28 = vld [vmem:[%s8609_s5 + $0x90] sm:$0xe] }
 0x19f   : > { %5067 = vrot.lane.b32.xlu0 %v10055_v21, %s7862_s12  ;;  %v5955_v21 = vor.u32 %v5954_v9, %v5950_v27  ;;  %v10162_v51 = vsel %vm8054_vm5, %v6348_v22, %v6349_v59  ;;  %v10173_v35 = vsel %vm8054_vm5, %v7620_v37, %v6290_v60  ;;  %v6292_v15 = vrot.slane %v6290_v60, 4  ;;  %v4119_v11 = vld [vmem:[%s8609_s5 + $0x98] sm:$0x1]  ;;  %v4093_v18 = vld [vmem:[%s8609_s5 + $0x30] sm:$0xe] }
 0x1a0   : > { %v3490_v1 = vpop.permute.xlu1 %3489  ;;  %v5946_v54 = vrot.slane %v5945_v29, 4  ;;  %v7644_v24 = vcombine.low %v10148_v23, %v10162_v51  ;;  %v3875_v10 = vrot.slane %v3873_v8, 4  ;;  %v3882_v36 = vshll.u32 %v3573_v52, 16  ;;  %v4094_v59 = vld [vmem:[%s8609_s5 + $0x34] sm:$0xf] }
 0x1a1   : > { %v6107_v25 = vpop.permute.xlu0 %6106  ;;  %3529 = vst.msk [vmem:[#allocation2 + $0x48] sm:$0xff] %vm3519_vm15, %v3490_v1  ;;  %v5956_v55 = vrot.slane %v5955_v21, 4  ;;  %v3886_v2 = vshrl.u32 %v3573_v52, 16  ;;  %v3892_v9 = vshll.u32 %v3574_v34, 16  ;;  %v3681_v1 = vshrl.u32 %v3548_v53, 16 }
 0x1a2   : > { %6155 = vst.msk [vmem:[#allocation2] sm:$0xff] %vm6154_vm8, %v6107_v25  ;;  %2995 = vrot.lane.b32.xlu1 %v7117_v45, %s7856_s6  ;;  %v5951_v6 = vsel %vm7933_vm2, %v5946_v54, %v5950_v27  ;;  %v5754_v45 = vrot.slane %v5753_v40, 4  ;;  %v10180_v27 = vsel %vm8054_vm5, %v6292_v15, %v6293_v56  ;;  %v3878_v41 = vrot.slane %v3876_v17, 5  ;;  %v4118_v25 = vld [vmem:[%s8609_s5 + $0x94] sm:$0xf] }
 0x1a3   : > { %5388 = vrot.lane.b32.xlu0 %v7444_v50, %s7863_s13  ;;  %v5961_v12 = vsel %vm7933_vm2, %v5956_v55, %v5960_v5  ;;  %v5763_v50 = vor.u32 %v5762_v57, %v10130_v3  ;;  %v3549_v5 = vld [vmem:[%s8609_s5 + $0x34] sm:$0xf]  ;;  %v7636_v49 = vcombine.low %v10173_v35, %v10180_v27  ;;  %v3888_v21 = vrot.slane %v3886_v2, 4  ;;  %v4095_v31 = vld [vmem:[%s8609_s5 + $0x38] sm:$0x1] }
 0x1a4   : > { %v6444_v43 = vpop.permute.xlu1 %6443  ;;  %v7564_v47 = vcombine.low %v5951_v6, %v5961_v12  ;;  %v5759_v14 = vsel %vm7933_vm2, %v5754_v45, %v10130_v3  ;;  %v3884_v3 = vrot.slane %v3882_v36, 5  ;;  %v3894_v32 = vrot.slane %v3892_v9, 5  ;;  %v7802_v57 = vld [vmem:[%s8609_s5 + $0x90] sm:$0xff]  }
 0x1a5   : > { %v3474_v39 = vpop.permute.xlu0 %3473  ;;  %6484 = vst.msk [vmem:[#allocation2 + $0x40] sm:$0xff] %vm6475_vm9, %v6444_v43  ;;  %v5764_v16 = vrot.slane %v5763_v50, 4  ;;  %v3683_v44 = vrot.slane %v3681_v1, 4  ;;  %v3684_v46 = vshll.u32 %v3548_v53, 16  ;;  %v3690_v54 = vshll.u32 %v3549_v5, 16 }
 0x1a6   : > { %3521 = vst.msk [vmem:[#allocation2 + $0x8] sm:$0xff] %vm3519_vm15, %v3474_v39  ;;  %5583 = vrot.lane.b32.xlu1 %v7800_v38, %s7864_s14  ;;  %v3879_v38 = vor.u32 %v3878_v41, %v3875_v10  ;;  %v3694_v40 = vshrl.u32 %v3549_v5, 16  ;;  %v3700_v58 = vshll.u32 %v3550_v42, 16  ;;  %v7245_v48 = vrot.slane %v4117_v28, 9  ;;  %v7349_v53 = vld [vmem:[%s8609_s5 + $0x9c] sm:$0xf] }
 0x1a7   : > { %2979 = vrot.lane.b32.xlu0 %v10110_v20, %s7856_s6  ;;  %v5769_v4 = vsel %vm7933_vm2, %v5764_v16, %v5768_v13  ;;  %v3889_v13 = vor.u32 %v3888_v21, %v3884_v3  ;;  %v3686_v37 = vrot.slane %v3684_v46, 5  ;;  %v4263_v43 = vrot.slane %v4118_v25, 5  ;;  %v7325_v41 = vld [vmem:[%s8609_s5 + $0x3c] sm:$0xf] }
 0x1a8   : > { %v4035_v62 = vpop.permute.xlu1 %4034  ;;  %v7556_v29 = vcombine.low %v5759_v14, %v5769_v4  ;;  %v3880_v6 = vrot.slane %v3879_v38, 4  ;;  %v3692_v45 = vrot.slane %v3690_v54, 5  ;;  %v3696_v22 = vrot.slane %v3694_v40, 4  ;;  %v7803_v4 = vld [vmem:[%s8609_s5 + $0x30] sm:$0xff]   ;;  %v7413_v38 = vld [vmem:[%s8609_s5 + $0x9c] sm:$0xe] }
 0x1a9   : > { %v6428_v20 = vpop.permute.xlu0 %6427  ;;  %4074 = vst.msk [vmem:[#allocation2 + $0x48] sm:$0xff] %vm4064_vm0, %v4035_v62  ;;  %v3702_v39 = vrot.slane %v3700_v58, 5  ;;  %v3890_v12 = vrot.slane %v3889_v13, 4  ;;  %v3687_v50 = vor.u32 %v3686_v37, %v3683_v44  ;;  %v10209_v60 = vsel %vm8054_vm5, %v7245_v48, %v4263_v43  ;;  %v7350_v62 = vld [vmem:[%s8609_s5 + $0xa0] sm:$0xf] }
 0x1aa   : > { %6476 = vst.msk [vmem:[#allocation2] sm:$0xff] %vm6475_vm9, %v6428_v20  ;;  %3316 = vrot.lane.b32.xlu1 %v7197_v33, %s7857_s7  ;;  %v4265_v56 = vrot.slane %v4263_v43, 4  ;;  %v3697_v14 = vor.u32 %v3696_v22, %v3692_v45  ;;  %v4266_v34 = vrot.slane %v4119_v11, 5  ;;  %v7237_v8 = vrot.slane %v4093_v18, 9  ;;  %v7351_v20 = vld [vmem:[%s8609_s5 + $0xa4] sm:$0x1] }
 0x1ab   : > { %5567 = vrot.lane.b32.xlu0 %v7801_v61, %s7864_s14  ;;  %v3895_v63 = vsel %vm7933_vm2, %v3890_v12, %v3894_v32  ;;  %v4207_v16 = vrot.slane %v4094_v59, 5  ;;  %v4210_v15 = vrot.slane %v4095_v31, 5  ;;  %v4918_v28 = vshrl.u32 %v7349_v53, 16  ;;  %v7326_v32 = vld [vmem:[%s8609_s5 + $0x40] sm:$0xf] }
 0x1ac   : > { %v4356_v30 = vpop.permute.xlu1 %4355  ;;  %v6501_v33 = vld [vmem:[#allocation2 + $0x40] sm:$0xff]  ;;  %v3698_v36 = vrot.slane %v3697_v14, 4  ;;  %v10223_v2 = vsel %vm8054_vm5, %v4265_v56, %v4266_v34  ;;  %v4921_v25 = vshll.u32 %v7349_v53, 16  ;;  %v4927_v21 = vshll.u32 %v7350_v62, 16  ;;  %v7389_v43 = vld [vmem:[%s8609_s5 + $0x3c] sm:$0xe] }
 0x1ad   : > { %v4019_v55 = vpop.permute.xlu0 %4018  ;;  %4395 = vst.msk [vmem:[#allocation2 + $0x48] sm:$0xff] %vm4385_vm1, %v4356_v30  ;;  %7673 = vmatprep.subr.msk.bf16.mxu0 %vm6515_vm10, %v6501_v33  ;;  %v7261_v5 = vcombine.low %v10209_v60, %v10223_v2  ;;  %v10234_v42 = vsel %vm8054_vm5, %v7237_v8, %v4207_v16  ;;  %v4209_v1 = vrot.slane %v4207_v16, 4  ;;  %v4931_v18 = vshrl.u32 %v7350_v62, 16  ;;  %v7327_v33 = vld [vmem:[%s8609_s5 + $0x44] sm:$0x1] }
 0x1ae   : > { %4066 = vst.msk [vmem:[#allocation2 + $0x8] sm:$0xff] %vm4064_vm0, %v4019_v55  ;;  %6128 = vrot.lane.b32.xlu1 %v7564_v47, %s7865_s19  ;;  %v3885_v47 = vsel %vm7933_vm2, %v3880_v6, %v3884_v3  ;;  %v4937_v30 = vshll.u32 %v7351_v20, 16  ;;  %v4920_v40 = vrot.slane %v4918_v28, 4  ;;  %v4923_v58 = vrot.slane %v4921_v25, 5  ;;  %v7414_v31 = vld [vmem:[%s8609_s5 + $0xa0] sm:$0xf] }
 0x1af   : > { %3300 = vrot.lane.b32.xlu0 %v7189_v7, %s7857_s7  ;;  %v3688_v7 = vrot.slane %v3687_v50, 4  ;;  %v7229_v17 = vcombine.low %v3885_v47, %v3895_v63  ;;  %v10245_v11 = vsel %vm8054_vm5, %v4209_v1, %v4210_v15  ;;  %v4929_v59 = vrot.slane %v4927_v21, 5  ;;  %v7415_v55 = vld [vmem:[%s8609_s5 + $0xa4] sm:$0x1]  ;;  %v7390_v6 = vld [vmem:[%s8609_s5 + $0x40] sm:$0xf] }
 0x1b0   : > { %v4535_v52 = vpop.permute.xlu1 %4534  ;;  %v7253_v54 = vcombine.low %v10234_v42, %v10245_v11  ;;  %v4939_v13 = vrot.slane %v4937_v30, 5  ;;  %v4726_v37 = vshrl.u32 %v7325_v41, 16  ;;  %v4729_v48 = vshll.u32 %v7325_v41, 16  ;;  %v7391_v62 = vld [vmem:[%s8609_s5 + $0x44] sm:$0x1]  ;;  %v7804_v1 = vld [vmem:[%s8609_s5 + $0x9c] sm:$0xff]  }
 0x1b1   : > { %v4340_v61 = vpop.permute.xlu0 %4339  ;;  %v6493_v19 = vld [vmem:[#allocation2] sm:$0xff]  ;;  %4574 = vst.msk [vmem:[#allocation2 + $0x48] sm:$0xff] %vm4564_vm3, %v4535_v52  ;;  %v3693_v9 = vsel %vm7933_vm2, %v3688_v7, %v3692_v45  ;;  %v4924_v22 = vor.u32 %v4923_v58, %v4920_v40  ;;  %v4735_v23 = vshll.u32 %v7326_v32, 16  ;;  %v4739_v51 = vshrl.u32 %v7326_v32, 16 }
 0x1b2   : > { %4387 = vst.msk [vmem:[#allocation2 + $0x8] sm:$0xff] %vm4385_vm1, %v4340_v61  ;;  %v6520_v10 = vsel %vm6515_vm10, %v6493_v19, 0  ;;  %3495 = vrot.lane.b32.xlu1 %v7802_v57, %s7858_s8  ;;  %v4933_v57 = vrot.slane %v4931_v18, 4  ;;  %v4728_v50 = vrot.slane %v4726_v37, 4  ;;  %v4731_v56 = vrot.slane %v4729_v48, 5  ;;  %v7805_v37 = vld [vmem:[%s8609_s5 + $0x3c] sm:$0xff]  }
 0x1b3   : > { %6112 = vrot.lane.b32.xlu0 %v7556_v29, %s7865_s19  ;;  %7656 = vmatpush3.bf16.xpose.msra.mxu0 %v6520_v10  ;;  %v3703_v29 = vsel %vm7933_vm2, %v3698_v36, %v3702_v39  ;;  %v7437_v52 = vrot.slane %v7413_v38, 9  ;;  %v4925_v47 = vrot.slane %v4924_v22, 4  ;;  %v4737_v14 = vrot.slane %v4735_v23, 5  ;;  %v7096_v36 = vld [vmem:[%s7921_s22 + $0xb4] sm:$0xf] }
 0x1b4   : > { %v5080_v3 = vpop.permute.xlu1 %5079  ;;  %v10241_v46 = vcombine.low %v3693_v9, %v3703_v29  ;;  %v4934_v12 = vor.u32 %v4933_v57, %v4929_v59  ;;  %v4741_v34 = vrot.slane %v4739_v51, 4  ;;  %v4732_v61 = vor.u32 %v4731_v56, %v4728_v50  ;;  %v7097_v9 = vld [vmem:[%s7921_s22 + $0xb8] sm:$0xf]  ;;  %v7074_v57 = vld [vmem:[%s7921_s22 + $0x5c] sm:$0x1] }
 0x1b5   : > { %v4519_v44 = vpop.permute.xlu0 %4518  ;;  %5119 = vst.msk [vmem:[#allocation2 + $0x48] sm:$0xff] %vm5109_vm4, %v5080_v3  ;;  %v5308_v19 = vrot.slane %v7414_v31, 5  ;;  %v5311_v63 = vrot.slane %v7415_v55, 5  ;;  %v4930_v16 = vsel %vm7933_vm2, %v4925_v47, %v4929_v59  ;;  %v7429_v10 = vrot.slane %v7389_v43, 9  ;;  %v7073_v38 = vld [vmem:[%s7921_s22 + $0x58] sm:$0xf] }
 0x1b6   : > { %4566 = vst.msk [vmem:[#allocation2 + $0x8] sm:$0xff] %vm4564_vm3, %v4519_v44  ;;  %6449 = vrot.lane.b32.xlu1 %v7644_v24, %s7866_s20  ;;  %v4745_v24 = vshll.u32 %v7327_v33, 16  ;;  %v4935_v53 = vrot.slane %v4934_v12, 4  ;;  %v4742_v15 = vor.u32 %v4741_v34, %v4737_v14  ;;  %v4733_v27 = vrot.slane %v4732_v61, 4  ;;  %v7072_v33 = vld [vmem:[%s7921_s22 + $0x54] sm:$0xf] }
 0x1b7   : > { %3479 = vrot.lane.b32.xlu0 %v7803_v4, %s7858_s8  ;;  %v5310_v4 = vrot.slane %v5308_v19, 4  ;;  %v5255_v2 = vrot.slane %v7391_v62, 5  ;;  %v2852_v21 = vshrl.u32 %v7096_v36, 16  ;;  %v2855_v18 = vshll.u32 %v7096_v36, 16  ;;  %v7161_v22 = vld [vmem:[%s7921_s22 + $0xb8] sm:$0xf] }
 0x1b8   : > { %v5401_v45 = vpop.permute.xlu1 %5400  ;;  %v4747_v8 = vrot.slane %v4745_v24, 5  ;;  %v4940_v35 = vsel %vm7933_vm2, %v4935_v53, %v4939_v13  ;;  %v4743_v3 = vrot.slane %v4742_v15, 4  ;;  %v4738_v25 = vsel %vm7933_vm2, %v4733_v27, %v4737_v14  ;;  %v7160_v13 = vld [vmem:[%s7921_s22 + $0xb4] sm:$0xe]  ;;  %v7162_v12 = vld [vmem:[%s7921_s22 + $0xbc] sm:$0x1] }
 0x1b9   : > { %v5064_v39 = vpop.permute.xlu0 %5063  ;;  %5440 = vst.msk [vmem:[#allocation2 + $0x48] sm:$0xff] %vm5430_vm6, %v5401_v45  ;;  %v7373_v41 = vcombine.low %v4930_v16, %v4940_v35  ;;  %v10296_v60 = vsel %vm8054_vm5, %v5310_v4, %v5311_v63  ;;  %v2861_v30 = vshll.u32 %v7097_v9, 16  ;;  %v2854_v31 = vrot.slane %v2852_v21, 4  ;;  %v7136_v34 = vld [vmem:[%s7921_s22 + $0x54] sm:$0xe] }
 0x1ba   : > { %5111 = vst.msk [vmem:[#allocation2 + $0x8] sm:$0xff] %vm5109_vm4, %v5064_v39  ;;  %4040 = vrot.lane.b32.xlu1 %v7229_v17, %s7859_s9  ;;  %v5252_v17 = vrot.slane %v7390_v6, 5  ;;  %v4748_v44 = vsel %vm7933_vm2, %v4743_v3, %v4747_v8  ;;  %v2865_v55 = vshrl.u32 %v7097_v9, 16  ;;  %v2857_v43 = vrot.slane %v2855_v18, 5  ;;  %v7137_v61 = vld [vmem:[%s7921_s22 + $0x58] sm:$0xf] }
 0x1bb   : > { %6433 = vrot.lane.b32.xlu0 %v7636_v49, %s7866_s20  ;;  %v10277_v49 = vsel %vm8054_vm5, %v7437_v52, %v5308_v19  ;;  %v10306_v58 = vcombine.low %v4738_v25, %v4748_v44  ;;  %v2863_v6 = vrot.slane %v2861_v30, 5  ;;  %v2660_v51 = vshrl.u32 %v7072_v33, 16  ;;  %v7138_v15 = vld [vmem:[%s7921_s22 + $0x5c] sm:$0x1]  ;;  %v7541_v62 = vld [vmem:[%s8609_s5 + $0xa8] sm:$0xf] }
 0x1bc   : > { %v2992_v7 = vpop.permute.xlu1 %2991  ;;  %v10288_v29 = vsel %vm8054_vm5, %v7429_v10, %v5252_v17  ;;  %v5254_v28 = vrot.slane %v5252_v17, 4  ;;  %v2867_v23 = vrot.slane %v2865_v55, 4  ;;  %v2663_v24 = vshll.u32 %v7072_v33, 16 }
 0x1bd   : > { %v5385_v20 = vpop.permute.xlu0 %5384  ;;  %3030 = vst.msk [vmem:[#allocation2 + $0x50] sm:$0xff] %vm3019_vm13, %v2992_v7  ;;  %v2669_v39 = vshll.u32 %v7073_v38, 16  ;;  %v2858_v56 = vor.u32 %v2857_v43, %v2854_v31  ;;  %v2673_v47 = vshrl.u32 %v7073_v38, 16  ;;  %v2679_v14 = vshll.u32 %v7074_v57, 16  ;;  %v7517_v57 = vld [vmem:[%s8609_s5 + $0x48] sm:$0xf] }
 0x1be   : > { %5432 = vst.msk [vmem:[#allocation2 + $0x8] sm:$0xff] %vm5430_vm6, %v5385_v20  ;;  %4361 = vrot.lane.b32.xlu1 %v7261_v5, %s7860_s10  ;;  %v7098_v5 = vld [vmem:[%s7921_s22 + $0xbc] sm:$0x1]  ;;  %v10310_v59 = vsel %vm8054_vm5, %v5254_v28, %v5255_v2  ;;  %v2868_v53 = vor.u32 %v2867_v23, %v2863_v6  ;;  %v2662_v42 = vrot.slane %v2660_v51, 4  ;;  %v2665_v11 = vrot.slane %v2663_v24, 5  ;;  %v7806_v24 = vld [vmem:[%s8609_s5 + $0xa8] sm:$0xff]  }
 0x1bf   : > { %4024 = vrot.lane.b32.xlu0 %v10241_v46, %s7859_s9  ;;  %v7453_v46 = vcombine.low %v10277_v49, %v10296_v60  ;;  %v7445_v48 = vcombine.low %v10288_v29, %v10310_v59  ;;  %v2871_v45 = vshll.u32 %v7098_v5, 16  ;;  %v2859_v19 = vrot.slane %v2858_v56, 4  ;;  %v7542_v5 = vld [vmem:[%s8609_s5 + $0xac] sm:$0xf]  ;;  %v7543_v60 = vld [vmem:[%s8609_s5 + $0xb0] sm:$0x1] }
 0x1c0   : > { %v5580_v32 = vpop.permute.xlu1 %5579  ;;  %v2675_v63 = vrot.slane %v2673_v47, 4  ;;  %v2681_v7 = vrot.slane %v2679_v14, 5  ;;  %v7182_v16 = vrot.slane %v7160_v13, 9  ;;  %v2869_v10 = vrot.slane %v2868_v53, 4  ;;  %v7518_v13 = vld [vmem:[%s8609_s5 + $0x4c] sm:$0xf] }
 0x1c1   : > { %v2976_v40 = vpop.permute.xlu0 %2975  ;;  %5619 = vst.msk [vmem:[#allocation2 + $0x48] sm:$0xff] %vm5609_vm7, %v5580_v32  ;;  %v2873_v52 = vrot.slane %v2871_v45, 5  ;;  %v2666_v17 = vor.u32 %v2665_v11, %v2662_v42  ;;  %v3225_v36 = vrot.slane %v7161_v22, 5  ;;  %v3228_v20 = vrot.slane %v7162_v12, 5  ;;  %v7519_v23 = vld [vmem:[%s8609_s5 + $0x50] sm:$0x1] }
 0x1c2   : > { %3022 = vst.msk [vmem:[#allocation2 + $0x10] sm:$0xff] %vm3019_vm13, %v2976_v40  ;;  %4540 = vrot.lane.b32.xlu1 %v7804_v1, %s7861_s11  ;;  %v2864_v27 = vsel %vm7933_vm2, %v2859_v19, %v2863_v6  ;;  %v7174_v9 = vrot.slane %v7136_v34, 9  ;;  %v3169_v1 = vrot.slane %v7137_v61, 5  ;;  %v3172_v49 = vrot.slane %v7138_v15, 5  ;;  %v7605_v51 = vld [vmem:[%s8609_s5 + $0xa8] sm:$0xe] }
 0x1c3   : > { %4345 = vrot.lane.b32.xlu0 %v7253_v54, %s7860_s10  ;;  %v2671_v54 = vrot.slane %v2669_v39, 5  ;;  %v2874_v3 = vsel %vm7933_vm2, %v2869_v10, %v2873_v52  ;;  %v2667_v28 = vrot.slane %v2666_v17, 4  ;;  %v10340_v25 = vsel %vm8054_vm5, %v7182_v16, %v3225_v36  ;;  %v7606_v52 = vld [vmem:[%s8609_s5 + $0xac] sm:$0xf]  ;;  %v7607_v53 = vld [vmem:[%s8609_s5 + $0xb0] sm:$0x1] }
 0x1c4   : > { %v3313_v50 = vpop.permute.xlu1 %3312  ;;  %v3227_v2 = vrot.slane %v3225_v36, 4  ;;  %v7118_v21 = vcombine.low %v2864_v27, %v2874_v3  ;;  %v10350_v44 = vsel %vm8054_vm5, %v7174_v9, %v3169_v1  ;;  %v3171_v18 = vrot.slane %v3169_v1, 4  ;;  %v7583_v1 = vld [vmem:[%s8609_s5 + $0x50] sm:$0x1] }
 0x1c5   : > { %v5564_v8 = vpop.permute.xlu0 %5563  ;;  %3351 = vst.msk [vmem:[#allocation2 + $0x50] sm:$0xff] %vm3340_vm14, %v3313_v50  ;;  %v2676_v4 = vor.u32 %v2675_v63, %v2671_v54  ;;  %v2672_v30 = vsel %vm7933_vm2, %v2667_v28, %v2671_v54  ;;  %v5966_v31 = vshll.u32 %v7541_v62, 16  ;;  %v5972_v55 = vshll.u32 %v7542_v5, 16  ;;  %v7581_v63 = vld [vmem:[%s8609_s5 + $0x48] sm:$0xe] }
 0x1c6   : > { %5611 = vst.msk [vmem:[#allocation2 + $0x8] sm:$0xff] %vm5609_vm7, %v5564_v8  ;;  %5085 = vrot.lane.b32.xlu1 %v7373_v41, %s7862_s12  ;;  %v10358_v33 = vsel %vm8054_vm5, %v3227_v2, %v3228_v20  ;;  %v10370_v6 = vsel %vm8054_vm5, %v3171_v18, %v3172_v49  ;;  %v5976_v22 = vshrl.u32 %v7542_v5, 16  ;;  %v5982_v56 = vshll.u32 %v7543_v60, 16  ;;  %v7807_v20 = vld [vmem:[%s8609_s5 + $0x48] sm:$0xff]  }
 0x1c7   : > { %4524 = vrot.lane.b32.xlu0 %v7805_v37, %s7861_s11  ;;  %v2677_v32 = vrot.slane %v2676_v4, 4  ;;  %v7190_v39 = vcombine.low %v10350_v44, %v10370_v6  ;;  %v5968_v12 = vrot.slane %v5966_v31, 5  ;;  %v5974_v50 = vrot.slane %v5972_v55, 5 }
 0x1c8   : > { %v6125_v35 = vpop.permute.xlu1 %6124  ;;  %v5978_v47 = vrot.slane %v5976_v22, 4  ;;  %v5771_v14 = vshrl.u32 %v7517_v57, 16  ;;  %v5774_v34 = vshll.u32 %v7517_v57, 16  ;;  %v5780_v8 = vshll.u32 %v7518_v13, 16 }
 0x1c9   : > { %v3297_v41 = vpop.permute.xlu0 %3296  ;;  %6164 = vst.msk [vmem:[#allocation2 + $0x48] sm:$0xff] %vm6154_vm8, %v6125_v35  ;;  %v2682_v40 = vsel %vm7933_vm2, %v2677_v32, %v2681_v7  ;;  %v5984_v54 = vrot.slane %v5982_v56, 5  ;;  %v5784_v61 = vshrl.u32 %v7518_v13, 16  ;;  %v5790_v19 = vshll.u32 %v7519_v23, 16  ;;  %v3576_v32 = vld [vmem:[%s8609_s5 + $0xa0] sm:$0xf] }
 0x1ca   : > { %3343 = vst.msk [vmem:[#allocation2 + $0x10] sm:$0xff] %vm3340_vm14, %v3297_v41  ;;  %5406 = vrot.lane.b32.xlu1 %v7453_v46, %s7863_s13  ;;  %v5963_v46 = vshrl.u32 %v7541_v62, 16  ;;  %v7110_v43 = vcombine.low %v2672_v30, %v2682_v40  ;;  %v5979_v16 = vor.u32 %v5978_v47, %v5974_v50  ;;  %v5773_v15 = vrot.slane %v5771_v14, 4 }
 0x1cb   : > { %5069 = vrot.lane.b32.xlu0 %v10306_v58, %s7862_s12  ;;  %v7198_v58 = vcombine.low %v10340_v25, %v10358_v33  ;;  %v5776_v29 = vrot.slane %v5774_v34, 5  ;;  %v5782_v59 = vrot.slane %v5780_v8, 5  ;;  %v5786_v10 = vrot.slane %v5784_v61, 4  ;;  %v3577_v25 = vld [vmem:[%s8609_s5 + $0xa4] sm:$0x1]  ;;  %v7808_v8 = vld [vmem:[%s8609_s5 + $0x9c] sm:$0xff]  }
 0x1cc   : > { %v3492_v38 = vpop.permute.xlu1 %3491  ;;  %v5965_v45 = vrot.slane %v5963_v46, 4  ;;  %v5792_v17 = vrot.slane %v5790_v19, 5  ;;  %v7629_v36 = vrot.slane %v7605_v51, 9  ;;  %v5980_v35 = vrot.slane %v5979_v16, 4  ;;  %v3553_v34 = vld [vmem:[%s8609_s5 + $0x44] sm:$0x1] }
 0x1cd   : > { %v6109_v37 = vpop.permute.xlu0 %6108  ;;  %3530 = vst.msk [vmem:[#allocation2 + $0x50] sm:$0xff] %vm3519_vm15, %v3492_v38  ;;  %v5777_v27 = vor.u32 %v5776_v29, %v5773_v15  ;;  %v6353_v4 = vrot.slane %v7606_v52, 5  ;;  %v6356_v9 = vrot.slane %v7607_v53, 5  ;;  %v5787_v28 = vor.u32 %v5786_v10, %v5782_v59  ;;  %v4120_v61 = vld [vmem:[%s8609_s5 + $0x9c] sm:$0xe] }
 0x1ce   : > { %6156 = vst.msk [vmem:[#allocation2 + $0x8] sm:$0xff] %vm6154_vm8, %v6109_v37  ;;  %2997 = vrot.lane.b32.xlu1 %v7118_v21, %s7856_s6  ;;  %v5969_v11 = vor.u32 %v5968_v12, %v5965_v45  ;;  %v7621_v2 = vrot.slane %v7581_v63, 9  ;;  %v3575_v21 = vld [vmem:[%s8609_s5 + $0x9c] sm:$0xf]  ;;  %v5985_v30 = vsel %vm7933_vm2, %v5980_v35, %v5984_v54  ;;  %v6300_v37 = vrot.slane %v7583_v1, 5 }
 0x1cf   : > { %5390 = vrot.lane.b32.xlu0 %v7445_v48, %s7863_s13  ;;  %v7582_v48 = vld [vmem:[%s8609_s5 + $0x4c] sm:$0xf]  ;;  %v5778_v49 = vrot.slane %v5777_v27, 4  ;;  %v10402_v60 = vsel %vm8054_vm5, %v7629_v36, %v6353_v4  ;;  %v6355_v46 = vrot.slane %v6353_v4, 4  ;;  %v5788_v40 = vrot.slane %v5787_v28, 4 }
 0x1d0   : > { %v6446_v42 = vpop.permute.xlu1 %6445  ;;  %v5970_v62 = vrot.slane %v5969_v11, 4  ;;  %v6297_v5 = vrot.slane %v7582_v48, 5  ;;  %v3897_v33 = vshrl.u32 %v3575_v21, 16  ;;  %v3900_v51 = vshll.u32 %v3575_v21, 16  ;;  %v3552_v12 = vld [vmem:[%s8609_s5 + $0x40] sm:$0xf] }
 0x1d1   : > { %v3476_v7 = vpop.permute.xlu0 %3475  ;;  %6485 = vst.msk [vmem:[#allocation2 + $0x48] sm:$0xff] %vm6475_vm9, %v6446_v42  ;;  %v5783_v57 = vsel %vm7933_vm2, %v5778_v49, %v5782_v59  ;;  %v10418_v13 = vsel %vm8054_vm5, %v6355_v46, %v6356_v9  ;;  %v5793_v22 = vsel %vm7933_vm2, %v5788_v40, %v5792_v17  ;;  %v3910_v14 = vshrl.u32 %v3576_v32, 16  ;;  %v4121_v19 = vld [vmem:[%s8609_s5 + $0xa0] sm:$0xf]  ;;  %v4122_v29 = vld [vmem:[%s8609_s5 + $0xa4] sm:$0x1] }
 0x1d2   : > { %3522 = vst.msk [vmem:[#allocation2 + $0x10] sm:$0xff] %vm3519_vm15, %v3476_v7  ;;  %5585 = vrot.lane.b32.xlu1 %v7806_v24, %s7864_s14  ;;  %v5975_v3 = vsel %vm7933_vm2, %v5970_v62, %v5974_v50  ;;  %v10411_v31 = vsel %vm8054_vm5, %v7621_v2, %v6297_v5  ;;  %v6299_v55 = vrot.slane %v6297_v5, 4  ;;  %v7645_v23 = vcombine.low %v10402_v60, %v10418_v13  ;;  %v4096_v36 = vld [vmem:[%s8609_s5 + $0x3c] sm:$0xe]  ;;  %v4097_v4 = vld [vmem:[%s8609_s5 + $0x40] sm:$0xf] }
 0x1d3   : > { %2981 = vrot.lane.b32.xlu0 %v7110_v43, %s7856_s6  ;;  %v7565_v38 = vcombine.low %v5975_v3, %v5985_v30  ;;  %v3906_v24 = vshll.u32 %v3576_v32, 16  ;;  %v7557_v56 = vcombine.low %v5783_v57, %v5793_v22  ;;  %v3899_v47 = vrot.slane %v3897_v33, 4  ;;  %v4098_v28 = vld [vmem:[%s8609_s5 + $0x44] sm:$0x1]  ;;  %v7809_v2 = vld [vmem:[%s8609_s5 + $0x3c] sm:$0xff]  }
 0x1d4   : > { %v4037_v41 = vpop.permute.xlu1 %4036  ;;  %v10431_v52 = vsel %vm8054_vm5, %v6299_v55, %v6300_v37  ;;  %v3902_v42 = vrot.slane %v3900_v51, 5  ;;  %v3916_v54 = vshll.u32 %v3577_v25, 16  ;;  %v3912_v63 = vrot.slane %v3910_v14, 4  ;;  %v7352_v30 = vld [vmem:[%s8609_s5 + $0xa8] sm:$0xf] }
 0x1d5   : > { %v6430_v18 = vpop.permute.xlu0 %6429  ;;  %4075 = vst.msk [vmem:[#allocation2 + $0x50] sm:$0xff] %vm4064_vm0, %v4037_v41  ;;  %v7637_v53 = vcombine.low %v10411_v31, %v10431_v52  ;;  %v3908_v11 = vrot.slane %v3906_v24, 5  ;;  %v3714_v15 = vshll.u32 %v3552_v12, 16  ;;  %v3718_v10 = vshrl.u32 %v3552_v12, 16  ;;  %v7353_v57 = vld [vmem:[%s8609_s5 + $0xac] sm:$0xf] }
 0x1d6   : > { %6477 = vst.msk [vmem:[#allocation2 + $0x8] sm:$0xff] %vm6475_vm9, %v6430_v18  ;;  %3318 = vrot.lane.b32.xlu1 %v7198_v58, %s7857_s7  ;;  %v3551_v58 = vld [vmem:[%s8609_s5 + $0x3c] sm:$0xf]  ;;  %v3903_v48 = vor.u32 %v3902_v42, %v3899_v47  ;;  %v3918_v62 = vrot.slane %v3916_v54, 5  ;;  %v3724_v17 = vshll.u32 %v3553_v34, 16  ;;  %v7246_v32 = vrot.slane %v4120_v61, 9 }
 0x1d7   : > { %5569 = vrot.lane.b32.xlu0 %v7807_v20, %s7864_s14  ;;  %v3705_v7 = vshrl.u32 %v3551_v58, 16  ;;  %v3708_v16 = vshll.u32 %v3551_v58, 16  ;;  %v3913_v44 = vor.u32 %v3912_v63, %v3908_v11  ;;  %v3716_v27 = vrot.slane %v3714_v15, 5  ;;  %v7328_v34 = vld [vmem:[%s8609_s5 + $0x48] sm:$0xf] }
 0x1d8   : > { %v4358_v43 = vpop.permute.xlu1 %4357  ;;  %v6502_v45 = vld [vmem:[#allocation2 + $0x48] sm:$0xff]  ;;  %v3904_v1 = vrot.slane %v3903_v48, 4  ;;  %v3720_v41 = vrot.slane %v3718_v10, 4  ;;  %v3726_v3 = vrot.slane %v3724_v17, 5  ;;  %v4270_v18 = vrot.slane %v4121_v19, 5 }
 0x1d9   : > { %v4021_v50 = vpop.permute.xlu0 %4020  ;;  %4396 = vst.msk [vmem:[#allocation2 + $0x50] sm:$0xff] %vm4385_vm1, %v4358_v43  ;;  %7674 = vmatprep.subr.msk.bf16.mxu0 %vm6515_vm10, %v6502_v45  ;;  %v3707_v6 = vrot.slane %v3705_v7, 4  ;;  %v3914_v5 = vrot.slane %v3913_v44, 4  ;;  %v4273_v40 = vrot.slane %v4122_v29, 5  ;;  %v7238_v55 = vrot.slane %v4096_v36, 9 }
 0x1da   : > { %4067 = vst.msk [vmem:[#allocation2 + $0x10] sm:$0xff] %vm4064_vm0, %v4021_v50  ;;  %6130 = vrot.lane.b32.xlu1 %v7565_v38, %s7865_s19  ;;  %v3909_v46 = vsel %vm7933_vm2, %v3904_v1, %v3908_v11  ;;  %v3721_v38 = vor.u32 %v3720_v41, %v3716_v27  ;;  %v4271_v58 = vsel %vm8054_vm5, %v7246_v32, %v4270_v18  ;;  %v4272_v43 = vrot.slane %v4270_v18, 4  ;;  %v7329_v7 = vld [vmem:[%s8609_s5 + $0x4c] sm:$0xf] }
 0x1db   : > { %3302 = vrot.lane.b32.xlu0 %v7190_v39, %s7857_s7  ;;  %v3710_v39 = vrot.slane %v3708_v16, 5  ;;  %v3919_v25 = vsel %vm7933_vm2, %v3914_v5, %v3918_v62  ;;  %v4214_v51 = vrot.slane %v4097_v4, 5  ;;  %v4217_v24 = vrot.slane %v4098_v28, 5  ;;  %v7810_v28 = vld [vmem:[%s8609_s5 + $0xa8] sm:$0xff]  }
 0x1dc   : > { %v4537_v59 = vpop.permute.xlu1 %4536  ;;  %v7230_v45 = vcombine.low %v3909_v46, %v3919_v25  ;;  %v3722_v22 = vrot.slane %v3721_v38, 4  ;;  %v4274_v50 = vsel %vm8054_vm5, %v4272_v43, %v4273_v40  ;;  %v4942_v47 = vshrl.u32 %v7352_v30, 16  ;;  %v7393_v18 = vld [vmem:[%s8609_s5 + $0x4c] sm:$0xf]  ;;  %v7394_v40 = vld [vmem:[%s8609_s5 + $0x50] sm:$0x1] }
 0x1dd   : > { %v4342_v20 = vpop.permute.xlu0 %4341  ;;  %v6494_v35 = vld [vmem:[#allocation2 + $0x8] sm:$0xff]  ;;  %4575 = vst.msk [vmem:[#allocation2 + $0x50] sm:$0xff] %vm4564_vm3, %v4537_v59  ;;  %v3711_v21 = vor.u32 %v3710_v39, %v3707_v6  ;;  %v4945_v14 = vshll.u32 %v7352_v30, 16  ;;  %v7262_v13 = vcombine.low %v4271_v58, %v4274_v50  ;;  %v4216_v42 = vrot.slane %v4214_v51, 4  ;;  %v7330_v59 = vld [vmem:[%s8609_s5 + $0x50] sm:$0x1] }
 0x1de   : > { %4388 = vst.msk [vmem:[#allocation2 + $0x10] sm:$0xff] %vm4385_vm1, %v4342_v20  ;;  %v6523_v9 = vsel %vm6515_vm10, %v6494_v35, 0  ;;  %3497 = vrot.lane.b32.xlu1 %v7808_v8, %s7858_s8  ;;  %v3727_v60 = vsel %vm7933_vm2, %v3722_v22, %v3726_v3  ;;  %v4944_v61 = vrot.slane %v4942_v47, 4  ;;  %v4951_v63 = vshll.u32 %v7353_v57, 16  ;;  %v7416_v20 = vld [vmem:[%s8609_s5 + $0xa8] sm:$0xe] }
 0x1df   : > { %6114 = vrot.lane.b32.xlu0 %v7557_v56, %s7865_s19  ;;  %7658 = vmatpush3.bf16.xpose.msra.mxu0 %v6523_v9  ;;  %v3712_v33 = vrot.slane %v3711_v21, 4  ;;  %v7354_v56 = vld [vmem:[%s8609_s5 + $0xb0] sm:$0x1]  ;;  %v4947_v19 = vrot.slane %v4945_v14, 5  ;;  %v4218_v16 = vsel %vm8054_vm5, %v4216_v42, %v4217_v24  ;;  %v4955_v15 = vshrl.u32 %v7353_v57, 16 }
 0x1e0   : > { %v5082_v49 = vpop.permute.xlu1 %5081  ;;  %v4961_v29 = vshll.u32 %v7354_v56, 16  ;;  %v4750_v48 = vshrl.u32 %v7328_v34, 16  ;;  %v4953_v17 = vrot.slane %v4951_v63, 5  ;;  %v4753_v36 = vshll.u32 %v7328_v34, 16  ;;  %v7417_v35 = vld [vmem:[%s8609_s5 + $0xac] sm:$0xf] }
 0x1e1   : > { %v4521_v37 = vpop.permute.xlu0 %4520  ;;  %5120 = vst.msk [vmem:[#allocation2 + $0x50] sm:$0xff] %vm5109_vm4, %v5082_v49  ;;  %v3717_v12 = vsel %vm7933_vm2, %v3712_v33, %v3716_v27  ;;  %v4948_v10 = vor.u32 %v4947_v19, %v4944_v61  ;;  %v4957_v6 = vrot.slane %v4955_v15, 4  ;;  %v4759_v4 = vshll.u32 %v7329_v7, 16  ;;  %v7418_v9 = vld [vmem:[%s8609_s5 + $0xb0] sm:$0x1] }
 0x1e2   : > { %4567 = vst.msk [vmem:[#allocation2 + $0x10] sm:$0xff] %vm4564_vm3, %v4521_v37  ;;  %6451 = vrot.lane.b32.xlu1 %v7645_v23, %s7866_s20  ;;  %v10480_v23 = vsel %vm8054_vm5, %v7238_v55, %v4214_v51  ;;  %v7222_v54 = vcombine.low %v3717_v12, %v3727_v60  ;;  %v4963_v39 = vrot.slane %v4961_v29, 5  ;;  %v4752_v27 = vrot.slane %v4750_v48, 4  ;;  %v7392_v3 = vld [vmem:[%s8609_s5 + $0x48] sm:$0xe] }
 0x1e3   : > { %3481 = vrot.lane.b32.xlu0 %v7809_v2, %s7858_s8  ;;  %v7254_v62 = vcombine.low %v10480_v23, %v4218_v16  ;;  %v4949_v31 = vrot.slane %v4948_v10, 4  ;;  %v4755_v52 = vrot.slane %v4753_v36, 5  ;;  %v4769_v41 = vshll.u32 %v7330_v59, 16  ;;  %v7099_v55 = vld [vmem:[%s7921_s22 + $0xc0] sm:$0xf]  ;;  %v7811_v60 = vld [vmem:[%s8609_s5 + $0x48] sm:$0xff]  }
 0x1e4   : > { %v5403_v8 = vpop.permute.xlu1 %5402  ;;  %v4958_v2 = vor.u32 %v4957_v6, %v4953_v17  ;;  %v4761_v5 = vrot.slane %v4759_v4, 5  ;;  %v7438_v21 = vrot.slane %v7416_v20, 9  ;;  %v5315_v32 = vrot.slane %v7417_v35, 5  ;;  %v7100_v12 = vld [vmem:[%s7921_s22 + $0xc4] sm:$0xf] }
 0x1e5   : > { %v5066_v11 = vpop.permute.xlu0 %5065  ;;  %5441 = vst.msk [vmem:[#allocation2 + $0x50] sm:$0xff] %vm5430_vm6, %v5403_v8  ;;  %v4954_v30 = vsel %vm7933_vm2, %v4949_v31, %v4953_v17  ;;  %v4756_v49 = vor.u32 %v4755_v52, %v4752_v27  ;;  %v4771_v38 = vrot.slane %v4769_v41, 5  ;;  %v5318_v58 = vrot.slane %v7418_v9, 5  ;;  %v7101_v14 = vld [vmem:[%s7921_s22 + $0xc8] sm:$0x1] }
 0x1e6   : > { %5112 = vst.msk [vmem:[#allocation2 + $0x10] sm:$0xff] %vm5109_vm4, %v5066_v11  ;;  %4042 = vrot.lane.b32.xlu1 %v7230_v45, %s7859_s9  ;;  %v4959_v37 = vrot.slane %v4958_v2, 4  ;;  %v10510_v25 = vsel %vm8054_vm5, %v7438_v21, %v5315_v32  ;;  %v5317_v33 = vrot.slane %v5315_v32, 4  ;;  %v7430_v51 = vrot.slane %v7392_v3, 9  ;;  %v7075_v8 = vld [vmem:[%s7921_s22 + $0x60] sm:$0xf] }
 0x1e7   : > { %6435 = vrot.lane.b32.xlu0 %v7637_v53, %s7866_s20  ;;  %v4763_v53 = vshrl.u32 %v7329_v7, 16  ;;  %v4757_v45 = vrot.slane %v4756_v49, 4  ;;  %v5259_v24 = vrot.slane %v7393_v18, 5  ;;  %v5262_v47 = vrot.slane %v7394_v40, 5  ;;  %v7077_v15 = vld [vmem:[%s7921_s22 + $0x68] sm:$0x1] }
 0x1e8   : > { %v2994_v44 = vpop.permute.xlu1 %2993  ;;  %v4964_v50 = vsel %vm7933_vm2, %v4959_v37, %v4963_v39  ;;  %v5319_v56 = vsel %vm8054_vm5, %v5317_v33, %v5318_v58  ;;  %v2876_v34 = vshrl.u32 %v7099_v55, 16  ;;  %v2879_v16 = vshll.u32 %v7099_v55, 16  ;;  %v7164_v9 = vld [vmem:[%s7921_s22 + $0xc4] sm:$0xf]  ;;  %v7165_v3 = vld [vmem:[%s7921_s22 + $0xc8] sm:$0x1] }
 0x1e9   : > { %v5387_v1 = vpop.permute.xlu0 %5386  ;;  %3031 = vst.msk [vmem:[#allocation2 + $0x58] sm:$0xff] %vm3019_vm13, %v2994_v44  ;;  %v4765_v46 = vrot.slane %v4763_v53, 4  ;;  %v4762_v23 = vsel %vm7933_vm2, %v4757_v45, %v4761_v5  ;;  %v7454_v11 = vcombine.low %v10510_v25, %v5319_v56  ;;  %v10530_v19 = vsel %vm8054_vm5, %v7430_v51, %v5259_v24  ;;  %v7163_v44 = vld [vmem:[%s7921_s22 + $0xc0] sm:$0xe]  ;;  %v7140_v40 = vld [vmem:[%s7921_s22 + $0x64] sm:$0xf] }
 0x1ea   : > { %5433 = vst.msk [vmem:[#allocation2 + $0x10] sm:$0xff] %vm5430_vm6, %v5387_v1  ;;  %4363 = vrot.lane.b32.xlu1 %v7262_v13, %s7860_s10  ;;  %v7374_v13 = vcombine.low %v4954_v30, %v4964_v50  ;;  %v5261_v63 = vrot.slane %v5259_v24, 4  ;;  %v2878_v7 = vrot.slane %v2876_v34, 4  ;;  %v2885_v48 = vshll.u32 %v7100_v12, 16  ;;  %v7139_v18 = vld [vmem:[%s7921_s22 + $0x60] sm:$0xe] }
 0x1eb   : > { %4026 = vrot.lane.b32.xlu0 %v7222_v54, %s7859_s9  ;;  %v4766_v22 = vor.u32 %v4765_v46, %v4761_v5  ;;  %v7076_v54 = vld [vmem:[%s7921_s22 + $0x64] sm:$0xf]  ;;  %v2895_v10 = vshll.u32 %v7101_v14, 16  ;;  %v2881_v20 = vrot.slane %v2879_v16, 5  ;;  %v2684_v35 = vshrl.u32 %v7075_v8, 16 }
 0x1ec   : > { %v5582_v57 = vpop.permute.xlu1 %5581  ;;  %v5263_v36 = vsel %vm8054_vm5, %v5261_v63, %v5262_v47  ;;  %v2887_v39 = vrot.slane %v2885_v48, 5  ;;  %v2687_v53 = vshll.u32 %v7075_v8, 16  ;;  %v2693_v41 = vshll.u32 %v7076_v54, 16  ;;  %v7141_v33 = vld [vmem:[%s7921_s22 + $0x68] sm:$0x1] }
 0x1ed   : > { %v2978_v43 = vpop.permute.xlu0 %2977  ;;  %5620 = vst.msk [vmem:[#allocation2 + $0x50] sm:$0xff] %vm5609_vm7, %v5582_v57  ;;  %v4767_v42 = vrot.slane %v4766_v22, 4  ;;  %v7446_v6 = vcombine.low %v10530_v19, %v5263_v36  ;;  %v2897_v4 = vrot.slane %v2895_v10, 5  ;;  %v2882_v31 = vor.u32 %v2881_v20, %v2878_v7  ;;  %v7544_v14 = vld [vmem:[%s8609_s5 + $0xb4] sm:$0xf] }
 0x1ee   : > { %3023 = vst.msk [vmem:[#allocation2 + $0x18] sm:$0xff] %vm3019_vm13, %v2978_v43  ;;  %4542 = vrot.lane.b32.xlu1 %v7810_v28, %s7861_s11  ;;  %v2686_v52 = vrot.slane %v2684_v35, 4  ;;  %v2697_v5 = vshrl.u32 %v7076_v54, 16  ;;  %v2703_v21 = vshll.u32 %v7077_v15, 16  ;;  %v7183_v32 = vrot.slane %v7163_v44, 9  ;;  %v7812_v15 = vld [vmem:[%s8609_s5 + $0xb4] sm:$0xff]  }
 0x1ef   : > { %4347 = vrot.lane.b32.xlu0 %v7254_v62, %s7860_s10  ;;  %v4772_v59 = vsel %vm7933_vm2, %v4767_v42, %v4771_v38  ;;  %v2889_v62 = vshrl.u32 %v7100_v12, 16  ;;  %v2883_v30 = vrot.slane %v2882_v31, 4  ;;  %v2689_v49 = vrot.slane %v2687_v53, 5  ;;  %v7545_v34 = vld [vmem:[%s8609_s5 + $0xb8] sm:$0xf] }
 0x1f0   : > { %v3315_v61 = vpop.permute.xlu1 %3314  ;;  %v7366_v17 = vcombine.low %v4762_v23, %v4772_v59  ;;  %v2695_v46 = vrot.slane %v2693_v41, 5  ;;  %v3232_v38 = vrot.slane %v7164_v9, 5  ;;  %v2699_v57 = vrot.slane %v2697_v5, 4  ;;  %v7546_v42 = vld [vmem:[%s8609_s5 + $0xbc] sm:$0x1] }
 0x1f1   : > { %v5566_v29 = vpop.permute.xlu0 %5565  ;;  %3352 = vst.msk [vmem:[#allocation2 + $0x58] sm:$0xff] %vm3340_vm14, %v3315_v61  ;;  %v2891_v27 = vrot.slane %v2889_v62, 4  ;;  %v2705_v37 = vrot.slane %v2703_v21, 5  ;;  %v3235_v25 = vrot.slane %v7165_v3, 5  ;;  %v2888_v43 = vsel %vm7933_vm2, %v2883_v30, %v2887_v39  ;;  %v7520_v63 = vld [vmem:[%s8609_s5 + $0x54] sm:$0xf] }
 0x1f2   : > { %5612 = vst.msk [vmem:[#allocation2 + $0x10] sm:$0xff] %vm5609_vm7, %v5566_v29  ;;  %5087 = vrot.lane.b32.xlu1 %v7374_v13, %s7862_s12  ;;  %v2690_v45 = vor.u32 %v2689_v49, %v2686_v52  ;;  %v10556_v22 = vsel %vm8054_vm5, %v7183_v32, %v3232_v38  ;;  %v3234_v51 = vrot.slane %v3232_v38, 4  ;;  %v2700_v50 = vor.u32 %v2699_v57, %v2695_v46  ;;  %v7521_v62 = vld [vmem:[%s8609_s5 + $0x58] sm:$0xf]  ;;  %v7522_v44 = vld [vmem:[%s8609_s5 + $0x5c] sm:$0x1] }
 0x1f3   : > { %4526 = vrot.lane.b32.xlu0 %v7811_v60, %s7861_s11  ;;  %v2892_v2 = vor.u32 %v2891_v27, %v2887_v39  ;;  %v7175_v56 = vrot.slane %v7139_v18, 9  ;;  %v3176_v47 = vrot.slane %v7140_v40, 5  ;;  %v3179_v23 = vrot.slane %v7141_v33, 5  ;;  %v7610_v31 = vld [vmem:[%s8609_s5 + $0xbc] sm:$0x1] }
 0x1f4   : > { %v6127_v1 = vpop.permute.xlu1 %6126  ;;  %v2691_v60 = vrot.slane %v2690_v45, 4  ;;  %v10566_v13 = vsel %vm8054_vm5, %v3234_v51, %v3235_v25  ;;  %v5987_v29 = vshrl.u32 %v7544_v14, 16  ;;  %v5990_v59 = vshll.u32 %v7544_v14, 16 }
 0x1f5   : > { %v3299_v28 = vpop.permute.xlu0 %3298  ;;  %6165 = vst.msk [vmem:[#allocation2 + $0x50] sm:$0xff] %vm6154_vm8, %v6127_v1  ;;  %v2893_v55 = vrot.slane %v2892_v2, 4  ;;  %v7199_v54 = vcombine.low %v10556_v22, %v10566_v13  ;;  %v10574_v61 = vsel %vm8054_vm5, %v7175_v56, %v3176_v47  ;;  %v3178_v19 = vrot.slane %v3176_v47, 4  ;;  %v7609_v1 = vld [vmem:[%s8609_s5 + $0xb8] sm:$0xf] }
 0x1f6   : > { %3344 = vst.msk [vmem:[#allocation2 + $0x18] sm:$0xff] %vm3340_vm14, %v3299_v28  ;;  %5408 = vrot.lane.b32.xlu1 %v7454_v11, %s7863_s13  ;;  %v2701_v11 = vrot.slane %v2700_v50, 4  ;;  %v2696_v7 = vsel %vm7933_vm2, %v2691_v60, %v2695_v46  ;;  %v5996_v48 = vshll.u32 %v7545_v34, 16  ;;  %v6000_v20 = vshrl.u32 %v7545_v34, 16  ;;  %v7584_v28 = vld [vmem:[%s8609_s5 + $0x54] sm:$0xe] }
 0x1f7   : > { %5071 = vrot.lane.b32.xlu0 %v7366_v17, %s7862_s12  ;;  %v2898_v12 = vsel %vm7933_vm2, %v2893_v55, %v2897_v4  ;;  %v10587_v36 = vsel %vm8054_vm5, %v3178_v19, %v3179_v23  ;;  %v6006_v35 = vshll.u32 %v7546_v42, 16  ;;  %v5989_v4 = vrot.slane %v5987_v29, 4  ;;  %v7813_v2 = vld [vmem:[%s8609_s5 + $0x54] sm:$0xff]  }
 0x1f8   : > { %v3494_v58 = vpop.permute.xlu1 %3493  ;;  %v7119_v8 = vcombine.low %v2888_v43, %v2898_v12  ;;  %v2706_v17 = vsel %vm7933_vm2, %v2701_v11, %v2705_v37  ;;  %v7191_v27 = vcombine.low %v10574_v61, %v10587_v36  ;;  %v5992_v9 = vrot.slane %v5990_v59, 5 }
 0x1f9   : > { %v6111_v24 = vpop.permute.xlu0 %6110  ;;  %3531 = vst.msk [vmem:[#allocation2 + $0x58] sm:$0xff] %vm3519_vm15, %v3494_v58  ;;  %v7111_v39 = vcombine.low %v2696_v7, %v2706_v17  ;;  %v5998_v52 = vrot.slane %v5996_v48, 5  ;;  %v6002_v53 = vrot.slane %v6000_v20, 4  ;;  %v6008_v41 = vrot.slane %v6006_v35, 5  ;;  %v7585_v58 = vld [vmem:[%s8609_s5 + $0x58] sm:$0xf] }
 0x1fa   : > { %6157 = vst.msk [vmem:[#allocation2 + $0x10] sm:$0xff] %vm6154_vm8, %v6111_v24  ;;  %2999 = vrot.lane.b32.xlu1 %v7119_v8, %s7856_s6  ;;  %v5795_v3 = vshrl.u32 %v7520_v63, 16  ;;  %v5993_v21 = vor.u32 %v5992_v9, %v5989_v4  ;;  %v5798_v32 = vshll.u32 %v7520_v63, 16  ;;  %v5804_v18 = vshll.u32 %v7521_v62, 16  ;;  %v7586_v24 = vld [vmem:[%s8609_s5 + $0x5c] sm:$0x1] }
 0x1fb   : > { %5392 = vrot.lane.b32.xlu0 %v7446_v6, %s7863_s13  ;;  %v7608_v6 = vld [vmem:[%s8609_s5 + $0xb4] sm:$0xe]  ;;  %v5808_v30 = vshrl.u32 %v7521_v62, 16  ;;  %v6003_v46 = vor.u32 %v6002_v53, %v5998_v52  ;;  %v5814_v40 = vshll.u32 %v7522_v44, 16  ;;  %v6360_v22 = vrot.slane %v7609_v1, 5 }
 0x1fc   : > { %v6448_v16 = vpop.permute.xlu1 %6447  ;;  %v5797_v38 = vrot.slane %v5795_v3, 4  ;;  %v7630_v55 = vrot.slane %v7608_v6, 9  ;;  %v5994_v57 = vrot.slane %v5993_v21, 4  ;;  %v5800_v37 = vrot.slane %v5798_v32, 5  ;;  %v3578_v8 = vld [vmem:[%s8609_s5 + $0xa8] sm:$0xf] }
 0x1fd   : > { %v3478_v10 = vpop.permute.xlu0 %3477  ;;  %6486 = vst.msk [vmem:[#allocation2 + $0x50] sm:$0xff] %vm6475_vm9, %v6448_v16  ;;  %v5806_v25 = vrot.slane %v5804_v18, 5  ;;  %v5810_v33 = vrot.slane %v5808_v30, 4  ;;  %v6004_v43 = vrot.slane %v6003_v46, 4  ;;  %v5816_v45 = vrot.slane %v5814_v40, 5  ;;  %v7814_v16 = vld [vmem:[%s8609_s5 + $0xa8] sm:$0xff]  }
 0x1fe   : > { %3523 = vst.msk [vmem:[#allocation2 + $0x18] sm:$0xff] %vm3519_vm15, %v3478_v10  ;;  %5587 = vrot.lane.b32.xlu1 %v7812_v15, %s7864_s14  ;;  %v6363_v51 = vrot.slane %v7610_v31, 5  ;;  %v5999_v56 = vsel %vm7933_vm2, %v5994_v57, %v5998_v52  ;;  %v5801_v47 = vor.u32 %v5800_v37, %v5797_v38  ;;  %v7622_v34 = vrot.slane %v7584_v28, 9  ;;  %v3579_v7 = vld [vmem:[%s8609_s5 + $0xac] sm:$0xf] }
 0x1ff   : > { %2983 = vrot.lane.b32.xlu0 %v7111_v39, %s7856_s6  ;;  %v5811_v14 = vor.u32 %v5810_v33, %v5806_v25  ;;  %v6009_v13 = vsel %vm7933_vm2, %v6004_v43, %v6008_v41  ;;  %v10615_v23 = vsel %vm8054_vm5, %v7630_v55, %v6360_v22  ;;  %v6362_v42 = vrot.slane %v6360_v22, 4  ;;  %v3580_v48 = vld [vmem:[%s8609_s5 + $0xb0] sm:$0x1]  ;;  %v3554_v44 = vld [vmem:[%s8609_s5 + $0x48] sm:$0xf] }
 0x200   : > { %v4039_v5 = vpop.permute.xlu1 %4038  ;;  %v6304_v11 = vrot.slane %v7585_v58, 5  ;;  %v5802_v61 = vrot.slane %v5801_v47, 4  ;;  %v6307_v63 = vrot.slane %v7586_v24, 5  ;;  %v3921_v62 = vshrl.u32 %v3578_v8, 16  ;;  %v3555_v6 = vld [vmem:[%s8609_s5 + $0x4c] sm:$0xf] }
 0x201   : > { %v6432_v49 = vpop.permute.xlu0 %6431  ;;  %4076 = vst.msk [vmem:[#allocation2 + $0x58] sm:$0xff] %vm4064_vm0, %v4039_v5  ;;  %v5812_v19 = vrot.slane %v5811_v14, 4  ;;  %v6364_v15 = vsel %vm8054_vm5, %v6362_v42, %v6363_v51  ;;  %v3924_v35 = vshll.u32 %v3578_v8, 16  ;;  %v3930_v31 = vshll.u32 %v3579_v7, 16  ;;  %v3556_v52 = vld [vmem:[%s8609_s5 + $0x50] sm:$0x1] }
 0x202   : > { %6478 = vst.msk [vmem:[#allocation2 + $0x10] sm:$0xff] %vm6475_vm9, %v6432_v49  ;;  %3320 = vrot.lane.b32.xlu1 %v7199_v54, %s7857_s7  ;;  %v7566_v54 = vcombine.low %v5999_v56, %v6009_v13  ;;  %v10624_v29 = vsel %vm8054_vm5, %v7622_v34, %v6304_v11  ;;  %v6306_v59 = vrot.slane %v6304_v11, 4  ;;  %v5807_v10 = vsel %vm7933_vm2, %v5802_v61, %v5806_v25  ;;  %v4124_v5 = vld [vmem:[%s8609_s5 + $0xac] sm:$0xf]  ;;  %v4125_v49 = vld [vmem:[%s8609_s5 + $0xb0] sm:$0x1] }
 0x203   : > { %5571 = vrot.lane.b32.xlu0 %v7813_v2, %s7864_s14  ;;  %v5817_v17 = vsel %vm7933_vm2, %v5812_v19, %v5816_v45  ;;  %v7646_v20 = vcombine.low %v10615_v23, %v6364_v15  ;;  %v3923_v1 = vrot.slane %v3921_v62, 4  ;;  %v3926_v3 = vrot.slane %v3924_v35, 5  ;;  %v4123_v2 = vld [vmem:[%s8609_s5 + $0xa8] sm:$0xe]  ;;  %v4100_v56 = vld [vmem:[%s8609_s5 + $0x4c] sm:$0xf] }
 0x204   : > { %v4360_v12 = vpop.permute.xlu1 %4359  ;;  %v6503_v50 = vld [vmem:[#allocation2 + $0x50] sm:$0xff]  ;;  %v7558_v4 = vcombine.low %v5807_v10, %v5817_v17  ;;  %v10639_v9 = vsel %vm8054_vm5, %v6306_v59, %v6307_v63  ;;  %v3934_v28 = vshrl.u32 %v3579_v7, 16  ;;  %v3932_v21 = vrot.slane %v3930_v31, 5  ;;  %v7815_v46 = vld [vmem:[%s8609_s5 + $0x48] sm:$0xff]   ;;  %v7356_v10 = vld [vmem:[%s8609_s5 + $0xb8] sm:$0xf] }
 0x205   : > { %v4023_v60 = vpop.permute.xlu0 %4022  ;;  %4397 = vst.msk [vmem:[#allocation2 + $0x58] sm:$0xff] %vm4385_vm1, %v4360_v12  ;;  %7675 = vmatprep.subr.msk.bf16.mxu0 %vm6515_vm10, %v6503_v50  ;;  %v7638_v41 = vcombine.low %v10624_v29, %v10639_v9  ;;  %v3940_v32 = vshll.u32 %v3580_v48, 16  ;;  %v3729_v18 = vshrl.u32 %v3554_v44, 16  ;;  %v3732_v30 = vshll.u32 %v3554_v44, 16  ;;  %v4099_v25 = vld [vmem:[%s8609_s5 + $0x48] sm:$0xe] }
 0x206   : > { %4068 = vst.msk [vmem:[#allocation2 + $0x18] sm:$0xff] %vm4064_vm0, %v4023_v60  ;;  %6132 = vrot.lane.b32.xlu1 %v7566_v54, %s7865_s19  ;;  %v3927_v40 = vor.u32 %v3926_v3, %v3923_v1  ;;  %v3936_v55 = vrot.slane %v3934_v28, 4  ;;  %v3738_v57 = vshll.u32 %v3555_v6, 16  ;;  %v3742_v37 = vshrl.u32 %v3555_v6, 16  ;;  %v4101_v60 = vld [vmem:[%s8609_s5 + $0x50] sm:$0x1] }
 0x207   : > { %3304 = vrot.lane.b32.xlu0 %v7191_v27, %s7857_s7  ;;  %v3942_v58 = vrot.slane %v3940_v32, 5  ;;  %v3731_v43 = vrot.slane %v3729_v18, 4  ;;  %v3734_v45 = vrot.slane %v3732_v30, 5  ;;  %v3748_v22 = vshll.u32 %v3556_v52, 16  ;;  %v7355_v61 = vld [vmem:[%s8609_s5 + $0xb4] sm:$0xf] }
 0x208   : > { %v4539_v36 = vpop.permute.xlu1 %4538  ;;  %v3928_v51 = vrot.slane %v3927_v40, 4  ;;  %v3937_v24 = vor.u32 %v3936_v55, %v3932_v21  ;;  %v3740_v12 = vrot.slane %v3738_v57, 5  ;;  %v3744_v50 = vrot.slane %v3742_v37, 4  ;;  %v7357_v35 = vld [vmem:[%s8609_s5 + $0xbc] sm:$0x1] }
 0x209   : > { %v4344_v39 = vpop.permute.xlu0 %4343  ;;  %v6495_v27 = vld [vmem:[#allocation2 + $0x10] sm:$0xff]  ;;  %4576 = vst.msk [vmem:[#allocation2 + $0x58] sm:$0xff] %vm4564_vm3, %v4539_v36  ;;  %v3735_v47 = vor.u32 %v3734_v45, %v3731_v43  ;;  %v3750_v14 = vrot.slane %v3748_v22, 5  ;;  %v7247_v34 = vrot.slane %v4123_v2, 9  ;;  %v4277_v8 = vrot.slane %v4124_v5, 5 }
 0x20a   : > { %4389 = vst.msk [vmem:[#allocation2 + $0x18] sm:$0xff] %vm4385_vm1, %v4344_v39  ;;  %v6526_v53 = vsel %vm6515_vm10, %v6495_v27, 0  ;;  %3499 = vrot.lane.b32.xlu1 %v7814_v16, %s7858_s8  ;;  %v3933_v23 = vsel %vm7933_vm2, %v3928_v51, %v3932_v21  ;;  %v3938_v42 = vrot.slane %v3937_v24, 4  ;;  %v3745_v11 = vor.u32 %v3744_v50, %v3740_v12  ;;  %v7331_v6 = vld [vmem:[%s8609_s5 + $0x54] sm:$0xf] }
 0x20b   : > { %7660 = vmatpush3.bf16.xpose.msra.mxu0 %v6526_v53  ;;  %6116 = vrot.lane.b32.xlu0 %v7558_v4, %s7865_s19  ;;  %v4280_v54 = vrot.slane %v4125_v49, 5  ;;  %v3736_v63 = vrot.slane %v3735_v47, 4  ;;  %v4278_v7 = vsel %vm8054_vm5, %v7247_v34, %v4277_v8  ;;  %v4279_v16 = vrot.slane %v4277_v8, 4  ;;  %v7332_v31 = vld [vmem:[%s8609_s5 + $0x58] sm:$0xf] }
 0x20c   : > { %v5084_v38 = vpop.permute.xlu1 %5083  ;;  %v7239_v15 = vrot.slane %v4099_v25, 9  ;;  %v3943_v29 = vsel %vm7933_vm2, %v3938_v42, %v3942_v58  ;;  %v3746_v59 = vrot.slane %v3745_v11, 4  ;;  %v4221_v48 = vrot.slane %v4100_v56, 5  ;;  %v7333_v52 = vld [vmem:[%s8609_s5 + $0x5c] sm:$0x1]  ;;  %v7816_v51 = vld [vmem:[%s8609_s5 + $0xb4] sm:$0xff]  }
 0x20d   : > { %v4523_v33 = vpop.permute.xlu0 %4522  ;;  %5121 = vst.msk [vmem:[#allocation2 + $0x58] sm:$0xff] %vm5109_vm4, %v5084_v38  ;;  %v4224_v62 = vrot.slane %v4101_v60, 5  ;;  %v7231_v17 = vcombine.low %v3933_v23, %v3943_v29  ;;  %v3741_v36 = vsel %vm7933_vm2, %v3736_v63, %v3740_v12  ;;  %v4966_v44 = vshrl.u32 %v7355_v61, 16  ;;  %v7419_v5 = vld [vmem:[%s8609_s5 + $0xb4] sm:$0xe] }
 0x20e   : > { %4568 = vst.msk [vmem:[#allocation2 + $0x18] sm:$0xff] %vm4564_vm3, %v4523_v33  ;;  %6453 = vrot.lane.b32.xlu1 %v7646_v20, %s7866_s20  ;;  %v4281_v20 = vsel %vm8054_vm5, %v4279_v16, %v4280_v54  ;;  %v3751_v39 = vsel %vm7933_vm2, %v3746_v59, %v3750_v14  ;;  %v4222_v9 = vsel %vm8054_vm5, %v7239_v15, %v4221_v48  ;;  %v4223_v1 = vrot.slane %v4221_v48, 4  ;;  %v7420_v49 = vld [vmem:[%s8609_s5 + $0xb8] sm:$0xf]  ;;  %v7421_v57 = vld [vmem:[%s8609_s5 + $0xbc] sm:$0x1] }
 0x20f   : > { %3483 = vrot.lane.b32.xlu0 %v7815_v46, %s7858_s8  ;;  %v7263_v27 = vcombine.low %v4278_v7, %v4281_v20  ;;  %v7223_v3 = vcombine.low %v3741_v36, %v3751_v39  ;;  %v4969_v28 = vshll.u32 %v7355_v61, 16  ;;  %v4975_v2 = vshll.u32 %v7356_v10, 16  ;;  %v7395_v45 = vld [vmem:[%s8609_s5 + $0x54] sm:$0xe]  ;;  %v7396_v47 = vld [vmem:[%s8609_s5 + $0x58] sm:$0xf] }
 0x210   : > { %v5405_v13 = vpop.permute.xlu1 %5404  ;;  %v4225_v21 = vsel %vm8054_vm5, %v4223_v1, %v4224_v62  ;;  %v4979_v32 = vshrl.u32 %v7356_v10, 16  ;;  %v4985_v18 = vshll.u32 %v7357_v35, 16  ;;  %v4774_v30 = vshrl.u32 %v7331_v6, 16  ;;  %v7102_v61 = vld [vmem:[%s7921_s22 + $0xcc] sm:$0xf] }
 0x211   : > { %v5068_v19 = vpop.permute.xlu0 %5067  ;;  %5442 = vst.msk [vmem:[#allocation2 + $0x58] sm:$0xff] %vm5430_vm6, %v5405_v13  ;;  %v7255_v46 = vcombine.low %v4222_v9, %v4225_v21  ;;  %v4971_v38 = vrot.slane %v4969_v28, 5  ;;  %v4977_v40 = vrot.slane %v4975_v2, 5  ;;  %v4777_v55 = vshll.u32 %v7331_v6, 16  ;;  %v7397_v13 = vld [vmem:[%s8609_s5 + $0x5c] sm:$0x1] }
 0x212   : > { %5113 = vst.msk [vmem:[#allocation2 + $0x18] sm:$0xff] %vm5109_vm4, %v5068_v19  ;;  %4044 = vrot.lane.b32.xlu1 %v7231_v17, %s7859_s9  ;;  %v4981_v25 = vrot.slane %v4979_v32, 4  ;;  %v4987_v33 = vrot.slane %v4985_v18, 5  ;;  %v4776_v58 = vrot.slane %v4774_v30, 4  ;;  %v4783_v43 = vshll.u32 %v7332_v31, 16  ;;  %v7817_v19 = vld [vmem:[%s8609_s5 + $0x54] sm:$0xff]  }
 0x213   : > { %6437 = vrot.lane.b32.xlu0 %v7638_v41, %s7866_s20  ;;  %v4968_v41 = vrot.slane %v4966_v44, 4  ;;  %v4779_v12 = vrot.slane %v4777_v55, 5  ;;  %v4787_v50 = vshrl.u32 %v7332_v31, 16  ;;  %v4793_v56 = vshll.u32 %v7333_v52, 16  ;;  %v7103_v59 = vld [vmem:[%s7921_s22 + $0xd0] sm:$0xf] }
 0x214   : > { %v2996_v4 = vpop.permute.xlu1 %2995  ;;  %v4982_v14 = vor.u32 %v4981_v25, %v4977_v40  ;;  %v4785_v34 = vrot.slane %v4783_v43, 5  ;;  %v7439_v8 = vrot.slane %v7419_v5, 9  ;;  %v5322_v60 = vrot.slane %v7420_v49, 5  ;;  %v7104_v48 = vld [vmem:[%s7921_s22 + $0xd4] sm:$0x1] }
 0x215   : > { %v5389_v53 = vpop.permute.xlu0 %5388  ;;  %3032 = vst.msk [vmem:[#allocation2 + $0x60] sm:$0xff] %vm3019_vm13, %v2996_v4  ;;  %v4972_v24 = vor.u32 %v4971_v38, %v4968_v41  ;;  %v4780_v42 = vor.u32 %v4779_v12, %v4776_v58  ;;  %v4789_v11 = vrot.slane %v4787_v50, 4  ;;  %v4795_v54 = vrot.slane %v4793_v56, 5  ;;  %v7078_v31 = vld [vmem:[%s7921_s22 + $0x6c] sm:$0xf] }
 0x216   : > { %5434 = vst.msk [vmem:[#allocation2 + $0x18] sm:$0xff] %vm5430_vm6, %v5389_v53  ;;  %4365 = vrot.lane.b32.xlu1 %v7263_v27, %s7860_s10  ;;  %v4983_v7 = vrot.slane %v4982_v14, 4  ;;  %v5323_v16 = vsel %vm8054_vm5, %v7439_v8, %v5322_v60  ;;  %v5324_v15 = vrot.slane %v5322_v60, 4  ;;  %v5325_v29 = vrot.slane %v7421_v57, 5  ;;  %v7079_v2 = vld [vmem:[%s7921_s22 + $0x70] sm:$0xf] }
 0x217   : > { %4028 = vrot.lane.b32.xlu0 %v7223_v3, %s7859_s9  ;;  %v4973_v23 = vrot.slane %v4972_v24, 4  ;;  %v4781_v17 = vrot.slane %v4780_v42, 4  ;;  %v4790_v36 = vor.u32 %v4789_v11, %v4785_v34  ;;  %v7431_v20 = vrot.slane %v7395_v45, 9  ;;  %v7080_v49 = vld [vmem:[%s7921_s22 + $0x74] sm:$0x1] }
 0x218   : > { %v5584_v37 = vpop.permute.xlu1 %5583  ;;  %v4988_v35 = vsel %vm7933_vm2, %v4983_v7, %v4987_v33  ;;  %v5326_v44 = vsel %vm8054_vm5, %v5324_v15, %v5325_v29  ;;  %v5266_v6 = vrot.slane %v7396_v47, 5  ;;  %v5269_v39 = vrot.slane %v7397_v13, 5  ;;  %v7166_v57 = vld [vmem:[%s7921_s22 + $0xcc] sm:$0xe]  ;;  %v7168_v45 = vld [vmem:[%s7921_s22 + $0xd4] sm:$0x1] }
 0x219   : > { %v2980_v22 = vpop.permute.xlu0 %2979  ;;  %5621 = vst.msk [vmem:[#allocation2 + $0x58] sm:$0xff] %vm5609_vm7, %v5584_v37  ;;  %v4978_v10 = vsel %vm7933_vm2, %v4973_v23, %v4977_v40  ;;  %v4786_v27 = vsel %vm7933_vm2, %v4781_v17, %v4785_v34  ;;  %v4791_v9 = vrot.slane %v4790_v36, 4  ;;  %v7455_v1 = vcombine.low %v5323_v16, %v5326_v44  ;;  %v7167_v37 = vld [vmem:[%s7921_s22 + $0xd0] sm:$0xf]  ;;  %v7142_v56 = vld [vmem:[%s7921_s22 + $0x6c] sm:$0xe] }
 0x21a   : > { %3024 = vst.msk [vmem:[#allocation2 + $0x20] sm:$0xff] %vm3019_vm13, %v2980_v22  ;;  %4544 = vrot.lane.b32.xlu1 %v7816_v51, %s7861_s11  ;;  %v7375_v4 = vcombine.low %v4978_v10, %v4988_v35  ;;  %v5267_v53 = vsel %vm8054_vm5, %v7431_v20, %v5266_v6  ;;  %v5268_v3 = vrot.slane %v5266_v6, 4  ;;  %v2900_v41 = vshrl.u32 %v7102_v61, 16  ;;  %v7143_v13 = vld [vmem:[%s7921_s22 + $0x70] sm:$0xf] }
 0x21b   : > { %4349 = vrot.lane.b32.xlu0 %v7255_v46, %s7860_s10  ;;  %v2903_v28 = vshll.u32 %v7102_v61, 16  ;;  %v4796_v21 = vsel %vm7933_vm2, %v4791_v9, %v4795_v54  ;;  %v2909_v32 = vshll.u32 %v7103_v59, 16  ;;  %v2913_v18 = vshrl.u32 %v7103_v59, 16  ;;  %v7144_v61 = vld [vmem:[%s7921_s22 + $0x74] sm:$0x1] }
 0x21c   : > { %v3317_v63 = vpop.permute.xlu1 %3316  ;;  %v2919_v30 = vshll.u32 %v7104_v48, 16  ;;  %v7367_v46 = vcombine.low %v4786_v27, %v4796_v21  ;;  %v5270_v38 = vsel %vm8054_vm5, %v5268_v3, %v5269_v39  ;;  %v2902_v40 = vrot.slane %v2900_v41, 4  ;;  %v7547_v15 = vld [vmem:[%s8609_s5 + $0xc0] sm:$0xf]  ;;  %v7548_v17 = vld [vmem:[%s8609_s5 + $0xc4] sm:$0xf] }
 0x21d   : > { %v5568_v62 = vpop.permute.xlu0 %5567  ;;  %3353 = vst.msk [vmem:[#allocation2 + $0x60] sm:$0xff] %vm3340_vm14, %v3317_v63  ;;  %v2905_v55 = vrot.slane %v2903_v28, 5  ;;  %v7447_v25 = vcombine.low %v5267_v53, %v5270_v38  ;;  %v2911_v33 = vrot.slane %v2909_v32, 5  ;;  %v2915_v58 = vrot.slane %v2913_v18, 4  ;;  %v7818_v28 = vld [vmem:[%s8609_s5 + $0xc0] sm:$0xff]  }
 0x21e   : > { %5613 = vst.msk [vmem:[#allocation2 + $0x18] sm:$0xff] %vm5609_vm7, %v5568_v62  ;;  %5089 = vrot.lane.b32.xlu1 %v7375_v4, %s7862_s12  ;;  %v2921_v43 = vrot.slane %v2919_v30, 5  ;;  %v2708_v24 = vshrl.u32 %v7078_v31, 16  ;;  %v2711_v12 = vshll.u32 %v7078_v31, 16  ;;  %v2717_v50 = vshll.u32 %v7079_v2, 16 }
 0x21f   : > { %4528 = vrot.lane.b32.xlu0 %v7817_v19, %s7861_s11  ;;  %v2906_v51 = vor.u32 %v2905_v55, %v2902_v40  ;;  %v2916_v14 = vor.u32 %v2915_v58, %v2911_v33  ;;  %v2721_v34 = vshrl.u32 %v7079_v2, 16  ;;  %v2727_v8 = vshll.u32 %v7080_v49, 16  ;;  %v7523_v18 = vld [vmem:[%s8609_s5 + $0x60] sm:$0xf]  ;;  %v7524_v55 = vld [vmem:[%s8609_s5 + $0x64] sm:$0xf] }
 0x220   : > { %v6129_v52 = vpop.permute.xlu1 %6128  ;;  %v7184_v60 = vrot.slane %v7166_v57, 9  ;;  %v2710_v42 = vrot.slane %v2708_v24, 4  ;;  %v2713_v11 = vrot.slane %v2711_v12, 5  ;;  %v2719_v54 = vrot.slane %v2717_v50, 5  ;;  %v7525_v58 = vld [vmem:[%s8609_s5 + $0x68] sm:$0x1] }
 0x221   : > { %v3301_v5 = vpop.permute.xlu0 %3300  ;;  %6166 = vst.msk [vmem:[#allocation2 + $0x58] sm:$0xff] %vm6154_vm8, %v6129_v52  ;;  %v2907_v23 = vrot.slane %v2906_v51, 4  ;;  %v2917_v19 = vrot.slane %v2916_v14, 4  ;;  %v2723_v63 = vrot.slane %v2721_v34, 4  ;;  %v2729_v7 = vrot.slane %v2727_v8, 5 }
 0x222   : > { %3345 = vst.msk [vmem:[#allocation2 + $0x20] sm:$0xff] %vm3340_vm14, %v3301_v5  ;;  %5410 = vrot.lane.b32.xlu1 %v7455_v1, %s7863_s13  ;;  %v3239_v16 = vrot.slane %v7167_v37, 5  ;;  %v2714_v59 = vor.u32 %v2713_v11, %v2710_v42  ;;  %v3242_v62 = vrot.slane %v7168_v45, 5  ;;  %v7176_v10 = vrot.slane %v7142_v56, 9  ;;  %v7549_v52 = vld [vmem:[%s8609_s5 + $0xc8] sm:$0x1] }
 0x223   : > { %5073 = vrot.lane.b32.xlu0 %v7367_v46, %s7862_s12  ;;  %v2912_v29 = vsel %vm7933_vm2, %v2907_v23, %v2911_v33  ;;  %v2922_v20 = vsel %vm7933_vm2, %v2917_v19, %v2921_v43  ;;  %v2724_v35 = vor.u32 %v2723_v63, %v2719_v54  ;;  %v3183_v27 = vrot.slane %v7143_v13, 5  ;;  %v7611_v43 = vld [vmem:[%s8609_s5 + $0xc0] sm:$0xe]  ;;  %v7612_v12 = vld [vmem:[%s8609_s5 + $0xc4] sm:$0xf] }
 0x224   : > { %v3496_v22 = vpop.permute.xlu1 %3495  ;;  %v10749_v44 = vsel %vm8054_vm5, %v7184_v60, %v3239_v16  ;;  %v3241_v6 = vrot.slane %v3239_v16, 4  ;;  %v7120_v39 = vcombine.low %v2912_v29, %v2922_v20  ;;  %v2715_v4 = vrot.slane %v2714_v59, 4  ;;  %v7613_v50 = vld [vmem:[%s8609_s5 + $0xc8] sm:$0x1]  ;;  %v7819_v56 = vld [vmem:[%s8609_s5 + $0x60] sm:$0xff]  }
 0x225   : > { %v6113_v47 = vpop.permute.xlu0 %6112  ;;  %3532 = vst.msk [vmem:[#allocation2 + $0x60] sm:$0xff] %vm3519_vm15, %v3496_v22  ;;  %v3186_v9 = vrot.slane %v7144_v61, 5  ;;  %v2725_v1 = vrot.slane %v2724_v35, 4  ;;  %v6011_v53 = vshrl.u32 %v7547_v15, 16  ;;  %v6014_v3 = vshll.u32 %v7547_v15, 16 }
 0x226   : > { %6158 = vst.msk [vmem:[#allocation2 + $0x18] sm:$0xff] %vm6154_vm8, %v6113_v47  ;;  %v3243_v31 = vsel %vm8054_vm5, %v3241_v6, %v3242_v62  ;;  %3001 = vrot.lane.b32.xlu1 %v7120_v39, %s7856_s6  ;;  %v2720_v41 = vsel %vm7933_vm2, %v2715_v4, %v2719_v54  ;;  %v10762_v21 = vsel %vm8054_vm5, %v7176_v10, %v3183_v27  ;;  %v3185_v32 = vrot.slane %v3183_v27, 4  ;;  %v7587_v19 = vld [vmem:[%s8609_s5 + $0x60] sm:$0xe]  ;;  %v7588_v29 = vld [vmem:[%s8609_s5 + $0x64] sm:$0xf] }
 0x227   : > { %5394 = vrot.lane.b32.xlu0 %v7447_v25, %s7863_s13  ;;  %v7200_v5 = vcombine.low %v10749_v44, %v3243_v31  ;;  %v2730_v30 = vsel %vm7933_vm2, %v2725_v1, %v2729_v7  ;;  %v6013_v46 = vrot.slane %v6011_v53, 4  ;;  %v6016_v38 = vrot.slane %v6014_v3, 5 }
 0x228   : > { %v6450_v48 = vpop.permute.xlu1 %6449  ;;  %v6020_v40 = vshll.u32 %v7548_v17, 16  ;;  %v7112_v57 = vcombine.low %v2720_v41, %v2730_v30  ;;  %v10772_v37 = vsel %vm8054_vm5, %v3185_v32, %v3186_v9  ;;  %v6024_v25 = vshrl.u32 %v7548_v17, 16  ;;  %v7589_v17 = vld [vmem:[%s8609_s5 + $0x68] sm:$0x1]  ;;  %v3583_v30 = vld [vmem:[%s8609_s5 + $0xbc] sm:$0x1] }
 0x229   : > { %v3480_v36 = vpop.permute.xlu0 %3479  ;;  %6487 = vst.msk [vmem:[#allocation2 + $0x58] sm:$0xff] %vm6475_vm9, %v6450_v48  ;;  %v6030_v33 = vshll.u32 %v7549_v52, 16  ;;  %v7192_v45 = vcombine.low %v10762_v21, %v10772_v37  ;;  %v6017_v22 = vor.u32 %v6016_v38, %v6013_v46  ;;  %v5819_v24 = vshrl.u32 %v7523_v18, 16  ;;  %v3581_v52 = vld [vmem:[%s8609_s5 + $0xb4] sm:$0xf] }
 0x22a   : > { %3524 = vst.msk [vmem:[#allocation2 + $0x20] sm:$0xff] %vm3519_vm15, %v3480_v36  ;;  %v6022_v51 = vrot.slane %v6020_v40, 5  ;;  %5589 = vrot.lane.b32.xlu1 %v7818_v28, %s7864_s14  ;;  %v6026_v34 = vrot.slane %v6024_v25, 4  ;;  %v5822_v60 = vshll.u32 %v7523_v18, 16  ;;  %v5828_v13 = vshll.u32 %v7524_v55, 16 }
 0x22b   : > { %2985 = vrot.lane.b32.xlu0 %v7112_v57, %s7856_s6  ;;  %v6032_v8 = vrot.slane %v6030_v33, 5  ;;  %v6018_v42 = vrot.slane %v6017_v22, 4  ;;  %v5821_v11 = vrot.slane %v5819_v24, 4  ;;  %v5832_v54 = vshrl.u32 %v7524_v55, 16  ;;  %v3557_v57 = vld [vmem:[%s8609_s5 + $0x54] sm:$0xf] }
 0x22c   : > { %v4041_v2 = vpop.permute.xlu1 %4040  ;;  %v5838_v61 = vshll.u32 %v7525_v58, 16  ;;  %v6027_v63 = vor.u32 %v6026_v34, %v6022_v51  ;;  %v5824_v7 = vrot.slane %v5822_v60, 5  ;;  %v5830_v16 = vrot.slane %v5828_v13, 5  ;;  %v7820_v33 = vld [vmem:[%s8609_s5 + $0xb4] sm:$0xff]  }
 0x22d   : > { %v6434_v49 = vpop.permute.xlu0 %6433  ;;  %4077 = vst.msk [vmem:[#allocation2 + $0x60] sm:$0xff] %vm4064_vm0, %v4041_v2  ;;  %v7631_v15 = vrot.slane %v7611_v43, 9  ;;  %v6023_v59 = vsel %vm7933_vm2, %v6018_v42, %v6022_v51  ;;  %v5834_v48 = vrot.slane %v5832_v54, 4  ;;  %v6367_v10 = vrot.slane %v7612_v12, 5  ;;  %v3582_v2 = vld [vmem:[%s8609_s5 + $0xb8] sm:$0xf] }
 0x22e   : > { %6479 = vst.msk [vmem:[#allocation2 + $0x18] sm:$0xff] %vm6475_vm9, %v6434_v49  ;;  %v5840_v62 = vrot.slane %v5838_v61, 5  ;;  %3322 = vrot.lane.b32.xlu1 %v7200_v5, %s7857_s7  ;;  %v6028_v36 = vrot.slane %v6027_v63, 4  ;;  %v5825_v20 = vor.u32 %v5824_v7, %v5821_v11  ;;  %v6370_v44 = vrot.slane %v7613_v50, 5  ;;  %v3558_v22 = vld [vmem:[%s8609_s5 + $0x58] sm:$0xf] }
 0x22f   : > { %5573 = vrot.lane.b32.xlu0 %v7819_v56, %s7864_s14  ;;  %v7623_v6 = vrot.slane %v7587_v19, 9  ;;  %v5835_v4 = vor.u32 %v5834_v48, %v5830_v16  ;;  %v10796_v9 = vsel %vm8054_vm5, %v7631_v15, %v6367_v10  ;;  %v6369_v1 = vrot.slane %v6367_v10, 4  ;;  %v3559_v56 = vld [vmem:[%s8609_s5 + $0x5c] sm:$0x1]  ;;  %v4126_v13 = vld [vmem:[%s8609_s5 + $0xb4] sm:$0xe] }
 0x230   : > { %v4362_v47 = vpop.permute.xlu1 %4361  ;;  %v6504_v14 = vld [vmem:[#allocation2 + $0x58] sm:$0xff]  ;;  %v6311_v31 = vrot.slane %v7588_v29, 5  ;;  %v6033_v53 = vsel %vm7933_vm2, %v6028_v36, %v6032_v8  ;;  %v5826_v3 = vrot.slane %v5825_v20, 4  ;;  %v6314_v28 = vrot.slane %v7589_v17, 5  ;;  %v4102_v48 = vld [vmem:[%s8609_s5 + $0x54] sm:$0xe] }
 0x231   : > { %v4025_v23 = vpop.permute.xlu0 %4024  ;;  %4398 = vst.msk [vmem:[#allocation2 + $0x60] sm:$0xff] %vm4385_vm1, %v4362_v47  ;;  %7676 = vmatprep.subr.msk.bf16.mxu0 %vm6515_vm10, %v6504_v14  ;;  %v7567_v5 = vcombine.low %v6023_v59, %v6033_v53  ;;  %v5836_v21 = vrot.slane %v5835_v4, 4  ;;  %v10806_v32 = vsel %vm8054_vm5, %v6369_v1, %v6370_v44  ;;  %v3945_v55 = vshrl.u32 %v3581_v52, 16  ;;  %v7821_v47 = vld [vmem:[%s8609_s5 + $0x54] sm:$0xff]   ;;  %v4128_v59 = vld [vmem:[%s8609_s5 + $0xbc] sm:$0x1] }
 0x232   : > { %4069 = vst.msk [vmem:[#allocation2 + $0x20] sm:$0xff] %vm4064_vm0, %v4025_v23  ;;  %v10810_v18 = vsel %vm8054_vm5, %v7623_v6, %v6311_v31  ;;  %v5831_v49 = vsel %vm7933_vm2, %v5826_v3, %v5830_v16  ;;  %v7647_v38 = vcombine.low %v10796_v9, %v10806_v32  ;;  %v6313_v40 = vrot.slane %v6311_v31, 4  ;;  %v4127_v19 = vld [vmem:[%s8609_s5 + $0xb8] sm:$0xf]  ;;  %v4104_v31 = vld [vmem:[%s8609_s5 + $0x5c] sm:$0x1] }
 0x233   : > { %3306 = vrot.lane.b32.xlu0 %v7192_v45, %s7857_s7  ;;  %6134 = vrot.lane.b32.xlu1 %v7567_v5, %s7865_s19  ;;  %v5841_v37 = vsel %vm7933_vm2, %v5836_v21, %v5840_v62  ;;  %v3948_v58 = vshll.u32 %v3581_v52, 16  ;;  %v3954_v43 = vshll.u32 %v3582_v2, 16  ;;  %v3958_v45 = vshrl.u32 %v3582_v2, 16  ;;  %v4103_v20 = vld [vmem:[%s8609_s5 + $0x58] sm:$0xf] }
 0x234   : > { %v4541_v35 = vpop.permute.xlu1 %4540  ;;  %v7559_v51 = vcombine.low %v5831_v49, %v5841_v37  ;;  %v6315_v24 = vsel %vm8054_vm5, %v6313_v40, %v6314_v28  ;;  %v3947_v12 = vrot.slane %v3945_v55, 4  ;;  %v3964_v50 = vshll.u32 %v3583_v30, 16  ;;  %v7358_v5 = vld [vmem:[%s8609_s5 + $0xc0] sm:$0xf]  ;;  %v7359_v49 = vld [vmem:[%s8609_s5 + $0xc4] sm:$0xf] }
 0x235   : > { %v4346_v39 = vpop.permute.xlu0 %4345  ;;  %v6496_v27 = vld [vmem:[#allocation2 + $0x18] sm:$0xff]  ;;  %4577 = vst.msk [vmem:[#allocation2 + $0x60] sm:$0xff] %vm4564_vm3, %v4541_v35  ;;  %v7639_v14 = vcombine.low %v10810_v18, %v6315_v24  ;;  %v3950_v34 = vrot.slane %v3948_v58, 5  ;;  %v3956_v8 = vrot.slane %v3954_v43, 5  ;;  %v3960_v60 = vrot.slane %v3958_v45, 4 }
 0x236   : > { %4390 = vst.msk [vmem:[#allocation2 + $0x20] sm:$0xff] %vm4385_vm1, %v4346_v39  ;;  %v6529_v41 = vsel %vm6515_vm10, %v6496_v27, 0  ;;  %v3966_v42 = vrot.slane %v3964_v50, 5  ;;  %v3753_v11 = vshrl.u32 %v3557_v57, 16  ;;  %v3756_v54 = vshll.u32 %v3557_v57, 16 }
 0x237   : > { %7662 = vmatpush3.bf16.xpose.msra.mxu0 %v6529_v41  ;;  %6118 = vrot.lane.b32.xlu0 %v7559_v51, %s7865_s19  ;;  %v3762_v61 = vshll.u32 %v3558_v22, 16  ;;  %v3951_v7 = vor.u32 %v3950_v34, %v3947_v12  ;;  %v3961_v16 = vor.u32 %v3960_v60, %v3956_v8  ;;  %v3766_v15 = vshrl.u32 %v3558_v22, 16  ;;  %v7334_v45 = vld [vmem:[%s8609_s5 + $0x60] sm:$0xf]  ;;  %v7336_v60 = vld [vmem:[%s8609_s5 + $0x68] sm:$0x1] }
 0x238   : > { %v5086_v46 = vpop.permute.xlu1 %5085  ;;  %3501 = vrot.lane.b32.xlu1 %v7820_v33, %s7858_s8  ;;  %v3772_v29 = vshll.u32 %v3559_v56, 16  ;;  %v3755_v62 = vrot.slane %v3753_v11, 4  ;;  %v3758_v10 = vrot.slane %v3756_v54, 5  ;;  %v7248_v36 = vrot.slane %v4126_v13, 9  ;;  %v7360_v33 = vld [vmem:[%s8609_s5 + $0xc8] sm:$0x1] }
 0x239   : > { %v4525_v25 = vpop.permute.xlu0 %4524  ;;  %5122 = vst.msk [vmem:[#allocation2 + $0x60] sm:$0xff] %vm5109_vm4, %v5086_v46  ;;  %v3764_v17 = vrot.slane %v3762_v61, 5  ;;  %v3952_v35 = vrot.slane %v3951_v7, 4  ;;  %v3962_v44 = vrot.slane %v3961_v16, 4  ;;  %v3768_v6 = vrot.slane %v3766_v15, 4 }
 0x23a   : > { %4569 = vst.msk [vmem:[#allocation2 + $0x20] sm:$0xff] %vm4564_vm3, %v4525_v25  ;;  %v3774_v39 = vrot.slane %v3772_v29, 5  ;;  %v3759_v4 = vor.u32 %v3758_v10, %v3755_v62  ;;  %v4284_v9 = vrot.slane %v4127_v19, 5  ;;  %v4287_v1 = vrot.slane %v4128_v59, 5  ;;  %v7335_v56 = vld [vmem:[%s8609_s5 + $0x64] sm:$0xf] }
 0x23b   : > { %3485 = vrot.lane.b32.xlu0 %v7821_v47, %s7858_s8  ;;  %v7240_v52 = vrot.slane %v4102_v48, 9  ;;  %v3957_v3 = vsel %vm7933_vm2, %v3952_v35, %v3956_v8  ;;  %v3967_v41 = vsel %vm7933_vm2, %v3962_v44, %v3966_v42  ;;  %v3769_v28 = vor.u32 %v3768_v6, %v3764_v17  ;;  %v7422_v13 = vld [vmem:[%s8609_s5 + $0xc0] sm:$0xe]  ;;  %v7423_v61 = vld [vmem:[%s8609_s5 + $0xc4] sm:$0xf] }
 0x23c   : > { %v5407_v23 = vpop.permute.xlu1 %5406  ;;  %6455 = vrot.lane.b32.xlu1 %v7647_v38, %s7866_s20  ;;  %v4228_v2 = vrot.slane %v4103_v20, 5  ;;  %v7232_v21 = vcombine.low %v3957_v3, %v3967_v41  ;;  %v3760_v32 = vrot.slane %v3759_v4, 4  ;;  %v4285_v18 = vsel %vm8054_vm5, %v7248_v36, %v4284_v9  ;;  %v7822_v19 = vld [vmem:[%s8609_s5 + $0xc0] sm:$0xff]   ;;  %v7424_v59 = vld [vmem:[%s8609_s5 + $0xc8] sm:$0x1] }
 0x23d   : > { %v5070_v63 = vpop.permute.xlu0 %5069  ;;  %5443 = vst.msk [vmem:[#allocation2 + $0x60] sm:$0xff] %vm5430_vm6, %v5407_v23  ;;  %v4286_v30 = vrot.slane %v4284_v9, 4  ;;  %v3770_v46 = vrot.slane %v3769_v28, 4  ;;  %v4231_v55 = vrot.slane %v4104_v31, 5  ;;  %v4990_v58 = vshrl.u32 %v7358_v5, 16 }
 0x23e   : > { %5114 = vst.msk [vmem:[#allocation2 + $0x20] sm:$0xff] %vm5109_vm4, %v5070_v63  ;;  %v4229_v38 = vsel %vm8054_vm5, %v7240_v52, %v4228_v2  ;;  %v4230_v40 = vrot.slane %v4228_v2, 4  ;;  %v3765_v57 = vsel %vm7933_vm2, %v3760_v32, %v3764_v17  ;;  %v4993_v43 = vshll.u32 %v7358_v5, 16  ;;  %v7398_v20 = vld [vmem:[%s8609_s5 + $0x60] sm:$0xe] }
 0x23f   : > { %6439 = vrot.lane.b32.xlu0 %v7639_v14, %s7866_s20  ;;  %v4288_v37 = vsel %vm8054_vm5, %v4286_v30, %v4287_v1  ;;  %v3775_v22 = vsel %vm7933_vm2, %v3770_v46, %v3774_v39  ;;  %v4999_v50 = vshll.u32 %v7359_v49, 16  ;;  %v4992_v34 = vrot.slane %v4990_v58, 4  ;;  %v7399_v4 = vld [vmem:[%s8609_s5 + $0x64] sm:$0xf]  ;;  %v7400_v52 = vld [vmem:[%s8609_s5 + $0x68] sm:$0x1] }
 0x240   : > { %v2998_v27 = vpop.permute.xlu1 %2997  ;;  %4046 = vrot.lane.b32.xlu1 %v7232_v21, %s7859_s9  ;;  %v7264_v24 = vcombine.low %v4285_v18, %v4288_v37  ;;  %v4232_v12 = vsel %vm8054_vm5, %v4230_v40, %v4231_v55  ;;  %v7224_v47 = vcombine.low %v3765_v57, %v3775_v22  ;;  %v4995_v8 = vrot.slane %v4993_v43, 5  ;;  %v7550_v21 = vld [vmem:[%s8609_s5 + $0xcc] sm:$0xf]  ;;  %v7552_v58 = vld [vmem:[%s8609_s5 + $0xd4] sm:$0x1] }
 0x241   : > { %v5391_v53 = vpop.permute.xlu0 %5390  ;;  %3033 = vst.msk [vmem:[#allocation2 + $0x68] sm:$0xff] %vm3019_vm13, %v2998_v27  ;;  %v7256_v14 = vcombine.low %v4229_v38, %v4232_v12  ;;  %v5001_v23 = vrot.slane %v4999_v50, 5  ;;  %v5003_v42 = vshrl.u32 %v7359_v49, 16  ;;  %v5009_v11 = vshll.u32 %v7360_v33, 16  ;;  %v7551_v33 = vld [vmem:[%s8609_s5 + $0xd0] sm:$0xf] }
 0x242   : > { %5435 = vst.msk [vmem:[#allocation2 + $0x20] sm:$0xff] %vm5430_vm6, %v5391_v53  ;;  %v4798_v54 = vshrl.u32 %v7334_v45, 16  ;;  %v4996_v7 = vor.u32 %v4995_v8, %v4992_v34  ;;  %v4801_v16 = vshll.u32 %v7334_v45, 16  ;;  %v4807_v15 = vshll.u32 %v7335_v56, 16  ;;  %v7823_v53 = vld [vmem:[%s8609_s5 + $0x60] sm:$0xff]  }
 0x243   : > { %4030 = vrot.lane.b32.xlu0 %v7224_v47, %s7859_s9  ;;  %v4811_v29 = vshrl.u32 %v7335_v56, 16  ;;  %v5005_v62 = vrot.slane %v5003_v42, 4  ;;  %v5011_v10 = vrot.slane %v5009_v11, 5  ;;  %v4817_v36 = vshll.u32 %v7336_v60, 16  ;;  %v7526_v56 = vld [vmem:[%s8609_s5 + $0x6c] sm:$0xf] }
 0x244   : > { %v5586_v25 = vpop.permute.xlu1 %5585  ;;  %4367 = vrot.lane.b32.xlu1 %v7264_v24, %s7860_s10  ;;  %v4800_v17 = vrot.slane %v4798_v54, 4  ;;  %v4997_v35 = vrot.slane %v4996_v7, 4  ;;  %v4803_v44 = vrot.slane %v4801_v16, 5  ;;  %v4809_v6 = vrot.slane %v4807_v15, 5  ;;  %v7527_v47 = vld [vmem:[%s8609_s5 + $0x70] sm:$0xf] }
 0x245   : > { %v2982_v51 = vpop.permute.xlu0 %2981  ;;  %5622 = vst.msk [vmem:[#allocation2 + $0x60] sm:$0xff] %vm5609_vm7, %v5586_v25  ;;  %v4813_v39 = vrot.slane %v4811_v29, 4  ;;  %v5006_v27 = vor.u32 %v5005_v62, %v5001_v23  ;;  %v4819_v9 = vrot.slane %v4817_v36, 5  ;;  %v7440_v1 = vrot.slane %v7422_v13, 9  ;;  %v7614_v15 = vld [vmem:[%s8609_s5 + $0xcc] sm:$0xe] }
 0x246   : > { %3025 = vst.msk [vmem:[#allocation2 + $0x28] sm:$0xff] %vm3019_vm13, %v2982_v51  ;;  %v5329_v31 = vrot.slane %v7423_v61, 5  ;;  %v5002_v3 = vsel %vm7933_vm2, %v4997_v35, %v5001_v23  ;;  %v4804_v41 = vor.u32 %v4803_v44, %v4800_v17  ;;  %v5332_v5 = vrot.slane %v7424_v59, 5  ;;  %v7528_v61 = vld [vmem:[%s8609_s5 + $0x74] sm:$0x1] }
 0x247   : > { %4351 = vrot.lane.b32.xlu0 %v7256_v14, %s7860_s10  ;;  %v4814_v28 = vor.u32 %v4813_v39, %v4809_v6  ;;  %v5007_v18 = vrot.slane %v5006_v27, 4  ;;  %v7432_v46 = vrot.slane %v7398_v20, 9  ;;  %v5273_v55 = vrot.slane %v7399_v4, 5  ;;  %v7615_v17 = vld [vmem:[%s8609_s5 + $0xd0] sm:$0xf] }
 0x248   : > { %v3319_v63 = vpop.permute.xlu1 %3318  ;;  %4546 = vrot.lane.b32.xlu1 %v7822_v19, %s7861_s11  ;;  %v5330_v30 = vsel %vm8054_vm5, %v7440_v1, %v5329_v31  ;;  %v5331_v49 = vrot.slane %v5329_v31, 4  ;;  %v4805_v38 = vrot.slane %v4804_v41, 4  ;;  %v5276_v57 = vrot.slane %v7400_v52, 5  ;;  %v7616_v36 = vld [vmem:[%s8609_s5 + $0xd4] sm:$0x1]  ;;  %v7824_v27 = vld [vmem:[%s8609_s5 + $0xcc] sm:$0xff]  }
 0x249   : > { %v5570_v48 = vpop.permute.xlu0 %5569  ;;  %3354 = vst.msk [vmem:[#allocation2 + $0x68] sm:$0xff] %vm3340_vm14, %v3319_v63  ;;  %v4815_v40 = vrot.slane %v4814_v28, 4  ;;  %v5012_v37 = vsel %vm7933_vm2, %v5007_v18, %v5011_v10  ;;  %v6035_v43 = vshrl.u32 %v7550_v21, 16  ;;  %v6038_v45 = vshll.u32 %v7550_v21, 16  ;;  %v7590_v4 = vld [vmem:[%s8609_s5 + $0x6c] sm:$0xe] }
 0x24a   : > { %5614 = vst.msk [vmem:[#allocation2 + $0x20] sm:$0xff] %vm5609_vm7, %v5570_v48  ;;  %v5333_v25 = vsel %vm8054_vm5, %v5331_v49, %v5332_v5  ;;  %v7376_v22 = vcombine.low %v5002_v3, %v5012_v37  ;;  %v4810_v51 = vsel %vm7933_vm2, %v4805_v38, %v4809_v6  ;;  %v5274_v8 = vsel %vm8054_vm5, %v7432_v46, %v5273_v55  ;;  %v7592_v5 = vld [vmem:[%s8609_s5 + $0x74] sm:$0x1]  ;;  %v7825_v21 = vld [vmem:[%s8609_s5 + $0x6c] sm:$0xff]  }
 0x24b   : > { %4530 = vrot.lane.b32.xlu0 %v7823_v53, %s7861_s11  ;;  %v4820_v24 = vsel %vm7933_vm2, %v4815_v40, %v4819_v9  ;;  %v7456_v12 = vcombine.low %v5330_v30, %v5333_v25  ;;  %v5275_v60 = vrot.slane %v5273_v55, 4  ;;  %v6037_v13 = vrot.slane %v6035_v43, 4  ;;  %v7591_v53 = vld [vmem:[%s8609_s5 + $0x70] sm:$0xf] }
 0x24c   : > { %v6131_v2 = vpop.permute.xlu1 %6130  ;;  %v7368_v14 = vcombine.low %v4810_v51, %v4820_v24  ;;  %5091 = vrot.lane.b32.xlu1 %v7376_v22, %s7862_s12  ;;  %v6040_v23 = vrot.slane %v6038_v45, 5  ;;  %v6044_v42 = vshll.u32 %v7551_v33, 16  ;;  %v6048_v11 = vshrl.u32 %v7551_v33, 16 }
 0x24d   : > { %v3303_v32 = vpop.permute.xlu0 %3302  ;;  %6167 = vst.msk [vmem:[#allocation2 + $0x60] sm:$0xff] %vm6154_vm8, %v6131_v2  ;;  %v6054_v54 = vshll.u32 %v7552_v58, 16  ;;  %v5277_v19 = vsel %vm8054_vm5, %v5275_v60, %v5276_v57  ;;  %v5843_v63 = vshrl.u32 %v7526_v56, 16  ;;  %v5846_v7 = vshll.u32 %v7526_v56, 16 }
 0x24e   : > { %3346 = vst.msk [vmem:[#allocation2 + $0x28] sm:$0xff] %vm3340_vm14, %v3303_v32  ;;  %v5852_v16 = vshll.u32 %v7527_v47, 16  ;;  %v7448_v29 = vcombine.low %v5274_v8, %v5277_v19  ;;  %v6041_v48 = vor.u32 %v6040_v23, %v6037_v13  ;;  %v6046_v62 = vrot.slane %v6044_v42, 5 }
 0x24f   : > { %5075 = vrot.lane.b32.xlu0 %v7368_v14, %s7862_s12  ;;  %v6050_v10 = vrot.slane %v6048_v11, 4  ;;  %v6056_v35 = vrot.slane %v6054_v54, 5  ;;  %v5845_v44 = vrot.slane %v5843_v63, 4  ;;  %v5848_v6 = vrot.slane %v5846_v7, 5  ;;  %v6509_v7 = vld [vmem:[%s11045_s3] sm:$0xff] }
 0x250   : > { %v3498_v50 = vpop.permute.xlu1 %3497  ;;  %v5854_v39 = vrot.slane %v5852_v16, 5  ;;  %5412 = vrot.lane.b32.xlu1 %v7456_v12, %s7863_s13  ;;  %v6042_v9 = vrot.slane %v6041_v48, 4  ;;  %v5856_v31 = vshrl.u32 %v7527_v47, 16  ;;  %v5862_v52 = vshll.u32 %v7528_v61, 16 }
 0x251   : > { %v6115_v34 = vpop.permute.xlu0 %6114  ;;  %3533 = vst.msk [vmem:[#allocation2 + $0x68] sm:$0xff] %vm3519_vm15, %v3498_v50  ;;  %v6051_v1 = vor.u32 %v6050_v10, %v6046_v62  ;;  %v5849_v3 = vor.u32 %v5848_v6, %v5845_v44  ;;  %v7632_v41 = vrot.slane %v7614_v15, 9  ;;  %v6374_v28 = vrot.slane %v7615_v17, 5 }
 0x252   : > { %6159 = vst.msk [vmem:[#allocation2 + $0x20] sm:$0xff] %vm6154_vm8, %v6115_v34  ;;  %v6377_v2 = vrot.slane %v7616_v36, 5  ;;  %v6047_v32 = vsel %vm7933_vm2, %v6042_v9, %v6046_v62  ;;  %v5858_v30 = vrot.slane %v5856_v31, 4  ;;  %v5864_v40 = vrot.slane %v5862_v52, 5 }
 0x253   : > { %5396 = vrot.lane.b32.xlu0 %v7448_v29, %s7863_s13  ;;  %v6052_v18 = vrot.slane %v6051_v1, 4  ;;  %v5850_v38 = vrot.slane %v5849_v3, 4  ;;  %v6376_v55 = vrot.slane %v6374_v28, 4  ;;  %v7624_v57 = vrot.slane %v7590_v4, 9 }
 0x254   : > { %v6452_v59 = vpop.permute.xlu1 %6451  ;;  %5591 = vrot.lane.b32.xlu1 %v7824_v27, %s7864_s14  ;;  %v5859_v25 = vor.u32 %v5858_v30, %v5854_v39  ;;  %v6318_v33 = vrot.slane %v7591_v53, 5  ;;  %v6321_v58 = vrot.slane %v7592_v5, 5  ;;  %v6375_v45 = vsel %vm8054_vm5, %v7632_v41, %v6374_v28 }
 0x255   : > { %v3482_v20 = vpop.permute.xlu0 %3481  ;;  %6488 = vst.msk [vmem:[#allocation2 + $0x60] sm:$0xff] %vm6475_vm9, %v6452_v59  ;;  %v6057_v37 = vsel %vm7933_vm2, %v6052_v18, %v6056_v35  ;;  %v6378_v22 = vsel %vm8054_vm5, %v6376_v55, %v6377_v2  ;;  %v5855_v51 = vsel %vm7933_vm2, %v5850_v38, %v5854_v39  ;;  %v7867_v15 = vmov 0  }
 0x256   : > { %3525 = vst.msk [vmem:[#allocation2 + $0x28] sm:$0xff] %vm3519_vm15, %v3482_v20  ;;  %v7568_v43 = vcombine.low %v6047_v32, %v6057_v37  ;;  %v5860_v24 = vrot.slane %v5859_v25, 4  ;;  %v6320_v12 = vrot.slane %v6318_v33, 4  ;;  %v7648_v34 = vcombine.low %v6375_v45, %v6378_v22  ;;  %7726 = vset.pattern.permute.xlu0 %v7867_v15 }
 0x257   : > { %5575 = vrot.lane.b32.xlu0 %v7825_v21, %s7864_s14  ;;  %v6319_v8 = vsel %vm8054_vm5, %v7624_v57, %v6318_v33  ;;  %v7868_v29 = vmov 1   ;;  %v7869_v62 = vmov 2  }
 0x258   : > { %v4043_v49 = vpop.permute.xlu1 %4042  ;;  %6136 = vrot.lane.b32.xlu1 %v7568_v43, %s7865_s19  ;;  %v5865_v14 = vsel %vm7933_vm2, %v5860_v24, %v5864_v40  ;;  %v6322_v60 = vsel %vm8054_vm5, %v6320_v12, %v6321_v58 }
 0x259   : > { %v6436_v46 = vpop.permute.xlu0 %6435  ;;  %4078 = vst.msk [vmem:[#allocation2 + $0x68] sm:$0xff] %vm4064_vm0, %v4043_v49  ;;  %v7560_v13 = vcombine.low %v5855_v51, %v5865_v14  ;;  %v7640_v42 = vcombine.low %v6319_v8, %v6322_v60  ;;  %7727 = vset.pattern.permute.xlu1 %v7868_v29 }
 0x25a   : > { %6480 = vst.msk [vmem:[#allocation2 + $0x20] sm:$0xff] %vm6475_vm9, %v6436_v46 }
 0x25b   : > { %6120 = vrot.lane.b32.xlu0 %v7560_v13, %s7865_s19 }
 0x25c   : > { %v4364_v50 = vpop.permute.xlu1 %4363  ;;  %v6505_v56 = vld [vmem:[#allocation2 + $0x60] sm:$0xff]  ;;  %6457 = vrot.lane.b32.xlu1 %v7648_v34, %s7866_s20 }
 0x25d   : > { %v4027_v47 = vpop.permute.xlu0 %4026  ;;  %4399 = vst.msk [vmem:[#allocation2 + $0x68] sm:$0xff] %vm4385_vm1, %v4364_v50  ;;  %7677 = vmatprep.subr.msk.bf16.mxu0 %vm6515_vm10, %v6505_v56 }
 0x25e   : > { %4070 = vst.msk [vmem:[#allocation2 + $0x28] sm:$0xff] %vm4064_vm0, %v4027_v47 }
 0x25f   : > { %6441 = vrot.lane.b32.xlu0 %v7640_v42, %s7866_s20 }
 0x260   : > { %v4543_v23 = vpop.permute.xlu1 %4542  ;;  %6611 = vperm.xlu1 %7727, %v6509_v7  }
 0x261   : > { %v4348_v11 = vpop.permute.xlu0 %4347  ;;  %v6497_v54 = vld [vmem:[#allocation2 + $0x20] sm:$0xff]  ;;  %4578 = vst.msk [vmem:[#allocation2 + $0x68] sm:$0xff] %vm4564_vm3, %v4543_v23 }
 0x262   : > { %4391 = vst.msk [vmem:[#allocation2 + $0x28] sm:$0xff] %vm4385_vm1, %v4348_v11  ;;  %v6532_v0 = vsel %vm6515_vm10, %v6497_v54, 0 }
 0x263   : > { %7664 = vmatpush3.bf16.xpose.msra.mxu0 %v6532_v0  ;;  %6512 = vperm.xlu0 %7726, %v6509_v7  }
 0x264   : > { %v5088_v61 = vpop.permute.xlu1 %5087  ;;  %7728 = vset.pattern.permute.xlu1 %v7869_v62 }
 0x265   : > { %v4527_v19 = vpop.permute.xlu0 %4526  ;;  %5123 = vst.msk [vmem:[#allocation2 + $0x68] sm:$0xff] %vm5109_vm4, %v5088_v61  ;;  %6617 = vperm.xlu1 %7728, %v6509_v7  }
 0x266   : > { %4570 = vst.msk [vmem:[#allocation2 + $0x28] sm:$0xff] %vm4564_vm3, %v4527_v19 }
 0x267   : > { %7729 = vset.pattern.permute.xlu0 %v7869_v62 }
 0x268   : > { %v5409_v63 = vpop.permute.xlu1 %5408 }
 0x269   : > { %v5072_v16 = vpop.permute.xlu0 %5071  ;;  %5444 = vst.msk [vmem:[#allocation2 + $0x68] sm:$0xff] %vm5430_vm6, %v5409_v63 }
 0x26a   : > { %5115 = vst.msk [vmem:[#allocation2 + $0x28] sm:$0xff] %vm5109_vm4, %v5072_v16 }
 0x26c   : > { %v3000_v48 = vpop.permute.xlu1 %2999 }
 0x26d   : > { %v5393_v59 = vpop.permute.xlu0 %5392  ;;  %3034 = vst.msk [vmem:[#allocation2 + $0x70] sm:$0xff] %vm3019_vm13, %v3000_v48 }
 0x26e   : > { %5436 = vst.msk [vmem:[#allocation2 + $0x28] sm:$0xff] %vm5430_vm6, %v5393_v59 }
 0x270   : > { %v5588_v17 = vpop.permute.xlu1 %5587 }
 0x271   : > { %v2984_v10 = vpop.permute.xlu0 %2983  ;;  %5623 = vst.msk [vmem:[#allocation2 + $0x68] sm:$0xff] %vm5609_vm7, %v5588_v17 }
 0x272   : > { %3026 = vst.msk [vmem:[#allocation2 + $0x30] sm:$0xff] %vm3019_vm13, %v2984_v10 }
 0x274   : > { %v3321_v20 = vpop.permute.xlu1 %3320 }
 0x275   : > { %v5572_v36 = vpop.permute.xlu0 %5571  ;;  %3355 = vst.msk [vmem:[#allocation2 + $0x70] sm:$0xff] %vm3340_vm14, %v3321_v20 }
 0x276   : > { %5615 = vst.msk [vmem:[#allocation2 + $0x28] sm:$0xff] %vm5609_vm7, %v5572_v36 }
 0x278   : > { %v6133_v44 = vpop.permute.xlu1 %6132 }
 0x279   : > { %v3305_v35 = vpop.permute.xlu0 %3304  ;;  %6168 = vst.msk [vmem:[#allocation2 + $0x68] sm:$0xff] %vm6154_vm8, %v6133_v44 }
 0x27a   : > { %3347 = vst.msk [vmem:[#allocation2 + $0x30] sm:$0xff] %vm3340_vm14, %v3305_v35 }
 0x27c   : > { %v3500_v39 = vpop.permute.xlu1 %3499 }
 0x27d   : > { %v6117_v6 = vpop.permute.xlu0 %6116  ;;  %3534 = vst.msk [vmem:[#allocation2 + $0x70] sm:$0xff] %vm3519_vm15, %v3500_v39 }
 0x27e   : > { %6160 = vst.msk [vmem:[#allocation2 + $0x28] sm:$0xff] %vm6154_vm8, %v6117_v6 }
 0x280   : > { %v6454_v27 = vpop.permute.xlu1 %6453 }
 0x281   : > { %v3484_v4 = vpop.permute.xlu0 %3483  ;;  %6489 = vst.msk [vmem:[#allocation2 + $0x68] sm:$0xff] %vm6475_vm9, %v6454_v27 }
 0x282   : > { %3526 = vst.msk [vmem:[#allocation2 + $0x30] sm:$0xff] %vm3519_vm15, %v3484_v4 }
 0x284   : > { %v4045_v1 = vpop.permute.xlu1 %4044 }
 0x285   : > { %v6438_v9 = vpop.permute.xlu0 %6437  ;;  %4079 = vst.msk [vmem:[#allocation2 + $0x70] sm:$0xff] %vm4064_vm0, %v4045_v1 }
 0x286   : > { %6481 = vst.msk [vmem:[#allocation2 + $0x28] sm:$0xff] %vm6475_vm9, %v6438_v9 }
 0x288   : > { %v6506_v52 = vld [vmem:[#allocation2 + $0x68] sm:$0xff]  ;;  %v4366_v53 = vpop.permute.xlu1 %4365 }
 0x289   : > { %v4029_v31 = vpop.permute.xlu0 %4028  ;;  %7678 = vmatprep.subr.msk.bf16.mxu0 %vm6515_vm10, %v6506_v52  ;;  %4400 = vst.msk [vmem:[#allocation2 + $0x70] sm:$0xff] %vm4385_vm1, %v4366_v53 }
 0x28a   : > { %4071 = vst.msk [vmem:[#allocation2 + $0x30] sm:$0xff] %vm4064_vm0, %v4029_v31 }
 0x28c   : > { %v4545_v2 = vpop.permute.xlu1 %4544 }
 0x28d   : > { %v4350_v3 = vpop.permute.xlu0 %4349  ;;  %v6498_v41 = vld [vmem:[#allocation2 + $0x28] sm:$0xff]  ;;  %4579 = vst.msk [vmem:[#allocation2 + $0x70] sm:$0xff] %vm4564_vm3, %v4545_v2 }
 0x28e   : > { %4392 = vst.msk [vmem:[#allocation2 + $0x30] sm:$0xff] %vm4385_vm1, %v4350_v3  ;;  %v6535_v28 = vsel %vm6515_vm10, %v6498_v41, 0 }
 0x28f   : > { %7666 = vmatpush3.bf16.xpose.msra.mxu0 %v6535_v28 }
 0x290   : > { %v5090_v21 = vpop.permute.xlu1 %5089 }
 0x291   : > { %v4529_v5 = vpop.permute.xlu0 %4528  ;;  %5124 = vst.msk [vmem:[#allocation2 + $0x70] sm:$0xff] %vm5109_vm4, %v5090_v21 }
 0x292   : > { %4571 = vst.msk [vmem:[#allocation2 + $0x30] sm:$0xff] %vm4564_vm3, %v4529_v5 }
 0x294   : > { %v5411_v18 = vpop.permute.xlu1 %5410 }
 0x295   : > { %v5074_v32 = vpop.permute.xlu0 %5073  ;;  %5445 = vst.msk [vmem:[#allocation2 + $0x70] sm:$0xff] %vm5430_vm6, %v5411_v18 }
 0x296   : > { %5116 = vst.msk [vmem:[#allocation2 + $0x30] sm:$0xff] %vm5109_vm4, %v5074_v32 }
 0x298   : > { %v3002_v49 = vpop.permute.xlu1 %3001 }
 0x299   : > { %v5395_v30 = vpop.permute.xlu0 %5394  ;;  %3035 = vst.msk [vmem:[#allocation2 + $0x78] sm:$0xff] %vm3019_vm13, %v3002_v49 }
 0x29a   : > { %5437 = vst.msk [vmem:[#allocation2 + $0x30] sm:$0xff] %vm5430_vm6, %v5395_v30 }
 0x29c   : > { %v5590_v38 = vpop.permute.xlu1 %5589 }
 0x29d   : > { %v2986_v46 = vpop.permute.xlu0 %2985  ;;  %5624 = vst.msk [vmem:[#allocation2 + $0x70] sm:$0xff] %vm5609_vm7, %v5590_v38 }
 0x29e   : > { %3027 = vst.msk [vmem:[#allocation2 + $0x38] sm:$0xff] %vm3019_vm13, %v2986_v46 }
 0x2a0   : > { %v3323_v55 = vpop.permute.xlu1 %3322 }
 0x2a1   : > { %v5574_v40 = vpop.permute.xlu0 %5573  ;;  %3356 = vst.msk [vmem:[#allocation2 + $0x78] sm:$0xff] %vm3340_vm14, %v3323_v55 }
 0x2a2   : > { %5616 = vst.msk [vmem:[#allocation2 + $0x30] sm:$0xff] %vm5609_vm7, %v5574_v40 }
 0x2a5   : > { %v3307_v57 = vpop.permute.xlu0 %3306  ;;  %v6135_v37 = vpop.permute.xlu1 %6134 }
 0x2a6   : > { %3348 = vst.msk [vmem:[#allocation2 + $0x38] sm:$0xff] %vm3340_vm14, %v3307_v57 }
 0x2a7   : > { %6169 = vst.msk [vmem:[#allocation2 + $0x70] sm:$0xff] %vm6154_vm8, %v6135_v37 }
 0x2a9   : > { %v6119_v25 = vpop.permute.xlu0 %6118 }
 0x2aa   : > { %6161 = vst.msk [vmem:[#allocation2 + $0x30] sm:$0xff] %vm6154_vm8, %v6119_v25  ;;  %v3502_v33 = vpop.permute.xlu1 %3501 }
 0x2ab   : > { %3535 = vst.msk [vmem:[#allocation2 + $0x78] sm:$0xff] %vm3519_vm15, %v3502_v33 }
 0x2ad   : > { %v3486_v58 = vpop.permute.xlu0 %3485 }
 0x2ae   : > { %3527 = vst.msk [vmem:[#allocation2 + $0x38] sm:$0xff] %vm3519_vm15, %v3486_v58  ;;  %v6456_v43 = vpop.permute.xlu1 %6455 }
 0x2af   : > { %6490 = vst.msk [vmem:[#allocation2 + $0x70] sm:$0xff] %vm6475_vm9, %v6456_v43 }
 0x2b1   : > { %v6440_v45 = vpop.permute.xlu0 %6439 }
 0x2b2   : > { %6482 = vst.msk [vmem:[#allocation2 + $0x30] sm:$0xff] %vm6475_vm9, %v6440_v45  ;;  %v4047_v22 = vpop.permute.xlu1 %4046 }
 0x2b3   : > { %4080 = vst.msk [vmem:[#allocation2 + $0x78] sm:$0xff] %vm4064_vm0, %v4047_v22 }
 0x2b5   : > { %v4031_v51 = vpop.permute.xlu0 %4030 }
 0x2b6   : > { %4072 = vst.msk [vmem:[#allocation2 + $0x38] sm:$0xff] %vm4064_vm0, %v4031_v51  ;;  %v4368_v24 = vpop.permute.xlu1 %4367  ;;  %v6507_v12 = vld [vmem:[#allocation2 + $0x70] sm:$0xff] }
 0x2b7   : > { %4401 = vst.msk [vmem:[#allocation2 + $0x78] sm:$0xff] %vm4385_vm1, %v4368_v24  ;;  %7679 = vmatprep.subr.msk.bf16.mxu0 %vm6515_vm10, %v6507_v12 }
 0x2b9   : > { %v4352_v50 = vpop.permute.xlu0 %4351  ;;  %v6499_v56 = vld [vmem:[#allocation2 + $0x30] sm:$0xff] }
 0x2ba   : > { %4393 = vst.msk [vmem:[#allocation2 + $0x38] sm:$0xff] %vm4385_vm1, %v4352_v50  ;;  %v6538_v47 = vsel %vm6515_vm10, %v6499_v56, 0  ;;  %v4547_v14 = vpop.permute.xlu1 %4546 }
 0x2bb   : > { %7668 = vmatpush3.bf16.xpose.msra.mxu0 %v6538_v47  ;;  %4580 = vst.msk [vmem:[#allocation2 + $0x78] sm:$0xff] %vm4564_vm3, %v4547_v14 }
 0x2bd   : > { %v4531_v34 = vpop.permute.xlu0 %4530 }
 0x2be   : > { %4572 = vst.msk [vmem:[#allocation2 + $0x38] sm:$0xff] %vm4564_vm3, %v4531_v34  ;;  %v5092_v8 = vpop.permute.xlu1 %5091 }
 0x2bf   : > { %5125 = vst.msk [vmem:[#allocation2 + $0x78] sm:$0xff] %vm5109_vm4, %v5092_v8 }
 0x2c1   : > { %v5076_v60 = vpop.permute.xlu0 %5075 }
 0x2c2   : > { %5117 = vst.msk [vmem:[#allocation2 + $0x38] sm:$0xff] %vm5109_vm4, %v5076_v60  ;;  %v5413_v13 = vpop.permute.xlu1 %5412 }
 0x2c3   : > { %5446 = vst.msk [vmem:[#allocation2 + $0x78] sm:$0xff] %vm5430_vm6, %v5413_v13 }
 0x2c5   : > { %v5397_v23 = vpop.permute.xlu0 %5396 }
 0x2c6   : > { %5438 = vst.msk [vmem:[#allocation2 + $0x38] sm:$0xff] %vm5430_vm6, %v5397_v23  ;;  %v5592_v42 = vpop.permute.xlu1 %5591 }
 0x2c7   : > { %5625 = vst.msk [vmem:[#allocation2 + $0x78] sm:$0xff] %vm5609_vm7, %v5592_v42 }
 0x2c9   : > { %v5576_v11 = vpop.permute.xlu0 %5575 }
 0x2ca   : > { %5617 = vst.msk [vmem:[#allocation2 + $0x38] sm:$0xff] %vm5609_vm7, %v5576_v11  ;;  %v6137_v54 = vpop.permute.xlu1 %6136 }
 0x2cb   : > { %6170 = vst.msk [vmem:[#allocation2 + $0x78] sm:$0xff] %vm6154_vm8, %v6137_v54 }
 0x2cd   : > { %v6121_v0 = vpop.permute.xlu0 %6120 }
 0x2ce   : > { %6162 = vst.msk [vmem:[#allocation2 + $0x38] sm:$0xff] %vm6154_vm8, %v6121_v0  ;;  %v6458_v61 = vpop.permute.xlu1 %6457 }
 0x2cf   : > { %6491 = vst.msk [vmem:[#allocation2 + $0x78] sm:$0xff] %vm6475_vm9, %v6458_v61 }
 0x2d1   : > { %v6442_v19 = vpop.permute.xlu0 %6441 }
 0x2d2   : > { %6483 = vst.msk [vmem:[#allocation2 + $0x38] sm:$0xff] %vm6475_vm9, %v6442_v19 }
 0x2d6   : > { %v6508_v63 = vld [vmem:[#allocation2 + $0x78] sm:$0xff] }
 0x2d7   : > { %7680 = vmatprep.subr.msk.bf16.mxu0 %vm6515_vm10, %v6508_v63 }
 0x2d9   : > { %v6500_v7 = vld [vmem:[#allocation2 + $0x38] sm:$0xff] }
 0x2da   : > { %v6541_v16 = vsel %vm6515_vm10, %v6500_v7, 0 }
 0x2db   : > { %7670 = vmatpush3.bf16.xpose.msra.mxu0 %v6541_v16 }
 0x2df   : > { %v6612_v29 = vpop.permute.xlu1 %6611 }
 0x2e2   : > { %7672 = vmatmul.mubr.msk.bf16.vlgmr.msra.gmra.mrb[0].mxu0 %vm6515_vm10, %v10955_v26  ;;  %v6513_v15 = vpop.permute.xlu0 %6512 }
 0x2e4   : > { %v6618_v44 = vpop.permute.xlu1 %6617 }
 0x3b5   : > { %v6601_v59 = vpop.f32.mrb[0].mxu0 }
 0x3b6   : > { %v6602_v48 = vadd.f32 %v6601_v59, %v6513_v15  ;;  %v6603_v62 = vpop.f32.mrb[1].mxu0 }
 0x3b7   : > { %v6604_v10 = vadd.f32 %v6603_v62, %v6513_v15  ;;  %v6605_v17 = vpop.f32.mrb[2].mxu0 }
 0x3b8   : > { %v6608_v36 = vmax.f32 %v6602_v48, 0.0  ;;  %v6606_v20 = vpop.f32.mrb[3].mxu0 }
 0x3b9   : > { %v6609_v35 = vmax.f32 %v6604_v10, 0.0 }
 0x3ba   : > { %v6614_v6 = vmul.f32 %v6612_v29, %v6608_v36 }
 0x3bb   : > { %v6615_v39 = vmul.f32 %v6612_v29, %v6609_v35 }
 0x3bc   : > { %v6620_v4 = vadd.f32 %v6618_v44, %v6614_v6 }
 0x3bd   : > { %v6621_v27 = vadd.f32 %v6618_v44, %v6615_v39 }
 0x3bf   : > { %v7654_v26 = vpack.c.bf16 %v6621_v27, %v6620_v4 }
 0x3c1   : > { %6630 = vst [vmem:[%s239_s28] sm:$0xff] %v7654_v26 }
 0x3c2 PF: > { %s14_s17 = sadd.s32 1, %s7848_s17   ;;  %s11051_s15 = smov %s7844_s16 }
 0x3c3   : > { %p11_p5 = scmp.ge.s32.totalorder %s14_s17, 4   ;;  %s11052_s16 = smov %s11054_s18 }
 0x3c5   :  { %13 = sbr.rel (!%p11_p5) target bundleno = 2 (0x2), region = 75 }

</bundles_post_ra>
